<compile_context>
chip_gen: v7x
topology: tpu7x:2x2x1
jax: 0.10.0
libtpu: 0.0.40
codegen_flags: <defaults>
</compile_context>

<pallas_src>
import functools
import math

import jax
import jax.numpy as jnp
from jax.experimental import pallas as pl
from jax.experimental.pallas import tpu as pltpu

# ----------------------------- small synthetic config -----------------------------
BATCH       = 2
NUM_FRAMES  = 4
INPUT_RES   = 16
PATCH       = 8
CHANNELS    = 3
WIDTH       = 128          # shared embed dim; multiple of 128 -> lane-dense kernel outputs
NUM_HEADS   = 4
HEAD_DIM    = WIDTH // NUM_HEADS
NUM_LAYERS  = 2
MLP_RATIO   = 4
VOCAB       = 50
CTX_LEN     = 8
GRID_P      = INPUT_RES // PATCH           # patches per side
VIS_SEQ     = GRID_P * GRID_P + 1          # + CLS token
VIS_SEQS_PER_STEP = 4                      # frames per grid step (grid of 2 -> 2 TCs busy)
ATTN_SCALE  = 1.0 / math.sqrt(HEAD_DIM)


# ================================ in-kernel helpers ================================

def _layernorm_f32(x, g, b, eps=1e-5):
    """LayerNorm over the last axis with f32 statistics. g/b broadcast as (1, D)."""
    mu = jnp.mean(x, axis=-1, keepdims=True)
    var = jnp.mean((x - mu) ** 2, axis=-1, keepdims=True)
    return (x - mu) * jax.lax.rsqrt(var + eps) * g + b


def _softmax_lastaxis(logits):
    """Max-subtract softmax; divide replaced by EUP reciprocal (free slot)."""
    m = jnp.max(logits, axis=-1, keepdims=True)
    p = jnp.exp(logits - m)
    denom = jnp.sum(p, axis=-1, keepdims=True)
    return p * pl.reciprocal(denom, approx=True)


# ========================= fused residual stack (all layers) =========================

def _stack_kernel(x_ref, wbig_ref, wproj_ref, ln_ref, bias_ref, o_ref, *, causal):
    """One pre-LN CLIP ResidualAttentionBlock per grid step; grid = (batch_step, layer).

    x_ref    : (Bblk, S, D) f32        -- constant over the layer axis (DMA'd once / b)
    wbig_ref : (D, 8D) bf16            -- [w_qkv (3D) | w_attn_out (D) | w_fc (4D)]
    wproj_ref: (4D, D) bf16            -- MLP projection
    ln_ref   : (6, D) f32              -- ln1_g, ln1_b, ln2_g, ln2_b, b_attn_out, b_mlp_proj
    bias_ref : (2, 4D) f32             -- row0 = [b_qkv (3D) | 0], row1 = b_fc (4D)
    o_ref    : (Bblk, S, D) f32        -- resident across the layer axis (residual stream)
    """
    l = pl.program_id(1)
    D = WIDTH
    Bblk, S, _ = o_ref.shape
    M = Bblk * S

    @pl.when(l == 0)
    def _():
        o_ref[...] = x_ref[...]

    xb = o_ref[...]                              # (Bblk, S, D) residual stream (resident)
    xf = xb.reshape(M, D)

    ln = ln_ref[...]                             # (6, D)
    bias = bias_ref[...]                         # (2, 4D)
    ln1_g, ln1_b = ln[0:1], ln[1:2]
    ln2_g, ln2_b = ln[2:3], ln[3:4]
    b_attn_out, b_mlp_proj = ln[4:5], ln[5:6]
    b_qkv = bias[0:1, 0:3 * D]
    b_fc = bias[1:2, :]

    # ---- attention: fused lane-dense QKV projection -------------------------------
    h = _layernorm_f32(xf, ln1_g, ln1_b)
    qkv = jnp.dot(h.astype(jnp.bfloat16), wbig_ref[:, 0:3 * D],
                  preferred_element_type=jnp.float32) + b_qkv          # (M, 3D)
    qkv3 = qkv.reshape(Bblk, S, 3 * D)

    if causal:                                   # mask built once, reused by every head
        r = jax.lax.broadcasted_iota(jnp.int32, (S, S), 0)
        c = jax.lax.broadcasted_iota(jnp.int32, (S, S), 1)
        cmask = jnp.where(c <= r, 0.0, -1e30).astype(jnp.float32)

    head_outs = []
    for hh in range(NUM_HEADS):                  # static unroll (small H); slices are lane-static
        lo = hh * HEAD_DIM
        q = qkv3[:, :, lo:lo + HEAD_DIM]
        k = qkv3[:, :, D + lo:D + lo + HEAD_DIM]
        v = qkv3[:, :, 2 * D + lo:2 * D + lo + HEAD_DIM]
        logits = jnp.einsum('bqd,bkd->bqk', q.astype(jnp.bfloat16), k.astype(jnp.bfloat16),
                            preferred_element_type=jnp.float32) * ATTN_SCALE
        if causal:
            logits = logits + cmask
        p = _softmax_lastaxis(logits)
        head_outs.append(jnp.einsum('bqk,bkd->bqd', p.astype(jnp.bfloat16),
                                    v.astype(jnp.bfloat16),
                                    preferred_element_type=jnp.float32))
    o = jnp.concatenate(head_outs, axis=-1).reshape(M, D)               # merged heads
    attn = jnp.dot(o.astype(jnp.bfloat16), wbig_ref[:, 3 * D:4 * D],
                   preferred_element_type=jnp.float32) + b_attn_out     # full-width out-proj
    x1 = xf + attn

    # ---- MLP ------------------------------------------------------------------------
    h2 = _layernorm_f32(x1, ln2_g, ln2_b)
    fc = jnp.dot(h2.astype(jnp.bfloat16), wbig_ref[:, 4 * D:8 * D],
                 preferred_element_type=jnp.float32) + b_fc
    fc = fc * jax.nn.sigmoid(1.702 * fc)                                # QuickGELU
    proj = jnp.dot(fc.astype(jnp.bfloat16), wproj_ref[...],
                   preferred_element_type=jnp.float32) + b_mlp_proj

    o_ref[...] = (x1 + proj).reshape(Bblk, S, D)


def residual_stack(x, sp, causal, seqs_per_step):
    """x: (B, S, D) f32 -> (B, S, D) f32 after all NUM_LAYERS blocks, in ONE pallas_call."""
    B, S, D = x.shape
    L = sp["w_big"].shape[0]
    assert B % seqs_per_step == 0
    nb = B // seqs_per_step
    return pl.pallas_call(
        functools.partial(_stack_kernel, causal=causal),
        out_shape=jax.ShapeDtypeStruct((B, S, D), jnp.float32),
        grid=(nb, L),
        in_specs=[
            pl.BlockSpec((seqs_per_step, S, D), lambda b, l: (b, 0, 0)),
            pl.BlockSpec((None, D, 8 * D), lambda b, l: (l, 0, 0)),
            pl.BlockSpec((None, 4 * D, D), lambda b, l: (l, 0, 0)),
            pl.BlockSpec((None, 6, D), lambda b, l: (l, 0, 0)),
            pl.BlockSpec((None, 2, 4 * D), lambda b, l: (l, 0, 0)),
        ],
        out_specs=pl.BlockSpec((seqs_per_step, S, D), lambda b, l: (b, 0, 0)),
        compiler_params=pltpu.CompilerParams(
            dimension_semantics=("parallel", "arbitrary")),
    )(x, sp["w_big"], sp["w_proj"], sp["ln"], sp["b_wide"])


# ============================ X-Pool frame pooling kernel ============================

def _pool_kernel(t_ref, v_ref, w_ref, vec_ref, bias_ref, o_ref):
    """X-Pool 'transformer' pooling for one video: text queries attend over its frames.

    t_ref   : (T, D) f32     text embeddings (shared, resident)
    v_ref   : (F, D) f32     this video's frame embeddings
    w_ref   : (D, 5D) bf16   [w_q | w_k | w_v | w_out | w_lin]
    vec_ref : (8, D) f32     ln1_g, ln1_b, ln2_g, ln2_b, ln3_g, ln3_b, b_out, b_lin
    bias_ref: (2, 2D) f32    row0 = [b_q | 0], row1 = [b_k | b_v]
    o_ref   : (T, D) f32
    """
    D = WIDTH
    vec = vec_ref[...]
    ln1_g, ln1_b = vec[0:1], vec[1:2]
    ln2_g, ln2_b = vec[2:3], vec[3:4]
    ln3_g, ln3_b = vec[4:5], vec[5:6]
    b_out, b_lin = vec[6:7], vec[7:8]
    bias = bias_ref[...]
    b_q = bias[0:1, 0:D]
    b_kv = bias[1:2, :]

    t = _layernorm_f32(t_ref[...], ln1_g, ln1_b)                        # (T, D)
    f = _layernorm_f32(v_ref[...], ln1_g, ln1_b)                        # (F, D)
    q_all = jnp.dot(t.astype(jnp.bfloat16), w_ref[:, 0:D],
                    preferred_element_type=jnp.float32) + b_q           # (T, D)
    kv = jnp.dot(f.astype(jnp.bfloat16), w_ref[:, D:3 * D],
                 preferred_element_type=jnp.float32) + b_kv             # (F, 2D)

    head_outs = []
    for hh in range(NUM_HEADS):
        lo = hh * HEAD_DIM
        q = q_all[:, lo:lo + HEAD_DIM]
        k = kv[:, lo:lo + HEAD_DIM]
        v = kv[:, D + lo:D + lo + HEAD_DIM]
        logits = jax.lax.dot_general(q.astype(jnp.bfloat16), k.astype(jnp.bfloat16),
                                     (((1,), (1,)), ((), ())),
                                     preferred_element_type=jnp.float32) * ATTN_SCALE
        p = _softmax_lastaxis(logits)
        head_outs.append(jnp.dot(p.astype(jnp.bfloat16), v.astype(jnp.bfloat16),
                                 preferred_element_type=jnp.float32))
    o = jnp.concatenate(head_outs, axis=-1)                             # (T, D)
    attn = jnp.dot(o.astype(jnp.bfloat16), w_ref[:, 3 * D:4 * D],
                   preferred_element_type=jnp.float32) + b_out
    a = _layernorm_f32(attn, ln2_g, ln2_b)
    lin = jnp.dot(a.astype(jnp.bfloat16), w_ref[:, 4 * D:5 * D],
                  preferred_element_type=jnp.float32) + b_lin
    o_ref[...] = _layernorm_f32(a + lin, ln3_g, ln3_b)                  # dropout = identity (eval)


def pool_frames(text_embeds, video_embeds, pp):
    """text: (T, D); video: (V, F, D) -> (V, T, D). One pallas_call, parallel over videos."""
    T, D = text_embeds.shape
    V, F, _ = video_embeds.shape
    return pl.pallas_call(
        _pool_kernel,
        out_shape=jax.ShapeDtypeStruct((V, T, D), jnp.float32),
        grid=(V,),
        in_specs=[pl.BlockSpec((T, D), lambda i: (0, 0)),
                  pl.BlockSpec((None, F, D), lambda i: (i, 0, 0)),
                  pl.BlockSpec((D, 5 * D), lambda i: (0, 0)),
                  pl.BlockSpec((8, D), lambda i: (0, 0)),
                  pl.BlockSpec((2, 2 * D), lambda i: (0, 0))],
        out_specs=pl.BlockSpec((None, T, D), lambda i: (i, 0, 0)),
        compiler_params=pltpu.CompilerParams(dimension_semantics=("parallel",)),
    )(text_embeds, video_embeds, pp["w_slab"], pp["vec_slab"], pp["bias_slab"])


# --------------------- fused vision prologue & LN+projection heads ---------------------

def _vis_pre_kernel(p_ref, w_ref, cls_ref, pos_ref, g_ref, b_ref, o_ref):
    """Patch-embed matmul + CLS row + positional embedding + ln_pre, in one kernel."""
    N, P, K = p_ref.shape
    emb = jnp.dot(p_ref[...].reshape(N * P, K).astype(jnp.bfloat16), w_ref[...],
                  preferred_element_type=jnp.float32).reshape(N, P, WIDTH)
    emb = emb + pos_ref[1:, :][None]
    o_ref[:, 1:, :] = _layernorm_f32(emb, g_ref[...], b_ref[...])
    # CLS row is identical for every image -> LayerNorm once, broadcast.
    cls_row = _layernorm_f32(cls_ref[...] + pos_ref[0:1, :], g_ref[...], b_ref[...])   # (1, D)
    o_ref[:, 0:1, :] = jnp.broadcast_to(cls_row[None], (N, 1, WIDTH))


def vision_prologue(patches, vp):
    """patches: (N, g*g, C*p*p) f32 -> ln_pre-ed (N, VIS_SEQ, D) f32."""
    N = patches.shape[0]
    return pl.pallas_call(
        _vis_pre_kernel,
        out_shape=jax.ShapeDtypeStruct((N, VIS_SEQ, WIDTH), jnp.float32),
    )(patches, vp["conv_w"], vp["class_emb"], vp["pos_emb"], vp["ln_pre_g"], vp["ln_pre_b"])


def _ln_proj_kernel(x_ref, g_ref, b_ref, w_ref, o_ref):
    h = _layernorm_f32(x_ref[...], g_ref[...], b_ref[...])
    o_ref[...] = jnp.dot(h.astype(jnp.bfloat16), w_ref[...],
                         preferred_element_type=jnp.float32)


def ln_project(x, g, b, w):
    """Fused LayerNorm + (bias-free) projection: ln_post@visual_proj / ln_final@text_projection."""
    return pl.pallas_call(
        _ln_proj_kernel,
        out_shape=jax.ShapeDtypeStruct((x.shape[0], w.shape[1]), jnp.float32),
    )(x, g, b, w)


# ============================ model forward (thin JAX glue) ============================

def encode_image(video_flat, vp):
    """video_flat: (N, C, R, R) NCHW -> (N, WIDTH) CLIP image features."""
    N = video_flat.shape[0]
    p, C, g = PATCH, CHANNELS, GRID_P
    # Patchify exactly like Conv2d(stride=kernel=patch): weight flatten order (C, p, p).
    patches = (video_flat.reshape(N, C, g, p, g, p).transpose(0, 2, 4, 1, 3, 5)
               .reshape(N, g * g, C * p * p))
    x = vision_prologue(patches, vp)                                  # (N, VIS_SEQ, D)
    x = residual_stack(x, vp["stack"], causal=False, seqs_per_step=VIS_SEQS_PER_STEP)
    cls_tok = x[:, 0, :]                                              # CLS token gather (glue)
    return ln_project(cls_tok, vp["ln_post_g"], vp["ln_post_b"], vp["proj"])


def encode_text(tokens, tp):
    """tokens: (T, L) int32 -> (T, WIDTH). EOT = argmax token (as in CLIP)."""
    T, L = tokens.shape
    x = jnp.take(tp["tok_emb"], tokens, axis=0) + tp["pos_emb"][None]   # (T, L, D)
    x = residual_stack(x, tp["stack"], causal=True, seqs_per_step=1)
    eot = jnp.argmax(tokens, axis=-1)
    x_eot = x[jnp.arange(T), eot]                 # per-token LN commutes with the row gather
    return ln_project(x_eot, tp["ln_f_g"], tp["ln_f_b"], tp["text_proj"])


def clip_transformer_forward(params, text_tokens, video, return_all_frames=False):
    """Mirrors CLIPTransformer.forward."""
    batch_size = video.shape[0]
    video_flat = video.reshape(-1, CHANNELS, INPUT_RES, INPUT_RES)
    text_features = encode_text(text_tokens, params["text"])
    video_features = encode_image(video_flat, params["vision"])
    video_features = video_features.reshape(batch_size, NUM_FRAMES, -1)
    video_features_pooled = pool_frames(text_features, video_features, params["pool"])
    if return_all_frames:
        return text_features, video_features, video_features_pooled
    return text_features, video_features_pooled


# ================================ parameter init / packing ================================

def init_params(key):
    """PyTorch-layout parameters (x @ W convention, as in nn.MultiheadAttention / CLIP)."""
    keys = iter(jax.random.split(key, 256))

    def nrm(shape, scale=0.02):
        return scale * jax.random.normal(next(keys), shape, jnp.float32)

    def init_block(width):
        return dict(
            ln1_g=jnp.ones((width,), jnp.float32), ln1_b=jnp.zeros((width,), jnp.float32),
            attn=dict(in_w=nrm((width, 3 * width)), in_b=jnp.zeros((3 * width,), jnp.float32),
                      out_w=nrm((width, width)), out_b=jnp.zeros((width,), jnp.float32)),
            ln2_g=jnp.ones((width,), jnp.float32), ln2_b=jnp.zeros((width,), jnp.float32),
            fc_w=nrm((width, MLP_RATIO * width)), fc_b=jnp.zeros((MLP_RATIO * width,), jnp.float32),
            proj_w=nrm((MLP_RATIO * width, width)), proj_b=jnp.zeros((width,), jnp.float32),
        )

    vision = dict(
        conv_w=nrm((CHANNELS * PATCH * PATCH, WIDTH)),
        class_emb=nrm((WIDTH,)), pos_emb=nrm((VIS_SEQ, WIDTH)),
        ln_pre_g=jnp.ones((WIDTH,), jnp.float32), ln_pre_b=jnp.zeros((WIDTH,), jnp.float32),
        blocks=[init_block(WIDTH) for _ in range(NUM_LAYERS)],
        ln_post_g=jnp.ones((WIDTH,), jnp.float32), ln_post_b=jnp.zeros((WIDTH,), jnp.float32),
        proj=nrm((WIDTH, WIDTH)),
    )
    text = dict(
        tok_emb=nrm((VOCAB, WIDTH)), pos_emb=nrm((CTX_LEN, WIDTH)),
        blocks=[init_block(WIDTH) for _ in range(NUM_LAYERS)],
        ln_f_g=jnp.ones((WIDTH,), jnp.float32), ln_f_b=jnp.zeros((WIDTH,), jnp.float32),
        text_proj=nrm((WIDTH, WIDTH)),
    )
    pool = dict(
        ln1_g=jnp.ones((WIDTH,), jnp.float32), ln1_b=jnp.zeros((WIDTH,), jnp.float32),
        q_w=nrm((WIDTH, WIDTH)), q_b=jnp.zeros((WIDTH,), jnp.float32),
        k_w=nrm((WIDTH, WIDTH)), k_b=jnp.zeros((WIDTH,), jnp.float32),
        v_w=nrm((WIDTH, WIDTH)), v_b=jnp.zeros((WIDTH,), jnp.float32),
        out_w=nrm((WIDTH, WIDTH)), out_b=jnp.zeros((WIDTH,), jnp.float32),
        ln2_g=jnp.ones((WIDTH,), jnp.float32), ln2_b=jnp.zeros((WIDTH,), jnp.float32),
        lin_w=nrm((WIDTH, WIDTH)), lin_b=jnp.zeros((WIDTH,), jnp.float32),
        ln3_g=jnp.ones((WIDTH,), jnp.float32), ln3_b=jnp.zeros((WIDTH,), jnp.float32),
    )
    return dict(vision=vision, text=text, pool=pool)


def prepare_params(raw):
    """One-time packing to kernel-friendly layout (all reshapes/casts hoisted out of the hot path).

    NOTE: assumes in_w is (D, 3D) with columns ordered [q|k|v], heads contiguous inside each
    block, applied as x @ W (self-consistent with init_params above).  When loading real
    PyTorch nn.MultiheadAttention checkpoints the (3D, D)/x@W.T layout must be transposed.
    """
    D = WIDTH

    def ln2d(v):
        return v.reshape(1, -1).astype(jnp.float32)

    def pack_stack(blocks):
        w_big, w_proj, ln, b_wide = [], [], [], []
        for blk in blocks:
            a = blk["attn"]
            w_big.append(jnp.concatenate([a["in_w"], a["out_w"], blk["fc_w"]],
                                         axis=1).astype(jnp.bfloat16))            # (D, 8D)
            w_proj.append(blk["proj_w"].astype(jnp.bfloat16))                      # (4D, D)
            ln.append(jnp.stack([blk["ln1_g"], blk["ln1_b"], blk["ln2_g"], blk["ln2_b"],
                                 a["out_b"], blk["proj_b"]], axis=0).astype(jnp.float32))  # (6, D)
            b_wide.append(jnp.stack(
                [jnp.concatenate([a["in_b"], jnp.zeros((D,), jnp.float32)]),
                 blk["fc_b"]], axis=0).astype(jnp.float32))                        # (2, 4D)
        return dict(w_big=jnp.stack(w_big), w_proj=jnp.stack(w_proj),
                    ln=jnp.stack(ln), b_wide=jnp.stack(b_wide))

    rv, rt, rp = raw["vision"], raw["text"], raw["pool"]
    vision = dict(
        conv_w=rv["conv_w"].astype(jnp.bfloat16),
        class_emb=rv["class_emb"].reshape(1, D).astype(jnp.float32),
        pos_emb=rv["pos_emb"].astype(jnp.float32),
        ln_pre_g=ln2d(rv["ln_pre_g"]), ln_pre_b=ln2d(rv["ln_pre_b"]),
        stack=pack_stack(rv["blocks"]),
        ln_post_g=ln2d(rv["ln_post_g"]), ln_post_b=ln2d(rv["ln_post_b"]),
        proj=rv["proj"].astype(jnp.bfloat16),
    )
    text = dict(
        tok_emb=rt["tok_emb"].astype(jnp.float32), pos_emb=rt["pos_emb"].astype(jnp.float32),
        stack=pack_stack(rt["blocks"]),
        ln_f_g=ln2d(rt["ln_f_g"]), ln_f_b=ln2d(rt["ln_f_b"]),
        text_proj=rt["text_proj"].astype(jnp.bfloat16),
    )
    pool = dict(
        w_slab=jnp.concatenate([rp["q_w"], rp["k_w"], rp["v_w"], rp["out_w"], rp["lin_w"]],
                               axis=1).astype(jnp.bfloat16),                       # (D, 5D)
        vec_slab=jnp.stack([rp["ln1_g"], rp["ln1_b"], rp["ln2_g"], rp["ln2_b"],
                            rp["ln3_g"], rp["ln3_b"], rp["out_b"], rp["lin_b"]],
                           axis=0).astype(jnp.float32),                            # (8, D)
        bias_slab=jnp.stack([jnp.concatenate([rp["q_b"], jnp.zeros((D,), jnp.float32)]),
                             jnp.concatenate([rp["k_b"], rp["v_b"]])],
                            axis=0).astype(jnp.float32),                           # (2, 2D)
    )
    return dict(vision=vision, text=text, pool=pool)


# ==================================== main ====================================

if __name__ == "__main__":
    root = jax.random.PRNGKey(0)
    k_param, k_vid, k_txt = jax.random.split(root, 3)

    params = prepare_params(init_params(k_param))

    # video: (batch, num_frames, 3, R, R) NCHW per frame (matches data['video'])
    video = jax.random.normal(k_vid, (BATCH, NUM_FRAMES, CHANNELS, INPUT_RES, INPUT_RES),
                              jnp.float32)
    # text tokens: random ids with an explicit EOT (= max id) so argmax picks it, like CLIP
    text_tokens = jax.random.randint(k_txt, (BATCH, CTX_LEN), 1, VOCAB - 2).astype(jnp.int32)
    text_tokens = text_tokens.at[:, CTX_LEN - 3].set(VOCAB - 1)

    fwd = jax.jit(functools.partial(clip_transformer_forward, return_all_frames=False))
    text_features, video_features_pooled = fwd(params, text_tokens, video)
    jax.block_until_ready((text_features, video_features_pooled))

    assert text_features.shape == (BATCH, WIDTH)
    assert video_features_pooled.shape == (BATCH, BATCH, WIDTH)   # (num_vids, num_texts, D)
    assert bool(jnp.all(jnp.isfinite(text_features)))
    assert bool(jnp.all(jnp.isfinite(video_features_pooled)))
    print("KERNEL_OK")
</pallas_src>

<mosaic_0001>
module attributes {stable_mosaic.version = 11 : i64} {
  func.func @_ln_proj_kernel(%arg0: memref<2x128xf32, #tpu.memory_space<vmem>>, %arg1: memref<1x128xf32, #tpu.memory_space<vmem>>, %arg2: memref<1x128xf32, #tpu.memory_space<vmem>>, %arg3: memref<128x128xbf16, #tpu.memory_space<vmem>>, %arg4: memref<2x128xf32, #tpu.memory_space<vmem>>) attributes {dimension_semantics = [], scalar_prefetch = 0 : i64, scratch_operands = 0 : i64, tpu.core_type = #tpu.core_type<tc>} {
    %c0 = arith.constant 0 : index
    %c0_0 = arith.constant 0 : index
    %0 = vector.load %arg0[%c0, %c0_0] : memref<2x128xf32, #tpu.memory_space<vmem>>, vector<2x128xf32>
    %c0_1 = arith.constant 0 : index
    %c0_2 = arith.constant 0 : index
    %1 = vector.load %arg1[%c0_1, %c0_2] : memref<1x128xf32, #tpu.memory_space<vmem>>, vector<1x128xf32>
    %c0_3 = arith.constant 0 : index
    %c0_4 = arith.constant 0 : index
    %2 = vector.load %arg2[%c0_3, %c0_4] : memref<1x128xf32, #tpu.memory_space<vmem>>, vector<1x128xf32>
    %cst = arith.constant dense<0.000000e+00> : vector<2xf32>
    %3 = vector.multi_reduction <add>, %0, %cst [1] : vector<2x128xf32> to vector<2xf32>
    %4 = vector.shape_cast %3 : vector<2xf32> to vector<2x1xf32>
    %cst_5 = arith.constant 1.280000e+02 : f32
    %5 = vector.broadcast %cst_5 : f32 to vector<2x1xf32>
    %6 = arith.divf %4, %5 : vector<2x1xf32>
    %7 = vector.broadcast %6 : vector<2x1xf32> to vector<2x128xf32>
    %8 = arith.subf %0, %7 : vector<2x128xf32>
    %9 = arith.mulf %8, %8 : vector<2x128xf32>
    %cst_6 = arith.constant dense<0.000000e+00> : vector<2xf32>
    %10 = vector.multi_reduction <add>, %9, %cst_6 [1] : vector<2x128xf32> to vector<2xf32>
    %11 = vector.shape_cast %10 : vector<2xf32> to vector<2x1xf32>
    %cst_7 = arith.constant 1.280000e+02 : f32
    %12 = vector.broadcast %cst_7 : f32 to vector<2x1xf32>
    %13 = arith.divf %11, %12 : vector<2x1xf32>
    %14 = vector.broadcast %6 : vector<2x1xf32> to vector<2x128xf32>
    %15 = arith.subf %0, %14 : vector<2x128xf32>
    %cst_8 = arith.constant 9.99999974E-6 : f32
    %16 = vector.broadcast %cst_8 : f32 to vector<2x1xf32>
    %17 = arith.addf %13, %16 : vector<2x1xf32>
    %18 = math.rsqrt %17 : vector<2x1xf32>
    %19 = vector.broadcast %18 : vector<2x1xf32> to vector<2x128xf32>
    %20 = arith.mulf %15, %19 : vector<2x128xf32>
    %21 = vector.broadcast %1 : vector<1x128xf32> to vector<2x128xf32>
    %22 = arith.mulf %20, %21 : vector<2x128xf32>
    %23 = vector.broadcast %2 : vector<1x128xf32> to vector<2x128xf32>
    %24 = arith.addf %22, %23 : vector<2x128xf32>
    %25 = arith.truncf %24 : vector<2x128xf32> to vector<2x128xbf16>
    %c0_9 = arith.constant 0 : index
    %c0_10 = arith.constant 0 : index
    %26 = vector.load %arg3[%c0_9, %c0_10] : memref<128x128xbf16, #tpu.memory_space<vmem>>, vector<128x128xbf16>
    %cst_11 = arith.constant dense<0.000000e+00> : vector<2x128xf32>
    %27 = tpu.matmul %25, %26, %cst_11 {dimension_numbers = #tpu.dot_dimension_numbers<[1], [0], [0], [1], [0, 0, 1, 1], [], []>} : vector<2x128xbf16>, vector<128x128xbf16>, vector<2x128xf32> -> vector<2x128xf32>
    %c0_12 = arith.constant 0 : index
    %c0_13 = arith.constant 0 : index
    %28 = vector.load %arg4[%c0_12, %c0_13] : memref<2x128xf32, #tpu.memory_space<vmem>>, vector<2x128xf32>
    tpu.vector_store %arg4[%c0_12, %c0_13], %27 {strides = array<i32>} : memref<2x128xf32, #tpu.memory_space<vmem>>, vector<2x128xf32>,
    return
  }
}

module attributes {stable_mosaic.version = 11 : i64} {
  func.func @_stack_kernel(%arg0: i32, %arg1: i32, %arg2: memref<1x8x128xf32, #tpu.memory_space<vmem>>, %arg3: memref<1x128x1024xbf16, #tpu.memory_space<vmem>>, %arg4: memref<1x512x128xbf16, #tpu.memory_space<vmem>>, %arg5: memref<1x6x128xf32, #tpu.memory_space<vmem>>, %arg6: memref<1x2x512xf32, #tpu.memory_space<vmem>>, %arg7: memref<1x8x128xf32, #tpu.memory_space<vmem>>) attributes {dimension_semantics = [#tpu.dimension_semantics<parallel>, #tpu.dimension_semantics<arbitrary>], iteration_bounds = array<i64: 2, 2>, scalar_prefetch = 0 : i64, scratch_operands = 0 : i64, tpu.core_type = #tpu.core_type<tc>, window_params = [{transform_indices = @transform_0, window_bounds = array<i64: 1, 8, 128>}, {transform_indices = @transform_1, window_bounds = array<i64: 1, 128, 1024>}, {transform_indices = @transform_2, window_bounds = array<i64: 1, 512, 128>}, {transform_indices = @transform_3, window_bounds = array<i64: 1, 6, 128>}, {transform_indices = @transform_4, window_bounds = array<i64: 1, 2, 512>}, {transform_indices = @transform_5, window_bounds = array<i64: 1, 8, 128>}]} {
    %c0_i32 = arith.constant 0 : i32
    %0 = arith.cmpi eq, %arg1, %c0_i32 : i32
    %1 = arith.extui %0 : i1 to i32
    %c0_i32_0 = arith.constant 0 : i32
    %2 = arith.cmpi ne, %1, %c0_i32_0 : i32
    scf.if %2 {
      %c0_59 = arith.constant 0 : index
      %c0_60 = arith.constant 0 : index
      %c0_61 = arith.constant 0 : index
      %198 = vector.load %arg2[%c0_59, %c0_60, %c0_61] : memref<1x8x128xf32, #tpu.memory_space<vmem>>, vector<1x8x128xf32>
      %c0_62 = arith.constant 0 : index
      %c0_63 = arith.constant 0 : index
      %c0_64 = arith.constant 0 : index
      %199 = vector.load %arg7[%c0_62, %c0_63, %c0_64] : memref<1x8x128xf32, #tpu.memory_space<vmem>>, vector<1x8x128xf32>
      tpu.vector_store %arg7[%c0_62, %c0_63, %c0_64], %198 {strides = array<i32>} : memref<1x8x128xf32, #tpu.memory_space<vmem>>, vector<1x8x128xf32>,
    } else {
    }
    %c0 = arith.constant 0 : index
    %c0_1 = arith.constant 0 : index
    %c0_2 = arith.constant 0 : index
    %3 = vector.load %arg7[%c0, %c0_1, %c0_2] : memref<1x8x128xf32, #tpu.memory_space<vmem>>, vector<1x8x128xf32>
    %4 = vector.shape_cast %3 : vector<1x8x128xf32> to vector<8x128xf32>
    %c0_3 = arith.constant 0 : index
    %c0_4 = arith.constant 0 : index
    %c0_5 = arith.constant 0 : index
    %5 = vector.load %arg5[%c0_3, %c0_4, %c0_5] : memref<1x6x128xf32, #tpu.memory_space<vmem>>, vector<1x6x128xf32>
    %6 = vector.shape_cast %5 : vector<1x6x128xf32> to vector<6x128xf32>
    %c0_6 = arith.constant 0 : index
    %c0_7 = arith.constant 0 : index
    %c0_8 = arith.constant 0 : index
    %7 = vector.load %arg6[%c0_6, %c0_7, %c0_8] : memref<1x2x512xf32, #tpu.memory_space<vmem>>, vector<1x2x512xf32>
    %8 = vector.shape_cast %7 : vector<1x2x512xf32> to vector<2x512xf32>
    %9 = vector.extract_strided_slice %6 {offsets = [0, 0], sizes = [1, 128], strides = [1, 1]} : vector<6x128xf32> to vector<1x128xf32>
    %10 = vector.extract_strided_slice %6 {offsets = [1, 0], sizes = [1, 128], strides = [1, 1]} : vector<6x128xf32> to vector<1x128xf32>
    %11 = vector.extract_strided_slice %6 {offsets = [2, 0], sizes = [1, 128], strides = [1, 1]} : vector<6x128xf32> to vector<1x128xf32>
    %12 = vector.extract_strided_slice %6 {offsets = [3, 0], sizes = [1, 128], strides = [1, 1]} : vector<6x128xf32> to vector<1x128xf32>
    %13 = vector.extract_strided_slice %6 {offsets = [4, 0], sizes = [1, 128], strides = [1, 1]} : vector<6x128xf32> to vector<1x128xf32>
    %14 = vector.extract_strided_slice %6 {offsets = [5, 0], sizes = [1, 128], strides = [1, 1]} : vector<6x128xf32> to vector<1x128xf32>
    %15 = vector.extract_strided_slice %8 {offsets = [0, 0], sizes = [1, 384], strides = [1, 1]} : vector<2x512xf32> to vector<1x384xf32>
    %16 = vector.extract_strided_slice %8 {offsets = [1, 0], sizes = [1, 512], strides = [1, 1]} : vector<2x512xf32> to vector<1x512xf32>
    %cst = arith.constant dense<0.000000e+00> : vector<8xf32>
    %17 = vector.multi_reduction <add>, %4, %cst [1] : vector<8x128xf32> to vector<8xf32>
    %18 = vector.shape_cast %17 : vector<8xf32> to vector<8x1xf32>
    %cst_9 = arith.constant 1.280000e+02 : f32
    %19 = vector.broadcast %cst_9 : f32 to vector<8x1xf32>
    %20 = arith.divf %18, %19 : vector<8x1xf32>
    %21 = vector.broadcast %20 : vector<8x1xf32> to vector<8x128xf32>
    %22 = arith.subf %4, %21 : vector<8x128xf32>
    %23 = arith.mulf %22, %22 : vector<8x128xf32>
    %cst_10 = arith.constant dense<0.000000e+00> : vector<8xf32>
    %24 = vector.multi_reduction <add>, %23, %cst_10 [1] : vector<8x128xf32> to vector<8xf32>
    %25 = vector.shape_cast %24 : vector<8xf32> to vector<8x1xf32>
    %cst_11 = arith.constant 1.280000e+02 : f32
    %26 = vector.broadcast %cst_11 : f32 to vector<8x1xf32>
    %27 = arith.divf %25, %26 : vector<8x1xf32>
    %28 = vector.broadcast %20 : vector<8x1xf32> to vector<8x128xf32>
    %29 = arith.subf %4, %28 : vector<8x128xf32>
    %cst_12 = arith.constant 9.99999974E-6 : f32
    %30 = vector.broadcast %cst_12 : f32 to vector<8x1xf32>
    %31 = arith.addf %27, %30 : vector<8x1xf32>
    %32 = math.rsqrt %31 : vector<8x1xf32>
    %33 = vector.broadcast %32 : vector<8x1xf32> to vector<8x128xf32>
    %34 = arith.mulf %29, %33 : vector<8x128xf32>
    %35 = vector.broadcast %9 : vector<1x128xf32> to vector<8x128xf32>
    %36 = arith.mulf %34, %35 : vector<8x128xf32>
    %37 = vector.broadcast %10 : vector<1x128xf32> to vector<8x128xf32>
    %38 = arith.addf %36, %37 : vector<8x128xf32>
    %39 = arith.truncf %38 : vector<8x128xf32> to vector<8x128xbf16>
    %c0_13 = arith.constant 0 : index
    %c0_14 = arith.constant 0 : index
    %c0_15 = arith.constant 0 : index
    %40 = vector.load %arg3[%c0_13, %c0_14, %c0_15] : memref<1x128x1024xbf16, #tpu.memory_space<vmem>>, vector<1x128x384xbf16>
    %41 = vector.shape_cast %40 : vector<1x128x384xbf16> to vector<128x384xbf16>
    %cst_16 = arith.constant dense<0.000000e+00> : vector<8x384xf32>
    %42 = tpu.matmul %39, %41, %cst_16 {dimension_numbers = #tpu.dot_dimension_numbers<[1], [0], [0], [1], [0, 0, 1, 1], [], []>} : vector<8x128xbf16>, vector<128x384xbf16>, vector<8x384xf32> -> vector<8x384xf32>
    %43 = vector.broadcast %15 : vector<1x384xf32> to vector<8x384xf32>
    %44 = arith.addf %42, %43 : vector<8x384xf32>
    %45 = vector.shape_cast %44 : vector<8x384xf32> to vector<1x8x384xf32>
    %46 = tpu.iota {dimensions = array<i32: 0>} : vector<8x8xi32>
    %47 = tpu.iota {dimensions = array<i32: 1>} : vector<8x8xi32>
    %48 = arith.cmpi sle, %47, %46 : vector<8x8xi32>
    %cst_17 = arith.constant 0.000000e+00 : f32
    %cst_18 = arith.constant -1.000000e+30 : f32
    %49 = vector.broadcast %cst_17 : f32 to vector<8x8xf32>
    %50 = vector.broadcast %cst_18 : f32 to vector<8x8xf32>
    %51 = arith.select %48, %49, %50 : vector<8x8xi1>, vector<8x8xf32>
    %52 = vector.extract_strided_slice %45 {offsets = [0, 0, 0], sizes = [1, 8, 32], strides = [1, 1, 1]} : vector<1x8x384xf32> to vector<1x8x32xf32>
    %53 = vector.extract_strided_slice %45 {offsets = [0, 0, 128], sizes = [1, 8, 32], strides = [1, 1, 1]} : vector<1x8x384xf32> to vector<1x8x32xf32>
    %54 = vector.extract_strided_slice %45 {offsets = [0, 0, 256], sizes = [1, 8, 32], strides = [1, 1, 1]} : vector<1x8x384xf32> to vector<1x8x32xf32>
    %55 = arith.truncf %52 : vector<1x8x32xf32> to vector<1x8x32xbf16>
    %56 = arith.truncf %53 : vector<1x8x32xf32> to vector<1x8x32xbf16>
    "tpu.trace_start"() <{level = 10 : i32, message = "bqd,bkd->bqk"}> : () -> ()
    %cst_19 = arith.constant dense<0.000000e+00> : vector<1x8x8xf32>
    %57 = tpu.matmul %55, %56, %cst_19 {dimension_numbers = #tpu.dot_dimension_numbers<[2], [2], [1], [1], [0, 0, 0, 1, 1, 1], [0], [0]>} : vector<1x8x32xbf16>, vector<1x8x32xbf16>, vector<1x8x8xf32> -> vector<1x8x8xf32>
    "tpu.trace_stop"() : () -> ()
    %cst_20 = arith.constant 0.176776692 : f32
    %58 = vector.broadcast %cst_20 : f32 to vector<1x8x8xf32>
    %59 = arith.mulf %57, %58 : vector<1x8x8xf32>
    %60 = vector.shape_cast %51 : vector<8x8xf32> to vector<1x8x8xf32>
    %61 = arith.addf %59, %60 : vector<1x8x8xf32>
    %cst_21 = arith.constant dense<0xFF800000> : vector<1x8xf32>
    %62 = vector.multi_reduction <maximumf>, %61, %cst_21 [2] : vector<1x8x8xf32> to vector<1x8xf32>
    %63 = vector.shape_cast %62 : vector<1x8xf32> to vector<1x8x1xf32>
    %64 = vector.broadcast %63 : vector<1x8x1xf32> to vector<1x8x8xf32>
    %65 = arith.subf %61, %64 : vector<1x8x8xf32>
    %66 = math.exp %65 : vector<1x8x8xf32>
    %cst_22 = arith.constant dense<0.000000e+00> : vector<1x8xf32>
    %67 = vector.multi_reduction <add>, %66, %cst_22 [2] : vector<1x8x8xf32> to vector<1x8xf32>
    %68 = vector.shape_cast %67 : vector<1x8xf32> to vector<1x8x1xf32>
    %69 = tpu.reciprocal %68 {approx = true} : vector<1x8x1xf32> -> vector<1x8x1xf32>
    %70 = vector.broadcast %69 : vector<1x8x1xf32> to vector<1x8x8xf32>
    %71 = arith.mulf %66, %70 : vector<1x8x8xf32>
    %72 = arith.truncf %71 : vector<1x8x8xf32> to vector<1x8x8xbf16>
    %73 = arith.truncf %54 : vector<1x8x32xf32> to vector<1x8x32xbf16>
    "tpu.trace_start"() <{level = 10 : i32, message = "bqk,bkd->bqd"}> : () -> ()
    %cst_23 = arith.constant dense<0.000000e+00> : vector<1x8x32xf32>
    %74 = tpu.matmul %72, %73, %cst_23 {dimension_numbers = #tpu.dot_dimension_numbers<[2], [1], [1], [2], [0, 0, 0, 1, 1, 2], [0], [0]>} : vector<1x8x8xbf16>, vector<1x8x32xbf16>, vector<1x8x32xf32> -> vector<1x8x32xf32>
    "tpu.trace_stop"() : () -> ()
    %75 = vector.extract_strided_slice %45 {offsets = [0, 0, 32], sizes = [1, 8, 32], strides = [1, 1, 1]} : vector<1x8x384xf32> to vector<1x8x32xf32>
    %76 = vector.extract_strided_slice %45 {offsets = [0, 0, 160], sizes = [1, 8, 32], strides = [1, 1, 1]} : vector<1x8x384xf32> to vector<1x8x32xf32>
    %77 = vector.extract_strided_slice %45 {offsets = [0, 0, 288], sizes = [1, 8, 32], strides = [1, 1, 1]} : vector<1x8x384xf32> to vector<1x8x32xf32>
    %78 = arith.truncf %75 : vector<1x8x32xf32> to vector<1x8x32xbf16>
    %79 = arith.truncf %76 : vector<1x8x32xf32> to vector<1x8x32xbf16>
    "tpu.trace_start"() <{level = 10 : i32, message = "bqd,bkd->bqk"}> : () -> ()
    %cst_24 = arith.constant dense<0.000000e+00> : vector<1x8x8xf32>
    %80 = tpu.matmul %78, %79, %cst_24 {dimension_numbers = #tpu.dot_dimension_numbers<[2], [2], [1], [1], [0, 0, 0, 1, 1, 1], [0], [0]>} : vector<1x8x32xbf16>, vector<1x8x32xbf16>, vector<1x8x8xf32> -> vector<1x8x8xf32>
    "tpu.trace_stop"() : () -> ()
    %cst_25 = arith.constant 0.176776692 : f32
    %81 = vector.broadcast %cst_25 : f32 to vector<1x8x8xf32>
    %82 = arith.mulf %80, %81 : vector<1x8x8xf32>
    %83 = vector.shape_cast %51 : vector<8x8xf32> to vector<1x8x8xf32>
    %84 = arith.addf %82, %83 : vector<1x8x8xf32>
    %cst_26 = arith.constant dense<0xFF800000> : vector<1x8xf32>
    %85 = vector.multi_reduction <maximumf>, %84, %cst_26 [2] : vector<1x8x8xf32> to vector<1x8xf32>
    %86 = vector.shape_cast %85 : vector<1x8xf32> to vector<1x8x1xf32>
    %87 = vector.broadcast %86 : vector<1x8x1xf32> to vector<1x8x8xf32>
    %88 = arith.subf %84, %87 : vector<1x8x8xf32>
    %89 = math.exp %88 : vector<1x8x8xf32>
    %cst_27 = arith.constant dense<0.000000e+00> : vector<1x8xf32>
    %90 = vector.multi_reduction <add>, %89, %cst_27 [2] : vector<1x8x8xf32> to vector<1x8xf32>
    %91 = vector.shape_cast %90 : vector<1x8xf32> to vector<1x8x1xf32>
    %92 = tpu.reciprocal %91 {approx = true} : vector<1x8x1xf32> -> vector<1x8x1xf32>
    %93 = vector.broadcast %92 : vector<1x8x1xf32> to vector<1x8x8xf32>
    %94 = arith.mulf %89, %93 : vector<1x8x8xf32>
    %95 = arith.truncf %94 : vector<1x8x8xf32> to vector<1x8x8xbf16>
    %96 = arith.truncf %77 : vector<1x8x32xf32> to vector<1x8x32xbf16>
    "tpu.trace_start"() <{level = 10 : i32, message = "bqk,bkd->bqd"}> : () -> ()
    %cst_28 = arith.constant dense<0.000000e+00> : vector<1x8x32xf32>
    %97 = tpu.matmul %95, %96, %cst_28 {dimension_numbers = #tpu.dot_dimension_numbers<[2], [1], [1], [2], [0, 0, 0, 1, 1, 2], [0], [0]>} : vector<1x8x8xbf16>, vector<1x8x32xbf16>, vector<1x8x32xf32> -> vector<1x8x32xf32>
    "tpu.trace_stop"() : () -> ()
    %98 = vector.extract_strided_slice %45 {offsets = [0, 0, 64], sizes = [1, 8, 32], strides = [1, 1, 1]} : vector<1x8x384xf32> to vector<1x8x32xf32>
    %99 = vector.extract_strided_slice %45 {offsets = [0, 0, 192], sizes = [1, 8, 32], strides = [1, 1, 1]} : vector<1x8x384xf32> to vector<1x8x32xf32>
    %100 = vector.extract_strided_slice %45 {offsets = [0, 0, 320], sizes = [1, 8, 32], strides = [1, 1, 1]} : vector<1x8x384xf32> to vector<1x8x32xf32>
    %101 = arith.truncf %98 : vector<1x8x32xf32> to vector<1x8x32xbf16>
    %102 = arith.truncf %99 : vector<1x8x32xf32> to vector<1x8x32xbf16>
    "tpu.trace_start"() <{level = 10 : i32, message = "bqd,bkd->bqk"}> : () -> ()
    %cst_29 = arith.constant dense<0.000000e+00> : vector<1x8x8xf32>
    %103 = tpu.matmul %101, %102, %cst_29 {dimension_numbers = #tpu.dot_dimension_numbers<[2], [2], [1], [1], [0, 0, 0, 1, 1, 1], [0], [0]>} : vector<1x8x32xbf16>, vector<1x8x32xbf16>, vector<1x8x8xf32> -> vector<1x8x8xf32>
    "tpu.trace_stop"() : () -> ()
    %cst_30 = arith.constant 0.176776692 : f32
    %104 = vector.broadcast %cst_30 : f32 to vector<1x8x8xf32>
    %105 = arith.mulf %103, %104 : vector<1x8x8xf32>
    %106 = vector.shape_cast %51 : vector<8x8xf32> to vector<1x8x8xf32>
    %107 = arith.addf %105, %106 : vector<1x8x8xf32>
    %cst_31 = arith.constant dense<0xFF800000> : vector<1x8xf32>
    %108 = vector.multi_reduction <maximumf>, %107, %cst_31 [2] : vector<1x8x8xf32> to vector<1x8xf32>
    %109 = vector.shape_cast %108 : vector<1x8xf32> to vector<1x8x1xf32>
    %110 = vector.broadcast %109 : vector<1x8x1xf32> to vector<1x8x8xf32>
    %111 = arith.subf %107, %110 : vector<1x8x8xf32>
    %112 = math.exp %111 : vector<1x8x8xf32>
    %cst_32 = arith.constant dense<0.000000e+00> : vector<1x8xf32>
    %113 = vector.multi_reduction <add>, %112, %cst_32 [2] : vector<1x8x8xf32> to vector<1x8xf32>
    %114 = vector.shape_cast %113 : vector<1x8xf32> to vector<1x8x1xf32>
    %115 = tpu.reciprocal %114 {approx = true} : vector<1x8x1xf32> -> vector<1x8x1xf32>
    %116 = vector.broadcast %115 : vector<1x8x1xf32> to vector<1x8x8xf32>
    %117 = arith.mulf %112, %116 : vector<1x8x8xf32>
    %118 = arith.truncf %117 : vector<1x8x8xf32> to vector<1x8x8xbf16>
    %119 = arith.truncf %100 : vector<1x8x32xf32> to vector<1x8x32xbf16>
    "tpu.trace_start"() <{level = 10 : i32, message = "bqk,bkd->bqd"}> : () -> ()
    %cst_33 = arith.constant dense<0.000000e+00> : vector<1x8x32xf32>
    %120 = tpu.matmul %118, %119, %cst_33 {dimension_numbers = #tpu.dot_dimension_numbers<[2], [1], [1], [2], [0, 0, 0, 1, 1, 2], [0], [0]>} : vector<1x8x8xbf16>, vector<1x8x32xbf16>, vector<1x8x32xf32> -> vector<1x8x32xf32>
    "tpu.trace_stop"() : () -> ()
    %121 = vector.extract_strided_slice %45 {offsets = [0, 0, 96], sizes = [1, 8, 32], strides = [1, 1, 1]} : vector<1x8x384xf32> to vector<1x8x32xf32>
    %122 = vector.extract_strided_slice %45 {offsets = [0, 0, 224], sizes = [1, 8, 32], strides = [1, 1, 1]} : vector<1x8x384xf32> to vector<1x8x32xf32>
    %123 = vector.extract_strided_slice %45 {offsets = [0, 0, 352], sizes = [1, 8, 32], strides = [1, 1, 1]} : vector<1x8x384xf32> to vector<1x8x32xf32>
    %124 = arith.truncf %121 : vector<1x8x32xf32> to vector<1x8x32xbf16>
    %125 = arith.truncf %122 : vector<1x8x32xf32> to vector<1x8x32xbf16>
    "tpu.trace_start"() <{level = 10 : i32, message = "bqd,bkd->bqk"}> : () -> ()
    %cst_34 = arith.constant dense<0.000000e+00> : vector<1x8x8xf32>
    %126 = tpu.matmul %124, %125, %cst_34 {dimension_numbers = #tpu.dot_dimension_numbers<[2], [2], [1], [1], [0, 0, 0, 1, 1, 1], [0], [0]>} : vector<1x8x32xbf16>, vector<1x8x32xbf16>, vector<1x8x8xf32> -> vector<1x8x8xf32>
    "tpu.trace_stop"() : () -> ()
    %cst_35 = arith.constant 0.176776692 : f32
    %127 = vector.broadcast %cst_35 : f32 to vector<1x8x8xf32>
    %128 = arith.mulf %126, %127 : vector<1x8x8xf32>
    %129 = vector.shape_cast %51 : vector<8x8xf32> to vector<1x8x8xf32>
    %130 = arith.addf %128, %129 : vector<1x8x8xf32>
    %cst_36 = arith.constant dense<0xFF800000> : vector<1x8xf32>
    %131 = vector.multi_reduction <maximumf>, %130, %cst_36 [2] : vector<1x8x8xf32> to vector<1x8xf32>
    %132 = vector.shape_cast %131 : vector<1x8xf32> to vector<1x8x1xf32>
    %133 = vector.broadcast %132 : vector<1x8x1xf32> to vector<1x8x8xf32>
    %134 = arith.subf %130, %133 : vector<1x8x8xf32>
    %135 = math.exp %134 : vector<1x8x8xf32>
    %cst_37 = arith.constant dense<0.000000e+00> : vector<1x8xf32>
    %136 = vector.multi_reduction <add>, %135, %cst_37 [2] : vector<1x8x8xf32> to vector<1x8xf32>
    %137 = vector.shape_cast %136 : vector<1x8xf32> to vector<1x8x1xf32>
    %138 = tpu.reciprocal %137 {approx = true} : vector<1x8x1xf32> -> vector<1x8x1xf32>
    %139 = vector.broadcast %138 : vector<1x8x1xf32> to vector<1x8x8xf32>
    %140 = arith.mulf %135, %139 : vector<1x8x8xf32>
    %141 = arith.truncf %140 : vector<1x8x8xf32> to vector<1x8x8xbf16>
    %142 = arith.truncf %123 : vector<1x8x32xf32> to vector<1x8x32xbf16>
    "tpu.trace_start"() <{level = 10 : i32, message = "bqk,bkd->bqd"}> : () -> ()
    %cst_38 = arith.constant dense<0.000000e+00> : vector<1x8x32xf32>
    %143 = tpu.matmul %141, %142, %cst_38 {dimension_numbers = #tpu.dot_dimension_numbers<[2], [1], [1], [2], [0, 0, 0, 1, 1, 2], [0], [0]>} : vector<1x8x8xbf16>, vector<1x8x32xbf16>, vector<1x8x32xf32> -> vector<1x8x32xf32>
    "tpu.trace_stop"() : () -> ()
    %144 = tpu.concatenate %74, %97, %120, %143 in 2 : vector<1x8x32xf32>, vector<1x8x32xf32>, vector<1x8x32xf32>, vector<1x8x32xf32> -> vector<1x8x128xf32>
    %145 = vector.shape_cast %144 : vector<1x8x128xf32> to vector<8x128xf32>
    %146 = arith.truncf %145 : vector<8x128xf32> to vector<8x128xbf16>
    %c0_39 = arith.constant 0 : index
    %c0_40 = arith.constant 0 : index
    %c384 = arith.constant 384 : index
    %147 = vector.load %arg3[%c0_39, %c0_40, %c384] : memref<1x128x1024xbf16, #tpu.memory_space<vmem>>, vector<1x128x128xbf16>
    %148 = vector.shape_cast %147 : vector<1x128x128xbf16> to vector<128x128xbf16>
    %cst_41 = arith.constant dense<0.000000e+00> : vector<8x128xf32>
    %149 = tpu.matmul %146, %148, %cst_41 {dimension_numbers = #tpu.dot_dimension_numbers<[1], [0], [0], [1], [0, 0, 1, 1], [], []>} : vector<8x128xbf16>, vector<128x128xbf16>, vector<8x128xf32> -> vector<8x128xf32>
    %150 = vector.broadcast %13 : vector<1x128xf32> to vector<8x128xf32>
    %151 = arith.addf %149, %150 : vector<8x128xf32>
    %152 = arith.addf %4, %151 : vector<8x128xf32>
    %cst_42 = arith.constant dense<0.000000e+00> : vector<8xf32>
    %153 = vector.multi_reduction <add>, %152, %cst_42 [1] : vector<8x128xf32> to vector<8xf32>
    %154 = vector.shape_cast %153 : vector<8xf32> to vector<8x1xf32>
    %cst_43 = arith.constant 1.280000e+02 : f32
    %155 = vector.broadcast %cst_43 : f32 to vector<8x1xf32>
    %156 = arith.divf %154, %155 : vector<8x1xf32>
    %157 = vector.broadcast %156 : vector<8x1xf32> to vector<8x128xf32>
    %158 = arith.subf %152, %157 : vector<8x128xf32>
    %159 = arith.mulf %158, %158 : vector<8x128xf32>
    %cst_44 = arith.constant dense<0.000000e+00> : vector<8xf32>
    %160 = vector.multi_reduction <add>, %159, %cst_44 [1] : vector<8x128xf32> to vector<8xf32>
    %161 = vector.shape_cast %160 : vector<8xf32> to vector<8x1xf32>
    %cst_45 = arith.constant 1.280000e+02 : f32
    %162 = vector.broadcast %cst_45 : f32 to vector<8x1xf32>
    %163 = arith.divf %161, %162 : vector<8x1xf32>
    %164 = vector.broadcast %156 : vector<8x1xf32> to vector<8x128xf32>
    %165 = arith.subf %152, %164 : vector<8x128xf32>
    %cst_46 = arith.constant 9.99999974E-6 : f32
    %166 = vector.broadcast %cst_46 : f32 to vector<8x1xf32>
    %167 = arith.addf %163, %166 : vector<8x1xf32>
    %168 = math.rsqrt %167 : vector<8x1xf32>
    %169 = vector.broadcast %168 : vector<8x1xf32> to vector<8x128xf32>
    %170 = arith.mulf %165, %169 : vector<8x128xf32>
    %171 = vector.broadcast %11 : vector<1x128xf32> to vector<8x128xf32>
    %172 = arith.mulf %170, %171 : vector<8x128xf32>
    %173 = vector.broadcast %12 : vector<1x128xf32> to vector<8x128xf32>
    %174 = arith.addf %172, %173 : vector<8x128xf32>
    %175 = arith.truncf %174 : vector<8x128xf32> to vector<8x128xbf16>
    %c0_47 = arith.constant 0 : index
    %c0_48 = arith.constant 0 : index
    %c512 = arith.constant 512 : index
    %176 = vector.load %arg3[%c0_47, %c0_48, %c512] : memref<1x128x1024xbf16, #tpu.memory_space<vmem>>, vector<1x128x512xbf16>
    %177 = vector.shape_cast %176 : vector<1x128x512xbf16> to vector<128x512xbf16>
    %cst_49 = arith.constant dense<0.000000e+00> : vector<8x512xf32>
    %178 = tpu.matmul %175, %177, %cst_49 {dimension_numbers = #tpu.dot_dimension_numbers<[1], [0], [0], [1], [0, 0, 1, 1], [], []>} : vector<8x128xbf16>, vector<128x512xbf16>, vector<8x512xf32> -> vector<8x512xf32>
    %179 = vector.broadcast %16 : vector<1x512xf32> to vector<8x512xf32>
    %180 = arith.addf %178, %179 : vector<8x512xf32>
    %cst_50 = arith.constant 1.702000e+00 : f32
    %181 = vector.broadcast %cst_50 : f32 to vector<8x512xf32>
    %182 = arith.mulf %181, %180 : vector<8x512xf32>
    %183 = arith.negf %182 : vector<8x512xf32>
    %184 = math.exp %183 : vector<8x512xf32>
    %cst_51 = arith.constant 1.000000e+00 : f32
    %185 = vector.broadcast %cst_51 : f32 to vector<8x512xf32>
    %186 = arith.addf %185, %184 : vector<8x512xf32>
    %187 = arith.divf %185, %186 : vector<8x512xf32>
    %188 = arith.mulf %180, %187 : vector<8x512xf32>
    %189 = arith.truncf %188 : vector<8x512xf32> to vector<8x512xbf16>
    %c0_52 = arith.constant 0 : index
    %c0_53 = arith.constant 0 : index
    %c0_54 = arith.constant 0 : index
    %190 = vector.load %arg4[%c0_52, %c0_53, %c0_54] : memref<1x512x128xbf16, #tpu.memory_space<vmem>>, vector<1x512x128xbf16>
    %191 = vector.shape_cast %190 : vector<1x512x128xbf16> to vector<512x128xbf16>
    %cst_55 = arith.constant dense<0.000000e+00> : vector<8x128xf32>
    %192 = tpu.matmul %189, %191, %cst_55 {dimension_numbers = #tpu.dot_dimension_numbers<[1], [0], [0], [1], [0, 0, 1, 1], [], []>} : vector<8x512xbf16>, vector<512x128xbf16>, vector<8x128xf32> -> vector<8x128xf32>
    %193 = vector.broadcast %14 : vector<1x128xf32> to vector<8x128xf32>
    %194 = arith.addf %192, %193 : vector<8x128xf32>
    %195 = arith.addf %152, %194 : vector<8x128xf32>
    %196 = vector.shape_cast %195 : vector<8x128xf32> to vector<1x8x128xf32>
    %c0_56 = arith.constant 0 : index
    %c0_57 = arith.constant 0 : index
    %c0_58 = arith.constant 0 : index
    %197 = vector.load %arg7[%c0_56, %c0_57, %c0_58] : memref<1x8x128xf32, #tpu.memory_space<vmem>>, vector<1x8x128xf32>
    tpu.vector_store %arg7[%c0_56, %c0_57, %c0_58], %196 {strides = array<i32>} : memref<1x8x128xf32, #tpu.memory_space<vmem>>, vector<1x8x128xf32>,
    return
  }
  func.func @transform_0(%arg0: i32, %arg1: i32) -> (i32, i32, i32) {
    %c0_i32 = arith.constant 0 : i32
    %c0_i32_0 = arith.constant 0 : i32
    %c0_i32_1 = arith.constant 0 : i32
    return %arg0, %c0_i32, %c0_i32_0 : i32, i32, i32
  }
  func.func @transform_1(%arg0: i32, %arg1: i32) -> (i32, i32, i32) {
    %c0_i32 = arith.constant 0 : i32
    %c0_i32_0 = arith.constant 0 : i32
    %c0_i32_1 = arith.constant 0 : i32
    return %arg1, %c0_i32, %c0_i32_0 : i32, i32, i32
  }
  func.func @transform_2(%arg0: i32, %arg1: i32) -> (i32, i32, i32) {
    %c0_i32 = arith.constant 0 : i32
    %c0_i32_0 = arith.constant 0 : i32
    %c0_i32_1 = arith.constant 0 : i32
    return %arg1, %c0_i32, %c0_i32_0 : i32, i32, i32
  }
  func.func @transform_3(%arg0: i32, %arg1: i32) -> (i32, i32, i32) {
    %c0_i32 = arith.constant 0 : i32
    %c0_i32_0 = arith.constant 0 : i32
    %c0_i32_1 = arith.constant 0 : i32
    return %arg1, %c0_i32, %c0_i32_0 : i32, i32, i32
  }
  func.func @transform_4(%arg0: i32, %arg1: i32) -> (i32, i32, i32) {
    %c0_i32 = arith.constant 0 : i32
    %c0_i32_0 = arith.constant 0 : i32
    %c0_i32_1 = arith.constant 0 : i32
    return %arg1, %c0_i32, %c0_i32_0 : i32, i32, i32
  }
  func.func @transform_5(%arg0: i32, %arg1: i32) -> (i32, i32, i32) {
    %c0_i32 = arith.constant 0 : i32
    %c0_i32_0 = arith.constant 0 : i32
    %c0_i32_1 = arith.constant 0 : i32
    return %arg0, %c0_i32, %c0_i32_0 : i32, i32, i32
  }
}

module attributes {stable_mosaic.version = 11 : i64} {
  func.func @_vis_pre_kernel(%arg0: memref<8x4x192xf32, #tpu.memory_space<vmem>>, %arg1: memref<192x128xbf16, #tpu.memory_space<vmem>>, %arg2: memref<1x128xf32, #tpu.memory_space<vmem>>, %arg3: memref<5x128xf32, #tpu.memory_space<vmem>>, %arg4: memref<1x128xf32, #tpu.memory_space<vmem>>, %arg5: memref<1x128xf32, #tpu.memory_space<vmem>>, %arg6: memref<8x5x128xf32, #tpu.memory_space<vmem>>) attributes {dimension_semantics = [], scalar_prefetch = 0 : i64, scratch_operands = 0 : i64, tpu.core_type = #tpu.core_type<tc>} {
    %c0 = arith.constant 0 : index
    %c0_0 = arith.constant 0 : index
    %c0_1 = arith.constant 0 : index
    %0 = vector.load %arg0[%c0, %c0_0, %c0_1] : memref<8x4x192xf32, #tpu.memory_space<vmem>>, vector<8x4x192xf32>
    %1 = vector.shape_cast %0 : vector<8x4x192xf32> to vector<32x192xf32>
    %2 = arith.truncf %1 : vector<32x192xf32> to vector<32x192xbf16>
    %c0_2 = arith.constant 0 : index
    %c0_3 = arith.constant 0 : index
    %3 = vector.load %arg1[%c0_2, %c0_3] : memref<192x128xbf16, #tpu.memory_space<vmem>>, vector<192x128xbf16>
    %cst = arith.constant dense<0.000000e+00> : vector<32x128xf32>
    %4 = tpu.matmul %2, %3, %cst {dimension_numbers = #tpu.dot_dimension_numbers<[1], [0], [0], [1], [0, 0, 1, 1], [], []>} : vector<32x192xbf16>, vector<192x128xbf16>, vector<32x128xf32> -> vector<32x128xf32>
    %5 = vector.shape_cast %4 : vector<32x128xf32> to vector<8x4x128xf32>
    %c1 = arith.constant 1 : index
    %c0_4 = arith.constant 0 : index
    %6 = vector.load %arg3[%c1, %c0_4] : memref<5x128xf32, #tpu.memory_space<vmem>>, vector<4x128xf32>
    %7 = vector.shape_cast %6 : vector<4x128xf32> to vector<1x4x128xf32>
    %8 = vector.broadcast %7 : vector<1x4x128xf32> to vector<8x4x128xf32>
    %9 = arith.addf %5, %8 : vector<8x4x128xf32>
    %c0_5 = arith.constant 0 : index
    %c0_6 = arith.constant 0 : index
    %10 = vector.load %arg4[%c0_5, %c0_6] : memref<1x128xf32, #tpu.memory_space<vmem>>, vector<1x128xf32>
    %c0_7 = arith.constant 0 : index
    %c0_8 = arith.constant 0 : index
    %11 = vector.load %arg5[%c0_7, %c0_8] : memref<1x128xf32, #tpu.memory_space<vmem>>, vector<1x128xf32>
    %cst_9 = arith.constant dense<0.000000e+00> : vector<8x4xf32>
    %12 = vector.multi_reduction <add>, %9, %cst_9 [2] : vector<8x4x128xf32> to vector<8x4xf32>
    %13 = vector.shape_cast %12 : vector<8x4xf32> to vector<8x4x1xf32>
    %cst_10 = arith.constant 1.280000e+02 : f32
    %14 = vector.broadcast %cst_10 : f32 to vector<8x4x1xf32>
    %15 = arith.divf %13, %14 : vector<8x4x1xf32>
    %16 = vector.broadcast %15 : vector<8x4x1xf32> to vector<8x4x128xf32>
    %17 = arith.subf %9, %16 : vector<8x4x128xf32>
    %18 = arith.mulf %17, %17 : vector<8x4x128xf32>
    %cst_11 = arith.constant dense<0.000000e+00> : vector<8x4xf32>
    %19 = vector.multi_reduction <add>, %18, %cst_11 [2] : vector<8x4x128xf32> to vector<8x4xf32>
    %20 = vector.shape_cast %19 : vector<8x4xf32> to vector<8x4x1xf32>
    %cst_12 = arith.constant 1.280000e+02 : f32
    %21 = vector.broadcast %cst_12 : f32 to vector<8x4x1xf32>
    %22 = arith.divf %20, %21 : vector<8x4x1xf32>
    %23 = vector.broadcast %15 : vector<8x4x1xf32> to vector<8x4x128xf32>
    %24 = arith.subf %9, %23 : vector<8x4x128xf32>
    %cst_13 = arith.constant 9.99999974E-6 : f32
    %25 = vector.broadcast %cst_13 : f32 to vector<8x4x1xf32>
    %26 = arith.addf %22, %25 : vector<8x4x1xf32>
    %27 = math.rsqrt %26 : vector<8x4x1xf32>
    %28 = vector.broadcast %27 : vector<8x4x1xf32> to vector<8x4x128xf32>
    %29 = arith.mulf %24, %28 : vector<8x4x128xf32>
    %30 = vector.shape_cast %10 : vector<1x128xf32> to vector<1x1x128xf32>
    %31 = vector.broadcast %30 : vector<1x1x128xf32> to vector<8x4x128xf32>
    %32 = arith.mulf %29, %31 : vector<8x4x128xf32>
    %33 = vector.shape_cast %11 : vector<1x128xf32> to vector<1x1x128xf32>
    %34 = vector.broadcast %33 : vector<1x1x128xf32> to vector<8x4x128xf32>
    %35 = arith.addf %32, %34 : vector<8x4x128xf32>
    %c0_14 = arith.constant 0 : index
    %c1_15 = arith.constant 1 : index
    %c0_16 = arith.constant 0 : index
    %36 = vector.load %arg6[%c0_14, %c1_15, %c0_16] : memref<8x5x128xf32, #tpu.memory_space<vmem>>, vector<8x4x128xf32>
    tpu.vector_store %arg6[%c0_14, %c1_15, %c0_16], %35 {strides = array<i32>} : memref<8x5x128xf32, #tpu.memory_space<vmem>>, vector<8x4x128xf32>,
    %c0_17 = arith.constant 0 : index
    %c0_18 = arith.constant 0 : index
    %37 = vector.load %arg2[%c0_17, %c0_18] : memref<1x128xf32, #tpu.memory_space<vmem>>, vector<1x128xf32>
    %c0_19 = arith.constant 0 : index
    %c0_20 = arith.constant 0 : index
    %38 = vector.load %arg3[%c0_19, %c0_20] : memref<5x128xf32, #tpu.memory_space<vmem>>, vector<1x128xf32>
    %39 = arith.addf %37, %38 : vector<1x128xf32>
    %c0_21 = arith.constant 0 : index
    %c0_22 = arith.constant 0 : index
    %40 = vector.load %arg4[%c0_21, %c0_22] : memref<1x128xf32, #tpu.memory_space<vmem>>, vector<1x128xf32>
    %c0_23 = arith.constant 0 : index
    %c0_24 = arith.constant 0 : index
    %41 = vector.load %arg5[%c0_23, %c0_24] : memref<1x128xf32, #tpu.memory_space<vmem>>, vector<1x128xf32>
    %cst_25 = arith.constant dense<0.000000e+00> : vector<1xf32>
    %42 = vector.multi_reduction <add>, %39, %cst_25 [1] : vector<1x128xf32> to vector<1xf32>
    %43 = vector.shape_cast %42 : vector<1xf32> to vector<1x1xf32>
    %cst_26 = arith.constant 1.280000e+02 : f32
    %44 = vector.broadcast %cst_26 : f32 to vector<1x1xf32>
    %45 = arith.divf %43, %44 : vector<1x1xf32>
    %46 = vector.broadcast %45 : vector<1x1xf32> to vector<1x128xf32>
    %47 = arith.subf %39, %46 : vector<1x128xf32>
    %48 = arith.mulf %47, %47 : vector<1x128xf32>
    %cst_27 = arith.constant dense<0.000000e+00> : vector<1xf32>
    %49 = vector.multi_reduction <add>, %48, %cst_27 [1] : vector<1x128xf32> to vector<1xf32>
    %50 = vector.shape_cast %49 : vector<1xf32> to vector<1x1xf32>
    %cst_28 = arith.constant 1.280000e+02 : f32
    %51 = vector.broadcast %cst_28 : f32 to vector<1x1xf32>
    %52 = arith.divf %50, %51 : vector<1x1xf32>
    %53 = vector.broadcast %45 : vector<1x1xf32> to vector<1x128xf32>
    %54 = arith.subf %39, %53 : vector<1x128xf32>
    %cst_29 = arith.constant 9.99999974E-6 : f32
    %55 = vector.broadcast %cst_29 : f32 to vector<1x1xf32>
    %56 = arith.addf %52, %55 : vector<1x1xf32>
    %57 = math.rsqrt %56 : vector<1x1xf32>
    %58 = vector.broadcast %57 : vector<1x1xf32> to vector<1x128xf32>
    %59 = arith.mulf %54, %58 : vector<1x128xf32>
    %60 = arith.mulf %59, %40 : vector<1x128xf32>
    %61 = arith.addf %60, %41 : vector<1x128xf32>
    %62 = vector.shape_cast %61 : vector<1x128xf32> to vector<1x1x128xf32>
    %63 = vector.shape_cast %62 : vector<1x1x128xf32> to vector<1x1x128xf32>
    %64 = vector.broadcast %63 : vector<1x1x128xf32> to vector<8x1x128xf32>
    %c0_30 = arith.constant 0 : index
    %c0_31 = arith.constant 0 : index
    %c0_32 = arith.constant 0 : index
    %65 = vector.load %arg6[%c0_30, %c0_31, %c0_32] : memref<8x5x128xf32, #tpu.memory_space<vmem>>, vector<8x1x128xf32>
    tpu.vector_store %arg6[%c0_30, %c0_31, %c0_32], %64 {strides = array<i32>} : memref<8x5x128xf32, #tpu.memory_space<vmem>>, vector<8x1x128xf32>,
    return
  }
}

module attributes {stable_mosaic.version = 11 : i64} {
  func.func @_stack_kernel(%arg0: i32, %arg1: i32, %arg2: memref<4x5x128xf32, #tpu.memory_space<vmem>>, %arg3: memref<1x128x1024xbf16, #tpu.memory_space<vmem>>, %arg4: memref<1x512x128xbf16, #tpu.memory_space<vmem>>, %arg5: memref<1x6x128xf32, #tpu.memory_space<vmem>>, %arg6: memref<1x2x512xf32, #tpu.memory_space<vmem>>, %arg7: memref<4x5x128xf32, #tpu.memory_space<vmem>>) attributes {dimension_semantics = [#tpu.dimension_semantics<parallel>, #tpu.dimension_semantics<arbitrary>], iteration_bounds = array<i64: 2, 2>, scalar_prefetch = 0 : i64, scratch_operands = 0 : i64, tpu.core_type = #tpu.core_type<tc>, window_params = [{transform_indices = @transform_0, window_bounds = array<i64: 4, 5, 128>}, {transform_indices = @transform_1, window_bounds = array<i64: 1, 128, 1024>}, {transform_indices = @transform_2, window_bounds = array<i64: 1, 512, 128>}, {transform_indices = @transform_3, window_bounds = array<i64: 1, 6, 128>}, {transform_indices = @transform_4, window_bounds = array<i64: 1, 2, 512>}, {transform_indices = @transform_5, window_bounds = array<i64: 4, 5, 128>}]} {
    %c0_i32 = arith.constant 0 : i32
    %0 = arith.cmpi eq, %arg1, %c0_i32 : i32
    %1 = arith.extui %0 : i1 to i32
    %c0_i32_0 = arith.constant 0 : i32
    %2 = arith.cmpi ne, %1, %c0_i32_0 : i32
    scf.if %2 {
      %c0_57 = arith.constant 0 : index
      %c0_58 = arith.constant 0 : index
      %c0_59 = arith.constant 0 : index
      %184 = vector.load %arg2[%c0_57, %c0_58, %c0_59] : memref<4x5x128xf32, #tpu.memory_space<vmem>>, vector<4x5x128xf32>
      %c0_60 = arith.constant 0 : index
      %c0_61 = arith.constant 0 : index
      %c0_62 = arith.constant 0 : index
      %185 = vector.load %arg7[%c0_60, %c0_61, %c0_62] : memref<4x5x128xf32, #tpu.memory_space<vmem>>, vector<4x5x128xf32>
      tpu.vector_store %arg7[%c0_60, %c0_61, %c0_62], %184 {strides = array<i32>} : memref<4x5x128xf32, #tpu.memory_space<vmem>>, vector<4x5x128xf32>,
    } else {
    }
    %c0 = arith.constant 0 : index
    %c0_1 = arith.constant 0 : index
    %c0_2 = arith.constant 0 : index
    %3 = vector.load %arg7[%c0, %c0_1, %c0_2] : memref<4x5x128xf32, #tpu.memory_space<vmem>>, vector<4x5x128xf32>
    %4 = vector.shape_cast %3 : vector<4x5x128xf32> to vector<20x128xf32>
    %c0_3 = arith.constant 0 : index
    %c0_4 = arith.constant 0 : index
    %c0_5 = arith.constant 0 : index
    %5 = vector.load %arg5[%c0_3, %c0_4, %c0_5] : memref<1x6x128xf32, #tpu.memory_space<vmem>>, vector<1x6x128xf32>
    %6 = vector.shape_cast %5 : vector<1x6x128xf32> to vector<6x128xf32>
    %c0_6 = arith.constant 0 : index
    %c0_7 = arith.constant 0 : index
    %c0_8 = arith.constant 0 : index
    %7 = vector.load %arg6[%c0_6, %c0_7, %c0_8] : memref<1x2x512xf32, #tpu.memory_space<vmem>>, vector<1x2x512xf32>
    %8 = vector.shape_cast %7 : vector<1x2x512xf32> to vector<2x512xf32>
    %9 = vector.extract_strided_slice %6 {offsets = [0, 0], sizes = [1, 128], strides = [1, 1]} : vector<6x128xf32> to vector<1x128xf32>
    %10 = vector.extract_strided_slice %6 {offsets = [1, 0], sizes = [1, 128], strides = [1, 1]} : vector<6x128xf32> to vector<1x128xf32>
    %11 = vector.extract_strided_slice %6 {offsets = [2, 0], sizes = [1, 128], strides = [1, 1]} : vector<6x128xf32> to vector<1x128xf32>
    %12 = vector.extract_strided_slice %6 {offsets = [3, 0], sizes = [1, 128], strides = [1, 1]} : vector<6x128xf32> to vector<1x128xf32>
    %13 = vector.extract_strided_slice %6 {offsets = [4, 0], sizes = [1, 128], strides = [1, 1]} : vector<6x128xf32> to vector<1x128xf32>
    %14 = vector.extract_strided_slice %6 {offsets = [5, 0], sizes = [1, 128], strides = [1, 1]} : vector<6x128xf32> to vector<1x128xf32>
    %15 = vector.extract_strided_slice %8 {offsets = [0, 0], sizes = [1, 384], strides = [1, 1]} : vector<2x512xf32> to vector<1x384xf32>
    %16 = vector.extract_strided_slice %8 {offsets = [1, 0], sizes = [1, 512], strides = [1, 1]} : vector<2x512xf32> to vector<1x512xf32>
    %cst = arith.constant dense<0.000000e+00> : vector<20xf32>
    %17 = vector.multi_reduction <add>, %4, %cst [1] : vector<20x128xf32> to vector<20xf32>
    %18 = vector.shape_cast %17 : vector<20xf32> to vector<20x1xf32>
    %cst_9 = arith.constant 1.280000e+02 : f32
    %19 = vector.broadcast %cst_9 : f32 to vector<20x1xf32>
    %20 = arith.divf %18, %19 : vector<20x1xf32>
    %21 = vector.broadcast %20 : vector<20x1xf32> to vector<20x128xf32>
    %22 = arith.subf %4, %21 : vector<20x128xf32>
    %23 = arith.mulf %22, %22 : vector<20x128xf32>
    %cst_10 = arith.constant dense<0.000000e+00> : vector<20xf32>
    %24 = vector.multi_reduction <add>, %23, %cst_10 [1] : vector<20x128xf32> to vector<20xf32>
    %25 = vector.shape_cast %24 : vector<20xf32> to vector<20x1xf32>
    %cst_11 = arith.constant 1.280000e+02 : f32
    %26 = vector.broadcast %cst_11 : f32 to vector<20x1xf32>
    %27 = arith.divf %25, %26 : vector<20x1xf32>
    %28 = vector.broadcast %20 : vector<20x1xf32> to vector<20x128xf32>
    %29 = arith.subf %4, %28 : vector<20x128xf32>
    %cst_12 = arith.constant 9.99999974E-6 : f32
    %30 = vector.broadcast %cst_12 : f32 to vector<20x1xf32>
    %31 = arith.addf %27, %30 : vector<20x1xf32>
    %32 = math.rsqrt %31 : vector<20x1xf32>
    %33 = vector.broadcast %32 : vector<20x1xf32> to vector<20x128xf32>
    %34 = arith.mulf %29, %33 : vector<20x128xf32>
    %35 = vector.broadcast %9 : vector<1x128xf32> to vector<20x128xf32>
    %36 = arith.mulf %34, %35 : vector<20x128xf32>
    %37 = vector.broadcast %10 : vector<1x128xf32> to vector<20x128xf32>
    %38 = arith.addf %36, %37 : vector<20x128xf32>
    %39 = arith.truncf %38 : vector<20x128xf32> to vector<20x128xbf16>
    %c0_13 = arith.constant 0 : index
    %c0_14 = arith.constant 0 : index
    %c0_15 = arith.constant 0 : index
    %40 = vector.load %arg3[%c0_13, %c0_14, %c0_15] : memref<1x128x1024xbf16, #tpu.memory_space<vmem>>, vector<1x128x384xbf16>
    %41 = vector.shape_cast %40 : vector<1x128x384xbf16> to vector<128x384xbf16>
    %cst_16 = arith.constant dense<0.000000e+00> : vector<20x384xf32>
    %42 = tpu.matmul %39, %41, %cst_16 {dimension_numbers = #tpu.dot_dimension_numbers<[1], [0], [0], [1], [0, 0, 1, 1], [], []>} : vector<20x128xbf16>, vector<128x384xbf16>, vector<20x384xf32> -> vector<20x384xf32>
    %43 = vector.broadcast %15 : vector<1x384xf32> to vector<20x384xf32>
    %44 = arith.addf %42, %43 : vector<20x384xf32>
    %45 = vector.shape_cast %44 : vector<20x384xf32> to vector<4x5x384xf32>
    %46 = vector.extract_strided_slice %45 {offsets = [0, 0, 0], sizes = [4, 5, 32], strides = [1, 1, 1]} : vector<4x5x384xf32> to vector<4x5x32xf32>
    %47 = vector.extract_strided_slice %45 {offsets = [0, 0, 128], sizes = [4, 5, 32], strides = [1, 1, 1]} : vector<4x5x384xf32> to vector<4x5x32xf32>
    %48 = vector.extract_strided_slice %45 {offsets = [0, 0, 256], sizes = [4, 5, 32], strides = [1, 1, 1]} : vector<4x5x384xf32> to vector<4x5x32xf32>
    %49 = arith.truncf %46 : vector<4x5x32xf32> to vector<4x5x32xbf16>
    %50 = arith.truncf %47 : vector<4x5x32xf32> to vector<4x5x32xbf16>
    "tpu.trace_start"() <{level = 10 : i32, message = "bqd,bkd->bqk"}> : () -> ()
    %cst_17 = arith.constant dense<0.000000e+00> : vector<4x5x5xf32>
    %51 = tpu.matmul %49, %50, %cst_17 {dimension_numbers = #tpu.dot_dimension_numbers<[2], [2], [1], [1], [0, 0, 0, 1, 1, 1], [0], [0]>} : vector<4x5x32xbf16>, vector<4x5x32xbf16>, vector<4x5x5xf32> -> vector<4x5x5xf32>
    "tpu.trace_stop"() : () -> ()
    %cst_18 = arith.constant 0.176776692 : f32
    %52 = vector.broadcast %cst_18 : f32 to vector<4x5x5xf32>
    %53 = arith.mulf %51, %52 : vector<4x5x5xf32>
    %cst_19 = arith.constant dense<0xFF800000> : vector<4x5xf32>
    %54 = vector.multi_reduction <maximumf>, %53, %cst_19 [2] : vector<4x5x5xf32> to vector<4x5xf32>
    %55 = vector.shape_cast %54 : vector<4x5xf32> to vector<4x5x1xf32>
    %56 = vector.broadcast %55 : vector<4x5x1xf32> to vector<4x5x5xf32>
    %57 = arith.subf %53, %56 : vector<4x5x5xf32>
    %58 = math.exp %57 : vector<4x5x5xf32>
    %cst_20 = arith.constant dense<0.000000e+00> : vector<4x5xf32>
    %59 = vector.multi_reduction <add>, %58, %cst_20 [2] : vector<4x5x5xf32> to vector<4x5xf32>
    %60 = vector.shape_cast %59 : vector<4x5xf32> to vector<4x5x1xf32>
    %61 = tpu.reciprocal %60 {approx = true} : vector<4x5x1xf32> -> vector<4x5x1xf32>
    %62 = vector.broadcast %61 : vector<4x5x1xf32> to vector<4x5x5xf32>
    %63 = arith.mulf %58, %62 : vector<4x5x5xf32>
    %64 = arith.truncf %63 : vector<4x5x5xf32> to vector<4x5x5xbf16>
    %65 = arith.truncf %48 : vector<4x5x32xf32> to vector<4x5x32xbf16>
    "tpu.trace_start"() <{level = 10 : i32, message = "bqk,bkd->bqd"}> : () -> ()
    %cst_21 = arith.constant dense<0.000000e+00> : vector<4x5x32xf32>
    %66 = tpu.matmul %64, %65, %cst_21 {dimension_numbers = #tpu.dot_dimension_numbers<[2], [1], [1], [2], [0, 0, 0, 1, 1, 2], [0], [0]>} : vector<4x5x5xbf16>, vector<4x5x32xbf16>, vector<4x5x32xf32> -> vector<4x5x32xf32>
    "tpu.trace_stop"() : () -> ()
    %67 = vector.extract_strided_slice %45 {offsets = [0, 0, 32], sizes = [4, 5, 32], strides = [1, 1, 1]} : vector<4x5x384xf32> to vector<4x5x32xf32>
    %68 = vector.extract_strided_slice %45 {offsets = [0, 0, 160], sizes = [4, 5, 32], strides = [1, 1, 1]} : vector<4x5x384xf32> to vector<4x5x32xf32>
    %69 = vector.extract_strided_slice %45 {offsets = [0, 0, 288], sizes = [4, 5, 32], strides = [1, 1, 1]} : vector<4x5x384xf32> to vector<4x5x32xf32>
    %70 = arith.truncf %67 : vector<4x5x32xf32> to vector<4x5x32xbf16>
    %71 = arith.truncf %68 : vector<4x5x32xf32> to vector<4x5x32xbf16>
    "tpu.trace_start"() <{level = 10 : i32, message = "bqd,bkd->bqk"}> : () -> ()
    %cst_22 = arith.constant dense<0.000000e+00> : vector<4x5x5xf32>
    %72 = tpu.matmul %70, %71, %cst_22 {dimension_numbers = #tpu.dot_dimension_numbers<[2], [2], [1], [1], [0, 0, 0, 1, 1, 1], [0], [0]>} : vector<4x5x32xbf16>, vector<4x5x32xbf16>, vector<4x5x5xf32> -> vector<4x5x5xf32>
    "tpu.trace_stop"() : () -> ()
    %cst_23 = arith.constant 0.176776692 : f32
    %73 = vector.broadcast %cst_23 : f32 to vector<4x5x5xf32>
    %74 = arith.mulf %72, %73 : vector<4x5x5xf32>
    %cst_24 = arith.constant dense<0xFF800000> : vector<4x5xf32>
    %75 = vector.multi_reduction <maximumf>, %74, %cst_24 [2] : vector<4x5x5xf32> to vector<4x5xf32>
    %76 = vector.shape_cast %75 : vector<4x5xf32> to vector<4x5x1xf32>
    %77 = vector.broadcast %76 : vector<4x5x1xf32> to vector<4x5x5xf32>
    %78 = arith.subf %74, %77 : vector<4x5x5xf32>
    %79 = math.exp %78 : vector<4x5x5xf32>
    %cst_25 = arith.constant dense<0.000000e+00> : vector<4x5xf32>
    %80 = vector.multi_reduction <add>, %79, %cst_25 [2] : vector<4x5x5xf32> to vector<4x5xf32>
    %81 = vector.shape_cast %80 : vector<4x5xf32> to vector<4x5x1xf32>
    %82 = tpu.reciprocal %81 {approx = true} : vector<4x5x1xf32> -> vector<4x5x1xf32>
    %83 = vector.broadcast %82 : vector<4x5x1xf32> to vector<4x5x5xf32>
    %84 = arith.mulf %79, %83 : vector<4x5x5xf32>
    %85 = arith.truncf %84 : vector<4x5x5xf32> to vector<4x5x5xbf16>
    %86 = arith.truncf %69 : vector<4x5x32xf32> to vector<4x5x32xbf16>
    "tpu.trace_start"() <{level = 10 : i32, message = "bqk,bkd->bqd"}> : () -> ()
    %cst_26 = arith.constant dense<0.000000e+00> : vector<4x5x32xf32>
    %87 = tpu.matmul %85, %86, %cst_26 {dimension_numbers = #tpu.dot_dimension_numbers<[2], [1], [1], [2], [0, 0, 0, 1, 1, 2], [0], [0]>} : vector<4x5x5xbf16>, vector<4x5x32xbf16>, vector<4x5x32xf32> -> vector<4x5x32xf32>
    "tpu.trace_stop"() : () -> ()
    %88 = vector.extract_strided_slice %45 {offsets = [0, 0, 64], sizes = [4, 5, 32], strides = [1, 1, 1]} : vector<4x5x384xf32> to vector<4x5x32xf32>
    %89 = vector.extract_strided_slice %45 {offsets = [0, 0, 192], sizes = [4, 5, 32], strides = [1, 1, 1]} : vector<4x5x384xf32> to vector<4x5x32xf32>
    %90 = vector.extract_strided_slice %45 {offsets = [0, 0, 320], sizes = [4, 5, 32], strides = [1, 1, 1]} : vector<4x5x384xf32> to vector<4x5x32xf32>
    %91 = arith.truncf %88 : vector<4x5x32xf32> to vector<4x5x32xbf16>
    %92 = arith.truncf %89 : vector<4x5x32xf32> to vector<4x5x32xbf16>
    "tpu.trace_start"() <{level = 10 : i32, message = "bqd,bkd->bqk"}> : () -> ()
    %cst_27 = arith.constant dense<0.000000e+00> : vector<4x5x5xf32>
    %93 = tpu.matmul %91, %92, %cst_27 {dimension_numbers = #tpu.dot_dimension_numbers<[2], [2], [1], [1], [0, 0, 0, 1, 1, 1], [0], [0]>} : vector<4x5x32xbf16>, vector<4x5x32xbf16>, vector<4x5x5xf32> -> vector<4x5x5xf32>
    "tpu.trace_stop"() : () -> ()
    %cst_28 = arith.constant 0.176776692 : f32
    %94 = vector.broadcast %cst_28 : f32 to vector<4x5x5xf32>
    %95 = arith.mulf %93, %94 : vector<4x5x5xf32>
    %cst_29 = arith.constant dense<0xFF800000> : vector<4x5xf32>
    %96 = vector.multi_reduction <maximumf>, %95, %cst_29 [2] : vector<4x5x5xf32> to vector<4x5xf32>
    %97 = vector.shape_cast %96 : vector<4x5xf32> to vector<4x5x1xf32>
    %98 = vector.broadcast %97 : vector<4x5x1xf32> to vector<4x5x5xf32>
    %99 = arith.subf %95, %98 : vector<4x5x5xf32>
    %100 = math.exp %99 : vector<4x5x5xf32>
    %cst_30 = arith.constant dense<0.000000e+00> : vector<4x5xf32>
    %101 = vector.multi_reduction <add>, %100, %cst_30 [2] : vector<4x5x5xf32> to vector<4x5xf32>
    %102 = vector.shape_cast %101 : vector<4x5xf32> to vector<4x5x1xf32>
    %103 = tpu.reciprocal %102 {approx = true} : vector<4x5x1xf32> -> vector<4x5x1xf32>
    %104 = vector.broadcast %103 : vector<4x5x1xf32> to vector<4x5x5xf32>
    %105 = arith.mulf %100, %104 : vector<4x5x5xf32>
    %106 = arith.truncf %105 : vector<4x5x5xf32> to vector<4x5x5xbf16>
    %107 = arith.truncf %90 : vector<4x5x32xf32> to vector<4x5x32xbf16>
    "tpu.trace_start"() <{level = 10 : i32, message = "bqk,bkd->bqd"}> : () -> ()
    %cst_31 = arith.constant dense<0.000000e+00> : vector<4x5x32xf32>
    %108 = tpu.matmul %106, %107, %cst_31 {dimension_numbers = #tpu.dot_dimension_numbers<[2], [1], [1], [2], [0, 0, 0, 1, 1, 2], [0], [0]>} : vector<4x5x5xbf16>, vector<4x5x32xbf16>, vector<4x5x32xf32> -> vector<4x5x32xf32>
    "tpu.trace_stop"() : () -> ()
    %109 = vector.extract_strided_slice %45 {offsets = [0, 0, 96], sizes = [4, 5, 32], strides = [1, 1, 1]} : vector<4x5x384xf32> to vector<4x5x32xf32>
    %110 = vector.extract_strided_slice %45 {offsets = [0, 0, 224], sizes = [4, 5, 32], strides = [1, 1, 1]} : vector<4x5x384xf32> to vector<4x5x32xf32>
    %111 = vector.extract_strided_slice %45 {offsets = [0, 0, 352], sizes = [4, 5, 32], strides = [1, 1, 1]} : vector<4x5x384xf32> to vector<4x5x32xf32>
    %112 = arith.truncf %109 : vector<4x5x32xf32> to vector<4x5x32xbf16>
    %113 = arith.truncf %110 : vector<4x5x32xf32> to vector<4x5x32xbf16>
    "tpu.trace_start"() <{level = 10 : i32, message = "bqd,bkd->bqk"}> : () -> ()
    %cst_32 = arith.constant dense<0.000000e+00> : vector<4x5x5xf32>
    %114 = tpu.matmul %112, %113, %cst_32 {dimension_numbers = #tpu.dot_dimension_numbers<[2], [2], [1], [1], [0, 0, 0, 1, 1, 1], [0], [0]>} : vector<4x5x32xbf16>, vector<4x5x32xbf16>, vector<4x5x5xf32> -> vector<4x5x5xf32>
    "tpu.trace_stop"() : () -> ()
    %cst_33 = arith.constant 0.176776692 : f32
    %115 = vector.broadcast %cst_33 : f32 to vector<4x5x5xf32>
    %116 = arith.mulf %114, %115 : vector<4x5x5xf32>
    %cst_34 = arith.constant dense<0xFF800000> : vector<4x5xf32>
    %117 = vector.multi_reduction <maximumf>, %116, %cst_34 [2] : vector<4x5x5xf32> to vector<4x5xf32>
    %118 = vector.shape_cast %117 : vector<4x5xf32> to vector<4x5x1xf32>
    %119 = vector.broadcast %118 : vector<4x5x1xf32> to vector<4x5x5xf32>
    %120 = arith.subf %116, %119 : vector<4x5x5xf32>
    %121 = math.exp %120 : vector<4x5x5xf32>
    %cst_35 = arith.constant dense<0.000000e+00> : vector<4x5xf32>
    %122 = vector.multi_reduction <add>, %121, %cst_35 [2] : vector<4x5x5xf32> to vector<4x5xf32>
    %123 = vector.shape_cast %122 : vector<4x5xf32> to vector<4x5x1xf32>
    %124 = tpu.reciprocal %123 {approx = true} : vector<4x5x1xf32> -> vector<4x5x1xf32>
    %125 = vector.broadcast %124 : vector<4x5x1xf32> to vector<4x5x5xf32>
    %126 = arith.mulf %121, %125 : vector<4x5x5xf32>
    %127 = arith.truncf %126 : vector<4x5x5xf32> to vector<4x5x5xbf16>
    %128 = arith.truncf %111 : vector<4x5x32xf32> to vector<4x5x32xbf16>
    "tpu.trace_start"() <{level = 10 : i32, message = "bqk,bkd->bqd"}> : () -> ()
    %cst_36 = arith.constant dense<0.000000e+00> : vector<4x5x32xf32>
    %129 = tpu.matmul %127, %128, %cst_36 {dimension_numbers = #tpu.dot_dimension_numbers<[2], [1], [1], [2], [0, 0, 0, 1, 1, 2], [0], [0]>} : vector<4x5x5xbf16>, vector<4x5x32xbf16>, vector<4x5x32xf32> -> vector<4x5x32xf32>
    "tpu.trace_stop"() : () -> ()
    %130 = tpu.concatenate %66, %87, %108, %129 in 2 : vector<4x5x32xf32>, vector<4x5x32xf32>, vector<4x5x32xf32>, vector<4x5x32xf32> -> vector<4x5x128xf32>
    %131 = vector.shape_cast %130 : vector<4x5x128xf32> to vector<20x128xf32>
    %132 = arith.truncf %131 : vector<20x128xf32> to vector<20x128xbf16>
    %c0_37 = arith.constant 0 : index
    %c0_38 = arith.constant 0 : index
    %c384 = arith.constant 384 : index
    %133 = vector.load %arg3[%c0_37, %c0_38, %c384] : memref<1x128x1024xbf16, #tpu.memory_space<vmem>>, vector<1x128x128xbf16>
    %134 = vector.shape_cast %133 : vector<1x128x128xbf16> to vector<128x128xbf16>
    %cst_39 = arith.constant dense<0.000000e+00> : vector<20x128xf32>
    %135 = tpu.matmul %132, %134, %cst_39 {dimension_numbers = #tpu.dot_dimension_numbers<[1], [0], [0], [1], [0, 0, 1, 1], [], []>} : vector<20x128xbf16>, vector<128x128xbf16>, vector<20x128xf32> -> vector<20x128xf32>
    %136 = vector.broadcast %13 : vector<1x128xf32> to vector<20x128xf32>
    %137 = arith.addf %135, %136 : vector<20x128xf32>
    %138 = arith.addf %4, %137 : vector<20x128xf32>
    %cst_40 = arith.constant dense<0.000000e+00> : vector<20xf32>
    %139 = vector.multi_reduction <add>, %138, %cst_40 [1] : vector<20x128xf32> to vector<20xf32>
    %140 = vector.shape_cast %139 : vector<20xf32> to vector<20x1xf32>
    %cst_41 = arith.constant 1.280000e+02 : f32
    %141 = vector.broadcast %cst_41 : f32 to vector<20x1xf32>
    %142 = arith.divf %140, %141 : vector<20x1xf32>
    %143 = vector.broadcast %142 : vector<20x1xf32> to vector<20x128xf32>
    %144 = arith.subf %138, %143 : vector<20x128xf32>
    %145 = arith.mulf %144, %144 : vector<20x128xf32>
    %cst_42 = arith.constant dense<0.000000e+00> : vector<20xf32>
    %146 = vector.multi_reduction <add>, %145, %cst_42 [1] : vector<20x128xf32> to vector<20xf32>
    %147 = vector.shape_cast %146 : vector<20xf32> to vector<20x1xf32>
    %cst_43 = arith.constant 1.280000e+02 : f32
    %148 = vector.broadcast %cst_43 : f32 to vector<20x1xf32>
    %149 = arith.divf %147, %148 : vector<20x1xf32>
    %150 = vector.broadcast %142 : vector<20x1xf32> to vector<20x128xf32>
    %151 = arith.subf %138, %150 : vector<20x128xf32>
    %cst_44 = arith.constant 9.99999974E-6 : f32
    %152 = vector.broadcast %cst_44 : f32 to vector<20x1xf32>
    %153 = arith.addf %149, %152 : vector<20x1xf32>
    %154 = math.rsqrt %153 : vector<20x1xf32>
    %155 = vector.broadcast %154 : vector<20x1xf32> to vector<20x128xf32>
    %156 = arith.mulf %151, %155 : vector<20x128xf32>
    %157 = vector.broadcast %11 : vector<1x128xf32> to vector<20x128xf32>
    %158 = arith.mulf %156, %157 : vector<20x128xf32>
    %159 = vector.broadcast %12 : vector<1x128xf32> to vector<20x128xf32>
    %160 = arith.addf %158, %159 : vector<20x128xf32>
    %161 = arith.truncf %160 : vector<20x128xf32> to vector<20x128xbf16>
    %c0_45 = arith.constant 0 : index
    %c0_46 = arith.constant 0 : index
    %c512 = arith.constant 512 : index
    %162 = vector.load %arg3[%c0_45, %c0_46, %c512] : memref<1x128x1024xbf16, #tpu.memory_space<vmem>>, vector<1x128x512xbf16>
    %163 = vector.shape_cast %162 : vector<1x128x512xbf16> to vector<128x512xbf16>
    %cst_47 = arith.constant dense<0.000000e+00> : vector<20x512xf32>
    %164 = tpu.matmul %161, %163, %cst_47 {dimension_numbers = #tpu.dot_dimension_numbers<[1], [0], [0], [1], [0, 0, 1, 1], [], []>} : vector<20x128xbf16>, vector<128x512xbf16>, vector<20x512xf32> -> vector<20x512xf32>
    %165 = vector.broadcast %16 : vector<1x512xf32> to vector<20x512xf32>
    %166 = arith.addf %164, %165 : vector<20x512xf32>
    %cst_48 = arith.constant 1.702000e+00 : f32
    %167 = vector.broadcast %cst_48 : f32 to vector<20x512xf32>
    %168 = arith.mulf %167, %166 : vector<20x512xf32>
    %169 = arith.negf %168 : vector<20x512xf32>
    %170 = math.exp %169 : vector<20x512xf32>
    %cst_49 = arith.constant 1.000000e+00 : f32
    %171 = vector.broadcast %cst_49 : f32 to vector<20x512xf32>
    %172 = arith.addf %171, %170 : vector<20x512xf32>
    %173 = arith.divf %171, %172 : vector<20x512xf32>
    %174 = arith.mulf %166, %173 : vector<20x512xf32>
    %175 = arith.truncf %174 : vector<20x512xf32> to vector<20x512xbf16>
    %c0_50 = arith.constant 0 : index
    %c0_51 = arith.constant 0 : index
    %c0_52 = arith.constant 0 : index
    %176 = vector.load %arg4[%c0_50, %c0_51, %c0_52] : memref<1x512x128xbf16, #tpu.memory_space<vmem>>, vector<1x512x128xbf16>
    %177 = vector.shape_cast %176 : vector<1x512x128xbf16> to vector<512x128xbf16>
    %cst_53 = arith.constant dense<0.000000e+00> : vector<20x128xf32>
    %178 = tpu.matmul %175, %177, %cst_53 {dimension_numbers = #tpu.dot_dimension_numbers<[1], [0], [0], [1], [0, 0, 1, 1], [], []>} : vector<20x512xbf16>, vector<512x128xbf16>, vector<20x128xf32> -> vector<20x128xf32>
    %179 = vector.broadcast %14 : vector<1x128xf32> to vector<20x128xf32>
    %180 = arith.addf %178, %179 : vector<20x128xf32>
    %181 = arith.addf %138, %180 : vector<20x128xf32>
    %182 = vector.shape_cast %181 : vector<20x128xf32> to vector<4x5x128xf32>
    %c0_54 = arith.constant 0 : index
    %c0_55 = arith.constant 0 : index
    %c0_56 = arith.constant 0 : index
    %183 = vector.load %arg7[%c0_54, %c0_55, %c0_56] : memref<4x5x128xf32, #tpu.memory_space<vmem>>, vector<4x5x128xf32>
    tpu.vector_store %arg7[%c0_54, %c0_55, %c0_56], %182 {strides = array<i32>} : memref<4x5x128xf32, #tpu.memory_space<vmem>>, vector<4x5x128xf32>,
    return
  }
  func.func @transform_0(%arg0: i32, %arg1: i32) -> (i32, i32, i32) {
    %c0_i32 = arith.constant 0 : i32
    %c0_i32_0 = arith.constant 0 : i32
    %c0_i32_1 = arith.constant 0 : i32
    return %arg0, %c0_i32, %c0_i32_0 : i32, i32, i32
  }
  func.func @transform_1(%arg0: i32, %arg1: i32) -> (i32, i32, i32) {
    %c0_i32 = arith.constant 0 : i32
    %c0_i32_0 = arith.constant 0 : i32
    %c0_i32_1 = arith.constant 0 : i32
    return %arg1, %c0_i32, %c0_i32_0 : i32, i32, i32
  }
  func.func @transform_2(%arg0: i32, %arg1: i32) -> (i32, i32, i32) {
    %c0_i32 = arith.constant 0 : i32
    %c0_i32_0 = arith.constant 0 : i32
    %c0_i32_1 = arith.constant 0 : i32
    return %arg1, %c0_i32, %c0_i32_0 : i32, i32, i32
  }
  func.func @transform_3(%arg0: i32, %arg1: i32) -> (i32, i32, i32) {
    %c0_i32 = arith.constant 0 : i32
    %c0_i32_0 = arith.constant 0 : i32
    %c0_i32_1 = arith.constant 0 : i32
    return %arg1, %c0_i32, %c0_i32_0 : i32, i32, i32
  }
  func.func @transform_4(%arg0: i32, %arg1: i32) -> (i32, i32, i32) {
    %c0_i32 = arith.constant 0 : i32
    %c0_i32_0 = arith.constant 0 : i32
    %c0_i32_1 = arith.constant 0 : i32
    return %arg1, %c0_i32, %c0_i32_0 : i32, i32, i32
  }
  func.func @transform_5(%arg0: i32, %arg1: i32) -> (i32, i32, i32) {
    %c0_i32 = arith.constant 0 : i32
    %c0_i32_0 = arith.constant 0 : i32
    %c0_i32_1 = arith.constant 0 : i32
    return %arg0, %c0_i32, %c0_i32_0 : i32, i32, i32
  }
}

module attributes {stable_mosaic.version = 11 : i64} {
  func.func @_ln_proj_kernel(%arg0: memref<8x128xf32, #tpu.memory_space<vmem>>, %arg1: memref<1x128xf32, #tpu.memory_space<vmem>>, %arg2: memref<1x128xf32, #tpu.memory_space<vmem>>, %arg3: memref<128x128xbf16, #tpu.memory_space<vmem>>, %arg4: memref<8x128xf32, #tpu.memory_space<vmem>>) attributes {dimension_semantics = [], scalar_prefetch = 0 : i64, scratch_operands = 0 : i64, tpu.core_type = #tpu.core_type<tc>} {
    %c0 = arith.constant 0 : index
    %c0_0 = arith.constant 0 : index
    %0 = vector.load %arg0[%c0, %c0_0] : memref<8x128xf32, #tpu.memory_space<vmem>>, vector<8x128xf32>
    %c0_1 = arith.constant 0 : index
    %c0_2 = arith.constant 0 : index
    %1 = vector.load %arg1[%c0_1, %c0_2] : memref<1x128xf32, #tpu.memory_space<vmem>>, vector<1x128xf32>
    %c0_3 = arith.constant 0 : index
    %c0_4 = arith.constant 0 : index
    %2 = vector.load %arg2[%c0_3, %c0_4] : memref<1x128xf32, #tpu.memory_space<vmem>>, vector<1x128xf32>
    %cst = arith.constant dense<0.000000e+00> : vector<8xf32>
    %3 = vector.multi_reduction <add>, %0, %cst [1] : vector<8x128xf32> to vector<8xf32>
    %4 = vector.shape_cast %3 : vector<8xf32> to vector<8x1xf32>
    %cst_5 = arith.constant 1.280000e+02 : f32
    %5 = vector.broadcast %cst_5 : f32 to vector<8x1xf32>
    %6 = arith.divf %4, %5 : vector<8x1xf32>
    %7 = vector.broadcast %6 : vector<8x1xf32> to vector<8x128xf32>
    %8 = arith.subf %0, %7 : vector<8x128xf32>
    %9 = arith.mulf %8, %8 : vector<8x128xf32>
    %cst_6 = arith.constant dense<0.000000e+00> : vector<8xf32>
    %10 = vector.multi_reduction <add>, %9, %cst_6 [1] : vector<8x128xf32> to vector<8xf32>
    %11 = vector.shape_cast %10 : vector<8xf32> to vector<8x1xf32>
    %cst_7 = arith.constant 1.280000e+02 : f32
    %12 = vector.broadcast %cst_7 : f32 to vector<8x1xf32>
    %13 = arith.divf %11, %12 : vector<8x1xf32>
    %14 = vector.broadcast %6 : vector<8x1xf32> to vector<8x128xf32>
    %15 = arith.subf %0, %14 : vector<8x128xf32>
    %cst_8 = arith.constant 9.99999974E-6 : f32
    %16 = vector.broadcast %cst_8 : f32 to vector<8x1xf32>
    %17 = arith.addf %13, %16 : vector<8x1xf32>
    %18 = math.rsqrt %17 : vector<8x1xf32>
    %19 = vector.broadcast %18 : vector<8x1xf32> to vector<8x128xf32>
    %20 = arith.mulf %15, %19 : vector<8x128xf32>
    %21 = vector.broadcast %1 : vector<1x128xf32> to vector<8x128xf32>
    %22 = arith.mulf %20, %21 : vector<8x128xf32>
    %23 = vector.broadcast %2 : vector<1x128xf32> to vector<8x128xf32>
    %24 = arith.addf %22, %23 : vector<8x128xf32>
    %25 = arith.truncf %24 : vector<8x128xf32> to vector<8x128xbf16>
    %c0_9 = arith.constant 0 : index
    %c0_10 = arith.constant 0 : index
    %26 = vector.load %arg3[%c0_9, %c0_10] : memref<128x128xbf16, #tpu.memory_space<vmem>>, vector<128x128xbf16>
    %cst_11 = arith.constant dense<0.000000e+00> : vector<8x128xf32>
    %27 = tpu.matmul %25, %26, %cst_11 {dimension_numbers = #tpu.dot_dimension_numbers<[1], [0], [0], [1], [0, 0, 1, 1], [], []>} : vector<8x128xbf16>, vector<128x128xbf16>, vector<8x128xf32> -> vector<8x128xf32>
    %c0_12 = arith.constant 0 : index
    %c0_13 = arith.constant 0 : index
    %28 = vector.load %arg4[%c0_12, %c0_13] : memref<8x128xf32, #tpu.memory_space<vmem>>, vector<8x128xf32>
    tpu.vector_store %arg4[%c0_12, %c0_13], %27 {strides = array<i32>} : memref<8x128xf32, #tpu.memory_space<vmem>>, vector<8x128xf32>,
    return
  }
}

module attributes {stable_mosaic.version = 11 : i64} {
  func.func @_pool_kernel(%arg0: i32, %arg1: memref<2x128xf32, #tpu.memory_space<vmem>>, %arg2: memref<1x4x128xf32, #tpu.memory_space<vmem>>, %arg3: memref<128x640xbf16, #tpu.memory_space<vmem>>, %arg4: memref<8x128xf32, #tpu.memory_space<vmem>>, %arg5: memref<2x256xf32, #tpu.memory_space<vmem>>, %arg6: memref<1x2x128xf32, #tpu.memory_space<vmem>>) attributes {dimension_semantics = [#tpu.dimension_semantics<parallel>], iteration_bounds = array<i64: 2>, scalar_prefetch = 0 : i64, scratch_operands = 0 : i64, tpu.core_type = #tpu.core_type<tc>, window_params = [{pipeline_mode = #tpu.pipeline_mode<synchronous>, transform_indices = @transform_0, window_bounds = array<i64: 2, 128>}, {transform_indices = @transform_1, window_bounds = array<i64: 1, 4, 128>}, {pipeline_mode = #tpu.pipeline_mode<synchronous>, transform_indices = @transform_2, window_bounds = array<i64: 128, 640>}, {pipeline_mode = #tpu.pipeline_mode<synchronous>, transform_indices = @transform_3, window_bounds = array<i64: 8, 128>}, {pipeline_mode = #tpu.pipeline_mode<synchronous>, transform_indices = @transform_4, window_bounds = array<i64: 2, 256>}, {transform_indices = @transform_5, window_bounds = array<i64: 1, 2, 128>}]} {
    %c0 = arith.constant 0 : index
    %c0_0 = arith.constant 0 : index
    %0 = vector.load %arg4[%c0, %c0_0] : memref<8x128xf32, #tpu.memory_space<vmem>>, vector<8x128xf32>
    %1 = vector.extract_strided_slice %0 {offsets = [0, 0], sizes = [1, 128], strides = [1, 1]} : vector<8x128xf32> to vector<1x128xf32>
    %2 = vector.extract_strided_slice %0 {offsets = [1, 0], sizes = [1, 128], strides = [1, 1]} : vector<8x128xf32> to vector<1x128xf32>
    %3 = vector.extract_strided_slice %0 {offsets = [2, 0], sizes = [1, 128], strides = [1, 1]} : vector<8x128xf32> to vector<1x128xf32>
    %4 = vector.extract_strided_slice %0 {offsets = [3, 0], sizes = [1, 128], strides = [1, 1]} : vector<8x128xf32> to vector<1x128xf32>
    %5 = vector.extract_strided_slice %0 {offsets = [4, 0], sizes = [1, 128], strides = [1, 1]} : vector<8x128xf32> to vector<1x128xf32>
    %6 = vector.extract_strided_slice %0 {offsets = [5, 0], sizes = [1, 128], strides = [1, 1]} : vector<8x128xf32> to vector<1x128xf32>
    %7 = vector.extract_strided_slice %0 {offsets = [6, 0], sizes = [1, 128], strides = [1, 1]} : vector<8x128xf32> to vector<1x128xf32>
    %8 = vector.extract_strided_slice %0 {offsets = [7, 0], sizes = [1, 128], strides = [1, 1]} : vector<8x128xf32> to vector<1x128xf32>
    %c0_1 = arith.constant 0 : index
    %c0_2 = arith.constant 0 : index
    %9 = vector.load %arg5[%c0_1, %c0_2] : memref<2x256xf32, #tpu.memory_space<vmem>>, vector<2x256xf32>
    %10 = vector.extract_strided_slice %9 {offsets = [0, 0], sizes = [1, 128], strides = [1, 1]} : vector<2x256xf32> to vector<1x128xf32>
    %11 = vector.extract_strided_slice %9 {offsets = [1, 0], sizes = [1, 256], strides = [1, 1]} : vector<2x256xf32> to vector<1x256xf32>
    %c0_3 = arith.constant 0 : index
    %c0_4 = arith.constant 0 : index
    %12 = vector.load %arg1[%c0_3, %c0_4] : memref<2x128xf32, #tpu.memory_space<vmem>>, vector<2x128xf32>
    %cst = arith.constant dense<0.000000e+00> : vector<2xf32>
    %13 = vector.multi_reduction <add>, %12, %cst [1] : vector<2x128xf32> to vector<2xf32>
    %14 = vector.shape_cast %13 : vector<2xf32> to vector<2x1xf32>
    %cst_5 = arith.constant 1.280000e+02 : f32
    %15 = vector.broadcast %cst_5 : f32 to vector<2x1xf32>
    %16 = arith.divf %14, %15 : vector<2x1xf32>
    %17 = vector.broadcast %16 : vector<2x1xf32> to vector<2x128xf32>
    %18 = arith.subf %12, %17 : vector<2x128xf32>
    %19 = arith.mulf %18, %18 : vector<2x128xf32>
    %cst_6 = arith.constant dense<0.000000e+00> : vector<2xf32>
    %20 = vector.multi_reduction <add>, %19, %cst_6 [1] : vector<2x128xf32> to vector<2xf32>
    %21 = vector.shape_cast %20 : vector<2xf32> to vector<2x1xf32>
    %cst_7 = arith.constant 1.280000e+02 : f32
    %22 = vector.broadcast %cst_7 : f32 to vector<2x1xf32>
    %23 = arith.divf %21, %22 : vector<2x1xf32>
    %24 = vector.broadcast %16 : vector<2x1xf32> to vector<2x128xf32>
    %25 = arith.subf %12, %24 : vector<2x128xf32>
    %cst_8 = arith.constant 9.99999974E-6 : f32
    %26 = vector.broadcast %cst_8 : f32 to vector<2x1xf32>
    %27 = arith.addf %23, %26 : vector<2x1xf32>
    %28 = math.rsqrt %27 : vector<2x1xf32>
    %29 = vector.broadcast %28 : vector<2x1xf32> to vector<2x128xf32>
    %30 = arith.mulf %25, %29 : vector<2x128xf32>
    %31 = vector.broadcast %1 : vector<1x128xf32> to vector<2x128xf32>
    %32 = arith.mulf %30, %31 : vector<2x128xf32>
    %33 = vector.broadcast %2 : vector<1x128xf32> to vector<2x128xf32>
    %34 = arith.addf %32, %33 : vector<2x128xf32>
    %c0_9 = arith.constant 0 : index
    %c0_10 = arith.constant 0 : index
    %c0_11 = arith.constant 0 : index
    %35 = vector.load %arg2[%c0_9, %c0_10, %c0_11] : memref<1x4x128xf32, #tpu.memory_space<vmem>>, vector<1x4x128xf32>
    %36 = vector.shape_cast %35 : vector<1x4x128xf32> to vector<4x128xf32>
    %cst_12 = arith.constant dense<0.000000e+00> : vector<4xf32>
    %37 = vector.multi_reduction <add>, %36, %cst_12 [1] : vector<4x128xf32> to vector<4xf32>
    %38 = vector.shape_cast %37 : vector<4xf32> to vector<4x1xf32>
    %cst_13 = arith.constant 1.280000e+02 : f32
    %39 = vector.broadcast %cst_13 : f32 to vector<4x1xf32>
    %40 = arith.divf %38, %39 : vector<4x1xf32>
    %41 = vector.broadcast %40 : vector<4x1xf32> to vector<4x128xf32>
    %42 = arith.subf %36, %41 : vector<4x128xf32>
    %43 = arith.mulf %42, %42 : vector<4x128xf32>
    %cst_14 = arith.constant dense<0.000000e+00> : vector<4xf32>
    %44 = vector.multi_reduction <add>, %43, %cst_14 [1] : vector<4x128xf32> to vector<4xf32>
    %45 = vector.shape_cast %44 : vector<4xf32> to vector<4x1xf32>
    %cst_15 = arith.constant 1.280000e+02 : f32
    %46 = vector.broadcast %cst_15 : f32 to vector<4x1xf32>
    %47 = arith.divf %45, %46 : vector<4x1xf32>
    %48 = vector.broadcast %40 : vector<4x1xf32> to vector<4x128xf32>
    %49 = arith.subf %36, %48 : vector<4x128xf32>
    %cst_16 = arith.constant 9.99999974E-6 : f32
    %50 = vector.broadcast %cst_16 : f32 to vector<4x1xf32>
    %51 = arith.addf %47, %50 : vector<4x1xf32>
    %52 = math.rsqrt %51 : vector<4x1xf32>
    %53 = vector.broadcast %52 : vector<4x1xf32> to vector<4x128xf32>
    %54 = arith.mulf %49, %53 : vector<4x128xf32>
    %55 = vector.broadcast %1 : vector<1x128xf32> to vector<4x128xf32>
    %56 = arith.mulf %54, %55 : vector<4x128xf32>
    %57 = vector.broadcast %2 : vector<1x128xf32> to vector<4x128xf32>
    %58 = arith.addf %56, %57 : vector<4x128xf32>
    %59 = arith.truncf %34 : vector<2x128xf32> to vector<2x128xbf16>
    %c0_17 = arith.constant 0 : index
    %c0_18 = arith.constant 0 : index
    %60 = vector.load %arg3[%c0_17, %c0_18] : memref<128x640xbf16, #tpu.memory_space<vmem>>, vector<128x128xbf16>
    %cst_19 = arith.constant dense<0.000000e+00> : vector<2x128xf32>
    %61 = tpu.matmul %59, %60, %cst_19 {dimension_numbers = #tpu.dot_dimension_numbers<[1], [0], [0], [1], [0, 0, 1, 1], [], []>} : vector<2x128xbf16>, vector<128x128xbf16>, vector<2x128xf32> -> vector<2x128xf32>
    %62 = vector.broadcast %10 : vector<1x128xf32> to vector<2x128xf32>
    %63 = arith.addf %61, %62 : vector<2x128xf32>
    %64 = arith.truncf %58 : vector<4x128xf32> to vector<4x128xbf16>
    %c0_20 = arith.constant 0 : index
    %c128 = arith.constant 128 : index
    %65 = vector.load %arg3[%c0_20, %c128] : memref<128x640xbf16, #tpu.memory_space<vmem>>, vector<128x256xbf16>
    %cst_21 = arith.constant dense<0.000000e+00> : vector<4x256xf32>
    %66 = tpu.matmul %64, %65, %cst_21 {dimension_numbers = #tpu.dot_dimension_numbers<[1], [0], [0], [1], [0, 0, 1, 1], [], []>} : vector<4x128xbf16>, vector<128x256xbf16>, vector<4x256xf32> -> vector<4x256xf32>
    %67 = vector.broadcast %11 : vector<1x256xf32> to vector<4x256xf32>
    %68 = arith.addf %66, %67 : vector<4x256xf32>
    %69 = vector.extract_strided_slice %63 {offsets = [0, 0], sizes = [2, 32], strides = [1, 1]} : vector<2x128xf32> to vector<2x32xf32>
    %70 = vector.extract_strided_slice %68 {offsets = [0, 0], sizes = [4, 32], strides = [1, 1]} : vector<4x256xf32> to vector<4x32xf32>
    %71 = vector.extract_strided_slice %68 {offsets = [0, 128], sizes = [4, 32], strides = [1, 1]} : vector<4x256xf32> to vector<4x32xf32>
    %72 = arith.truncf %69 : vector<2x32xf32> to vector<2x32xbf16>
    %73 = arith.truncf %70 : vector<4x32xf32> to vector<4x32xbf16>
    %cst_22 = arith.constant dense<0.000000e+00> : vector<2x4xf32>
    %74 = tpu.matmul %72, %73, %cst_22 {dimension_numbers = #tpu.dot_dimension_numbers<[1], [1], [0], [0], [0, 0, 1, 0], [], []>} : vector<2x32xbf16>, vector<4x32xbf16>, vector<2x4xf32> -> vector<2x4xf32>
    %cst_23 = arith.constant 0.176776692 : f32
    %75 = vector.broadcast %cst_23 : f32 to vector<2x4xf32>
    %76 = arith.mulf %74, %75 : vector<2x4xf32>
    %cst_24 = arith.constant dense<0xFF800000> : vector<2xf32>
    %77 = vector.multi_reduction <maximumf>, %76, %cst_24 [1] : vector<2x4xf32> to vector<2xf32>
    %78 = vector.shape_cast %77 : vector<2xf32> to vector<2x1xf32>
    %79 = vector.broadcast %78 : vector<2x1xf32> to vector<2x4xf32>
    %80 = arith.subf %76, %79 : vector<2x4xf32>
    %81 = math.exp %80 : vector<2x4xf32>
    %cst_25 = arith.constant dense<0.000000e+00> : vector<2xf32>
    %82 = vector.multi_reduction <add>, %81, %cst_25 [1] : vector<2x4xf32> to vector<2xf32>
    %83 = vector.shape_cast %82 : vector<2xf32> to vector<2x1xf32>
    %84 = tpu.reciprocal %83 {approx = true} : vector<2x1xf32> -> vector<2x1xf32>
    %85 = vector.broadcast %84 : vector<2x1xf32> to vector<2x4xf32>
    %86 = arith.mulf %81, %85 : vector<2x4xf32>
    %87 = arith.truncf %86 : vector<2x4xf32> to vector<2x4xbf16>
    %88 = arith.truncf %71 : vector<4x32xf32> to vector<4x32xbf16>
    %cst_26 = arith.constant dense<0.000000e+00> : vector<2x32xf32>
    %89 = tpu.matmul %87, %88, %cst_26 {dimension_numbers = #tpu.dot_dimension_numbers<[1], [0], [0], [1], [0, 0, 1, 1], [], []>} : vector<2x4xbf16>, vector<4x32xbf16>, vector<2x32xf32> -> vector<2x32xf32>
    %90 = vector.extract_strided_slice %63 {offsets = [0, 32], sizes = [2, 32], strides = [1, 1]} : vector<2x128xf32> to vector<2x32xf32>
    %91 = vector.extract_strided_slice %68 {offsets = [0, 32], sizes = [4, 32], strides = [1, 1]} : vector<4x256xf32> to vector<4x32xf32>
    %92 = vector.extract_strided_slice %68 {offsets = [0, 160], sizes = [4, 32], strides = [1, 1]} : vector<4x256xf32> to vector<4x32xf32>
    %93 = arith.truncf %90 : vector<2x32xf32> to vector<2x32xbf16>
    %94 = arith.truncf %91 : vector<4x32xf32> to vector<4x32xbf16>
    %cst_27 = arith.constant dense<0.000000e+00> : vector<2x4xf32>
    %95 = tpu.matmul %93, %94, %cst_27 {dimension_numbers = #tpu.dot_dimension_numbers<[1], [1], [0], [0], [0, 0, 1, 0], [], []>} : vector<2x32xbf16>, vector<4x32xbf16>, vector<2x4xf32> -> vector<2x4xf32>
    %cst_28 = arith.constant 0.176776692 : f32
    %96 = vector.broadcast %cst_28 : f32 to vector<2x4xf32>
    %97 = arith.mulf %95, %96 : vector<2x4xf32>
    %cst_29 = arith.constant dense<0xFF800000> : vector<2xf32>
    %98 = vector.multi_reduction <maximumf>, %97, %cst_29 [1] : vector<2x4xf32> to vector<2xf32>
    %99 = vector.shape_cast %98 : vector<2xf32> to vector<2x1xf32>
    %100 = vector.broadcast %99 : vector<2x1xf32> to vector<2x4xf32>
    %101 = arith.subf %97, %100 : vector<2x4xf32>
    %102 = math.exp %101 : vector<2x4xf32>
    %cst_30 = arith.constant dense<0.000000e+00> : vector<2xf32>
    %103 = vector.multi_reduction <add>, %102, %cst_30 [1] : vector<2x4xf32> to vector<2xf32>
    %104 = vector.shape_cast %103 : vector<2xf32> to vector<2x1xf32>
    %105 = tpu.reciprocal %104 {approx = true} : vector<2x1xf32> -> vector<2x1xf32>
    %106 = vector.broadcast %105 : vector<2x1xf32> to vector<2x4xf32>
    %107 = arith.mulf %102, %106 : vector<2x4xf32>
    %108 = arith.truncf %107 : vector<2x4xf32> to vector<2x4xbf16>
    %109 = arith.truncf %92 : vector<4x32xf32> to vector<4x32xbf16>
    %cst_31 = arith.constant dense<0.000000e+00> : vector<2x32xf32>
    %110 = tpu.matmul %108, %109, %cst_31 {dimension_numbers = #tpu.dot_dimension_numbers<[1], [0], [0], [1], [0, 0, 1, 1], [], []>} : vector<2x4xbf16>, vector<4x32xbf16>, vector<2x32xf32> -> vector<2x32xf32>
    %111 = vector.extract_strided_slice %63 {offsets = [0, 64], sizes = [2, 32], strides = [1, 1]} : vector<2x128xf32> to vector<2x32xf32>
    %112 = vector.extract_strided_slice %68 {offsets = [0, 64], sizes = [4, 32], strides = [1, 1]} : vector<4x256xf32> to vector<4x32xf32>
    %113 = vector.extract_strided_slice %68 {offsets = [0, 192], sizes = [4, 32], strides = [1, 1]} : vector<4x256xf32> to vector<4x32xf32>
    %114 = arith.truncf %111 : vector<2x32xf32> to vector<2x32xbf16>
    %115 = arith.truncf %112 : vector<4x32xf32> to vector<4x32xbf16>
    %cst_32 = arith.constant dense<0.000000e+00> : vector<2x4xf32>
    %116 = tpu.matmul %114, %115, %cst_32 {dimension_numbers = #tpu.dot_dimension_numbers<[1], [1], [0], [0], [0, 0, 1, 0], [], []>} : vector<2x32xbf16>, vector<4x32xbf16>, vector<2x4xf32> -> vector<2x4xf32>
    %cst_33 = arith.constant 0.176776692 : f32
    %117 = vector.broadcast %cst_33 : f32 to vector<2x4xf32>
    %118 = arith.mulf %116, %117 : vector<2x4xf32>
    %cst_34 = arith.constant dense<0xFF800000> : vector<2xf32>
    %119 = vector.multi_reduction <maximumf>, %118, %cst_34 [1] : vector<2x4xf32> to vector<2xf32>
    %120 = vector.shape_cast %119 : vector<2xf32> to vector<2x1xf32>
    %121 = vector.broadcast %120 : vector<2x1xf32> to vector<2x4xf32>
    %122 = arith.subf %118, %121 : vector<2x4xf32>
    %123 = math.exp %122 : vector<2x4xf32>
    %cst_35 = arith.constant dense<0.000000e+00> : vector<2xf32>
    %124 = vector.multi_reduction <add>, %123, %cst_35 [1] : vector<2x4xf32> to vector<2xf32>
    %125 = vector.shape_cast %124 : vector<2xf32> to vector<2x1xf32>
    %126 = tpu.reciprocal %125 {approx = true} : vector<2x1xf32> -> vector<2x1xf32>
    %127 = vector.broadcast %126 : vector<2x1xf32> to vector<2x4xf32>
    %128 = arith.mulf %123, %127 : vector<2x4xf32>
    %129 = arith.truncf %128 : vector<2x4xf32> to vector<2x4xbf16>
    %130 = arith.truncf %113 : vector<4x32xf32> to vector<4x32xbf16>
    %cst_36 = arith.constant dense<0.000000e+00> : vector<2x32xf32>
    %131 = tpu.matmul %129, %130, %cst_36 {dimension_numbers = #tpu.dot_dimension_numbers<[1], [0], [0], [1], [0, 0, 1, 1], [], []>} : vector<2x4xbf16>, vector<4x32xbf16>, vector<2x32xf32> -> vector<2x32xf32>
    %132 = vector.extract_strided_slice %63 {offsets = [0, 96], sizes = [2, 32], strides = [1, 1]} : vector<2x128xf32> to vector<2x32xf32>
    %133 = vector.extract_strided_slice %68 {offsets = [0, 96], sizes = [4, 32], strides = [1, 1]} : vector<4x256xf32> to vector<4x32xf32>
    %134 = vector.extract_strided_slice %68 {offsets = [0, 224], sizes = [4, 32], strides = [1, 1]} : vector<4x256xf32> to vector<4x32xf32>
    %135 = arith.truncf %132 : vector<2x32xf32> to vector<2x32xbf16>
    %136 = arith.truncf %133 : vector<4x32xf32> to vector<4x32xbf16>
    %cst_37 = arith.constant dense<0.000000e+00> : vector<2x4xf32>
    %137 = tpu.matmul %135, %136, %cst_37 {dimension_numbers = #tpu.dot_dimension_numbers<[1], [1], [0], [0], [0, 0, 1, 0], [], []>} : vector<2x32xbf16>, vector<4x32xbf16>, vector<2x4xf32> -> vector<2x4xf32>
    %cst_38 = arith.constant 0.176776692 : f32
    %138 = vector.broadcast %cst_38 : f32 to vector<2x4xf32>
    %139 = arith.mulf %137, %138 : vector<2x4xf32>
    %cst_39 = arith.constant dense<0xFF800000> : vector<2xf32>
    %140 = vector.multi_reduction <maximumf>, %139, %cst_39 [1] : vector<2x4xf32> to vector<2xf32>
    %141 = vector.shape_cast %140 : vector<2xf32> to vector<2x1xf32>
    %142 = vector.broadcast %141 : vector<2x1xf32> to vector<2x4xf32>
    %143 = arith.subf %139, %142 : vector<2x4xf32>
    %144 = math.exp %143 : vector<2x4xf32>
    %cst_40 = arith.constant dense<0.000000e+00> : vector<2xf32>
    %145 = vector.multi_reduction <add>, %144, %cst_40 [1] : vector<2x4xf32> to vector<2xf32>
    %146 = vector.shape_cast %145 : vector<2xf32> to vector<2x1xf32>
    %147 = tpu.reciprocal %146 {approx = true} : vector<2x1xf32> -> vector<2x1xf32>
    %148 = vector.broadcast %147 : vector<2x1xf32> to vector<2x4xf32>
    %149 = arith.mulf %144, %148 : vector<2x4xf32>
    %150 = arith.truncf %149 : vector<2x4xf32> to vector<2x4xbf16>
    %151 = arith.truncf %134 : vector<4x32xf32> to vector<4x32xbf16>
    %cst_41 = arith.constant dense<0.000000e+00> : vector<2x32xf32>
    %152 = tpu.matmul %150, %151, %cst_41 {dimension_numbers = #tpu.dot_dimension_numbers<[1], [0], [0], [1], [0, 0, 1, 1], [], []>} : vector<2x4xbf16>, vector<4x32xbf16>, vector<2x32xf32> -> vector<2x32xf32>
    %153 = tpu.concatenate %89, %110, %131, %152 in 1 : vector<2x32xf32>, vector<2x32xf32>, vector<2x32xf32>, vector<2x32xf32> -> vector<2x128xf32>
    %154 = arith.truncf %153 : vector<2x128xf32> to vector<2x128xbf16>
    %c0_42 = arith.constant 0 : index
    %c384 = arith.constant 384 : index
    %155 = vector.load %arg3[%c0_42, %c384] : memref<128x640xbf16, #tpu.memory_space<vmem>>, vector<128x128xbf16>
    %cst_43 = arith.constant dense<0.000000e+00> : vector<2x128xf32>
    %156 = tpu.matmul %154, %155, %cst_43 {dimension_numbers = #tpu.dot_dimension_numbers<[1], [0], [0], [1], [0, 0, 1, 1], [], []>} : vector<2x128xbf16>, vector<128x128xbf16>, vector<2x128xf32> -> vector<2x128xf32>
    %157 = vector.broadcast %7 : vector<1x128xf32> to vector<2x128xf32>
    %158 = arith.addf %156, %157 : vector<2x128xf32>
    %cst_44 = arith.constant dense<0.000000e+00> : vector<2xf32>
    %159 = vector.multi_reduction <add>, %158, %cst_44 [1] : vector<2x128xf32> to vector<2xf32>
    %160 = vector.shape_cast %159 : vector<2xf32> to vector<2x1xf32>
    %cst_45 = arith.constant 1.280000e+02 : f32
    %161 = vector.broadcast %cst_45 : f32 to vector<2x1xf32>
    %162 = arith.divf %160, %161 : vector<2x1xf32>
    %163 = vector.broadcast %162 : vector<2x1xf32> to vector<2x128xf32>
    %164 = arith.subf %158, %163 : vector<2x128xf32>
    %165 = arith.mulf %164, %164 : vector<2x128xf32>
    %cst_46 = arith.constant dense<0.000000e+00> : vector<2xf32>
    %166 = vector.multi_reduction <add>, %165, %cst_46 [1] : vector<2x128xf32> to vector<2xf32>
    %167 = vector.shape_cast %166 : vector<2xf32> to vector<2x1xf32>
    %cst_47 = arith.constant 1.280000e+02 : f32
    %168 = vector.broadcast %cst_47 : f32 to vector<2x1xf32>
    %169 = arith.divf %167, %168 : vector<2x1xf32>
    %170 = vector.broadcast %162 : vector<2x1xf32> to vector<2x128xf32>
    %171 = arith.subf %158, %170 : vector<2x128xf32>
    %cst_48 = arith.constant 9.99999974E-6 : f32
    %172 = vector.broadcast %cst_48 : f32 to vector<2x1xf32>
    %173 = arith.addf %169, %172 : vector<2x1xf32>
    %174 = math.rsqrt %173 : vector<2x1xf32>
    %175 = vector.broadcast %174 : vector<2x1xf32> to vector<2x128xf32>
    %176 = arith.mulf %171, %175 : vector<2x128xf32>
    %177 = vector.broadcast %3 : vector<1x128xf32> to vector<2x128xf32>
    %178 = arith.mulf %176, %177 : vector<2x128xf32>
    %179 = vector.broadcast %4 : vector<1x128xf32> to vector<2x128xf32>
    %180 = arith.addf %178, %179 : vector<2x128xf32>
    %181 = arith.truncf %180 : vector<2x128xf32> to vector<2x128xbf16>
    %c0_49 = arith.constant 0 : index
    %c512 = arith.constant 512 : index
    %182 = vector.load %arg3[%c0_49, %c512] : memref<128x640xbf16, #tpu.memory_space<vmem>>, vector<128x128xbf16>
    %cst_50 = arith.constant dense<0.000000e+00> : vector<2x128xf32>
    %183 = tpu.matmul %181, %182, %cst_50 {dimension_numbers = #tpu.dot_dimension_numbers<[1], [0], [0], [1], [0, 0, 1, 1], [], []>} : vector<2x128xbf16>, vector<128x128xbf16>, vector<2x128xf32> -> vector<2x128xf32>
    %184 = vector.broadcast %8 : vector<1x128xf32> to vector<2x128xf32>
    %185 = arith.addf %183, %184 : vector<2x128xf32>
    %186 = arith.addf %180, %185 : vector<2x128xf32>
    %cst_51 = arith.constant dense<0.000000e+00> : vector<2xf32>
    %187 = vector.multi_reduction <add>, %186, %cst_51 [1] : vector<2x128xf32> to vector<2xf32>
    %188 = vector.shape_cast %187 : vector<2xf32> to vector<2x1xf32>
    %cst_52 = arith.constant 1.280000e+02 : f32
    %189 = vector.broadcast %cst_52 : f32 to vector<2x1xf32>
    %190 = arith.divf %188, %189 : vector<2x1xf32>
    %191 = vector.broadcast %190 : vector<2x1xf32> to vector<2x128xf32>
    %192 = arith.subf %186, %191 : vector<2x128xf32>
    %193 = arith.mulf %192, %192 : vector<2x128xf32>
    %cst_53 = arith.constant dense<0.000000e+00> : vector<2xf32>
    %194 = vector.multi_reduction <add>, %193, %cst_53 [1] : vector<2x128xf32> to vector<2xf32>
    %195 = vector.shape_cast %194 : vector<2xf32> to vector<2x1xf32>
    %cst_54 = arith.constant 1.280000e+02 : f32
    %196 = vector.broadcast %cst_54 : f32 to vector<2x1xf32>
    %197 = arith.divf %195, %196 : vector<2x1xf32>
    %198 = vector.broadcast %190 : vector<2x1xf32> to vector<2x128xf32>
    %199 = arith.subf %186, %198 : vector<2x128xf32>
    %cst_55 = arith.constant 9.99999974E-6 : f32
    %200 = vector.broadcast %cst_55 : f32 to vector<2x1xf32>
    %201 = arith.addf %197, %200 : vector<2x1xf32>
    %202 = math.rsqrt %201 : vector<2x1xf32>
    %203 = vector.broadcast %202 : vector<2x1xf32> to vector<2x128xf32>
    %204 = arith.mulf %199, %203 : vector<2x128xf32>
    %205 = vector.broadcast %5 : vector<1x128xf32> to vector<2x128xf32>
    %206 = arith.mulf %204, %205 : vector<2x128xf32>
    %207 = vector.broadcast %6 : vector<1x128xf32> to vector<2x128xf32>
    %208 = arith.addf %206, %207 : vector<2x128xf32>
    %c0_56 = arith.constant 0 : index
    %c0_57 = arith.constant 0 : index
    %c0_58 = arith.constant 0 : index
    %209 = vector.load %arg6[%c0_56, %c0_57, %c0_58] : memref<1x2x128xf32, #tpu.memory_space<vmem>>, vector<1x2x128xf32>
    %210 = vector.shape_cast %209 : vector<1x2x128xf32> to vector<2x128xf32>
    %211 = vector.shape_cast %208 : vector<2x128xf32> to vector<1x2x128xf32>
    tpu.vector_store %arg6[%c0_56, %c0_57, %c0_58], %211 {strides = array<i32>} : memref<1x2x128xf32, #tpu.memory_space<vmem>>, vector<1x2x128xf32>,
    return
  }
  func.func @transform_0(%arg0: i32) -> (i32, i32) {
    %c0_i32 = arith.constant 0 : i32
    %c0_i32_0 = arith.constant 0 : i32
    %c0_i32_1 = arith.constant 0 : i32
    return %c0_i32, %c0_i32_0 : i32, i32
  }
  func.func @transform_1(%arg0: i32) -> (i32, i32, i32) {
    %c0_i32 = arith.constant 0 : i32
    %c0_i32_0 = arith.constant 0 : i32
    %c0_i32_1 = arith.constant 0 : i32
    return %arg0, %c0_i32, %c0_i32_0 : i32, i32, i32
  }
  func.func @transform_2(%arg0: i32) -> (i32, i32) {
    %c0_i32 = arith.constant 0 : i32
    %c0_i32_0 = arith.constant 0 : i32
    %c0_i32_1 = arith.constant 0 : i32
    return %c0_i32, %c0_i32_0 : i32, i32
  }
  func.func @transform_3(%arg0: i32) -> (i32, i32) {
    %c0_i32 = arith.constant 0 : i32
    %c0_i32_0 = arith.constant 0 : i32
    %c0_i32_1 = arith.constant 0 : i32
    return %c0_i32, %c0_i32_0 : i32, i32
  }
  func.func @transform_4(%arg0: i32) -> (i32, i32) {
    %c0_i32 = arith.constant 0 : i32
    %c0_i32_0 = arith.constant 0 : i32
    %c0_i32_1 = arith.constant 0 : i32
    return %c0_i32, %c0_i32_0 : i32, i32
  }
  func.func @transform_5(%arg0: i32) -> (i32, i32, i32) {
    %c0_i32 = arith.constant 0 : i32
    %c0_i32_0 = arith.constant 0 : i32
    %c0_i32_1 = arith.constant 0 : i32
    return %arg0, %c0_i32, %c0_i32_0 : i32, i32, i32
  }
}

</mosaic_0001>

<bundles_post_ra>
// kernel: clip_transformer_forward.7
= control target key start
LH: loop header
LB: loop body
LE: loop exit
PB: predicated region body
PF: predicated region fallthrough
CT: control target
= control target key end

     0   :  { %vm21_vm0 = vcmask 1041408   ;;  %v211_v2 = vmov 0.0   ;;  %vm212_vm1 = vmmov 0   ;;  %s276_s0 = inlined_call_operand.vmem [shape: f32[2,128], index: 0, kind: input, shape index: {}]   ;;  %s277_s3 = inlined_call_operand.vmem [shape: bf16[128,128], index: 3, kind: input, shape index: {}]   ;;  %s278_s1 = inlined_call_operand.vmem [shape: f32[1,128], index: 1, kind: input, shape index: {}]   ;;  %s279_s2 = inlined_call_operand.vmem [shape: f32[1,128], index: 2, kind: input, shape index: {}]   ;;  %s280_s4 = inlined_call_operand.vmem [shape: f32[2,128], index: 4, kind: output, shape index: {}]  }
   0x1   :  { %v18_v0 = vld [vmem:[%s276_s0] sm:$0x3]  ;;  %179 = vmatprep.subr.bf16.mxu0 %v211_v2  ;;  %v202_v4 = vld [vmem:[%s277_s3 + $0x8] sm:$0xff]   ;;  %v203_v10 = vld [vmem:[%s277_s3 + $0x10] sm:$0xff]   ;;  %195 = vmatprep.mubr.msk.bf16.mxu0 %vm212_vm1, %v211_v2 }
   0x2   :  { %v22_v1 = vsel %vm21_vm0, %v18_v0, 0.0  ;;  %v201_v3 = vld [vmem:[%s277_s3] sm:$0xff]   ;;  %v204_v11 = vld [vmem:[%s277_s3 + $0x18] sm:$0xff]   ;;  %v206_v13 = vld [vmem:[%s277_s3 + $0x28] sm:$0xff]  }
   0x3   :  { %23 = vadd.xlane.f32.xlu0 %v22_v1  ;;  %180 = vmatpush3.bf16.msra.mxu0 %v201_v3  ;;  %v205_v12 = vld [vmem:[%s277_s3 + $0x20] sm:$0xff]   ;;  %v207_v14 = vld [vmem:[%s277_s3 + $0x30] sm:$0xff]   ;;  %v208_v15 = vld [vmem:[%s277_s3 + $0x38] sm:$0xff]  }
   0x4   :  { %181 = vmatprep.subr.bf16.mxu0 %v211_v2  ;;  %v160_v20 = vld [vmem:[%s278_s1] ss:$0 sm:$0xff] }
   0x5   :  { %v161_v22 = vld [vmem:[%s279_s2] ss:$0 sm:$0xff] }
   0x7   :  { %182 = vmatpush3.bf16.msra.mxu0 %v202_v4 }
   0x8   :  { %183 = vmatprep.subr.bf16.mxu0 %v211_v2 }
   0xb   :  { %184 = vmatpush3.bf16.msra.mxu0 %v203_v10 }
   0xc   :  { %185 = vmatprep.subr.bf16.mxu0 %v211_v2 }
   0xf   :  { %186 = vmatpush3.bf16.msra.mxu0 %v204_v11 }
  0x10   :  { %187 = vmatprep.subr.bf16.mxu0 %v211_v2 }
  0x13   :  { %188 = vmatpush3.bf16.msra.mxu0 %v205_v12 }
  0x14   :  { %189 = vmatprep.subr.bf16.mxu0 %v211_v2 }
  0x17   :  { %190 = vmatpush3.bf16.msra.mxu0 %v206_v13 }
  0x18   :  { %191 = vmatprep.subr.bf16.mxu0 %v211_v2 }
  0x1b   :  { %192 = vmatpush3.bf16.msra.mxu0 %v207_v14 }
  0x1c   :  { %193 = vmatprep.subr.bf16.mxu0 %v211_v2 }
  0x1f   :  { %194 = vmatpush3.bf16.msra.mxu0 %v208_v15 }
  0x90   :  { %v24_v5 = vpop.xlane.xlu0 %23 }
  0x91   :  { %v26_v6 = vmul.f32 0.0078125, %v24_v5 }
  0x93   :  { %v27_v7 = vsub.f32 %v18_v0, %v26_v6 }
  0x95   :  { %v28_v8 = vmul.f32 %v27_v7, %v27_v7 }
  0x97   :  { %v29_v9 = vsel %vm21_vm0, %v28_v8, 0.0 }
  0x98   :  { %30 = vadd.xlane.f32.xlu0 %v29_v9 }
 0x125   :  { %v31_v16 = vpop.xlane.xlu0 %30 }
 0x126   :  { %v32_v17 = vmul.f32 0.0078125, %v31_v16 }
 0x128   :  { %v33_v18 = vadd.f32 1e-05, %v32_v17 }
 0x12a   :  { %209 = vrsqrt.f32 %v33_v18 }
 0x134   :  { %v210_v19 = vpop.eup %209 }
 0x135   :  { %v35_v21 = vmul.f32 %v210_v19, %v27_v7 }
 0x137   :  { %v42_v23 = vmul.f32 %v160_v20, %v35_v21 }
 0x139   :  { %v49_v24 = vadd.f32 %v161_v22, %v42_v23 }
 0x13b   :  { %v50_v25 = vpack.c.bf16 %v49_v24, %v49_v24 }
 0x13d   :  { %196 = vmatmul.mubr.bf16.vlgmr.msra.gmra.mrb[0].mxu0 %v50_v25 }
 0x210   :  { %v149_v26 = vpop.f32.mrb[0].mxu0 }
 0x211   :  { %155 = vst [vmem:[%s280_s4] sm:$0x3] %v149_v26  ;;  %v197_v27 = vpop.f32.mrb[1].mxu0 }
 0x212   :  { %v152_v28 = vpop.f32.mrb[2].mxu0 }
 0x213   :  { %v198_v29 = vpop.f32.mrb[3].mxu0 }

// kernel: clip_transformer_forward.6
= control target key start
LH: loop header
LB: loop body
LE: loop exit
PB: predicated region body
PF: predicated region fallthrough
CT: control target
= control target key end

     0   :  { %s3209_s0 = inlined_call_operand.vmem [shape: f32[2,8,128], index: 0, kind: input, shape index: {}]   ;;  %s3210_s1 = inlined_call_operand.hbm [shape: bf16[2,128,1024], index: 1, kind: input, shape index: {}]   ;;  %s3211_s2 = inlined_call_operand.hbm [shape: bf16[2,512,128], index: 2, kind: input, shape index: {}]   ;;  %s3212_s3 = inlined_call_operand.vmem [shape: f32[2,6,128], index: 3, kind: input, shape index: {}]   ;;  %s3213_s4 = inlined_call_operand.vmem [shape: f32[2,2,512], index: 4, kind: input, shape index: {}]   ;;  %s3214_s5 = inlined_call_operand.vmem [shape: f32[2,8,128], index: 5, kind: output, shape index: {}]  }
   0x1   :  { %3216 = sst [smem:[#allocation8_spill]] %s3210_s1 }
   0x2   :  { %3217 = sst [smem:[#allocation9_spill]] %s3211_s2 }
   0x3   :  { %10 = vsyncpa [#allocation3], 0 }
   0x4   :  { %12 = vsyncpa [#allocation3 + $0x1], 0 }
   0x5   :  { %13 = vsyncpa [#allocation5], 0 }
   0x6   :  { %15 = vsyncpa [#allocation5 + $0x1], 0  ;;  %s2708_s18 = smov 0   ;;  %s2710_s19 = smov 0  }
   0x7   :  { %s2712_s20 = smov 0   ;;  %s2714_s21 = smov 0  }
   0x8   :  { %s2716_s22 = smov 0   ;;  %s2718_s23 = smov 0  }
   0x9   :  { %s2720_s24 = smov 0   ;;  %s2722_s25 = smov 0  }
   0xa LB: > { %s2080_s26 = sadd.s32 4294967295, %s2663_s25   ;;  %s30_s27 = sadd.s32 1, %s2655_s23  ;;  %s2663_s25 = sphi %s2722_s25, %s21_s25   ;;  %s2659_s24 = sphi %s2720_s24, %s3231_s24   ;;  %s2655_s23 = sphi %s2718_s23, %s3230_s23   ;;  %s2651_s22 = sphi %s2716_s22, %s3229_s22   ;;  %s2647_s21 = sphi %s2714_s21, %s3228_s21   ;;  %s2643_s20 = sphi %s2712_s20, %s3227_s20   ;;  %s2639_s19 = sphi %s2710_s19, %s3226_s19   ;;  %s2635_s18 = sphi %s2708_s18, %s3225_s18  }
   0xb   : > { %p31_p0 = scmp.ge.s32.totalorder %s30_s27, 2  ;;  %s33_s28 = sadd.s32 1, %s2659_s24 }
   0xc   : > { %s66_s29 = sadd.s32 1, %s2643_s20  ;;  %p73_p1 = scmp.ne.s32.totalorder %s2643_s20, %s2639_s19 }
   0xd   : > { %s3233_s27 = smov (%p31_p0, %s30_s27), 0  ;;  %s3235_s28 = smov (!%p31_p0, %s33_s28), %s2659_s24 }
   0xe   : > { %s63_s30 = ssub.s32 %s2655_s23, %s3233_s27  ;;  %p74_p2 = scmp.eq.s32.totalorder %s2663_s25, 0 }
   0xf   : > { %p35_p3 = scmp.ge.s32.totalorder %s3235_s28, 2  ;;  %p64_p4 = scmp.eq.s32.totalorder %s63_s30, 0 }
  0x10   : > { %p2758_p5 = por %p74_p2, %p73_p1  ;;  %p79_p6 = scmp.ne.s32.totalorder %s2639_s19, %s2635_s18 }
  0x11   : > { %s3237_s28 = smov (%p35_p3, %s3235_s28), 0  ;;  %p80_p7 = scmp.eq.s32.totalorder %s2080_s26, 0 }
  0x12   : > { %s2766_s7 = scalar_select %p64_p4, %s2643_s20, %s66_s29  }
  0x13   : > { %p2389_p8 = scmp.lt.s32.totalorder %s2663_s25, 4  ;;  %s2770_s8 = sand.u32 1, %s2643_s20  }
  0x14   : > { %p2772_p9 = por %p80_p7, %p79_p6  ;;  %s2084_s10 = sshll.u32 %s2770_s8, 9 }
  0x15   : > { %s2209_s11 = sshll.u32 %s2655_s23, 13  ;;  %s3220_s1 = sld [smem:[#allocation8_spill]] }
  0x16   : > { %s3219_s9 = scalar_select %p2772_p9, 1, 0 }
  0x17   : > { %s218_s15 = scalar_lea.vmem [#allocation2], %s2084_s10  ;;  %p2785_p10 = pnand %p2389_p8, %p2758_p5 }
  0x18   : > { %s225_s16 = sshll.u32 %s218_s15, 4  ;;  %s215_s18 = scalar_lea.sflag [#allocation3], %s2770_s8  ;;  %s2789_s16 = int_to_ptr.vmem [resolvable:$true] %s225_s16 }
  0x19   : > { %p2535_p12 = pneg %p2785_p10 }
  0x1b   : > { %s2781_s14 = scalar_lea.hbm %s3220_s1, %s2209_s11  ;;  %s2538_s6 = scalar_lea.hbm %s3220_s1, 16384 }
  0x1c   : > { %s2533_s26 = scalar_lea.hbm %s2781_s14, 8192  ;;  %p2539_p1 = scmp.lt.u32.totalorder %s2781_s14, %s3220_s1 }
  0x1d   : > { %p2534_p11 = scmp.ne.s32.totalorder %s2781_s14, %s2533_s26  ;;  %p2540_p2 = scmp.lt.u32.totalorder %s2538_s6, %s2533_s26 }
  0x1e   : > { %p2542_p4 = scmp.lt.u32.totalorder %s2533_s26, %s2781_s14 }
  0x1f   : > { %p2536_p13 = pnand %p2535_p12, %p2534_p11  ;;  %p2541_p3 = por %p2540_p2, %p2539_p1 }
  0x21   : > { %p2537_p0 = pneg %p2536_p13  ;;  %p2543_p5 = por %p2542_p4, %p2541_p3 }
  0x23   : > { %p2544_p6 = pnand %p2543_p5, %p2537_p0 }
  0x25   : > { %2547 = shalt.err (!%p2544_p6)
}
  0x26   : > { %s2548_s12 = scalar_lea.vmem %s2789_s16, 8192  ;;  %s2665_s13 = smov [#allocation2]  }
  0x27   : > { %p2549_p7 = scmp.ne.s32.totalorder %s2789_s16, %s2548_s12  ;;  %s2553_s15 = sshll.u32 %s2665_s13, 4  ;;  %s2554_s15 = int_to_ptr.vmem [resolvable:$false] %s2553_s15 }
  0x28   : > { %s2555_s29 = scalar_lea.vmem %s2554_s15, 16384  ;;  %p2556_p13 = scmp.lt.s32.totalorder %s2789_s16, %s2554_s15 }
  0x29   : > { %p2551_p8 = pnand %p2549_p7, %p2535_p12  ;;  %p2557_p1 = scmp.lt.s32.totalorder %s2555_s29, %s2548_s12 }
  0x2b   : > { %p2552_p11 = pneg %p2551_p8  ;;  %p2558_p2 = por %p2557_p1, %p2556_p13 }
  0x2d   : > { %p2559_p3 = pnand %p2558_p2, %p2552_p11 }
  0x2f   : > { %2562 = shalt.err (!%p2559_p3)
}
  0x30   : > { %s2666_s26 = smov 512   ;;  %s2667_s30 = smov 32  }
  0x31   : > { %2385 = dma.hbm_to_vmem [thread:$0]  (!%p2785_p10), %s2781_s14, 8192, %s2789_s16, %s215_s18, %s2666_s26, %s2666_s26, %s2667_s30  }
  0x32   : > { %p2090_p0 = scmp.ge.s32.totalorder %s2663_s25, 1  ;;  %p269_p4 = scmp.lt.s32.totalorder %s2663_s25, 5 }
  0x33   : > { %s2087_s6 = sshll.u32 %s2770_s8, 8  ;;  %s2210_s11 = sshll.u32 %s2655_s23, 12 }
  0x34   : > { %p2822_p5 = pnand %p2090_p0, %p269_p4  ;;  %s239_s12 = scalar_lea.vmem [#allocation4], %s2087_s6 }
  0x35   : > { %s246_s13 = sshll.u32 %s239_s12, 4  ;;  %s3223_s2 = sld [smem:[#allocation9_spill]]  ;;  %s2832_s13 = int_to_ptr.vmem [resolvable:$true] %s246_s13 }
  0x36   : > { %s236_s14 = scalar_lea.sflag [#allocation5], %s2770_s8 }
  0x3b   : > { %s2830_s1 = scalar_lea.hbm %s3223_s2, %s2210_s11  ;;  %s2568_s30 = scalar_lea.hbm %s3223_s2, 8192 }
  0x3c   : > { %s2563_s16 = scalar_lea.hbm %s2830_s1, 4096  ;;  %p2569_p11 = scmp.lt.u32.totalorder %s2830_s1, %s3223_s2 }
  0x3d   : > { %p2564_p6 = scmp.ne.s32.totalorder %s2830_s1, %s2563_s16  ;;  %p2570_p13 = scmp.lt.u32.totalorder %s2568_s30, %s2563_s16 }
  0x3e   : > { %p2572_p2 = scmp.lt.u32.totalorder %s2563_s16, %s2830_s1 }
  0x3f   : > { %p2566_p7 = pnand %p2564_p6, %p2535_p12  ;;  %p2571_p1 = por %p2570_p13, %p2569_p11 }
  0x41   : > { %p2567_p8 = pneg %p2566_p7  ;;  %p2573_p3 = por %p2572_p2, %p2571_p1 }
  0x43   : > { %p2574_p0 = pnand %p2573_p3, %p2567_p8 }
  0x45   : > { %2577 = shalt.err (!%p2574_p0)
}
  0x46   : > { %s2578_s12 = scalar_lea.vmem %s2832_s13, 4096  ;;  %s2668_s15 = smov [#allocation4]  }
  0x47   : > { %p2579_p4 = scmp.ne.s32.totalorder %s2832_s13, %s2578_s12  ;;  %s2583_s29 = sshll.u32 %s2668_s15, 4  ;;  %s2584_s29 = int_to_ptr.vmem [resolvable:$false] %s2583_s29 }
  0x48   : > { %s2585_s18 = scalar_lea.vmem %s2584_s29, 8192  ;;  %p2586_p9 = scmp.lt.s32.totalorder %s2832_s13, %s2584_s29 }
  0x49   : > { %p2581_p6 = pnand %p2579_p4, %p2535_p12  ;;  %p2587_p11 = scmp.lt.s32.totalorder %s2585_s18, %s2578_s12 }
  0x4b   : > { %p2582_p7 = pneg %p2581_p6  ;;  %p2588_p13 = por %p2587_p11, %p2586_p9 }
  0x4d   : > { %p2589_p1 = pnand %p2588_p13, %p2582_p7 }
  0x4f   : > { %2592 = shalt.err (!%p2589_p1)
}
  0x50   : > { %s2669_s16 = smov 64   ;;  %s2670_s26 = smov 4  }
  0x51   : > { %2388 = dma.hbm_to_vmem [thread:$0]  (!%p2785_p10), %s2830_s1, 4096, %s2832_s13, %s236_s14, %s2669_s16, %s2669_s16, %s2670_s26  }
  0x52   : > { %273 = sbr.rel (%p2822_p5) target bundleno = 3065 (0xbf9), region = 40  ;;  %s275_s30 = sand.u32 (!%p2822_p5), 1, %s2639_s19  }
  0x53   : > { %s2091_s6 = sshll.u32 (!%p2822_p5), %s275_s30, 9  ;;  %s276_s11 = scalar_lea.sflag (!%p2822_p5), [#allocation3], %s275_s30 }
  0x54   : > { %s2863_s12 = scalar_lea.vmem (!%p2822_p5), [#allocation2], %s2091_s6  ;;  %p3224_p9 = scmp.ne.s32.totalorder (!%p2822_p5), %s3219_s9, 0 }
  0x59   : > { %2626 = dma.done.wait (%p3224_p9), %s276_s11, 8192  }
  0x5a   : > { %2628 = vsyncadd (%p3224_p9), %s276_s11, 4294959104  ;;  %s2092_s15 = sshll.u32 %s275_s30, 8  ;;  %s285_s17 = scalar_lea.sflag [#allocation5], %s275_s30 }
  0x5b   : > { %s2869_s8 = scalar_lea.vmem [#allocation4], %s2092_s15 }
  0x5c   : > { %2630 = dma.done.wait (%p3224_p9), %s285_s17, 4096  }
  0x5d   : > { %2632 = vsyncadd (%p3224_p9), %s285_s17, 4294963200  ;;  %p332_p10 = scmp.lt.s32.totalorder %s2651_s22, 1  ;;  %p336_p12 = scmp.lt.s32.totalorder %s2647_s21, 1 }
  0x5e   : > { %p2098_p5 = scmp.ne.s32.totalorder %s2647_s21, 0 }
  0x5f   : > { %s3239_s22 = smov (!%p332_p10, %s2651_s22), 1 }
  0x60   : > { %s337_s1 = scalar_select %p336_p12, %s2647_s21, 1 }
  0x61   : > { %s2093_s10 = sshll.u32 %s3239_s22, 3  ;;  %353 = sbr.rel (%p2098_p5) target bundleno = 104 (0x68), region = 52 }
  0x62   : > { %s335_s29 = scalar_lea.vmem %s3209_s0, %s2093_s10  ;;  %s2094_s18 = sshll.u32 %s337_s1, 3 }
  0x63   : > { %s2885_s30 = scalar_lea.vmem %s3212_s3, %s2094_s18  ;;  %s2890_s11 = scalar_lea.vmem %s3213_s4, %s2094_s18  ;;  %v354_v0 = vld [vmem:[%s335_s29] sm:$0xff] (!%p2098_p5) }
  0x64   : > { %s2895_s2 = scalar_lea.vmem %s3214_s5, %s2093_s10 }
  0x65   : > { %355 = vst [vmem:[%s2895_s2] sm:$0xff] (!%p2098_p5), %v354_v0 }
  0x68 PF: > { %v382_v2 = vld [vmem:[%s2863_s12] sm:$0xff]  ;;  %v383_v4 = vld [vmem:[%s2863_s12 + $0x8] sm:$0xf]  ;;  %v2671_v6 = vmov 0.0   ;;  %v2672_v43 = vmov 0   ;;  %vm2673_vm0 = vmmov 0  }
  0x69   : > { %v384_v3 = vld [vmem:[%s2863_s12 + $0x20] sm:$0xff]  ;;  %2290 = vmatprep.subr.bf16.mxu1 %v2671_v6  ;;  %v385_v8 = vld [vmem:[%s2863_s12 + $0x28] sm:$0xf]  ;;  %602 = vmatprep.mubr.bf16.mxu0 %v2672_v43  ;;  %vm659_vm1 = vcmask 261120   ;;  %s2674_s21 = smov 96   ;;  %s2675_s22 = smov 32  }
  0x6a   : > { %v2100_v5 = vcombine.high %v382_v2, %v384_v3  ;;  %v2099_v7 = vcombine.low %v382_v2, %v384_v3  ;;  %v386_v9 = vld [vmem:[%s2863_s12 + $0x40] sm:$0xff]  ;;  %v2101_v11 = vcombine.low %v383_v4, %v385_v8  ;;  %v387_v13 = vld [vmem:[%s2863_s12 + $0x48] sm:$0xf]  ;;  %2306 = vmatprep.mubr.msk.bf16.mxu1 %vm2673_vm0, %v2671_v6  ;;  %v371_v3 = vlaneseq  ;;  %s2677_s1 = smov 64  }
  0x6b   : > { %v388_v10 = vld [vmem:[%s2863_s12 + $0x60] sm:$0xff]  ;;  %v389_v14 = vld [vmem:[%s2863_s12 + $0x68] sm:$0xf]  ;;  %vm725_vm2 = vcmask 1043456   ;;  %vm708_vm4 = vcmask 64512   ;;  %vm1121_vm5 = vcmask 523264  }
  0x6c   : > { %v2900_v1 = vld [vmem:[%s2895_s2] sm:$0xff]  ;;  %v2103_v12 = vcombine.high %v386_v9, %v388_v10  ;;  %570 = vmatprep.subr.bf16.mxu0 %v2100_v5  ;;  %2291 = vmatpush3.bf16.msra.mxu1 %v2101_v11  ;;  %v2102_v17 = vcombine.low %v386_v9, %v388_v10  ;;  %v2104_v18 = vcombine.low %v387_v13, %v389_v14  ;;  %v391_v24 = vld [vmem:[%s2863_s12 + $0x88] sm:$0xf]  ;;  %v2953_v5 = vshrl.u32 %v371_v3, 7 }
  0x6d   : > { %359 = vadd.xlane.f32.xlu0 %v2900_v1  ;;  %v390_v15 = vld [vmem:[%s2863_s12 + $0x80] sm:$0xff]  ;;  %571 = vmatpush1.bf16.msra.mxu0 %v2099_v7  ;;  %v393_v25 = vld [vmem:[%s2863_s12 + $0xa8] sm:$0xf]  ;;  %vm1123_vm6 = vcmask 785408  }
  0x6e   : > { %v392_v16 = vld [vmem:[%s2863_s12 + $0xa0] sm:$0xff]  ;;  %572 = vmatprep.subr.bf16.mxu0 %v2103_v12  ;;  %2292 = vmatprep.subr.bf16.mxu1 %v2671_v6  ;;  %v2107_v27 = vcombine.low %v391_v24, %v393_v25  ;;  %v395_v31 = vld [vmem:[%s2863_s12 + $0xc8] sm:$0xf]  ;;  %v373_v7 = vsub.s32 0, %v2953_v5  ;;  %v2960_v9 = vsub.s32 1, %v2953_v5 }
  0x6f   : > { %v2106_v19 = vcombine.high %v390_v15, %v392_v16  ;;  %v2105_v26 = vcombine.low %v390_v15, %v392_v16  ;;  %v394_v28 = vld [vmem:[%s2863_s12 + $0xc0] sm:$0xff]  ;;  %v397_v32 = vld [vmem:[%s2863_s12 + $0xe8] sm:$0xf] }
  0x70   : > { %2293 = vmatpush3.bf16.msra.mxu1 %v2104_v18  ;;  %v396_v29 = vld [vmem:[%s2863_s12 + $0xe0] sm:$0xff]  ;;  %v2110_v34 = vcombine.low %v395_v31, %v397_v32  ;;  %v399_v37 = vld [vmem:[%s2863_s12 + $0x108] sm:$0xf] }
  0x71   : > { %573 = vmatpush1.bf16.msra.mxu0 %v2102_v17  ;;  %2294 = vmatprep.subr.bf16.mxu1 %v2671_v6  ;;  %v2109_v30 = vcombine.high %v394_v28, %v396_v29  ;;  %v2108_v33 = vcombine.low %v394_v28, %v396_v29  ;;  %v398_v35 = vld [vmem:[%s2863_s12 + $0x100] sm:$0xff]  ;;  %v401_v40 = vld [vmem:[%s2863_s12 + $0x128] sm:$0xf]  ;;  %v421_v17 = vsub.s32 2, %v2953_v5 }
  0x72   : > { %574 = vmatprep.subr.bf16.mxu0 %v2106_v19  ;;  %v400_v36 = vld [vmem:[%s2863_s12 + $0x120] sm:$0xff]  ;;  %v2113_v44 = vcombine.low %v399_v37, %v401_v40  ;;  %v403_v46 = vld [vmem:[%s2863_s12 + $0x148] sm:$0xf]  ;;  %v425_v19 = vsub.s32 4, %v2953_v5 }
  0x73   : > { %v2112_v38 = vcombine.high %v398_v35, %v400_v36  ;;  %v2111_v39 = vcombine.low %v398_v35, %v400_v36  ;;  %v402_v41 = vld [vmem:[%s2863_s12 + $0x140] sm:$0xff]  ;;  %v405_v47 = vld [vmem:[%s2863_s12 + $0x168] sm:$0xf] }
  0x74   : > { %2295 = vmatpush3.bf16.msra.mxu1 %v2107_v27  ;;  %v404_v42 = vld [vmem:[%s2863_s12 + $0x160] sm:$0xff]  ;;  %v2116_v51 = vcombine.low %v403_v46, %v405_v47  ;;  %v407_v53 = vld [vmem:[%s2863_s12 + $0x188] sm:$0xf] }
  0x75   : > { %575 = vmatpush1.bf16.msra.mxu0 %v2105_v26  ;;  %2296 = vmatprep.subr.bf16.mxu1 %v2671_v6  ;;  %v2115_v45 = vcombine.high %v402_v41, %v404_v42  ;;  %v406_v48 = vld [vmem:[%s2863_s12 + $0x180] sm:$0xff]  ;;  %v2114_v50 = vcombine.low %v402_v41, %v404_v42  ;;  %v409_v54 = vld [vmem:[%s2863_s12 + $0x1a8] sm:$0xf]  ;;  %v654_v42 = vand.u32 127, %v371_v3 }
  0x76   : > { %576 = vmatprep.subr.bf16.mxu0 %v2109_v30  ;;  %v408_v49 = vld [vmem:[%s2863_s12 + $0x1a0] sm:$0xff]  ;;  %v2119_v58 = vcombine.low %v407_v53, %v409_v54  ;;  %v411_v60 = vld [vmem:[%s2863_s12 + $0x1c8] sm:$0xf] }
  0x77   : > { %v2118_v52 = vcombine.high %v406_v48, %v408_v49  ;;  %v410_v55 = vld [vmem:[%s2863_s12 + $0x1c0] sm:$0xff]  ;;  %v2117_v57 = vcombine.low %v406_v48, %v408_v49  ;;  %v413_v61 = vld [vmem:[%s2863_s12 + $0x1e8] sm:$0xf]  ;;  %vm655_vm3 = vcmp.le.s32.totalorder %v654_v42, %v2953_v5 }
  0x78   : > { %2297 = vmatpush3.bf16.msra.mxu1 %v2110_v34  ;;  %v412_v56 = vld [vmem:[%s2863_s12 + $0x1e0] sm:$0xff]  ;;  %v2122_v63 = vcombine.low %v411_v60, %v413_v61 }
  0x79   : > { %577 = vmatpush1.bf16.msra.mxu0 %v2108_v33  ;;  %2298 = vmatprep.subr.bf16.mxu1 %v2671_v6  ;;  %v2121_v59 = vcombine.high %v410_v55, %v412_v56  ;;  %v2120_v62 = vcombine.low %v410_v55, %v412_v56  ;;  %v2957_v8 = vld [vmem:[%s2885_s30] sm:$0x3f] }
  0x7a   : > { %578 = vmatprep.subr.bf16.mxu0 %v2112_v38  ;;  %v374_v10 = vrot.slane %v2957_v8, %v373_v7  ;;  %v379_v13 = vrot.slane %v2957_v8, %v2960_v9  ;;  %v2972_v18 = vld [vmem:[%s2890_s11] sm:$0xff] }
  0x7c   : > { %2299 = vmatpush3.bf16.msra.mxu1 %v2113_v44 }
  0x7d   : > { %579 = vmatpush1.bf16.msra.mxu0 %v2111_v39  ;;  %2300 = vmatprep.subr.bf16.mxu1 %v2671_v6 }
  0x7e   : > { %580 = vmatprep.subr.bf16.mxu0 %v2115_v45  ;;  %v2676_v45 = vmov -1e+30  }
  0x7f   : > { %v2995_v46 = vsel %vm655_vm3, 0.0, %v2676_v45 }
  0x80   : > { %2301 = vmatpush3.bf16.msra.mxu1 %v2116_v51 }
  0x81   : > { %581 = vmatpush1.bf16.msra.mxu0 %v2114_v50  ;;  %2302 = vmatprep.subr.bf16.mxu1 %v2671_v6 }
  0x82   : > { %582 = vmatprep.subr.bf16.mxu0 %v2118_v52 }
  0x84   : > { %2303 = vmatpush3.bf16.msra.mxu1 %v2119_v58 }
  0x85   : > { %583 = vmatpush1.bf16.msra.mxu0 %v2117_v57  ;;  %2304 = vmatprep.subr.bf16.mxu1 %v2671_v6 }
  0x86   : > { %584 = vmatprep.subr.bf16.mxu0 %v2121_v59 }
  0x88   : > { %2305 = vmatpush3.bf16.msra.mxu1 %v2122_v63 }
  0x89   : > { %585 = vmatpush1.bf16.msra.mxu0 %v2120_v62  ;;  %2310 = vmatprep.subr.bf16.mxu1 %v2671_v6 }
  0x8a   : > { %2334 = vmatprep.subr.bf16.mxu0 %v2671_v6 }
  0xfa   : > { %v360_v20 = vpop.xlane.xlu0 %359 }
  0xfb   : > { %v362_v21 = vmul.f32 0.0078125, %v360_v20  ;;  %v422_v20 = vrot.slane %v2972_v18, %v421_v17 }
  0xfd   : > { %v2917_v22 = vsub.f32 %v2900_v1, %v362_v21  ;;  %v426_v21 = vrot.slane %v2972_v18, %v425_v19 }
  0xff   : > { %v364_v23 = vmul.f32 %v2917_v22, %v2917_v22  ;;  %v441_v28 = vrot.slane %v426_v21, %v373_v7 }
 0x101   : > { %365 = vadd.xlane.f32.xlu0 %v364_v23  ;;  %v418_v23 = vrot.slane %v2972_v18, %v373_v7 }
 0x103   : > { %v433_v34 = vrot.slane %v418_v23, %v373_v7 }
 0x18e   : > { %v366_v0 = vpop.xlane.xlu0 %365 }
 0x18f   : > { %v367_v2 = vmul.f32 0.0078125, %v366_v0 }
 0x191   : > { %v368_v4 = vadd.f32 1e-05, %v367_v2 }
 0x193   : > { %2497 = vrsqrt.f32 %v368_v4 }
 0x19d   : > { %v2498_v11 = vpop.eup %2497 }
 0x19e   : > { %v370_v12 = vmul.f32 %v2498_v11, %v2917_v22  ;;  %v437_v22 = vrot.slane %v422_v20, %v373_v7 }
 0x1a0   : > { %v375_v14 = vmul.f32 %v374_v10, %v370_v12 }
 0x1a2   : > { %v380_v15 = vadd.f32 %v379_v13, %v375_v14 }
 0x1a4   : > { %v381_v16 = vpack.c.bf16 %v380_v15, %v380_v15 }
 0x1a6   : > { %603 = vmatmul.mubr.bf16.vlgmr.msra.gmra.mrb[0].mxu0 %v381_v16  ;;  %2307 = vmatmul.mubr.bf16.vlgmr.msra.gmra.mrb[0].mxu1 %v381_v16 }
 0x1a7   : > { %2312 = vmatprep.mubr.msk.bf16.mxu1 %vm2673_vm0, %v2671_v6  ;;  %2336 = vmatprep.mubr.msk.bf16.mxu0 %vm2673_vm0, %v2671_v6 }
 0x279   : > { %v604_v24 = vpop.f32.mrb[0].mxu0  ;;  %v645_v25 = vpop.f32.mrb[0].mxu1 }
 0x27a   : > { %v606_v26 = vpop.f32.mrb[1].mxu0  ;;  %v2308_v27 = vpop.f32.mrb[1].mxu1  ;;  %v646_v36 = vadd.f32 %v645_v25, %v441_v28  ;;  %v605_v38 = vadd.f32 %v604_v24, %v433_v34 }
 0x27b   : > { %v607_v29 = vadd.f32 %v606_v26, %v437_v22  ;;  %v608_v30 = vpop.f32.mrb[2].mxu0  ;;  %v648_v31 = vpop.f32.mrb[2].mxu1 }
 0x27c   : > { %v609_v32 = vpop.f32.mrb[3].mxu0  ;;  %v2309_v33 = vpop.f32.mrb[3].mxu1  ;;  %v2985_v39 = vpack.c.bf16 %v646_v36, %v646_v36  ;;  %v657_v40 = vpack.c.bf16 %v605_v38, %v605_v38 }
 0x27d   : > { %v658_v35 = vpack.c.bf16 %v607_v29, %v607_v29 }
 0x27e   : > { %v727_v41 = vsel %vm725_vm2, %v2985_v39, 0 }
 0x27f   : > { %773 = vrot.lane.b32.xlu0 %v658_v35, %s2674_s21  ;;  %v664_v37 = vsel %vm659_vm1, %v658_v35, 0 }
 0x280   : > { %2311 = vmatpush3.bf16.xpose.msra.mxu1 %v664_v37 }
 0x281   : > { %2316 = vmatprep.subr.bf16.mxu1 %v2671_v6 }
 0x283   : > { %998 = vrot.lane.b32.xlu0 %v658_v35, %s2675_s22 }
 0x287   : > { %2313 = vmatmul.mubr.msk.bf16.vlgmr.msra.gmra.mrb[4].mxu1 %vm659_vm1, %v657_v40 }
 0x288   : > { %2317 = vmatpush3.bf16.msra.mxu1 %v727_v41  ;;  %2318 = vmatprep.mubr.msk.bf16.mxu1 %vm2673_vm0, %v2671_v6 }
 0x289   : > { %2322 = vmatprep.subr.bf16.mxu1 %v2671_v6 }
 0x2f1   : > { %v774_v60 = vpop.permute.xlu0 %773 }
 0x2f2   : > { %v779_v4 = vsel %vm659_vm1, %v774_v60, 0 }
 0x2f5   : > { %v999_v2 = vpop.permute.xlu0 %998 }
 0x2f6   : > { %v1004_v10 = vsel %vm659_vm1, %v999_v2, 0 }
 0x35a   : > { %v700_v44 = vpop.f32.mrb[4].mxu1 }
 0x35b   : > { %v706_v47 = vmul.f32 0.17677669, %v700_v44  ;;  %v2314_v48 = vpop.f32.mrb[5].mxu1 }
 0x35c   : > { %v703_v49 = vpop.f32.mrb[6].mxu1 }
 0x35d   : > { %v2315_v50 = vpop.f32.mrb[7].mxu1  ;;  %v707_v51 = vadd.f32 %v706_v47, %v2995_v46 }
 0x35f   : > { %v709_v52 = vsel %vm708_vm4, %v707_v51, -inf }
 0x360   : > { %710 = vmax.xlane.f32.xlu1 %v709_v52 }
 0x3ed   : > { %v711_v53 = vpop.xlane.xlu1 %710 }
 0x3ee   : > { %v712_v54 = vsub.f32 %v707_v51, %v711_v53 }
 0x3f0   : > { %v713_v55 = vmul.f32 1.442695, %v712_v54 }
 0x3f2   : > { %2499 = vpow2.f32 %v713_v55 }
 0x3fc   : > { %v2500_v56 = vpop.eup %2499 }
 0x3fd   : > { %v715_v57 = vsel %vm708_vm4, %v2500_v56, 0.0 }
 0x3fe   : > { %716 = vadd.xlane.f32.xlu1 %v715_v57 }
 0x40f   : > { %770 = vrot.lane.b32.xlu1 %v657_v40, %s2674_s21 }
 0x413   : > { %886 = vrot.lane.b32.xlu1 %v658_v35, %s2677_s1 }
 0x417   : > { %884 = vrot.lane.b32.xlu1 %v657_v40, %s2677_s1 }
 0x41b   : > { %996 = vrot.lane.b32.xlu1 %v657_v40, %s2675_s22 }
 0x48b   : > { %v717_v58 = vpop.xlane.xlu1 %716 }
 0x48c   : > { %2501 = vrcp.f32 %v717_v58 }
 0x48f   : > { %v771_v59 = vpop.permute.xlu1 %770 }
 0x493   : > { %v887_v61 = vpop.permute.xlu1 %886 }
 0x494   : > { %v892_v62 = vsel %vm659_vm1, %v887_v61, 0 }
 0x495   : > { %2335 = vmatpush3.bf16.xpose.msra.mxu0 %v892_v62 }
 0x496   : > { %v2502_v63 = vpop.eup %2501  ;;  %2346 = vmatprep.subr.bf16.mxu0 %v2671_v6 }
 0x497   : > { %v719_v0 = vmul.f32 %v2502_v63, %v2500_v56  ;;  %v885_v7 = vpop.permute.xlu1 %884 }
 0x499   : > { %v720_v3 = vpack.c.bf16 %v719_v0, %v719_v0 }
 0x49b   : > { %2319 = vmatmul.mubr.msk.bf16.vlgmr.msra.gmra.mrb[8].mxu1 %vm708_vm4, %v720_v3  ;;  %v997_v11 = vpop.permute.xlu1 %996 }
 0x49c   : > { %2323 = vmatpush3.bf16.xpose.msra.mxu1 %v779_v4  ;;  %2337 = vmatmul.mubr.msk.bf16.vlgmr.msra.gmra.mrb[4].mxu0 %vm659_vm1, %v885_v7 }
 0x49d   : > { %2347 = vmatpush3.bf16.xpose.msra.mxu0 %v1004_v10  ;;  %2324 = vmatprep.mubr.msk.bf16.mxu1 %vm2673_vm0, %v2671_v6 }
 0x49e   : > { %2348 = vmatprep.mubr.msk.bf16.mxu0 %vm2673_vm0, %v2671_v6  ;;  %2328 = vmatprep.subr.bf16.mxu1 %v2671_v6 }
 0x49f   : > { %2358 = vmatprep.subr.bf16.mxu0 %v2671_v6 }
 0x4a3   : > { %2325 = vmatmul.mubr.msk.bf16.vlgmr.msra.gmra.mrb[12].mxu1 %vm659_vm1, %v771_v59 }
 0x4a4   : > { %2349 = vmatmul.mubr.msk.bf16.vlgmr.msra.gmra.mrb[8].mxu0 %vm659_vm1, %v997_v11  ;;  %2330 = vmatprep.mubr.msk.bf16.mxu1 %vm2673_vm0, %v2671_v6 }
 0x4a5   : > { %2374 = vmatprep.mubr.msk.bf16.mxu0 %vm2673_vm0, %v2671_v6 }
 0x56e   : > { %v3022_v12 = vpop.f32.mrb[8].mxu1 }
 0x56f   : > { %v2320_v13 = vpop.f32.mrb[9].mxu1  ;;  %v928_v14 = vpop.f32.mrb[4].mxu0 }
 0x570   : > { %v934_v15 = vmul.f32 0.17677669, %v928_v14  ;;  %v766_v16 = vpop.f32.mrb[10].mxu1  ;;  %v2338_v20 = vpop.f32.mrb[5].mxu0 }
 0x571   : > { %v2321_v21 = vpop.f32.mrb[11].mxu1  ;;  %v931_v22 = vpop.f32.mrb[6].mxu0  ;;  %v1126_v16 = vld [vmem:[%s2863_s12 + $0xc] sm:$0xf] }
 0x572   : > { %v2339_v23 = vpop.f32.mrb[7].mxu0  ;;  %v935_v24 = vadd.f32 %v934_v15, %v2995_v46  ;;  %v1127_v20 = vld [vmem:[%s2863_s12 + $0x2c] sm:$0xf] }
 0x573   : > { %v1128_v21 = vld [vmem:[%s2863_s12 + $0x4c] sm:$0xf]  ;;  %v2131_v22 = vcombine.low %v1126_v16, %v1127_v20 }
 0x574   : > { %v936_v25 = vsel %vm708_vm4, %v935_v24, -inf  ;;  %v1129_v23 = vld [vmem:[%s2863_s12 + $0x6c] sm:$0xf] }
 0x575   : > { %937 = vmax.xlane.f32.xlu1 %v936_v25  ;;  %2359 = vmatpush3.bf16.msra.mxu0 %v2131_v22  ;;  %v1130_v25 = vld [vmem:[%s2863_s12 + $0x8c] sm:$0xf]  ;;  %v1264_v22 = vld [vmem:[%s2863_s12 + $0x78] sm:$0xff] }
 0x576   : > { %v815_v26 = vpop.f32.mrb[12].mxu1  ;;  %2360 = vmatprep.subr.bf16.mxu0 %v2671_v6 }
 0x577   : > { %v821_v27 = vmul.f32 0.17677669, %v815_v26  ;;  %v2326_v28 = vpop.f32.mrb[13].mxu1  ;;  %v1040_v29 = vpop.f32.mrb[8].mxu0  ;;  %v1131_v26 = vld [vmem:[%s2863_s12 + $0xac] sm:$0xf] }
 0x578   : > { %v1046_v30 = vmul.f32 0.17677669, %v1040_v29  ;;  %v818_v31 = vpop.f32.mrb[14].mxu1  ;;  %v2350_v32 = vpop.f32.mrb[9].mxu0  ;;  %v1132_v28 = vld [vmem:[%s2863_s12 + $0xcc] sm:$0xf] }
 0x579   : > { %v2327_v33 = vpop.f32.mrb[15].mxu1  ;;  %v1043_v34 = vpop.f32.mrb[10].mxu0  ;;  %v822_v35 = vadd.f32 %v821_v27, %v2995_v46  ;;  %v2133_v27 = vcombine.low %v1130_v25, %v1131_v26  ;;  %v1133_v29 = vld [vmem:[%s2863_s12 + $0xec] sm:$0xf]  ;;  %v1267_v25 = vld [vmem:[%s2863_s12 + $0xb0] sm:$0xff]  ;;  %v1266_v26 = vld [vmem:[%s2863_s12 + $0x98] sm:$0xff] }
 0x57a   : > { %v2351_v36 = vpop.f32.mrb[11].mxu0  ;;  %v1047_v38 = vadd.f32 %v1046_v30, %v2995_v46  ;;  %v2134_v30 = vcombine.low %v1132_v28, %v1133_v29  ;;  %v1134_v31 = vld [vmem:[%s2863_s12 + $0x10c] sm:$0xf] }
 0x57b   : > { %v823_v37 = vsel %vm708_vm4, %v822_v35, -inf  ;;  %v1135_v32 = vld [vmem:[%s2863_s12 + $0x12c] sm:$0xf] }
 0x57c   : > { %824 = vmax.xlane.f32.xlu0 %v823_v37  ;;  %v1048_v40 = vsel %vm708_vm4, %v1047_v38, -inf  ;;  %v2135_v33 = vcombine.low %v1134_v31, %v1135_v32  ;;  %v1136_v34 = vld [vmem:[%s2863_s12 + $0x14c] sm:$0xf] }
 0x57d   : > { %v1138_v37 = vld [vmem:[%s2863_s12 + $0x18c] sm:$0xf] }
 0x580   : > { %1049 = vmax.xlane.f32.xlu0 %v1048_v40 }
 0x602   : > { %v938_v41 = vpop.xlane.xlu1 %937 }
 0x603   : > { %v939_v42 = vsub.f32 %v935_v24, %v938_v41  ;;  %v2132_v24 = vcombine.low %v1128_v21, %v1129_v23  ;;  %v1265_v23 = vld [vmem:[%s2863_s12 + $0x90] sm:$0xff] }
 0x604   : > { %v2147_v32 = vcombine.low %v1265_v23, %v1267_v25 }
 0x605   : > { %v940_v44 = vmul.f32 1.442695, %v939_v42  ;;  %2361 = vmatpush3.bf16.msra.mxu0 %v2132_v24 }
 0x606   : > { %2362 = vmatprep.subr.bf16.mxu0 %v2671_v6 }
 0x607   : > { %2503 = vpow2.f32 %v940_v44 }
 0x609   : > { %v825_v45 = vpop.xlane.xlu0 %824  ;;  %2363 = vmatpush3.bf16.msra.mxu0 %v2133_v27  ;;  %v1268_v27 = vld [vmem:[%s2863_s12 + $0xb8] sm:$0xff] }
 0x60a   : > { %v826_v47 = vsub.f32 %v822_v35, %v825_v45  ;;  %2364 = vmatprep.subr.bf16.mxu0 %v2671_v6  ;;  %v1137_v35 = vld [vmem:[%s2863_s12 + $0x16c] sm:$0xf]  ;;  %v2150_v31 = vcombine.high %v1266_v26, %v1268_v27 }
 0x60b   : > { %v2136_v36 = vcombine.low %v1136_v34, %v1137_v35  ;;  %v1140_v45 = vld [vmem:[%s2863_s12 + $0x1cc] sm:$0xf] }
 0x60c   : > { %v827_v48 = vmul.f32 1.442695, %v826_v47  ;;  %v1141_v47 = vld [vmem:[%s2863_s12 + $0x1ec] sm:$0xf] }
 0x60d   : > { %v1050_v49 = vpop.xlane.xlu0 %1049  ;;  %2365 = vmatpush3.bf16.msra.mxu0 %v2134_v30  ;;  %v2148_v30 = vcombine.high %v1265_v23, %v1267_v25  ;;  %v1253_v23 = vsub.s32 3, %v2953_v5 }
 0x60e   : > { %2505 = vpow2.f32 %v827_v48  ;;  %v1051_v50 = vsub.f32 %v1047_v38, %v1050_v49  ;;  %2366 = vmatprep.subr.bf16.mxu0 %v2671_v6  ;;  %v1139_v38 = vld [vmem:[%s2863_s12 + $0x1ac] sm:$0xf]  ;;  %v2138_v49 = vcombine.low %v1140_v45, %v1141_v47 }
 0x60f   : > { %v2137_v40 = vcombine.low %v1138_v37, %v1139_v38  ;;  %v1269_v38 = vld [vmem:[%s2863_s12 + $0xd0] sm:$0xff] }
 0x610   : > { %v1052_v51 = vmul.f32 1.442695, %v1051_v50 }
 0x611   : > { %v2504_v52 = vpop.eup %2503  ;;  %2367 = vmatpush3.bf16.msra.mxu0 %v2135_v33  ;;  %v2149_v33 = vcombine.low %v1266_v26, %v1268_v27  ;;  %v1254_v27 = vrot.slane %v2957_v8, %v1253_v23 }
 0x612   : > { %2507 = vpow2.f32 %v1052_v51  ;;  %v942_v53 = vsel %vm708_vm4, %v2504_v52, 0.0  ;;  %2368 = vmatprep.subr.bf16.mxu0 %v2671_v6 }
 0x613   : > { %943 = vadd.xlane.f32.xlu0 %v942_v53 }
 0x615   : > { %2369 = vmatpush3.bf16.msra.mxu0 %v2136_v36 }
 0x616   : > { %2370 = vmatprep.subr.bf16.mxu0 %v2671_v6 }
 0x618   : > { %v2506_v46 = vpop.eup %2505 }
 0x619   : > { %v829_v54 = vsel %vm708_vm4, %v2506_v46, 0.0  ;;  %2371 = vmatpush3.bf16.msra.mxu0 %v2137_v40  ;;  %v1271_v40 = vld [vmem:[%s2863_s12 + $0xf0] sm:$0xff] }
 0x61a   : > { %830 = vadd.xlane.f32.xlu0 %v829_v54  ;;  %2372 = vmatprep.subr.bf16.mxu0 %v2671_v6  ;;  %v2151_v45 = vcombine.low %v1269_v38, %v1271_v40 }
 0x61c   : > { %v2508_v55 = vpop.eup %2507 }
 0x61d   : > { %v1054_v56 = vsel %vm708_vm4, %v2508_v55, 0.0  ;;  %2373 = vmatpush3.bf16.msra.mxu0 %v2138_v49  ;;  %v1273_v49 = vld [vmem:[%s2863_s12 + $0x110] sm:$0xff] }
 0x61e   : > { %1055 = vadd.xlane.f32.xlu1 %v1054_v56 }
 0x62f   : > { %948 = vrot.lane.b32.xlu1 %v2985_v39, %s2677_s1 }
 0x630   : > { %836 = vrot.lane.b32.xlu0 %v2985_v39, %s2674_s21 }
 0x633   : > { %1060 = vrot.lane.b32.xlu1 %v2985_v39, %s2675_s22 }
 0x6a0   : > { %v944_v57 = vpop.xlane.xlu0 %943 }
 0x6a7   : > { %v831_v58 = vpop.xlane.xlu0 %830 }
 0x6a8   : > { %2509 = vrcp.f32 %v831_v58 }
 0x6a9   : > { %2511 = vrcp.f32 %v944_v57 }
 0x6ab   : > { %v837_v59 = vpop.permute.xlu0 %836  ;;  %v1056_v61 = vpop.xlane.xlu1 %1055 }
 0x6ac   : > { %v842_v60 = vsel %vm725_vm2, %v837_v59, 0  ;;  %2513 = vrcp.f32 %v1056_v61 }
 0x6ad   : > { %2329 = vmatpush3.bf16.msra.mxu1 %v842_v60 }
 0x6ae   : > { %2340 = vmatprep.subr.bf16.mxu1 %v2671_v6 }
 0x6af   : > { %v949_v0 = vpop.permute.xlu1 %948 }
 0x6b0   : > { %v954_v4 = vsel %vm725_vm2, %v949_v0, 0 }
 0x6b2   : > { %v2510_v62 = vpop.eup %2509 }
 0x6b3   : > { %v833_v63 = vmul.f32 %v2510_v62, %v2506_v46  ;;  %v2512_v3 = vpop.eup %2511  ;;  %v1061_v7 = vpop.permute.xlu1 %1060 }
 0x6b4   : > { %v946_v39 = vmul.f32 %v2512_v3, %v2504_v52  ;;  %v1066_v13 = vsel %vm725_vm2, %v1061_v7, 0  ;;  %v1257_v7 = vld [vmem:[%s2863_s12 + $0x10] sm:$0xff] }
 0x6b5   : > { %v834_v2 = vpack.c.bf16 %v833_v63, %v833_v63  ;;  %v1145_v63 = vrot.slane %v2957_v8, %v425_v19 }
 0x6b6   : > { %v947_v10 = vpack.c.bf16 %v946_v39, %v946_v39  ;;  %v2514_v11 = vpop.eup %2513 }
 0x6b7   : > { %2331 = vmatmul.mubr.msk.bf16.vlgmr.msra.gmra.mrb[16].mxu1 %vm708_vm4, %v834_v2  ;;  %v1058_v14 = vmul.f32 %v2514_v11, %v2508_v55 }
 0x6b8   : > { %2341 = vmatpush3.bf16.msra.mxu1 %v954_v4  ;;  %2342 = vmatprep.mubr.msk.bf16.mxu1 %vm2673_vm0, %v2671_v6 }
 0x6b9   : > { %2352 = vmatprep.subr.bf16.mxu1 %v2671_v6  ;;  %v1059_v15 = vpack.c.bf16 %v1058_v14, %v1058_v14  ;;  %v1261_v14 = vld [vmem:[%s2863_s12 + $0x50] sm:$0xff] }
 0x6bf   : > { %2343 = vmatmul.mubr.msk.bf16.vlgmr.msra.gmra.mrb[20].mxu1 %vm708_vm4, %v947_v10  ;;  %v1258_v10 = vld [vmem:[%s2863_s12 + $0x18] sm:$0xff] }
 0x6c0   : > { %2353 = vmatpush3.bf16.msra.mxu1 %v1066_v13  ;;  %2354 = vmatprep.mubr.msk.bf16.mxu1 %vm2673_vm0, %v2671_v6  ;;  %v1260_v13 = vld [vmem:[%s2863_s12 + $0x38] sm:$0xff] }
 0x6c1   : > { %v2141_v16 = vcombine.low %v1258_v10, %v1260_v13  ;;  %v2142_v20 = vcombine.high %v1258_v10, %v1260_v13  ;;  %v1285_v10 = vld [vmem:[%s2863_s12 + $0x1d0] sm:$0xff] }
 0x6c3   : > { %1526 = vmatprep.subr.bf16.mxu0 %v2142_v20 }
 0x6c7   : > { %2355 = vmatmul.mubr.msk.bf16.vlgmr.msra.gmra.mrb[24].mxu1 %vm708_vm4, %v1059_v15  ;;  %v1263_v15 = vld [vmem:[%s2863_s12 + $0x70] sm:$0xff] }
 0x6c8   : > { %1517 = vmatprep.mubr.bf16.mxu1 %v2672_v43  ;;  %v2144_v21 = vcombine.high %v1261_v14, %v1263_v15  ;;  %v2143_v28 = vcombine.low %v1261_v14, %v1263_v15  ;;  %v1288_v14 = vld [vmem:[%s2863_s12 + $0x1f8] sm:$0xff] }
 0x78a   : > { %v878_v41 = vpop.f32.mrb[16].mxu1 }
 0x78b   : > { %1109 = vrot.lane.b32.xlu1 %v878_v41, %s2675_s22  ;;  %v2332_v42 = vpop.f32.mrb[17].mxu1  ;;  %v1270_v41 = vld [vmem:[%s2863_s12 + $0xd8] sm:$0xff] }
 0x78c   : > { %v881_v44 = vpop.f32.mrb[18].mxu1  ;;  %v2152_v42 = vcombine.high %v1269_v38, %v1271_v40  ;;  %v2473_v38 = vld [vmem:[%s2869_s8 + $0x50] sm:$0xff]  }
 0x78d   : > { %v2333_v48 = vpop.f32.mrb[19].mxu1  ;;  %v1272_v44 = vld [vmem:[%s2863_s12 + $0xf8] sm:$0xff]  ;;  %v2474_v40 = vld [vmem:[%s2869_s8 + $0xd0] sm:$0xff]  }
 0x78e   : > { %v2153_v47 = vcombine.low %v1270_v41, %v1272_v44  ;;  %v2154_v48 = vcombine.high %v1270_v41, %v1272_v44  ;;  %v2475_v41 = vld [vmem:[%s2869_s8 + $0x10] sm:$0xff]   ;;  %v2477_v44 = vld [vmem:[%s2869_s8 + $0x58] sm:$0xff]  }
 0x792   : > { %v990_v50 = vpop.f32.mrb[20].mxu1 }
 0x793   : > { %1113 = vrot.lane.b32.xlu0 %v990_v50, %s2677_s1  ;;  %v2344_v51 = vpop.f32.mrb[21].mxu1  ;;  %v1275_v50 = vld [vmem:[%s2863_s12 + $0x130] sm:$0xff] }
 0x794   : > { %v993_v52 = vpop.f32.mrb[22].mxu1  ;;  %v1274_v51 = vld [vmem:[%s2863_s12 + $0x118] sm:$0xff] }
 0x795   : > { %v2345_v53 = vpop.f32.mrb[23].mxu1  ;;  %v2156_v52 = vcombine.high %v1273_v49, %v1275_v50 }
 0x796   : > { %v1276_v53 = vld [vmem:[%s2863_s12 + $0x138] sm:$0xff] }
 0x79a   : > { %v1102_v46 = vpop.f32.mrb[24].mxu1 }
 0x79b   : > { %1117 = vrot.lane.b32.xlu1 %v1102_v46, %s2674_s21  ;;  %v2356_v54 = vpop.f32.mrb[25].mxu1  ;;  %v2155_v46 = vcombine.low %v1273_v49, %v1275_v50  ;;  %v2481_v49 = vld [vmem:[%s2869_s8 + $0x60] sm:$0xff]  }
 0x79c   : > { %v1105_v55 = vpop.f32.mrb[26].mxu1  ;;  %v2157_v54 = vcombine.low %v1274_v51, %v1276_v53  ;;  %v2482_v50 = vld [vmem:[%s2869_s8 + $0xe0] sm:$0xff]  }
 0x79d   : > { %v2357_v56 = vpop.f32.mrb[27].mxu1  ;;  %v2158_v55 = vcombine.high %v1274_v51, %v1276_v53  ;;  %v2483_v51 = vld [vmem:[%s2869_s8 + $0x20] sm:$0xff]   ;;  %v2485_v53 = vld [vmem:[%s2869_s8 + $0x68] sm:$0xff]  }
 0x79e   : > { %v1277_v56 = vld [vmem:[%s2863_s12 + $0x150] sm:$0xff] }
 0x7fd   : > { %v1110_v57 = vpop.permute.xlu1 %1109 }
 0x7fe   : > { %v1120_v58 = vsel %vm659_vm1, %v3022_v12, %v1110_v57  ;;  %v1279_v57 = vld [vmem:[%s2863_s12 + $0x170] sm:$0xff] }
 0x805   : > { %v1114_v6 = vpop.permute.xlu0 %1113 }
 0x806   : > { %v1122_v59 = vsel %vm1121_vm5, %v1120_v58, %v1114_v6  ;;  %v1278_v6 = vld [vmem:[%s2863_s12 + $0x158] sm:$0xff]  ;;  %v2160_v58 = vcombine.high %v1277_v56, %v1279_v57 }
 0x80d   : > { %v1118_v60 = vpop.permute.xlu1 %1117 }
 0x80e   : > { %v1124_v61 = vsel %vm1123_vm6, %v1122_v59, %v1118_v60  ;;  %v1280_v59 = vld [vmem:[%s2863_s12 + $0x178] sm:$0xff]  ;;  %v2159_v60 = vcombine.low %v1277_v56, %v1279_v57  ;;  %v2489_v56 = vld [vmem:[%s2869_s8 + $0x70] sm:$0xff]  }
 0x80f   : > { %v1125_v62 = vpack.c.bf16 %v1124_v61, %v1124_v61  ;;  %v2161_v61 = vcombine.low %v1278_v6, %v1280_v59  ;;  %v2490_v57 = vld [vmem:[%s2869_s8 + $0xf0] sm:$0xff]  }
 0x811   : > { %2375 = vmatmul.mubr.bf16.vlgmr.msra.gmra.mrb[12].mxu0 %v1125_v62  ;;  %v2162_v62 = vcombine.high %v1278_v6, %v1280_v59  ;;  %v2491_v6 = vld [vmem:[%s2869_s8 + $0x30] sm:$0xff]   ;;  %v2493_v59 = vld [vmem:[%s2869_s8 + $0x78] sm:$0xff]  }
 0x812   : > { %1558 = vmatprep.mubr.bf16.mxu0 %v2672_v43  ;;  %v1259_v43 = vld [vmem:[%s2863_s12 + $0x30] sm:$0xff]  ;;  %1527 = vmatpush1.bf16.msra.mxu0 %v2141_v16 }
 0x813   : > { %v2139_v19 = vcombine.low %v1257_v7, %v1259_v43  ;;  %v2140_v11 = vcombine.high %v1257_v7, %v1259_v43 }
 0x815   : > { %1485 = vmatprep.subr.bf16.mxu1 %v2140_v11  ;;  %v1286_v11 = vld [vmem:[%s2863_s12 + $0x1d8] sm:$0xff] }
 0x816   : > { %1486 = vmatpush1.bf16.msra.mxu1 %v2139_v19  ;;  %v1287_v19 = vld [vmem:[%s2863_s12 + $0x1f0] sm:$0xff]  ;;  %v2170_v16 = vcombine.high %v1286_v11, %v1288_v14  ;;  %v2169_v20 = vcombine.low %v1286_v11, %v1288_v14 }
 0x817   : > { %1487 = vmatprep.subr.bf16.mxu1 %v2144_v21  ;;  %v2168_v13 = vcombine.high %v1285_v10, %v1287_v19  ;;  %v2167_v15 = vcombine.low %v1285_v10, %v1287_v19 }
 0x81a   : > { %1488 = vmatpush1.bf16.msra.mxu1 %v2143_v28 }
 0x81b   : > { %1489 = vmatprep.subr.bf16.mxu1 %v2148_v30 }
 0x81e   : > { %1490 = vmatpush1.bf16.msra.mxu1 %v2147_v32  ;;  %v2466_v32 = vld [vmem:[%s2869_s8 + $0xc0] sm:$0xff]  }
 0x81f   : > { %1491 = vmatprep.subr.bf16.mxu1 %v2152_v42  ;;  %v2476_v42 = vld [vmem:[%s2869_s8 + $0x90] sm:$0xff]  }
 0x822   : > { %1492 = vmatpush1.bf16.msra.mxu1 %v2151_v45  ;;  %v2478_v45 = vld [vmem:[%s2869_s8 + $0xd8] sm:$0xff]  }
 0x823   : > { %1493 = vmatprep.subr.bf16.mxu1 %v2156_v52  ;;  %v2484_v52 = vld [vmem:[%s2869_s8 + $0xa0] sm:$0xff]  }
 0x826   : > { %1494 = vmatpush1.bf16.msra.mxu1 %v2155_v46  ;;  %v2486_v46 = vld [vmem:[%s2869_s8 + $0xe8] sm:$0xff]  }
 0x827   : > { %1495 = vmatprep.subr.bf16.mxu1 %v2160_v58  ;;  %v2492_v58 = vld [vmem:[%s2869_s8 + $0xb0] sm:$0xff]  }
 0x82a   : > { %1496 = vmatpush1.bf16.msra.mxu1 %v2159_v60  ;;  %v2494_v60 = vld [vmem:[%s2869_s8 + $0xf8] sm:$0xff]  }
 0x8e4   : > { %v1228_v0 = vpop.f32.mrb[12].mxu0 }
 0x8e5   : > { %v1229_v2 = vadd.f32 %v1228_v0, %v1145_v63  ;;  %v2376_v3 = vpop.f32.mrb[13].mxu0  ;;  %v1281_v63 = vld [vmem:[%s2863_s12 + $0x190] sm:$0xff] }
 0x8e6   : > { %v1231_v12 = vpop.f32.mrb[14].mxu0  ;;  %v1283_v0 = vld [vmem:[%s2863_s12 + $0x1b0] sm:$0xff] }
 0x8e7   : > { %v3085_v4 = vadd.f32 %v1229_v2, %v2900_v1  ;;  %v2377_v39 = vpop.f32.mrb[15].mxu0  ;;  %v1262_v1 = vld [vmem:[%s2863_s12 + $0x58] sm:$0xff]  ;;  %v2164_v3 = vcombine.high %v1281_v63, %v1283_v0 }
 0x8e8   : > { %v2146_v24 = vcombine.high %v1262_v1, %v1264_v22  ;;  %v2145_v29 = vcombine.low %v1262_v1, %v1264_v22  ;;  %v1282_v2 = vld [vmem:[%s2863_s12 + $0x198] sm:$0xff]  ;;  %v2163_v39 = vcombine.low %v1281_v63, %v1283_v0  ;;  %v1299_v63 = vsub.s32 5, %v2953_v5 }
 0x8e9   : > { %1235 = vadd.xlane.f32.xlu0 %v3085_v4  ;;  %v1284_v12 = vld [vmem:[%s2863_s12 + $0x1b8] sm:$0xff]  ;;  %1497 = vmatprep.subr.bf16.mxu1 %v2164_v3  ;;  %v1303_v0 = vsub.s32 7, %v2953_v5 }
 0x8ea   : > { %1528 = vmatprep.subr.bf16.mxu0 %v2146_v24  ;;  %v2165_v7 = vcombine.low %v1282_v2, %v1284_v12  ;;  %v2166_v43 = vcombine.high %v1282_v2, %v1284_v12  ;;  %1498 = vmatpush1.bf16.msra.mxu1 %v2163_v39  ;;  %v1249_v24 = vrot.slane %v2957_v8, %v421_v17  ;;  %v2467_v17 = vld [vmem:[%s2869_s8] sm:$0xff]  }
 0x8eb   : > { %1529 = vmatpush1.bf16.msra.mxu0 %v2145_v29  ;;  %1499 = vmatprep.subr.bf16.mxu1 %v2168_v13  ;;  %v1292_v2 = vrot.slane %v2972_v18, %v2960_v9  ;;  %v1300_v3 = vrot.slane %v2972_v18, %v1299_v63  ;;  %v1296_v12 = vrot.slane %v2972_v18, %v1253_v23 }
 0x8ec   : > { %1530 = vmatprep.subr.bf16.mxu0 %v2150_v31  ;;  %v2465_v31 = vld [vmem:[%s2869_s8 + $0x40] sm:$0xff]   ;;  %v1304_v39 = vrot.slane %v2972_v18, %v1303_v0 }
 0x8ed   : > { %v1316_v10 = vrot.slane %v1296_v12, %v2960_v9 }
 0x8ee   : > { %1500 = vmatpush1.bf16.msra.mxu1 %v2167_v15  ;;  %v1324_v19 = vrot.slane %v1304_v39, %v2960_v9 }
 0x8ef   : > { %1531 = vmatpush1.bf16.msra.mxu0 %v2149_v33  ;;  %v2468_v33 = vld [vmem:[%s2869_s8 + $0x80] sm:$0xff]   ;;  %2246 = vmatprep.subr.bf16.mxu1 %v2465_v31 }
 0x8f0   : > { %1532 = vmatprep.subr.bf16.mxu0 %v2154_v48  ;;  %v2480_v48 = vld [vmem:[%s2869_s8 + $0x98] sm:$0xff]  }
 0x8f3   : > { %1533 = vmatpush1.bf16.msra.mxu0 %v2153_v47  ;;  %v2479_v47 = vld [vmem:[%s2869_s8 + $0x18] sm:$0xff]  }
 0x8f4   : > { %1534 = vmatprep.subr.bf16.mxu0 %v2158_v55  ;;  %v2488_v55 = vld [vmem:[%s2869_s8 + $0xa8] sm:$0xff]  }
 0x8f7   : > { %1535 = vmatpush1.bf16.msra.mxu0 %v2157_v54  ;;  %v2487_v54 = vld [vmem:[%s2869_s8 + $0x28] sm:$0xff]  }
 0x8f8   : > { %1536 = vmatprep.subr.bf16.mxu0 %v2162_v62  ;;  %v2496_v62 = vld [vmem:[%s2869_s8 + $0xb8] sm:$0xff]  }
 0x8fb   : > { %1537 = vmatpush1.bf16.msra.mxu0 %v2161_v61  ;;  %v2495_v61 = vld [vmem:[%s2869_s8 + $0x38] sm:$0xff]  }
 0x8fc   : > { %1538 = vmatprep.subr.bf16.mxu0 %v2166_v43  ;;  %v1320_v43 = vrot.slane %v1300_v3, %v2960_v9 }
 0x8ff   : > { %1539 = vmatpush1.bf16.msra.mxu0 %v2165_v7  ;;  %v1312_v7 = vrot.slane %v1292_v2, %v2960_v9 }
 0x900   : > { %1540 = vmatprep.subr.bf16.mxu0 %v2170_v16 }
 0x903   : > { %1541 = vmatpush1.bf16.msra.mxu0 %v2169_v20 }
 0x904   : > { %2268 = vmatprep.subr.bf16.mxu0 %v2466_v32 }
 0x976   : > { %v1236_v34 = vpop.xlane.xlu0 %1235 }
 0x977   : > { %v1237_v35 = vmul.f32 0.0078125, %v1236_v34  ;;  %v2469_v34 = vld [vmem:[%s2869_s8 + $0x48] sm:$0xff]  }
 0x979   : > { %v3101_v36 = vsub.f32 %v3085_v4, %v1237_v35  ;;  %v2470_v35 = vld [vmem:[%s2869_s8 + $0xc8] sm:$0xff]  }
 0x97b   : > { %v1239_v37 = vmul.f32 %v3101_v36, %v3101_v36 }
 0x97d   : > { %1240 = vadd.xlane.f32.xlu1 %v1239_v37  ;;  %v2472_v37 = vld [vmem:[%s2869_s8 + $0x88] sm:$0xff]  }
 0xa0a   : > { %v1241_v21 = vpop.xlane.xlu1 %1240 }
 0xa0b   : > { %v1242_v1 = vmul.f32 0.0078125, %v1241_v21 }
 0xa0d   : > { %v1243_v22 = vadd.f32 1e-05, %v1242_v1 }
 0xa0f   : > { %2515 = vrsqrt.f32 %v1243_v22 }
 0xa19   : > { %v2516_v25 = vpop.eup %2515 }
 0xa1a   : > { %v1245_v26 = vmul.f32 %v2516_v25, %v3101_v36  ;;  %v2471_v36 = vld [vmem:[%s2869_s8 + $0x8] sm:$0xff]  }
 0xa1c   : > { %v1250_v28 = vmul.f32 %v1249_v24, %v1245_v26 }
 0xa1e   : > { %v1255_v29 = vadd.f32 %v1254_v27, %v1250_v28 }
 0xa20   : > { %v1256_v30 = vpack.c.bf16 %v1255_v29, %v1255_v29 }
 0xa22   : > { %1518 = vmatmul.mubr.bf16.vlgmr.msra.gmra.mrb[28].mxu1 %v1256_v30  ;;  %1559 = vmatmul.mubr.bf16.vlgmr.msra.gmra.mrb[16].mxu0 %v1256_v30 }
 0xa23   : > { %2247 = vmatpush3.bf16.msra.mxu1 %v2467_v17  ;;  %2269 = vmatpush3.bf16.msra.mxu0 %v2468_v33 }
 0xa24   : > { %2248 = vmatprep.subr.bf16.mxu1 %v2469_v34  ;;  %2270 = vmatprep.subr.bf16.mxu0 %v2470_v35 }
 0xa27   : > { %2249 = vmatpush3.bf16.msra.mxu1 %v2471_v36  ;;  %2271 = vmatpush3.bf16.msra.mxu0 %v2472_v37 }
 0xa28   : > { %2250 = vmatprep.subr.bf16.mxu1 %v2473_v38  ;;  %2272 = vmatprep.subr.bf16.mxu0 %v2474_v40 }
 0xa2b   : > { %2251 = vmatpush3.bf16.msra.mxu1 %v2475_v41  ;;  %2273 = vmatpush3.bf16.msra.mxu0 %v2476_v42 }
 0xa2c   : > { %2252 = vmatprep.subr.bf16.mxu1 %v2477_v44  ;;  %2274 = vmatprep.subr.bf16.mxu0 %v2478_v45 }
 0xa2f   : > { %2253 = vmatpush3.bf16.msra.mxu1 %v2479_v47  ;;  %2275 = vmatpush3.bf16.msra.mxu0 %v2480_v48 }
 0xa30   : > { %2254 = vmatprep.subr.bf16.mxu1 %v2481_v49  ;;  %2276 = vmatprep.subr.bf16.mxu0 %v2482_v50 }
 0xa33   : > { %2255 = vmatpush3.bf16.msra.mxu1 %v2483_v51  ;;  %2277 = vmatpush3.bf16.msra.mxu0 %v2484_v52 }
 0xa34   : > { %2256 = vmatprep.subr.bf16.mxu1 %v2485_v53  ;;  %2278 = vmatprep.subr.bf16.mxu0 %v2486_v46 }
 0xa37   : > { %2257 = vmatpush3.bf16.msra.mxu1 %v2487_v54  ;;  %2279 = vmatpush3.bf16.msra.mxu0 %v2488_v55  ;;  %v1670_v54 = vrot.slane %v2957_v8, %v1299_v63 }
 0xa38   : > { %2258 = vmatprep.subr.bf16.mxu1 %v2489_v56  ;;  %2280 = vmatprep.subr.bf16.mxu0 %v2490_v57 }
 0xa3b   : > { %2259 = vmatpush3.bf16.msra.mxu1 %v2491_v6  ;;  %2281 = vmatpush3.bf16.msra.mxu0 %v2492_v58 }
 0xa3c   : > { %2260 = vmatprep.subr.bf16.mxu1 %v2493_v59  ;;  %2282 = vmatprep.subr.bf16.mxu0 %v2494_v60 }
 0xa3f   : > { %2261 = vmatpush3.bf16.msra.mxu1 %v2495_v61  ;;  %2283 = vmatpush3.bf16.msra.mxu0 %v2496_v62 }
 0xaf5   : > { %v1519_v11 = vpop.f32.mrb[28].mxu1  ;;  %v1560_v13 = vpop.f32.mrb[16].mxu0 }
 0xaf6   : > { %v1520_v14 = vadd.f32 %v1519_v11, %v1312_v7  ;;  %v1561_v15 = vadd.f32 %v1560_v13, %v1320_v43  ;;  %v1521_v16 = vpop.f32.mrb[29].mxu1  ;;  %v1562_v20 = vpop.f32.mrb[17].mxu0 }
 0xaf7   : > { %v1522_v21 = vadd.f32 %v1521_v16, %v1316_v10  ;;  %v1563_v1 = vadd.f32 %v1562_v20, %v1324_v19  ;;  %v1523_v22 = vpop.f32.mrb[30].mxu1  ;;  %v1564_v23 = vpop.f32.mrb[18].mxu0 }
 0xaf8   : > { %v2171_v24 = vmul.f32 -1.702, %v1520_v14  ;;  %v2173_v18 = vmul.f32 -1.702, %v1561_v15  ;;  %v1524_v25 = vpop.f32.mrb[31].mxu1  ;;  %v1565_v26 = vpop.f32.mrb[19].mxu0 }
 0xaf9   : > { %v2172_v27 = vmul.f32 -1.702, %v1522_v21  ;;  %v2174_v28 = vmul.f32 -1.702, %v1563_v1 }
 0xafa   : > { %v1575_v29 = vmul.f32 1.442695, %v2171_v24  ;;  %v1579_v30 = vmul.f32 1.442695, %v2173_v18 }
 0xafb   : > { %v1577_v31 = vmul.f32 1.442695, %v2172_v27  ;;  %v1581_v9 = vmul.f32 1.442695, %v2174_v28 }
 0xafc   : > { %2517 = vpow2.f32 %v1575_v29 }
 0xafd   : > { %2519 = vpow2.f32 %v1579_v30 }
 0xafe   : > { %2521 = vpow2.f32 %v1577_v31 }
 0xaff   : > { %2523 = vpow2.f32 %v1581_v9 }
 0xb06   : > { %v2518_v32 = vpop.eup %2517 }
 0xb07   : > { %v2520_v17 = vpop.eup %2519  ;;  %v1583_v33 = vadd.f32 1.0, %v2518_v32 }
 0xb08   : > { %v2522_v34 = vpop.eup %2521  ;;  %v1585_v35 = vadd.f32 1.0, %v2520_v17 }
 0xb09   : > { %v2524_v36 = vpop.eup %2523  ;;  %2525 = vrcp.f32 %v1583_v33  ;;  %v1584_v37 = vadd.f32 1.0, %v2522_v34 }
 0xb0a   : > { %2527 = vrcp.f32 %v1585_v35  ;;  %v1586_v38 = vadd.f32 1.0, %v2524_v36 }
 0xb0b   : > { %2529 = vrcp.f32 %v1584_v37 }
 0xb0c   : > { %2531 = vrcp.f32 %v1586_v38 }
 0xb13   : > { %v2526_v40 = vpop.eup %2525 }
 0xb14   : > { %v2528_v41 = vpop.eup %2527  ;;  %v1595_v44 = vmul.f32 %v2526_v40, %v1520_v14 }
 0xb15   : > { %v2530_v42 = vpop.eup %2529  ;;  %v1597_v47 = vmul.f32 %v2528_v41, %v1561_v15 }
 0xb16   : > { %v2532_v45 = vpop.eup %2531  ;;  %v1596_v48 = vmul.f32 %v2530_v42, %v1522_v21  ;;  %v1599_v51 = vpack.c.bf16 %v1595_v44, %v1595_v44 }
 0xb17   : > { %v1598_v49 = vmul.f32 %v2532_v45, %v1563_v1  ;;  %v1601_v53 = vpack.c.bf16 %v1597_v47, %v1597_v47 }
 0xb18   : > { %v1600_v50 = vpack.c.bf16 %v1596_v48, %v1596_v48 }
 0xb19   : > { %v1602_v52 = vpack.c.bf16 %v1598_v49, %v1598_v49 }
 0xb1a   : > { %1895 = vmatprep.mubr.bf16.mxu1 %v1600_v50 }
 0xb1b   : > { %1935 = vmatprep.mubr.bf16.mxu0 %v1602_v52  ;;  %1896 = vmatmul.mubr.bf16.vlgmr.msra.gmra.mrb[32].mxu1 %v1599_v51 }
 0xb1c   : > { %1936 = vmatmul.mubr.bf16.vlgmr.msra.gmra.mrb[20].mxu0 %v1601_v53 }
 0xbee   : > { %v2262_v46 = vpop.f32.mrb[32].mxu1 }
 0xbef   : > { %v2284_v55 = vpop.f32.mrb[20].mxu0  ;;  %v2263_v56 = vpop.f32.mrb[33].mxu1 }
 0xbf0   : > { %v2264_v57 = vadd.f32 %v2263_v56, %v2262_v46  ;;  %v2285_v6 = vpop.f32.mrb[21].mxu0  ;;  %v2265_v58 = vpop.f32.mrb[34].mxu1 }
 0xbf1   : > { %v2286_v59 = vadd.f32 %v2285_v6, %v2284_v55  ;;  %v2287_v60 = vpop.f32.mrb[22].mxu0  ;;  %v2266_v61 = vpop.f32.mrb[35].mxu1 }
 0xbf2   : > { %v1898_v62 = vadd.f32 %v2264_v57, %v1670_v54  ;;  %v2288_v0 = vpop.f32.mrb[23].mxu0 }
 0xbf4   : > { %v1938_v2 = vadd.f32 %v2286_v59, %v1898_v62 }
 0xbf6   : > { %v1943_v3 = vadd.f32 %v1938_v2, %v3085_v4 }
 0xbf8   : > { %1944 = vst [vmem:[%s2895_s2] sm:$0xff] %v1943_v3 }
 0xbf9 PF: > { %s21_s25 = sadd.s32 1, %s2663_s25   ;;  %s3225_s18 = smov %s2639_s19 }
 0xbfa   : > { %p18_p8 = scmp.ge.s32.totalorder %s21_s25, 6   ;;  %s3226_s19 = smov %s2643_s20 }
 0xbfb   : > { %s3227_s20 = smov %s2766_s7  ;;  %s3228_s21 = smov %s2655_s23 }
 0xbfc   : > { %s3229_s22 = smov %s2659_s24  ;;  %s3230_s23 = smov %s3233_s27 }
 0xbfd   : > { %s3231_s24 = smov %s3237_s28  ;;  %20 = sbr.rel (!%p18_p8) target bundleno = 10 (0xa), region = 106 }
 0xc04   :  { %1964 = vsyncpa [#allocation3], 1 }
 0xc05   :  { %1966 = vsyncpa [#allocation3 + $0x1], 1 }
 0xc06   :  { %1967 = vsyncpa [#allocation5], 1 }
 0xc07   :  { %1969 = vsyncpa [#allocation5 + $0x1], 1 }

// kernel: clip_transformer_forward.8
= control target key start
LH: loop header
LB: loop body
LE: loop exit
PB: predicated region body
PF: predicated region fallthrough
CT: control target
= control target key end

     0   :  { %v493_v0 = vmov 0   ;;  %vm156_vm0 = vcmask 523264   ;;  %vm235_vm1 = vcmask 1043456   ;;  %vm382_vm2 = vcmask 1040384   ;;  %s755_s1 = inlined_call_operand.vmem [shape: bf16[192,128], index: 1, kind: input, shape index: {}]   ;;  %s756_s0 = inlined_call_operand.vmem [shape: f32[8,4,192], index: 0, kind: input, shape index: {}]   ;;  %s757_s3 = inlined_call_operand.vmem [shape: f32[5,128], index: 3, kind: input, shape index: {}]   ;;  %s758_s2 = inlined_call_operand.vmem [shape: f32[1,128], index: 2, kind: input, shape index: {}]   ;;  %s759_s4 = inlined_call_operand.vmem [shape: f32[1,128], index: 4, kind: input, shape index: {}]   ;;  %s760_s5 = inlined_call_operand.vmem [shape: f32[1,128], index: 5, kind: input, shape index: {}]   ;;  %s761_s6 = inlined_call_operand.vmem [shape: f32[8,5,128], index: 6, kind: output, shape index: {}]  }
   0x1   :  { %163 = vmatprep.subr.bf16.mxu0 %v493_v0  ;;  %426 = vmatprep.subr.bf16.mxu1 %v493_v0  ;;  %v451_v1 = vld [vmem:[%s755_s1] sm:$0xff]   ;;  %v452_v2 = vld [vmem:[%s755_s1 + $0x8] sm:$0xff]   ;;  %v453_v3 = vld [vmem:[%s755_s1 + $0x10] sm:$0xff]  }
   0x2   :  { %164 = vmatpush1.bf16.msra.mxu0 %v451_v1  ;;  %438 = vmatpush1.bf16.msra.mxu1 %v451_v1  ;;  %v454_v4 = vld [vmem:[%s755_s1 + $0x18] sm:$0xff]   ;;  %v465_v5 = vld [vmem:[%s756_s0 + $0x4] ss:$8 sps:$4 sm:$0xff]   ;;  %v457_v13 = vld [vmem:[%s755_s1 + $0x30] sm:$0xff]  }
   0x3   :  { %165 = vmatprep.subr.bf16.mxu0 %v493_v0  ;;  %427 = vmatprep.subr.bf16.mxu1 %v493_v0  ;;  %v455_v6 = vld [vmem:[%s755_s1 + $0x20] sm:$0xff]   ;;  %v468_v7 = vld [vmem:[%s756_s0 + $0x14] ss:$8 sps:$4 sm:$0xff]   ;;  %v456_v11 = vld [vmem:[%s755_s1 + $0x28] sm:$0xff]  }
   0x4   :  { %v57_v8 = vpack.c.bf16 %v468_v7, %v465_v5  ;;  %v471_v9 = vld [vmem:[%s756_s0 + $0x24] ss:$8 sps:$4 sm:$0xff]   ;;  %v474_v10 = vld [vmem:[%s756_s0 + $0x34] ss:$8 sps:$4 sm:$0xff]   ;;  %v463_v18 = vld [vmem:[%s756_s0] ss:$8 sps:$4 sm:$0xff]  }
   0x5   :  { %v59_v12 = vpack.c.bf16 %v474_v10, %v471_v9  ;;  %v458_v14 = vld [vmem:[%s755_s1 + $0x38] sm:$0xff]   ;;  %v459_v15 = vld [vmem:[%s755_s1 + $0x40] sm:$0xff]   ;;  %v460_v16 = vld [vmem:[%s755_s1 + $0x48] sm:$0xff]  }
   0x6   :  { %166 = vmatpush1.bf16.msra.mxu0 %v452_v2  ;;  %439 = vmatpush1.bf16.msra.mxu1 %v452_v2  ;;  %v461_v17 = vld [vmem:[%s755_s1 + $0x50] sm:$0xff]   ;;  %v469_v20 = vld [vmem:[%s756_s0 + $0x20] ss:$8 sps:$4 sm:$0xff]   ;;  %v462_v22 = vld [vmem:[%s755_s1 + $0x58] sm:$0xff]  }
   0x7   :  { %167 = vmatprep.subr.bf16.mxu0 %v493_v0  ;;  %428 = vmatprep.subr.bf16.mxu1 %v493_v0  ;;  %v466_v19 = vld [vmem:[%s756_s0 + $0x10] ss:$8 sps:$4 sm:$0xff]   ;;  %v224_v25 = vld [vmem:[%s757_s3 + $0x1] sm:$0xf]  ;;  %v377_v48 = vld [vmem:[%s758_s2] sm:$0x1] }
   0x8   :  { %422 = vmatprep.mubr.msk.bf16.mxu0 %vm156_vm0, %v57_v8  ;;  %423 = vmatprep.mubr.msk.bf16.mxu1 %vm156_vm0, %v59_v12  ;;  %v472_v21 = vld [vmem:[%s756_s0 + $0x30] ss:$8 sps:$4 sm:$0xff]   ;;  %v56_v23 = vpack.c.bf16 %v466_v19, %v463_v18  ;;  %v378_v49 = vld [vmem:[%s757_s3] sm:$0x1] }
   0x9   :  { %v58_v24 = vpack.c.bf16 %v472_v21, %v469_v20  ;;  %v379_v52 = vadd.f32 %v378_v49, %v377_v48 }
   0xa   :  { %168 = vmatpush1.bf16.msra.mxu0 %v453_v3  ;;  %440 = vmatpush1.bf16.msra.mxu1 %v453_v3 }
   0xb   :  { %169 = vmatprep.subr.bf16.mxu0 %v493_v0  ;;  %429 = vmatprep.subr.bf16.mxu1 %v493_v0  ;;  %v383_v56 = vsel %vm382_vm2, %v379_v52, 0.0 }
   0xe   :  { %170 = vmatpush1.bf16.msra.mxu0 %v454_v4  ;;  %441 = vmatpush1.bf16.msra.mxu1 %v454_v4 }
   0xf   :  { %171 = vmatprep.subr.bf16.mxu0 %v493_v0  ;;  %430 = vmatprep.subr.bf16.mxu1 %v493_v0 }
  0x12   :  { %172 = vmatpush1.bf16.msra.mxu0 %v455_v6  ;;  %442 = vmatpush1.bf16.msra.mxu1 %v455_v6 }
  0x13   :  { %173 = vmatprep.subr.bf16.mxu0 %v493_v0  ;;  %431 = vmatprep.subr.bf16.mxu1 %v493_v0 }
  0x16   :  { %174 = vmatpush1.bf16.msra.mxu0 %v456_v11  ;;  %443 = vmatpush1.bf16.msra.mxu1 %v456_v11 }
  0x17   :  { %175 = vmatprep.subr.bf16.mxu0 %v493_v0  ;;  %432 = vmatprep.subr.bf16.mxu1 %v493_v0 }
  0x1a   :  { %176 = vmatpush1.bf16.msra.mxu0 %v457_v13  ;;  %444 = vmatpush1.bf16.msra.mxu1 %v457_v13 }
  0x1b   :  { %177 = vmatprep.subr.bf16.mxu0 %v493_v0  ;;  %433 = vmatprep.subr.bf16.mxu1 %v493_v0 }
  0x1e   :  { %178 = vmatpush1.bf16.msra.mxu0 %v458_v14  ;;  %445 = vmatpush1.bf16.msra.mxu1 %v458_v14 }
  0x1f   :  { %179 = vmatprep.subr.bf16.mxu0 %v493_v0  ;;  %434 = vmatprep.subr.bf16.mxu1 %v493_v0 }
  0x22   :  { %180 = vmatpush1.bf16.msra.mxu0 %v459_v15  ;;  %446 = vmatpush1.bf16.msra.mxu1 %v459_v15 }
  0x23   :  { %181 = vmatprep.subr.bf16.mxu0 %v493_v0  ;;  %435 = vmatprep.subr.bf16.mxu1 %v493_v0 }
  0x26   :  { %182 = vmatpush1.bf16.msra.mxu0 %v460_v16  ;;  %447 = vmatpush1.bf16.msra.mxu1 %v460_v16 }
  0x27   :  { %183 = vmatprep.subr.bf16.mxu0 %v493_v0  ;;  %436 = vmatprep.subr.bf16.mxu1 %v493_v0 }
  0x2a   :  { %184 = vmatpush1.bf16.msra.mxu0 %v461_v17  ;;  %448 = vmatpush1.bf16.msra.mxu1 %v461_v17 }
  0x2b   :  { %185 = vmatprep.subr.bf16.mxu0 %v493_v0  ;;  %437 = vmatprep.subr.bf16.mxu1 %v493_v0 }
  0x2e   :  { %186 = vmatpush1.bf16.msra.mxu0 %v462_v22  ;;  %449 = vmatpush1.bf16.msra.mxu1 %v462_v22 }
  0x31   :  { %196 = vmatmul.mubr.bf16.vlgmr.msra.gmra.mrb[0].mxu0 %v56_v23  ;;  %204 = vmatmul.mubr.bf16.vlgmr.msra.gmra.mrb[0].mxu1 %v58_v24 }
 0x104   :  { %v197_v26 = vpop.f32.mrb[0].mxu0  ;;  %v205_v27 = vpop.f32.mrb[0].mxu1 }
 0x105   :  { %v199_v28 = vpop.f32.mrb[1].mxu0  ;;  %v218_v29 = vcombine.high %v205_v27, %v205_v27  ;;  %v229_v30 = vadd.f32 %v224_v25, %v205_v27  ;;  %v207_v31 = vpop.f32.mrb[1].mxu1  ;;  %v225_v32 = vadd.f32 %v224_v25, %v197_v26  ;;  %v216_v35 = vcombine.high %v197_v26, %v197_v26 }
 0x106   :  { %v200_v33 = vpop.f32.mrb[2].mxu0  ;;  %v208_v34 = vpop.f32.mrb[2].mxu1 }
 0x107   :  { %v202_v36 = vpop.f32.mrb[3].mxu0  ;;  %v210_v37 = vpop.f32.mrb[3].mxu1  ;;  %v236_v38 = vsel %vm235_vm1, %v225_v32, 0.0  ;;  %v227_v39 = vadd.f32 %v224_v25, %v200_v33  ;;  %v230_v40 = vadd.f32 %v224_v25, %v218_v29  ;;  %v248_v41 = vsel %vm235_vm1, %v229_v30, 0.0 }
 0x108   :  { %237 = vadd.xlane.f32.xlu0 %v236_v38  ;;  %v217_v42 = vcombine.high %v200_v33, %v200_v33  ;;  %v226_v44 = vadd.f32 %v224_v25, %v216_v35  ;;  %v219_v46 = vcombine.high %v208_v34, %v208_v34  ;;  %v231_v50 = vadd.f32 %v224_v25, %v208_v34 }
 0x109   :  { %v242_v43 = vsel %vm235_vm1, %v227_v39, 0.0  ;;  %v251_v45 = vsel %vm235_vm1, %v230_v40, 0.0 }
 0x10a   :  { %243 = vadd.xlane.f32.xlu1 %v242_v43  ;;  %v228_v47 = vadd.f32 %v224_v25, %v217_v42  ;;  %v239_v51 = vsel %vm235_vm1, %v226_v44, 0.0  ;;  %v232_v54 = vadd.f32 %v224_v25, %v219_v46  ;;  %v254_v55 = vsel %vm235_vm1, %v231_v50, 0.0 }
 0x10c   :  { %249 = vadd.xlane.f32.xlu0 %v248_v41  ;;  %v245_v53 = vsel %vm235_vm1, %v228_v47, 0.0  ;;  %v257_v57 = vsel %vm235_vm1, %v232_v54, 0.0 }
 0x10e   :  { %252 = vadd.xlane.f32.xlu1 %v251_v45 }
 0x110   :  { %240 = vadd.xlane.f32.xlu0 %v239_v51 }
 0x112   :  { %246 = vadd.xlane.f32.xlu1 %v245_v53 }
 0x114   :  { %255 = vadd.xlane.f32.xlu0 %v254_v55 }
 0x116   :  { %258 = vadd.xlane.f32.xlu1 %v257_v57 }
 0x118   :  { %384 = vadd.xlane.f32.xlu0 %v383_v56  ;;  %v424_v56 = vld [vmem:[%s759_s4] ss:$0 sm:$0xff] }
 0x195   :  { %v238_v58 = vpop.xlane.xlu0 %237 }
 0x196   :  { %v261_v59 = vmul.f32 0.0078125, %v238_v58 }
 0x197   :  { %v244_v61 = vpop.xlane.xlu1 %243 }
 0x198   :  { %v631_v60 = vsub.f32 %v225_v32, %v261_v59  ;;  %v263_v62 = vmul.f32 0.0078125, %v244_v61 }
 0x199   :  { %v250_v63 = vpop.xlane.xlu0 %249 }
 0x19a   :  { %v265_v0 = vmul.f32 0.0078125, %v250_v63  ;;  %v277_v1 = vmul.f32 %v631_v60, %v631_v60  ;;  %v635_v2 = vsub.f32 %v227_v39, %v263_v62  ;;  %v683_v63 = vld [vmem:[%s760_s5] ss:$0 sm:$0xff] }
 0x19b   :  { %v253_v4 = vpop.xlane.xlu1 %252 }
 0x19c   :  { %v637_v3 = vsub.f32 %v229_v30, %v265_v0  ;;  %v285_v5 = vsel %vm235_vm1, %v277_v1, 0.0  ;;  %v266_v6 = vmul.f32 0.0078125, %v253_v4  ;;  %v279_v14 = vmul.f32 %v635_v2, %v635_v2 }
 0x19d   :  { %v241_v7 = vpop.xlane.xlu0 %240  ;;  %286 = vadd.xlane.f32.xlu1 %v285_v5 }
 0x19e   :  { %v262_v8 = vmul.f32 0.0078125, %v241_v7  ;;  %v281_v9 = vmul.f32 %v637_v3, %v637_v3  ;;  %v642_v10 = vsub.f32 %v230_v40, %v266_v6  ;;  %v291_v24 = vsel %vm235_vm1, %v279_v14, 0.0 }
 0x19f   :  { %v247_v12 = vpop.xlane.xlu1 %246 }
 0x1a0   :  { %v644_v11 = vsub.f32 %v226_v44, %v262_v8  ;;  %v297_v13 = vsel %vm235_vm1, %v281_v9, 0.0  ;;  %v264_v15 = vmul.f32 0.0078125, %v247_v12  ;;  %v282_v19 = vmul.f32 %v642_v10, %v642_v10 }
 0x1a1   :  { %v256_v16 = vpop.xlane.xlu0 %255  ;;  %298 = vadd.xlane.f32.xlu1 %v297_v13 }
 0x1a2   :  { %v267_v17 = vmul.f32 0.0078125, %v256_v16  ;;  %v278_v18 = vmul.f32 %v644_v11, %v644_v11  ;;  %v653_v20 = vsub.f32 %v228_v47, %v264_v15  ;;  %v300_v29 = vsel %vm235_vm1, %v282_v19, 0.0 }
 0x1a3   :  { %v259_v22 = vpop.xlane.xlu1 %258 }
 0x1a4   :  { %v655_v21 = vsub.f32 %v231_v50, %v267_v17  ;;  %v288_v23 = vsel %vm235_vm1, %v278_v18, 0.0  ;;  %v268_v25 = vmul.f32 0.0078125, %v259_v22  ;;  %v280_v33 = vmul.f32 %v653_v20, %v653_v20 }
 0x1a5   :  { %289 = vadd.xlane.f32.xlu0 %v288_v23  ;;  %v385_v26 = vpop.xlane.xlu0 %384  ;;  %292 = vadd.xlane.f32.xlu1 %v291_v24 }
 0x1a6   :  { %v386_v27 = vmul.f32 0.0078125, %v385_v26  ;;  %v283_v28 = vmul.f32 %v655_v21, %v655_v21  ;;  %v662_v30 = vsub.f32 %v232_v54, %v268_v25  ;;  %v294_v36 = vsel %vm235_vm1, %v280_v33, 0.0 }
 0x1a8   :  { %v664_v31 = vsub.f32 %v379_v52, %v386_v27  ;;  %v303_v32 = vsel %vm235_vm1, %v283_v28, 0.0  ;;  %v284_v37 = vmul.f32 %v662_v30, %v662_v30 }
 0x1a9   :  { %301 = vadd.xlane.f32.xlu0 %v300_v29  ;;  %304 = vadd.xlane.f32.xlu1 %v303_v32 }
 0x1aa   :  { %v388_v34 = vmul.f32 %v664_v31, %v664_v31  ;;  %v306_v38 = vsel %vm235_vm1, %v284_v37, 0.0  ;;  %v381_v37 = vld [vmem:[%s760_s5] sm:$0x1] }
 0x1ac   :  { %v389_v35 = vsel %vm382_vm2, %v388_v34, 0.0 }
 0x1ad   :  { %390 = vadd.xlane.f32.xlu1 %v389_v35  ;;  %295 = vadd.xlane.f32.xlu0 %v294_v36 }
 0x1b1   :  { %307 = vadd.xlane.f32.xlu0 %v306_v38 }
 0x22a   :  { %v287_v39 = vpop.xlane.xlu1 %286 }
 0x22b   :  { %v309_v40 = vmul.f32 0.0078125, %v287_v39 }
 0x22d   :  { %v317_v41 = vadd.f32 1e-05, %v309_v40 }
 0x22e   :  { %v299_v42 = vpop.xlane.xlu1 %298 }
 0x22f   :  { %475 = vrsqrt.f32 %v317_v41  ;;  %v313_v43 = vmul.f32 0.0078125, %v299_v42 }
 0x231   :  { %v321_v44 = vadd.f32 1e-05, %v313_v43 }
 0x232   :  { %v290_v45 = vpop.xlane.xlu0 %289  ;;  %v293_v46 = vpop.xlane.xlu1 %292 }
 0x233   :  { %477 = vrsqrt.f32 %v321_v44  ;;  %v310_v47 = vmul.f32 0.0078125, %v290_v45  ;;  %v311_v48 = vmul.f32 0.0078125, %v293_v46 }
 0x235   :  { %v318_v49 = vadd.f32 1e-05, %v310_v47  ;;  %v319_v50 = vadd.f32 1e-05, %v311_v48 }
 0x236   :  { %v302_v51 = vpop.xlane.xlu0 %301  ;;  %v305_v52 = vpop.xlane.xlu1 %304 }
 0x237   :  { %479 = vrsqrt.f32 %v318_v49  ;;  %v314_v53 = vmul.f32 0.0078125, %v302_v51  ;;  %v315_v54 = vmul.f32 0.0078125, %v305_v52 }
 0x238   :  { %481 = vrsqrt.f32 %v319_v50 }
 0x239   :  { %v476_v55 = vpop.eup %475  ;;  %v322_v57 = vadd.f32 1e-05, %v314_v53  ;;  %v323_v58 = vadd.f32 1e-05, %v315_v54 }
 0x23a   :  { %v333_v59 = vmul.f32 %v476_v55, %v631_v60  ;;  %v296_v61 = vpop.xlane.xlu0 %295  ;;  %v391_v62 = vpop.xlane.xlu1 %390 }
 0x23b   :  { %483 = vrsqrt.f32 %v322_v57  ;;  %v312_v0 = vmul.f32 0.0078125, %v296_v61  ;;  %v392_v1 = vmul.f32 0.0078125, %v391_v62 }
 0x23c   :  { %v347_v4 = vmul.f32 %v424_v56, %v333_v59  ;;  %485 = vrsqrt.f32 %v323_v58 }
 0x23d   :  { %v478_v5 = vpop.eup %477  ;;  %v320_v6 = vadd.f32 1e-05, %v312_v0  ;;  %v393_v7 = vadd.f32 1e-05, %v392_v1 }
 0x23e   :  { %v361_v8 = vadd.f32 %v683_v63, %v347_v4  ;;  %v337_v9 = vmul.f32 %v478_v5, %v637_v3  ;;  %v308_v60 = vpop.xlane.xlu0 %307 }
 0x23f   :  { %487 = vrsqrt.f32 %v320_v6  ;;  %v316_v12 = vmul.f32 0.0078125, %v308_v60 }
 0x240   :  { %369 = vst [vmem:[%s761_s6 + $0x1] sm:$0xf] %v361_v8  ;;  %v351_v13 = vmul.f32 %v424_v56, %v337_v9  ;;  %489 = vrsqrt.f32 %v393_v7 }
 0x241   :  { %v480_v14 = vpop.eup %479  ;;  %v324_v15 = vadd.f32 1e-05, %v316_v12 }
 0x242   :  { %v482_v16 = vpop.eup %481  ;;  %v365_v17 = vadd.f32 %v683_v63, %v351_v13  ;;  %v334_v18 = vmul.f32 %v480_v14, %v644_v11 }
 0x243   :  { %v335_v19 = vmul.f32 %v482_v16, %v635_v2  ;;  %491 = vrsqrt.f32 %v324_v15 }
 0x244   :  { %373 = vst [vmem:[%s761_s6 + $0x21] sm:$0xf] %v365_v17  ;;  %v348_v3 = vmul.f32 %v424_v56, %v334_v18 }
 0x245   :  { %v484_v22 = vpop.eup %483  ;;  %v349_v23 = vmul.f32 %v424_v56, %v335_v19 }
 0x246   :  { %v486_v24 = vpop.eup %485  ;;  %v362_v25 = vadd.f32 %v683_v63, %v348_v3  ;;  %v338_v26 = vmul.f32 %v484_v22, %v642_v10 }
 0x247   :  { %v363_v27 = vadd.f32 %v683_v63, %v349_v23  ;;  %v339_v28 = vmul.f32 %v486_v24, %v655_v21  ;;  %v380_v21 = vld [vmem:[%s759_s4] sm:$0x1] }
 0x248   :  { %370 = vst [vmem:[%s761_s6 + $0x9] sm:$0xf] %v362_v25  ;;  %v352_v2 = vmul.f32 %v424_v56, %v338_v26 }
 0x249   :  { %v488_v11 = vpop.eup %487  ;;  %371 = vst [vmem:[%s761_s6 + $0x11] sm:$0xf] %v363_v27  ;;  %v353_v29 = vmul.f32 %v424_v56, %v339_v28 }
 0x24a   :  { %v490_v32 = vpop.eup %489  ;;  %v366_v33 = vadd.f32 %v683_v63, %v352_v2  ;;  %v336_v10 = vmul.f32 %v488_v11, %v653_v20 }
 0x24b   :  { %v367_v34 = vadd.f32 %v683_v63, %v353_v29  ;;  %v395_v35 = vmul.f32 %v490_v32, %v664_v31 }
 0x24c   :  { %374 = vst [vmem:[%s761_s6 + $0x29] sm:$0xf] %v366_v33  ;;  %v350_v36 = vmul.f32 %v424_v56, %v336_v10 }
 0x24d   :  { %v492_v38 = vpop.eup %491  ;;  %375 = vst [vmem:[%s761_s6 + $0x31] sm:$0xf] %v367_v34  ;;  %v396_v20 = vmul.f32 %v395_v35, %v380_v21 }
 0x24e   :  { %v364_v39 = vadd.f32 %v683_v63, %v350_v36  ;;  %v340_v40 = vmul.f32 %v492_v38, %v662_v30 }
 0x24f   :  { %v397_v31 = vadd.f32 %v396_v20, %v381_v37 }
 0x250   :  { %372 = vst [vmem:[%s761_s6 + $0x19] sm:$0xf] %v364_v39  ;;  %v354_v41 = vmul.f32 %v424_v56, %v340_v40 }
 0x251   :  { %398 = vst [vmem:[%s761_s6] sm:$0x1] %v397_v31  ;;  %399 = vst [vmem:[%s761_s6 + $0x8] sm:$0x1] %v397_v31 }
 0x252   :  { %400 = vst [vmem:[%s761_s6 + $0x10] sm:$0x1] %v397_v31  ;;  %401 = vst [vmem:[%s761_s6 + $0x18] sm:$0x1] %v397_v31  ;;  %v368_v30 = vadd.f32 %v683_v63, %v354_v41 }
 0x253   :  { %402 = vst [vmem:[%s761_s6 + $0x20] sm:$0x1] %v397_v31  ;;  %403 = vst [vmem:[%s761_s6 + $0x28] sm:$0x1] %v397_v31 }
 0x254   :  { %404 = vst [vmem:[%s761_s6 + $0x30] sm:$0x1] %v397_v31  ;;  %405 = vst [vmem:[%s761_s6 + $0x38] sm:$0x1] %v397_v31 }
 0x255   :  { %376 = vst [vmem:[%s761_s6 + $0x39] sm:$0xf] %v368_v30 }

// kernel: clip_transformer_forward.10
= control target key start
LH: loop header
LB: loop body
LE: loop exit
PB: predicated region body
PF: predicated region fallthrough
CT: control target
= control target key end

     0   :  { %v208_v1 = vmov 0.0   ;;  %vm209_vm0 = vmmov 0   ;;  %s271_s0 = inlined_call_operand.vmem [shape: f32[8,128], index: 0, kind: input, shape index: {}]   ;;  %s272_s3 = inlined_call_operand.vmem [shape: bf16[128,128], index: 3, kind: input, shape index: {}]   ;;  %s273_s1 = inlined_call_operand.vmem [shape: f32[1,128], index: 1, kind: input, shape index: {}]   ;;  %s274_s2 = inlined_call_operand.vmem [shape: f32[1,128], index: 2, kind: input, shape index: {}]   ;;  %s275_s4 = inlined_call_operand.vmem [shape: f32[8,128], index: 4, kind: output, shape index: {}]  }
   0x1   :  { %v18_v0 = vld [vmem:[%s271_s0] sm:$0xff]  ;;  %176 = vmatprep.subr.bf16.mxu0 %v208_v1  ;;  %v199_v3 = vld [vmem:[%s272_s3 + $0x8] sm:$0xff]   ;;  %v200_v8 = vld [vmem:[%s272_s3 + $0x10] sm:$0xff]   ;;  %192 = vmatprep.mubr.msk.bf16.mxu0 %vm209_vm0, %v208_v1 }
   0x2   :  { %21 = vadd.xlane.f32.xlu0 %v18_v0  ;;  %v198_v2 = vld [vmem:[%s272_s3] sm:$0xff]   ;;  %v201_v9 = vld [vmem:[%s272_s3 + $0x18] sm:$0xff]   ;;  %v203_v11 = vld [vmem:[%s272_s3 + $0x28] sm:$0xff]  }
   0x3   :  { %177 = vmatpush3.bf16.msra.mxu0 %v198_v2  ;;  %v202_v10 = vld [vmem:[%s272_s3 + $0x20] sm:$0xff]   ;;  %v204_v12 = vld [vmem:[%s272_s3 + $0x30] sm:$0xff]   ;;  %v205_v13 = vld [vmem:[%s272_s3 + $0x38] sm:$0xff]  }
   0x4   :  { %178 = vmatprep.subr.bf16.mxu0 %v208_v1  ;;  %v157_v18 = vld [vmem:[%s273_s1] ss:$0 sm:$0xff] }
   0x5   :  { %v158_v20 = vld [vmem:[%s274_s2] ss:$0 sm:$0xff] }
   0x7   :  { %179 = vmatpush3.bf16.msra.mxu0 %v199_v3 }
   0x8   :  { %180 = vmatprep.subr.bf16.mxu0 %v208_v1 }
   0xb   :  { %181 = vmatpush3.bf16.msra.mxu0 %v200_v8 }
   0xc   :  { %182 = vmatprep.subr.bf16.mxu0 %v208_v1 }
   0xf   :  { %183 = vmatpush3.bf16.msra.mxu0 %v201_v9 }
  0x10   :  { %184 = vmatprep.subr.bf16.mxu0 %v208_v1 }
  0x13   :  { %185 = vmatpush3.bf16.msra.mxu0 %v202_v10 }
  0x14   :  { %186 = vmatprep.subr.bf16.mxu0 %v208_v1 }
  0x17   :  { %187 = vmatpush3.bf16.msra.mxu0 %v203_v11 }
  0x18   :  { %188 = vmatprep.subr.bf16.mxu0 %v208_v1 }
  0x1b   :  { %189 = vmatpush3.bf16.msra.mxu0 %v204_v12 }
  0x1c   :  { %190 = vmatprep.subr.bf16.mxu0 %v208_v1 }
  0x1f   :  { %191 = vmatpush3.bf16.msra.mxu0 %v205_v13 }
  0x8f   :  { %v22_v4 = vpop.xlane.xlu0 %21 }
  0x90   :  { %v24_v5 = vmul.f32 0.0078125, %v22_v4 }
  0x92   :  { %v25_v6 = vsub.f32 %v18_v0, %v24_v5 }
  0x94   :  { %v26_v7 = vmul.f32 %v25_v6, %v25_v6 }
  0x96   :  { %27 = vadd.xlane.f32.xlu0 %v26_v7 }
 0x123   :  { %v28_v14 = vpop.xlane.xlu0 %27 }
 0x124   :  { %v29_v15 = vmul.f32 0.0078125, %v28_v14 }
 0x126   :  { %v30_v16 = vadd.f32 1e-05, %v29_v15 }
 0x128   :  { %206 = vrsqrt.f32 %v30_v16 }
 0x132   :  { %v207_v17 = vpop.eup %206 }
 0x133   :  { %v32_v19 = vmul.f32 %v207_v17, %v25_v6 }
 0x135   :  { %v39_v21 = vmul.f32 %v157_v18, %v32_v19 }
 0x137   :  { %v46_v22 = vadd.f32 %v158_v20, %v39_v21 }
 0x139   :  { %v47_v23 = vpack.c.bf16 %v46_v22, %v46_v22 }
 0x13b   :  { %193 = vmatmul.mubr.bf16.vlgmr.msra.gmra.mrb[0].mxu0 %v47_v23 }
 0x20e   :  { %v146_v24 = vpop.f32.mrb[0].mxu0 }
 0x20f   :  { %152 = vst [vmem:[%s275_s4] sm:$0xff] %v146_v24  ;;  %v194_v25 = vpop.f32.mrb[1].mxu0 }
 0x210   :  { %v149_v26 = vpop.f32.mrb[2].mxu0 }
 0x211   :  { %v195_v27 = vpop.f32.mrb[3].mxu0 }

// kernel: clip_transformer_forward.11
= control target key start
LH: loop header
LB: loop body
LE: loop exit
PB: predicated region body
PF: predicated region fallthrough
CT: control target
= control target key end

     0   :  { %10 = vsyncpa [#allocation3], 0  ;;  %s2130_s0 = inlined_call_operand.vmem [shape: f32[2,128], index: 0, kind: input, shape index: {}]   ;;  %s2131_s1 = inlined_call_operand.vmem [shape: f32[2,4,128], index: 1, kind: input, shape index: {}]   ;;  %s2132_s2 = inlined_call_operand.vmem [shape: bf16[128,640], index: 2, kind: input, shape index: {}]   ;;  %s2133_s3 = inlined_call_operand.vmem [shape: f32[8,128], index: 3, kind: input, shape index: {}]   ;;  %s2134_s4 = inlined_call_operand.vmem [shape: f32[2,256], index: 4, kind: input, shape index: {}]   ;;  %s2135_s5 = inlined_call_operand.hbm [shape: f32[2,2,128], index: 5, kind: output, shape index: {}]  }
   0x1   :  { %12 = vsyncpa [#allocation3 + $0x1], 0  ;;  %s1762_s18 = smov 0   ;;  %s1764_s19 = smov 0  }
   0x2   :  { %s1766_s20 = smov 0   ;;  %s1768_s21 = smov 0  }
   0x3 LB: > { %s1783_s22 = sadd.s32 4294967295, %s1723_s21   ;;  %s1335_s23 = sadd.s32 4294967294, %s1723_s21   ;;  %s1723_s21 = sphi %s1768_s21, %s2141_s21   ;;  %s1719_s20 = sphi %s1766_s20, %s2140_s20   ;;  %s1715_s19 = sphi %s1764_s19, %s2139_s19   ;;  %s1711_s18 = sphi %s1762_s18, %s2138_s18  }
   0x4   : > { %s1787_s24 = sadd.s32 1, %s1723_s21   ;;  %s135_s25 = sadd.s32 1, %s1719_s20 }
   0x5   : > { %s132_s26 = ssub.s32 %s1723_s21, %s1787_s24  ;;  %p145_p0 = scmp.ne.s32.totalorder %s1719_s20, %s1715_s19 }
   0x6   : > { %p133_p1 = scmp.eq.s32.totalorder %s132_s26, 0  ;;  %p146_p2 = scmp.eq.s32.totalorder %s1783_s22, 1 }
   0x7   : > { %p151_p3 = scmp.ne.s32.totalorder %s1715_s19, %s1711_s18  ;;  %p152_p4 = scmp.eq.s32.totalorder %s1335_s23, 1 }
   0x8   : > { %s1798_s27 = scalar_select %p133_p1, %s1719_s20, %s135_s25  }
   0x9   : > { %p1800_p5 = por %p146_p2, %p145_p0  ;;  %p1804_p6 = por %p152_p4, %p151_p3 }
   0xa   : > { %p1338_p7 = scmp.ge.s32.totalorder %s1723_s21, 1  ;;  %p189_p8 = scmp.lt.s32.totalorder %s1723_s21, 3 }
   0xc   : > { %p190_p9 = pnand %p1338_p7, %p189_p8 }
   0xd   : > { %p216_p10 = scmp.lt.s32.totalorder (!%p190_p9), %s1783_s22, 1  ;;  %vm250_vm0 = vcmask (!%p190_p9), 1043456   ;;  %v223_v0 = vld [vmem:[%s2130_s0] sm:$0x3] (!%p190_p9)  ;;  %vm224_vm1 = vcmask (!%p190_p9), 1041408   ;;  %v1725_v6 = vmov (!%p190_p9), 0.0   ;;  %v239_v42 = vlaneseq (!%p190_p9) }
   0xe   : > { %193 = sbr.rel (%p190_p9) target bundleno = 2665 (0xa69), region = 40  ;;  %v225_v3 = vsel (!%p190_p9), %vm224_vm1, %v223_v0, 0.0  ;;  %v1589_v4 = vld [vmem:[%s2132_s2 + $0x8] ss:$20 sps:$4 sm:$0xff] (!%p190_p9)   ;;  %v1591_v5 = vld [vmem:[%s2132_s2 + $0x4] ss:$20 sps:$4 sm:$0xff] (!%p190_p9)   ;;  %1436 = vmatprep.subr.bf16.mxu0 (!%p190_p9), %v1725_v6 }
   0xf   : > { %v1592_v7 = vld [vmem:[%s2132_s2 + $0x30] ss:$20 sps:$4 sm:$0xff] (!%p190_p9)   ;;  %v1594_v8 = vld [vmem:[%s2132_s2] ss:$20 sps:$4 sm:$0xff] (!%p190_p9)   ;;  %491 = vmatprep.subr.bf16.mxu1 (!%p190_p9), %v1589_v4  ;;  %v1596_v10 = vld [vmem:[%s2132_s2 + $0x58] ss:$20 sps:$4 sm:$0xff] (!%p190_p9)  }
  0x10   : > { %492 = vmatpush1.bf16.msra.mxu1 (!%p190_p9), %v1591_v5  ;;  %1437 = vmatpush3.bf16.msra.mxu0 (!%p190_p9), %v1594_v8  ;;  %v1595_v9 = vld [vmem:[%s2132_s2 + $0x2c] ss:$20 sps:$4 sm:$0xff] (!%p190_p9)   ;;  %v1598_v21 = vld [vmem:[%s2132_s2 + $0x28] ss:$20 sps:$4 sm:$0xff] (!%p190_p9)   ;;  %v1602_v24 = vld [vmem:[%s2132_s2 + $0x50] ss:$20 sps:$4 sm:$0xff] (!%p190_p9)  }
  0x11   : > { %493 = vmatprep.subr.bf16.mxu1 (!%p190_p9), %v1592_v7  ;;  %1438 = vmatprep.subr.bf16.mxu0 (!%p190_p9), %v1725_v6  ;;  %v1599_v22 = vld [vmem:[%s2132_s2 + $0x54] ss:$20 sps:$4 sm:$0xff] (!%p190_p9)   ;;  %v1603_v25 = vld [vmem:[%s2132_s2 + $0x7c] ss:$20 sps:$4 sm:$0xff] (!%p190_p9)   ;;  %v1606_v27 = vld [vmem:[%s2132_s2 + $0x78] ss:$20 sps:$4 sm:$0xff] (!%p190_p9)  }
  0x12   : > { %v1600_v23 = vld [vmem:[%s2132_s2 + $0x80] ss:$20 sps:$4 sm:$0xff] (!%p190_p9)   ;;  %v1604_v26 = vld [vmem:[%s2132_s2 + $0xa8] ss:$20 sps:$4 sm:$0xff] (!%p190_p9)   ;;  %v1607_v28 = vld [vmem:[%s2132_s2 + $0xa4] ss:$20 sps:$4 sm:$0xff] (!%p190_p9)  }
  0x13   : > { %v1608_v29 = vld [vmem:[%s2132_s2 + $0xd0] ss:$20 sps:$4 sm:$0xff] (!%p190_p9)   ;;  %v1610_v30 = vld [vmem:[%s2132_s2 + $0xa0] ss:$20 sps:$4 sm:$0xff] (!%p190_p9)   ;;  %v1612_v32 = vld [vmem:[%s2132_s2 + $0xf8] ss:$20 sps:$4 sm:$0xff] (!%p190_p9)  }
  0x14   : > { %494 = vmatpush1.bf16.msra.mxu1 (!%p190_p9), %v1595_v9  ;;  %1439 = vmatpush3.bf16.msra.mxu0 (!%p190_p9), %v1598_v21  ;;  %v1611_v31 = vld [vmem:[%s2132_s2 + $0xcc] ss:$20 sps:$4 sm:$0xff] (!%p190_p9)   ;;  %v1614_v33 = vld [vmem:[%s2132_s2 + $0xc8] ss:$20 sps:$4 sm:$0xff] (!%p190_p9)   ;;  %v1726_v36 = vmov (!%p190_p9), 0   ;;  %vm1727_vm2 = vmmov (!%p190_p9), 0  }
  0x15   : > { %s217_s30 = scalar_select %p216_p10, %s1783_s22, 1  ;;  %495 = vmatprep.subr.bf16.mxu1 %v1596_v10  ;;  %1440 = vmatprep.subr.bf16.mxu0 %v1725_v6  ;;  %v1615_v34 = vld [vmem:[%s2132_s2 + $0xf4] ss:$20 sps:$4 sm:$0xff]   ;;  %v1618_v37 = vld [vmem:[%s2132_s2 + $0xf0] ss:$20 sps:$4 sm:$0xff]   ;;  %v1914_v46 = vshrl.u32 %v239_v42, 7 }
  0x16   : > { %v1616_v35 = vld [vmem:[%s2132_s2 + $0x120] ss:$20 sps:$4 sm:$0xff]   ;;  %523 = vmatprep.mubr.bf16.mxu1 %v1726_v36  ;;  %v1619_v38 = vld [vmem:[%s2132_s2 + $0x11c] ss:$20 sps:$4 sm:$0xff]   ;;  %v1620_v39 = vld [vmem:[%s2132_s2 + $0x118] ss:$20 sps:$4 sm:$0xff]   ;;  %1452 = vmatprep.mubr.msk.bf16.mxu0 %vm1727_vm2, %v1725_v6 }
  0x17   : > { %s1340_s6 = sshll.u32 %s217_s30, 2  ;;  %v241_v48 = vsub.s32 0, %v1914_v46  ;;  %v1920_v49 = vld [vmem:[%s2133_s3] sm:$0xff]  ;;  %v246_v50 = vsub.s32 1, %v1914_v46  ;;  %vm534_vm3 = vcmask 261120   ;;  %s1728_s16 = smov 96  }
  0x18   : > { %s219_s11 = scalar_lea.vmem %s2131_s1, %s1340_s6  ;;  %496 = vmatpush1.bf16.msra.mxu1 %v1599_v22  ;;  %1441 = vmatpush3.bf16.msra.mxu0 %v1602_v24  ;;  %v222_v63 = vld [vmem:[%s2134_s4] sm:$0xf]  ;;  %s1729_s17 = smov 32   ;;  %vm582_vm4 = vcmask 25600   ;;  %vm596_vm5 = vcmask 31744   ;;  %vm992_vm6 = vcmask 523264  }
  0x19   : > { %v249_v1 = vld [vmem:[%s219_s11] sm:$0xf]  ;;  %497 = vmatprep.subr.bf16.mxu1 %v1600_v23  ;;  %1442 = vmatprep.subr.bf16.mxu0 %v1725_v6  ;;  %v242_v51 = vrot.slane %v1920_v49, %v241_v48  ;;  %v247_v53 = vrot.slane %v1920_v49, %v246_v50  ;;  %v286_v9 = vrot.slane %v222_v63, %v241_v48  ;;  %s1730_s23 = smov 64   ;;  %vm994_vm7 = vcmask 785408   ;;  %s1390_s30 = sshll.u32 %s1783_s22, 5 }
  0x1a   : > { %v251_v2 = vsel %vm250_vm0, %v249_v1, 0.0  ;;  %s2088_s10 = scalar_lea.hbm %s2135_s5, %s1390_s30  ;;  %s1731_s22 = smov [#allocation2]  }
  0x1b   : > { %252 = vadd.xlane.f32.xlu0 %v251_v2  ;;  %s1665_s13 = sshll.u32 %s1731_s22, 4  ;;  %s1666_s13 = int_to_ptr.vmem [resolvable:$false] %s1665_s13 }
  0x1c   : > { %498 = vmatpush1.bf16.msra.mxu1 %v1603_v25  ;;  %1443 = vmatpush3.bf16.msra.mxu0 %v1606_v27  ;;  %s1667_s14 = scalar_lea.vmem %s1666_s13, 64 }
  0x1d   : > { %499 = vmatprep.subr.bf16.mxu1 %v1604_v26  ;;  %1444 = vmatprep.subr.bf16.mxu0 %v1725_v6 }
  0x1f   : > { %226 = vadd.xlane.f32.xlu0 %v225_v3 }
  0x20   : > { %500 = vmatpush1.bf16.msra.mxu1 %v1607_v28  ;;  %1445 = vmatpush3.bf16.msra.mxu0 %v1610_v30 }
  0x21   : > { %501 = vmatprep.subr.bf16.mxu1 %v1608_v29  ;;  %1446 = vmatprep.subr.bf16.mxu0 %v1725_v6 }
  0x24   : > { %502 = vmatpush1.bf16.msra.mxu1 %v1611_v31  ;;  %1447 = vmatpush3.bf16.msra.mxu0 %v1614_v33 }
  0x25   : > { %503 = vmatprep.subr.bf16.mxu1 %v1612_v32  ;;  %1448 = vmatprep.subr.bf16.mxu0 %v1725_v6 }
  0x28   : > { %504 = vmatpush1.bf16.msra.mxu1 %v1615_v34  ;;  %1449 = vmatpush3.bf16.msra.mxu0 %v1618_v37 }
  0x29   : > { %505 = vmatprep.subr.bf16.mxu1 %v1616_v35  ;;  %1450 = vmatprep.subr.bf16.mxu0 %v1725_v6 }
  0x2c   : > { %506 = vmatpush1.bf16.msra.mxu1 %v1619_v38  ;;  %1451 = vmatpush3.bf16.msra.mxu0 %v1620_v39 }
  0x2d   : > { %1462 = vmatprep.subr.bf16.mxu1 %v1725_v6  ;;  %1456 = vmatprep.subr.bf16.mxu0 %v1725_v6 }
  0xa8   : > { %v253_v11 = vpop.xlane.xlu0 %252 }
  0xa9   : > { %v254_v12 = vmul.f32 0.0078125, %v253_v11 }
  0xab   : > { %v1840_v13 = vsub.f32 %v249_v1, %v254_v12  ;;  %v396_v1 = vrot.slane %v222_v63, %v246_v50 }
  0xac   : > { %v227_v14 = vpop.xlane.xlu0 %226 }
  0xad   : > { %v229_v15 = vmul.f32 0.0078125, %v227_v14  ;;  %v256_v16 = vmul.f32 %v1840_v13, %v1840_v13  ;;  %v406_v3 = vrot.slane %v396_v1, %v246_v50 }
  0xaf   : > { %v1844_v17 = vsub.f32 %v223_v0, %v229_v15  ;;  %v257_v18 = vsel %vm250_vm0, %v256_v16, 0.0  ;;  %v399_v0 = vsub.s32 3, %v1914_v46 }
  0xb0   : > { %258 = vadd.xlane.f32.xlu1 %v257_v18 }
  0xb1   : > { %v231_v19 = vmul.f32 %v1844_v17, %v1844_v17  ;;  %v400_v2 = vrot.slane %v222_v63, %v399_v0 }
  0xb3   : > { %v232_v20 = vsel %vm224_vm1, %v231_v19, 0.0  ;;  %v410_v4 = vrot.slane %v400_v2, %v246_v50 }
  0xb4   : > { %233 = vadd.xlane.f32.xlu1 %v232_v20 }
 0x13d   : > { %v259_v40 = vpop.xlane.xlu1 %258 }
 0x13e   : > { %v260_v41 = vmul.f32 0.0078125, %v259_v40 }
 0x140   : > { %v261_v43 = vadd.f32 1e-05, %v260_v41 }
 0x141   : > { %v234_v44 = vpop.xlane.xlu1 %233 }
 0x142   : > { %1637 = vrsqrt.f32 %v261_v43  ;;  %v235_v45 = vmul.f32 0.0078125, %v234_v44 }
 0x144   : > { %v236_v47 = vadd.f32 1e-05, %v235_v45 }
 0x146   : > { %1639 = vrsqrt.f32 %v236_v47 }
 0x14c   : > { %v1638_v52 = vpop.eup %1637 }
 0x14d   : > { %v263_v54 = vmul.f32 %v1638_v52, %v1840_v13 }
 0x14f   : > { %v264_v55 = vmul.f32 %v263_v54, %v242_v51 }
 0x150   : > { %v1640_v56 = vpop.eup %1639 }
 0x151   : > { %v265_v57 = vadd.f32 %v264_v55, %v247_v53  ;;  %v238_v58 = vmul.f32 %v1640_v56, %v1844_v17 }
 0x153   : > { %v375_v59 = vpack.c.bf16 %v265_v57, %v265_v57  ;;  %v243_v60 = vmul.f32 %v242_v51, %v238_v58 }
 0x155   : > { %524 = vmatmul.mubr.bf16.vlgmr.msra.gmra.mrb[0].mxu1 %v375_v59  ;;  %v248_v61 = vadd.f32 %v247_v53, %v243_v60 }
 0x156   : > { %1464 = vmatprep.mubr.msk.bf16.mxu1 %vm1727_vm2, %v1725_v6 }
 0x157   : > { %v266_v62 = vpack.c.bf16 %v248_v61, %v248_v61 }
 0x159   : > { %1453 = vmatmul.mubr.bf16.vlgmr.msra.gmra.mrb[0].mxu0 %v266_v62 }
 0x15a   : > { %1458 = vmatprep.mubr.msk.bf16.mxu0 %vm1727_vm2, %v1725_v6 }
 0x228   : > { %v525_v5 = vpop.f32.mrb[0].mxu1 }
 0x229   : > { %v526_v7 = vadd.f32 %v525_v5, %v406_v3  ;;  %v527_v8 = vpop.f32.mrb[1].mxu1 }
 0x22a   : > { %v528_v10 = vadd.f32 %v527_v8, %v410_v4  ;;  %v529_v11 = vpop.f32.mrb[2].mxu1 }
 0x22b   : > { %v533_v12 = vpack.c.bf16 %v526_v7, %v526_v7  ;;  %v530_v13 = vpop.f32.mrb[3].mxu1 }
 0x22c   : > { %v1937_v14 = vpack.c.bf16 %v528_v10, %v528_v10  ;;  %v369_v15 = vpop.f32.mrb[0].mxu0 }
 0x22d   : > { %v370_v16 = vadd.f32 %v369_v15, %v286_v9  ;;  %647 = vrot.lane.b32.xlu0 %v533_v12, %s1728_s16  ;;  %v1454_v17 = vpop.f32.mrb[1].mxu0  ;;  %v539_v18 = vsel %vm534_vm3, %v533_v12, 0 }
 0x22e   : > { %v372_v19 = vpop.f32.mrb[2].mxu0  ;;  %1457 = vmatpush3.bf16.xpose.msra.mxu0 %v539_v18  ;;  %v601_v20 = vsel %vm224_vm1, %v1937_v14, 0 }
 0x22f   : > { %v532_v21 = vpack.c.bf16 %v370_v16, %v370_v16  ;;  %v1455_v22 = vpop.f32.mrb[3].mxu0  ;;  %1463 = vmatpush3.bf16.msra.mxu1 %v601_v20  ;;  %1468 = vmatprep.subr.bf16.mxu0 %v1725_v6 }
 0x230   : > { %1474 = vmatprep.subr.bf16.mxu1 %v1725_v6 }
 0x231   : > { %870 = vrot.lane.b32.xlu0 %v533_v12, %s1729_s17  ;;  %644 = vrot.lane.b32.xlu1 %v532_v21, %s1728_s16 }
 0x235   : > { %759 = vrot.lane.b32.xlu1 %v533_v12, %s1730_s23  ;;  %1459 = vmatmul.mubr.msk.bf16.vlgmr.msra.gmra.mrb[4].mxu0 %vm534_vm3, %v532_v21 }
 0x236   : > { %1470 = vmatprep.mubr.msk.bf16.mxu0 %vm1727_vm2, %v1725_v6 }
 0x239   : > { %757 = vrot.lane.b32.xlu1 %v532_v21, %s1730_s23 }
 0x23d   : > { %868 = vrot.lane.b32.xlu1 %v532_v21, %s1729_s17 }
 0x29f   : > { %v648_v23 = vpop.permute.xlu0 %647 }
 0x2a0   : > { %v653_v24 = vsel %vm534_vm3, %v648_v23, 0 }
 0x2a1   : > { %1469 = vmatpush3.bf16.xpose.msra.mxu0 %v653_v24 }
 0x2a2   : > { %1480 = vmatprep.subr.bf16.mxu0 %v1725_v6 }
 0x2a3   : > { %v645_v25 = vpop.permute.xlu1 %644  ;;  %v871_v28 = vpop.permute.xlu0 %870 }
 0x2a4   : > { %v876_v30 = vsel %vm534_vm3, %v871_v28, 0 }
 0x2a7   : > { %v760_v26 = vpop.permute.xlu1 %759 }
 0x2a8   : > { %v765_v27 = vsel %vm534_vm3, %v760_v26, 0  ;;  %1471 = vmatmul.mubr.msk.bf16.vlgmr.msra.gmra.mrb[8].mxu0 %vm534_vm3, %v645_v25 }
 0x2a9   : > { %1481 = vmatpush3.bf16.xpose.msra.mxu0 %v765_v27  ;;  %1482 = vmatprep.mubr.msk.bf16.mxu0 %vm1727_vm2, %v1725_v6 }
 0x2aa   : > { %1492 = vmatprep.subr.bf16.mxu0 %v1725_v6 }
 0x2ab   : > { %v758_v29 = vpop.permute.xlu1 %757 }
 0x2af   : > { %v869_v31 = vpop.permute.xlu1 %868 }
 0x2b0   : > { %1483 = vmatmul.mubr.msk.bf16.vlgmr.msra.gmra.mrb[12].mxu0 %vm534_vm3, %v758_v29 }
 0x2b1   : > { %1493 = vmatpush3.bf16.xpose.msra.mxu0 %v876_v30  ;;  %1494 = vmatprep.mubr.msk.bf16.mxu0 %vm1727_vm2, %v1725_v6 }
 0x2b2   : > { %1504 = vmatprep.subr.bf16.mxu0 %v1725_v6 }
 0x2b8   : > { %1495 = vmatmul.mubr.msk.bf16.vlgmr.msra.gmra.mrb[16].mxu0 %vm534_vm3, %v869_v31 }
 0x2b9   : > { %1520 = vmatprep.mubr.msk.bf16.mxu0 %vm1727_vm2, %v1725_v6 }
 0x308   : > { %v575_v32 = vpop.f32.mrb[4].mxu0 }
 0x309   : > { %v581_v33 = vmul.f32 0.17677669, %v575_v32  ;;  %v1460_v34 = vpop.f32.mrb[5].mxu0 }
 0x30a   : > { %v578_v35 = vpop.f32.mrb[6].mxu0 }
 0x30b   : > { %v1461_v36 = vpop.f32.mrb[7].mxu0  ;;  %v583_v37 = vsel %vm582_vm4, %v581_v33, -inf }
 0x30c   : > { %584 = vmax.xlane.f32.xlu0 %v583_v37 }
 0x37b   : > { %v689_v38 = vpop.f32.mrb[8].mxu0 }
 0x37c   : > { %v695_v39 = vmul.f32 0.17677669, %v689_v38  ;;  %v1472_v40 = vpop.f32.mrb[9].mxu0 }
 0x37d   : > { %v692_v41 = vpop.f32.mrb[10].mxu0 }
 0x37e   : > { %v1473_v42 = vpop.f32.mrb[11].mxu0  ;;  %v696_v43 = vsel %vm582_vm4, %v695_v39, -inf }
 0x37f   : > { %697 = vmax.xlane.f32.xlu1 %v696_v43  ;;  %v1621_v42 = vld [vmem:[%s2132_s2 + $0xc] ss:$20 sps:$4 sm:$0xff]   ;;  %v1622_v43 = vld [vmem:[%s2132_s2 + $0x34] ss:$20 sps:$4 sm:$0xff]  }
 0x380   : > { %1505 = vmatpush3.bf16.msra.mxu0 %v1621_v42 }
 0x381   : > { %1506 = vmatprep.subr.bf16.mxu0 %v1725_v6 }
 0x383   : > { %v801_v44 = vpop.f32.mrb[12].mxu0 }
 0x384   : > { %v807_v45 = vmul.f32 0.17677669, %v801_v44  ;;  %v1484_v47 = vpop.f32.mrb[13].mxu0  ;;  %1507 = vmatpush3.bf16.msra.mxu0 %v1622_v43 }
 0x385   : > { %v804_v48 = vpop.f32.mrb[14].mxu0  ;;  %1508 = vmatprep.subr.bf16.mxu0 %v1725_v6 }
 0x386   : > { %v1485_v50 = vpop.f32.mrb[15].mxu0  ;;  %v808_v51 = vsel %vm582_vm4, %v807_v45, -inf  ;;  %v1623_v48 = vld [vmem:[%s2132_s2 + $0x5c] ss:$20 sps:$4 sm:$0xff]  }
 0x387   : > { %809 = vmax.xlane.f32.xlu0 %v808_v51  ;;  %v1624_v51 = vld [vmem:[%s2132_s2 + $0x84] ss:$20 sps:$4 sm:$0xff]  }
 0x388   : > { %1509 = vmatpush3.bf16.msra.mxu0 %v1623_v48 }
 0x389   : > { %1510 = vmatprep.subr.bf16.mxu0 %v1725_v6 }
 0x38b   : > { %v912_v52 = vpop.f32.mrb[16].mxu0 }
 0x38c   : > { %v918_v53 = vmul.f32 0.17677669, %v912_v52  ;;  %v1496_v54 = vpop.f32.mrb[17].mxu0  ;;  %1511 = vmatpush3.bf16.msra.mxu0 %v1624_v51 }
 0x38d   : > { %v915_v55 = vpop.f32.mrb[18].mxu0  ;;  %1512 = vmatprep.subr.bf16.mxu0 %v1725_v6 }
 0x38e   : > { %v1497_v56 = vpop.f32.mrb[19].mxu0  ;;  %v919_v57 = vsel %vm582_vm4, %v918_v53, -inf  ;;  %v1625_v55 = vld [vmem:[%s2132_s2 + $0xac] ss:$20 sps:$4 sm:$0xff]  }
 0x38f   : > { %920 = vmax.xlane.f32.xlu0 %v919_v57  ;;  %v1626_v57 = vld [vmem:[%s2132_s2 + $0xd4] ss:$20 sps:$4 sm:$0xff]  }
 0x390   : > { %1513 = vmatpush3.bf16.msra.mxu0 %v1625_v55 }
 0x391   : > { %1514 = vmatprep.subr.bf16.mxu0 %v1725_v6 }
 0x394   : > { %1515 = vmatpush3.bf16.msra.mxu0 %v1626_v57 }
 0x395   : > { %1516 = vmatprep.subr.bf16.mxu0 %v1725_v6 }
 0x399   : > { %v585_v58 = vpop.xlane.xlu0 %584 }
 0x39a   : > { %v586_v59 = vsub.f32 %v581_v33, %v585_v58  ;;  %v1627_v58 = vld [vmem:[%s2132_s2 + $0xfc] ss:$20 sps:$4 sm:$0xff]  }
 0x39b   : > { %1517 = vmatpush3.bf16.msra.mxu0 %v1627_v58  ;;  %v1253_v58 = vsub.s32 4, %v1914_v46 }
 0x39c   : > { %v587_v60 = vmul.f32 1.442695, %v586_v59  ;;  %1518 = vmatprep.subr.bf16.mxu0 %v1725_v6  ;;  %v1628_v59 = vld [vmem:[%s2132_s2 + $0x124] ss:$20 sps:$4 sm:$0xff]  }
 0x39e   : > { %1641 = vpow2.f32 %v587_v60 }
 0x39f   : > { %1519 = vmatpush3.bf16.msra.mxu0 %v1628_v59  ;;  %v1258_v59 = vsub.s32 5, %v1914_v46 }
 0x3a8   : > { %v1642_v61 = vpop.eup %1641 }
 0x3a9   : > { %v589_v62 = vsel %vm582_vm4, %v1642_v61, 0.0 }
 0x3aa   : > { %590 = vadd.xlane.f32.xlu0 %v589_v62 }
 0x40c   : > { %v698_v63 = vpop.xlane.xlu1 %697 }
 0x40d   : > { %v699_v1 = vsub.f32 %v695_v39, %v698_v63 }
 0x40f   : > { %v700_v2 = vmul.f32 1.442695, %v699_v1 }
 0x411   : > { %1643 = vpow2.f32 %v700_v2 }
 0x414   : > { %v810_v3 = vpop.xlane.xlu0 %809 }
 0x415   : > { %v811_v4 = vsub.f32 %v807_v45, %v810_v3 }
 0x417   : > { %v812_v5 = vmul.f32 1.442695, %v811_v4 }
 0x419   : > { %1645 = vpow2.f32 %v812_v5 }
 0x41b   : > { %v1644_v7 = vpop.eup %1643 }
 0x41c   : > { %v702_v8 = vsel %vm582_vm4, %v1644_v7, 0.0  ;;  %v921_v11 = vpop.xlane.xlu0 %920 }
 0x41d   : > { %703 = vadd.xlane.f32.xlu1 %v702_v8  ;;  %v922_v13 = vsub.f32 %v918_v53, %v921_v11 }
 0x41f   : > { %v923_v15 = vmul.f32 1.442695, %v922_v13 }
 0x423   : > { %v1646_v9 = vpop.eup %1645 }
 0x424   : > { %v814_v10 = vsel %vm582_vm4, %v1646_v9, 0.0 }
 0x425   : > { %815 = vadd.xlane.f32.xlu0 %v814_v10 }
 0x42e   : > { %820 = vrot.lane.b32.xlu1 %v1937_v14, %s1730_s23 }
 0x437   : > { %v591_v12 = vpop.xlane.xlu0 %590 }
 0x438   : > { %1647 = vrcp.f32 %v591_v12 }
 0x439   : > { %1649 = vpow2.f32 %v923_v15 }
 0x43b   : > { %709 = vrot.lane.b32.xlu0 %v1937_v14, %s1728_s16 }
 0x442   : > { %v1648_v16 = vpop.eup %1647 }
 0x443   : > { %v593_v17 = vmul.f32 %v1648_v16, %v1642_v61  ;;  %v1650_v19 = vpop.eup %1649 }
 0x444   : > { %v925_v20 = vsel %vm582_vm4, %v1650_v19, 0.0 }
 0x445   : > { %v594_v18 = vpack.c.bf16 %v593_v17, %v593_v17 }
 0x447   : > { %1465 = vmatmul.mubr.msk.bf16.vlgmr.msra.gmra.mrb[4].mxu1 %vm596_vm5, %v594_v18  ;;  %v1629_v18 = vld [vmem:[%s2132_s2 + $0x10] ss:$20 sps:$4 sm:$0xff]  }
 0x448   : > { %1476 = vmatprep.mubr.msk.bf16.mxu1 %vm1727_vm2, %v1725_v6 }
 0x452   : > { %926 = vadd.xlane.f32.xlu1 %v925_v20 }
 0x463   : > { %931 = vrot.lane.b32.xlu1 %v1937_v14, %s1729_s17 }
 0x4aa   : > { %v704_v21 = vpop.xlane.xlu1 %703 }
 0x4ab   : > { %1651 = vrcp.f32 %v704_v21 }
 0x4ae   : > { %v821_v27 = vpop.permute.xlu1 %820 }
 0x4af   : > { %v826_v29 = vsel %vm224_vm1, %v821_v27, 0  ;;  %v1633_v27 = vld [vmem:[%s2132_s2 + $0xb0] ss:$20 sps:$4 sm:$0xff]  }
 0x4b2   : > { %v816_v22 = vpop.xlane.xlu0 %815 }
 0x4b3   : > { %1653 = vrcp.f32 %v816_v22 }
 0x4b5   : > { %v1652_v23 = vpop.eup %1651 }
 0x4b6   : > { %v706_v24 = vmul.f32 %v1652_v23, %v1644_v7  ;;  %v710_v25 = vpop.permute.xlu0 %709 }
 0x4b7   : > { %v715_v26 = vsel %vm224_vm1, %v710_v25, 0  ;;  %v1631_v25 = vld [vmem:[%s2132_s2 + $0x60] ss:$20 sps:$4 sm:$0xff]  }
 0x4b8   : > { %1475 = vmatpush3.bf16.msra.mxu1 %v715_v26  ;;  %v707_v28 = vpack.c.bf16 %v706_v24, %v706_v24  ;;  %v1632_v26 = vld [vmem:[%s2132_s2 + $0x88] ss:$20 sps:$4 sm:$0xff]  }
 0x4b9   : > { %1486 = vmatprep.subr.bf16.mxu1 %v1725_v6 }
 0x4bb   : > { %1477 = vmatmul.mubr.msk.bf16.vlgmr.msra.gmra.mrb[8].mxu1 %vm596_vm5, %v707_v28  ;;  %v1634_v28 = vld [vmem:[%s2132_s2 + $0xd8] ss:$20 sps:$4 sm:$0xff]  }
 0x4bc   : > { %1487 = vmatpush3.bf16.msra.mxu1 %v826_v29  ;;  %1488 = vmatprep.mubr.msk.bf16.mxu1 %vm1727_vm2, %v1725_v6  ;;  %v1635_v29 = vld [vmem:[%s2132_s2 + $0x100] ss:$20 sps:$4 sm:$0xff]  }
 0x4bd   : > { %v1654_v14 = vpop.eup %1653  ;;  %1498 = vmatprep.subr.bf16.mxu1 %v1725_v6 }
 0x4be   : > { %v818_v30 = vmul.f32 %v1654_v14, %v1646_v9  ;;  %v1015_v9 = vsub.s32 6, %v1914_v46  ;;  %v1636_v14 = vld [vmem:[%s2132_s2 + $0x128] ss:$20 sps:$4 sm:$0xff]  }
 0x4c0   : > { %v819_v31 = vpack.c.bf16 %v818_v30, %v818_v30  ;;  %v1016_v10 = vrot.slane %v1920_v49, %v1015_v9 }
 0x4c3   : > { %1489 = vmatmul.mubr.msk.bf16.vlgmr.msra.gmra.mrb[12].mxu1 %vm596_vm5, %v819_v31 }
 0x4c4   : > { %1500 = vmatprep.mubr.msk.bf16.mxu1 %vm1727_vm2, %v1725_v6 }
 0x4df   : > { %v927_v32 = vpop.xlane.xlu1 %926 }
 0x4e0   : > { %1655 = vrcp.f32 %v927_v32 }
 0x4e3   : > { %v932_v33 = vpop.permute.xlu1 %931 }
 0x4e4   : > { %v937_v34 = vsel %vm224_vm1, %v932_v33, 0  ;;  %v1120_v33 = vsub.s32 2, %v1914_v46 }
 0x4e5   : > { %1499 = vmatpush3.bf16.msra.mxu1 %v937_v34 }
 0x4e6   : > { %1524 = vmatprep.subr.bf16.mxu1 %v1725_v6  ;;  %v1121_v34 = vrot.slane %v1920_v49, %v1120_v33 }
 0x4ea   : > { %v1656_v35 = vpop.eup %1655 }
 0x4eb   : > { %v929_v36 = vmul.f32 %v1656_v35, %v1650_v19  ;;  %v1630_v19 = vld [vmem:[%s2132_s2 + $0x38] ss:$20 sps:$4 sm:$0xff]  }
 0x4ed   : > { %v930_v37 = vpack.c.bf16 %v929_v36, %v929_v36  ;;  %v1126_v36 = vrot.slane %v1920_v49, %v399_v0 }
 0x4ef   : > { %1501 = vmatmul.mubr.msk.bf16.vlgmr.msra.gmra.mrb[16].mxu1 %vm596_vm5, %v930_v37 }
 0x4f0   : > { %1540 = vmatprep.mubr.msk.bf16.mxu1 %vm1727_vm2, %v1725_v6  ;;  %1525 = vmatpush3.bf16.msra.mxu1 %v1629_v18 }
 0x4f1   : > { %1526 = vmatprep.subr.bf16.mxu1 %v1725_v6 }
 0x4f4   : > { %1527 = vmatpush3.bf16.msra.mxu1 %v1630_v19 }
 0x4f5   : > { %1528 = vmatprep.subr.bf16.mxu1 %v1725_v6 }
 0x4f8   : > { %1529 = vmatpush3.bf16.msra.mxu1 %v1631_v25 }
 0x4f9   : > { %1530 = vmatprep.subr.bf16.mxu1 %v1725_v6 }
 0x4fc   : > { %1531 = vmatpush3.bf16.msra.mxu1 %v1632_v26 }
 0x4fd   : > { %1532 = vmatprep.subr.bf16.mxu1 %v1725_v6 }
 0x500   : > { %1533 = vmatpush3.bf16.msra.mxu1 %v1633_v27 }
 0x501   : > { %1534 = vmatprep.subr.bf16.mxu1 %v1725_v6 }
 0x504   : > { %1535 = vmatpush3.bf16.msra.mxu1 %v1634_v28 }
 0x505   : > { %1536 = vmatprep.subr.bf16.mxu1 %v1725_v6 }
 0x508   : > { %1537 = vmatpush3.bf16.msra.mxu1 %v1635_v29 }
 0x509   : > { %1538 = vmatprep.subr.bf16.mxu1 %v1725_v6  ;;  %v1147_v6 = vsub.s32 7, %v1914_v46 }
 0x50c   : > { %1539 = vmatpush3.bf16.msra.mxu1 %v1636_v14 }
 0x51a   : > { %v637_v38 = vpop.f32.mrb[4].mxu1 }
 0x51b   : > { %v1466_v39 = vpop.f32.mrb[5].mxu1 }
 0x51c   : > { %v640_v40 = vpop.f32.mrb[6].mxu1 }
 0x51d   : > { %v1467_v41 = vpop.f32.mrb[7].mxu1 }
 0x51e   : > { %v1148_v41 = vrot.slane %v1920_v49, %v1147_v6 }
 0x58e   : > { %v751_v44 = vpop.f32.mrb[8].mxu1 }
 0x58f   : > { %980 = vrot.lane.b32.xlu1 %v751_v44, %s1729_s17  ;;  %v1478_v45 = vpop.f32.mrb[9].mxu1 }
 0x590   : > { %v754_v47 = vpop.f32.mrb[10].mxu1 }
 0x591   : > { %v1479_v50 = vpop.f32.mrb[11].mxu1 }
 0x596   : > { %v862_v52 = vpop.f32.mrb[12].mxu1 }
 0x597   : > { %984 = vrot.lane.b32.xlu0 %v862_v52, %s1730_s23  ;;  %v1490_v53 = vpop.f32.mrb[13].mxu1 }
 0x598   : > { %v865_v54 = vpop.f32.mrb[14].mxu1 }
 0x599   : > { %v1491_v56 = vpop.f32.mrb[15].mxu1 }
 0x5c2   : > { %v973_v60 = vpop.f32.mrb[16].mxu1 }
 0x5c3   : > { %988 = vrot.lane.b32.xlu1 %v973_v60, %s1728_s16  ;;  %v1502_v61 = vpop.f32.mrb[17].mxu1  ;;  %s213_s16 = sand.u32 1, %s1715_s19   ;;  %v1254_v60 = vrot.slane %v1920_v49, %v1253_v58 }
 0x5c4   : > { %v976_v62 = vpop.f32.mrb[18].mxu1  ;;  %s1339_s26 = sshll.u32 %s213_s16, 1  ;;  %s1263_s11 = scalar_lea.sflag [#allocation3], %s213_s16 }
 0x5c5   : > { %v1503_v63 = vpop.f32.mrb[19].mxu1  ;;  %s215_s6 = scalar_lea.vmem [#allocation2], %s1339_s26 }
 0x5c6   : > { %v1259_v63 = vrot.slane %v1920_v49, %v1258_v59  ;;  %s1276_s7 = sshll.u32 %s215_s6, 4  ;;  %s2090_s7 = int_to_ptr.vmem [resolvable:$true] %s1276_s7 }
 0x5c7   : > { %s1661_s12 = scalar_lea.vmem %s2090_s7, 32  ;;  %p1668_p0 = scmp.lt.s32.totalorder %s2090_s7, %s1666_s13 }
 0x5c8   : > { %p1662_p11 = scmp.ne.s32.totalorder %s2090_s7, %s1661_s12  ;;  %p1669_p1 = scmp.lt.s32.totalorder %s1667_s14, %s1661_s12 }
 0x5ca   : > { %p1663_p12 = pnand %p1662_p11, %p1800_p5  ;;  %p1670_p2 = por %p1669_p1, %p1668_p0 }
 0x5cc   : > { %p1664_p13 = pneg %p1663_p12 }
 0x5ce   : > { %p1671_p3 = pnand %p1670_p2, %p1664_p13 }
 0x601   : > { %v981_v1 = vpop.permute.xlu1 %980 }
 0x602   : > { %v991_v3 = vsel %vm534_vm3, %v637_v38, %v981_v1 }
 0x609   : > { %v985_v2 = vpop.permute.xlu0 %984 }
 0x60a   : > { %v993_v4 = vsel %vm992_vm6, %v991_v3, %v985_v2 }
 0x635   : > { %v989_v5 = vpop.permute.xlu1 %988 }
 0x636   : > { %v995_v7 = vsel %vm994_vm7, %v993_v4, %v989_v5 }
 0x637   : > { %v996_v8 = vpack.c.bf16 %v995_v7, %v995_v7 }
 0x639   : > { %1521 = vmatmul.mubr.bf16.vlgmr.msra.gmra.mrb[20].mxu0 %v996_v8 }
 0x70c   : > { %v1099_v11 = vpop.f32.mrb[20].mxu0 }
 0x70d   : > { %v1100_v12 = vadd.f32 %v1099_v11, %v1016_v10  ;;  %v1522_v13 = vpop.f32.mrb[21].mxu0 }
 0x70e   : > { %v1102_v15 = vpop.f32.mrb[22].mxu0 }
 0x70f   : > { %v1523_v16 = vpop.f32.mrb[23].mxu0  ;;  %v1105_v17 = vsel %vm224_vm1, %v1100_v12, 0.0 }
 0x710   : > { %1106 = vadd.xlane.f32.xlu0 %v1105_v17 }
 0x79d   : > { %v1107_v20 = vpop.xlane.xlu0 %1106 }
 0x79e   : > { %v1108_v21 = vmul.f32 0.0078125, %v1107_v20 }
 0x7a0   : > { %v1109_v22 = vsub.f32 %v1100_v12, %v1108_v21 }
 0x7a2   : > { %v1110_v23 = vmul.f32 %v1109_v22, %v1109_v22 }
 0x7a4   : > { %v1111_v24 = vsel %vm224_vm1, %v1110_v23, 0.0 }
 0x7a5   : > { %1112 = vadd.xlane.f32.xlu1 %v1111_v24 }
 0x832   : > { %v1113_v30 = vpop.xlane.xlu1 %1112 }
 0x833   : > { %v1114_v31 = vmul.f32 0.0078125, %v1113_v30 }
 0x835   : > { %v1115_v32 = vadd.f32 1e-05, %v1114_v31 }
 0x837   : > { %1657 = vrsqrt.f32 %v1115_v32 }
 0x841   : > { %v1658_v35 = vpop.eup %1657 }
 0x842   : > { %v1117_v37 = vmul.f32 %v1658_v35, %v1109_v22 }
 0x844   : > { %v1122_v38 = vmul.f32 %v1121_v34, %v1117_v37 }
 0x846   : > { %v1127_v39 = vadd.f32 %v1126_v36, %v1122_v38 }
 0x848   : > { %v1128_v40 = vpack.c.bf16 %v1127_v39, %v1127_v39 }
 0x84a   : > { %1541 = vmatmul.mubr.bf16.vlgmr.msra.gmra.mrb[20].mxu1 %v1128_v40 }
 0x91d   : > { %v1231_v42 = vpop.f32.mrb[20].mxu1 }
 0x91e   : > { %v1232_v43 = vadd.f32 %v1231_v42, %v1148_v41  ;;  %v1542_v44 = vpop.f32.mrb[21].mxu1 }
 0x91f   : > { %v1234_v45 = vpop.f32.mrb[22].mxu1 }
 0x920   : > { %v1543_v47 = vpop.f32.mrb[23].mxu1  ;;  %v1237_v48 = vadd.f32 %v1232_v43, %v1127_v39 }
 0x922   : > { %v1238_v50 = vsel %vm224_vm1, %v1237_v48, 0.0 }
 0x923   : > { %1239 = vadd.xlane.f32.xlu0 %v1238_v50 }
 0x9b0   : > { %v1240_v0 = vpop.xlane.xlu0 %1239 }
 0x9b1   : > { %v1241_v51 = vmul.f32 0.0078125, %v1240_v0 }
 0x9b3   : > { %v1242_v52 = vsub.f32 %v1237_v48, %v1241_v51 }
 0x9b5   : > { %v1243_v53 = vmul.f32 %v1242_v52, %v1242_v52 }
 0x9b7   : > { %v1244_v54 = vsel %vm224_vm1, %v1243_v53, 0.0 }
 0x9b8   : > { %1245 = vadd.xlane.f32.xlu0 %v1244_v54 }
 0xa45   : > { %v1246_v55 = vpop.xlane.xlu0 %1245 }
 0xa46   : > { %v1247_v56 = vmul.f32 0.0078125, %v1246_v55 }
 0xa48   : > { %v1248_v57 = vadd.f32 1e-05, %v1247_v56 }
 0xa4a   : > { %1659 = vrsqrt.f32 %v1248_v57 }
 0xa54   : > { %v1660_v61 = vpop.eup %1659 }
 0xa55   : > { %v1250_v62 = vmul.f32 %v1660_v61, %v1242_v52 }
 0xa57   : > { %v1255_v1 = vmul.f32 %v1254_v60, %v1250_v62 }
 0xa59   : > { %v1260_v2 = vadd.f32 %v1259_v63, %v1255_v1 }
 0xa5b   : > { %1261 = vst [vmem:[%s215_s6] sm:$0x3] %v1260_v2 }
 0xa5c   : > { %1674 = shalt.err (!%p1671_p3)
}
 0xa5d   : > { %s1675_s15 = scalar_lea.hbm %s2088_s10, 32  ;;  %s1679_s25 = scalar_lea.hbm %s2135_s5, 64 }
 0xa5e   : > { %p1676_p4 = scmp.ne.s32.totalorder %s2088_s10, %s1675_s15  ;;  %p1680_p9 = scmp.lt.u32.totalorder %s2088_s10, %s2135_s5 }
 0xa5f   : > { %p1681_p10 = scmp.lt.u32.totalorder %s1679_s25, %s1675_s15  ;;  %p1683_p12 = scmp.lt.u32.totalorder %s1675_s15, %s2088_s10 }
 0xa60   : > { %p1677_p7 = pnand %p1676_p4, %p1800_p5 }
 0xa61   : > { %p1682_p11 = por %p1681_p10, %p1680_p9 }
 0xa62   : > { %p1678_p8 = pneg %p1677_p7 }
 0xa63   : > { %p1684_p13 = por %p1683_p12, %p1682_p11 }
 0xa65   : > { %p1685_p0 = pnand %p1684_p13, %p1678_p8 }
 0xa67   : > { %1688 = shalt.err (!%p1685_p0)
}
 0xa68   : > { %1544 = dma.vmem_to_hbm [thread:$0]  (%p1800_p5), %s2090_s7, 32, %s2088_s10, %s1263_s11  }
 0xa69 PF: > { %p1550_p1 = scmp.ge.s32.totalorder %s1723_s21, 2  ;;  %s1288_s30 = sand.u32 1, %s1711_s18  }
 0xa6a   : > { %s1289_s6 = scalar_lea.sflag [#allocation3], %s1288_s30 }
 0xa6b   : > { %p1547_p2 = pnand %p1550_p1, %p1804_p6 }
 0xa6d   : > { %1706 = dma.done.wait (!%p1547_p2), %s1289_s6, 32  }
 0xa6e   : > { %1708 = vsyncadd (!%p1547_p2), %s1289_s6, 4294967264  ;;  %p15_p3 = scmp.ge.s32.totalorder %s1787_s24, 4   ;;  %s2138_s18 = smov %s1715_s19 }
 0xa6f   : > { %s2139_s19 = smov %s1719_s20  ;;  %s2140_s20 = smov %s1798_s27 }
 0xa70   : > { %s2141_s21 = smov %s1787_s24  ;;  %17 = sbr.rel (!%p15_p3) target bundleno = 3 (0x3), region = 75 }
 0xa77   :  { %1294 = vsyncpa [#allocation3], 1 }
 0xa78   :  { %1296 = vsyncpa [#allocation3 + $0x1], 1 }

// kernel: clip_transformer_forward.9
= control target key start
LH: loop header
LB: loop body
LE: loop exit
PB: predicated region body
PF: predicated region fallthrough
CT: control target
= control target key end

     0   :  { %s7584_s18 = smov 0   ;;  %s7586_s19 = smov 0   ;;  %s9218_s0 = inlined_call_operand.vmem [shape: f32[8,5,128], index: 0, kind: input, shape index: {}]   ;;  %s9219_s1 = inlined_call_operand.vmem [shape: bf16[2,128,1024], index: 1, kind: input, shape index: {}]   ;;  %s9220_s2 = inlined_call_operand.vmem [shape: bf16[2,512,128], index: 2, kind: input, shape index: {}]   ;;  %s9221_s3 = inlined_call_operand.vmem [shape: f32[2,6,128], index: 3, kind: input, shape index: {}]   ;;  %s9222_s4 = inlined_call_operand.vmem [shape: f32[2,2,512], index: 4, kind: input, shape index: {}]   ;;  %s9223_s5 = inlined_call_operand.vmem [shape: f32[8,5,128], index: 5, kind: output, shape index: {}]  }
   0x1   :  { %s7588_s20 = smov 0   ;;  %s7590_s21 = smov 0  }
   0x2   :  { %s7592_s22 = smov 0  }
   0x3 LB: > { %s24_s23 = sadd.s32 1, %s7536_s20  ;;  %s27_s24 = sadd.s32 1, %s7540_s21  ;;  %s7544_s22 = sphi %s7592_s22, %s15_s22   ;;  %s7540_s21 = sphi %s7590_s21, %s9350_s21   ;;  %s7536_s20 = sphi %s7588_s20, %s9349_s20   ;;  %s7532_s19 = sphi %s7586_s19, %s9348_s19   ;;  %s7528_s18 = sphi %s7584_s18, %s9347_s18  }
   0x4   : > { %p25_p0 = scmp.ge.s32.totalorder %s24_s23, 2  ;;  %p6699_p1 = scmp.ge.s32.totalorder %s7544_s22, 1 }
   0x5   : > { %p239_p2 = scmp.lt.s32.totalorder %s7544_s22, 5 }
   0x6   : > { %s9352_s23 = smov (%p25_p0, %s24_s23), 0  ;;  %s9354_s24 = smov (!%p25_p0, %s27_s24), %s7540_s21 }
   0x7   : > { %p240_p3 = pnand %p6699_p1, %p239_p2  ;;  %p29_p4 = scmp.ge.s32.totalorder %s9354_s24, 2 }
   0x9   : > { %s9356_s24 = smov (%p29_p4, %s9354_s24), 0  ;;  %243 = sbr.rel (%p240_p3) target bundleno = 4431 (0x114f), region = 40 }
  0x10   : > { %s6700_s25 = sshll.u32 %s7532_s19, 2  ;;  %p292_p5 = scmp.lt.s32.totalorder %s7528_s18, 1 }
  0x11   : > { %p287_p6 = scmp.lt.s32.totalorder %s6700_s25, 7  ;;  %p6711_p7 = scmp.ne.s32.totalorder %s7528_s18, 0 }
  0x12   : > { %s293_s26 = scalar_select %p292_p5, %s7528_s18, 1 }
  0x13   : > { %s9358_s25 = smov (!%p287_p6, %s6700_s25), 7  ;;  %321 = sbr.rel (%p6711_p7) target bundleno = 27 (0x1b), region = 44 }
  0x14   : > { %s6860_s27 = sshll.u32 %s293_s26, 9  ;;  %s6861_s28 = sshll.u32 %s293_s26, 8 }
  0x15   : > { %s6701_s29 = sshll.u32 %s9358_s25, 3  ;;  %s7621_s7 = scalar_lea.vmem %s9219_s1, %s6860_s27 }
  0x16   : > { %s290_s10 = scalar_lea.vmem %s9218_s0, %s6701_s29  ;;  %s7629_s13 = scalar_lea.vmem %s9220_s2, %s6861_s28 }
  0x17   : > { %s6706_s14 = sshll.u32 %s293_s26, 3  ;;  %s7634_s17 = scalar_lea.vmem %s9223_s5, %s6701_s29  ;;  %v322_v0 = vld [vmem:[%s290_s10] sm:$0x1f] (!%p6711_p7)  ;;  %v323_v1 = vld [vmem:[%s290_s10 + $0x8] sm:$0x1f] (!%p6711_p7) }
  0x18   : > { %s7639_s27 = scalar_lea.vmem %s9221_s3, %s6706_s14  ;;  %s7644_s8 = scalar_lea.vmem %s9222_s4, %s6706_s14  ;;  %v324_v2 = vld [vmem:[%s290_s10 + $0x10] sm:$0x1f] (!%p6711_p7)  ;;  %326 = vst [vmem:[%s7634_s17] sm:$0x1f] (!%p6711_p7), %v322_v0  ;;  %v325_v3 = vld [vmem:[%s290_s10 + $0x18] sm:$0x1f] (!%p6711_p7) }
  0x19   : > { %327 = vst [vmem:[%s7634_s17 + $0x8] sm:$0x1f] (!%p6711_p7), %v323_v1  ;;  %328 = vst [vmem:[%s7634_s17 + $0x10] sm:$0x1f] (!%p6711_p7), %v324_v2 }
  0x1a   : > { %329 = vst [vmem:[%s7634_s17 + $0x18] sm:$0x1f] %v325_v3 }
  0x1b PF: > { %v342_v5 = vlaneseq  ;;  %v7546_v7 = vmov 1966171168   ;;  %vm645_vm0 = vcmask 1043456   ;;  %vm7549_vm1 = vmmov 0   ;;  %s7551_s18 = smov 96   ;;  %s7552_s26 = smov 64  }
  0x1c   : > { %v340_v8 = vunpack.c.l.s4 %v7546_v7  ;;  %vm2094_vm2 = vcmask 261120   ;;  %vm2348_vm3 = vcmask 1041408   ;;  %vm2349_vm4 = vcmask 1042432   ;;  %s7553_s28 = smov 32  }
  0x1d   : > { %v7655_v11 = vshrl.u32 %v342_v5, 7  ;;  %vm2283_vm5 = vcmask 36864   ;;  %vm2344_vm6 = vcmask 39936   ;;  %vm3969_vm7 = vcmask 523264  }
  0x1e   : > { %v341_v13 = vunpack.c.0.s8 %v340_v8  ;;  %vm3974_vm8 = vcmask 785408  }
  0x20   : > { %v330_v4 = vld [vmem:[%s7634_s17] sm:$0x1f]  ;;  %v7658_v17 = vsub.s32 %v341_v13, %v7655_v11 }
  0x21   : > { %v331_v6 = vld [vmem:[%s7634_s17 + $0x8] sm:$0x1f]  ;;  %v332_v9 = vld [vmem:[%s7634_s17 + $0x10] sm:$0x1f]  ;;  %v333_v10 = vld [vmem:[%s7634_s17 + $0x18] sm:$0x1f]  ;;  %v338_v12 = vcombine.high %v330_v4, %v330_v4 }
  0x22   : > { %v377_v14 = vcombine.high %v331_v6, %v331_v6  ;;  %v416_v15 = vcombine.high %v332_v9, %v332_v9  ;;  %v455_v16 = vcombine.high %v333_v10, %v333_v10  ;;  %v345_v18 = vrot.slane %v330_v4, %v7658_v17 }
  0x23   : > { %v352_v19 = vrot.slane %v338_v12, %v7658_v17  ;;  %v384_v20 = vrot.slane %v331_v6, %v7658_v17  ;;  %v423_v22 = vrot.slane %v332_v9, %v7658_v17  ;;  %v462_v24 = vrot.slane %v333_v10, %v7658_v17 }
  0x24   : > { %v391_v21 = vrot.slane %v377_v14, %v7658_v17  ;;  %v430_v23 = vrot.slane %v416_v15, %v7658_v17  ;;  %v469_v25 = vrot.slane %v455_v16, %v7658_v17  ;;  %v353_v26 = vcombine.high %v345_v18, %v345_v18 }
  0x25   : > { %v7669_v27 = vrot.slane %v345_v18, %v7658_v17  ;;  %v7672_v28 = vrot.slane %v352_v19, %v7658_v17  ;;  %v392_v29 = vcombine.high %v384_v20, %v384_v20  ;;  %v7675_v30 = vrot.slane %v384_v20, %v7658_v17 }
  0x26   : > { %v7678_v31 = vrot.slane %v391_v21, %v7658_v17  ;;  %v431_v32 = vcombine.high %v423_v22, %v423_v22  ;;  %v7681_v33 = vrot.slane %v423_v22, %v7658_v17  ;;  %v7684_v34 = vrot.slane %v353_v26, %v7658_v17 }
  0x27   : > { %9266 = vst [vmem:[#allocation2_spill] sm:$0xff] %v7669_v27  ;;  %9267 = vst [vmem:[#allocation3_spill] sm:$0xff] %v7672_v28  ;;  %v7687_v35 = vrot.slane %v392_v29, %v7658_v17  ;;  %v7690_v36 = vrot.slane %v430_v23, %v7658_v17  ;;  %v7693_v37 = vrot.slane %v462_v24, %v7658_v17  ;;  %v7757_v16 = vsub.s32 0, %v7655_v11 }
  0x28   : > { %9268 = vst [vmem:[#allocation4_spill] sm:$0xff] %v7675_v30  ;;  %9269 = vst [vmem:[#allocation5_spill] sm:$0xff] %v7678_v31  ;;  %v7697_v38 = vcombine.high %v7675_v30, %v7675_v30  ;;  %v518_v39 = vcombine.low %v7672_v28, %v7675_v30  ;;  %v7702_v40 = vrot.slane %v431_v32, %v7658_v17  ;;  %v7760_v18 = vsub.s32 1, %v7655_v11 }
  0x29   : > { %9270 = vst [vmem:[#allocation6_spill] sm:$0xff] %v7681_v33  ;;  %9271 = vst [vmem:[#allocation7_spill] sm:$0xff] %v7684_v34  ;;  %v470_v41 = vcombine.high %v462_v24, %v462_v24  ;;  %v516_v42 = vcombine.low %v7669_v27, %v7684_v34  ;;  %v6712_v43 = vcombine.high %v7669_v27, %v7684_v34  ;;  %v7763_v19 = vsub.s32 2, %v7655_v11 }
  0x2a   : > { %9272 = vst [vmem:[#allocation8_spill] sm:$0xff] %v7687_v35  ;;  %9273 = vst [vmem:[#allocation9_spill] sm:$0xff] %v7690_v36  ;;  %v7710_v44 = vcombine.high %v7687_v35, %v7687_v35  ;;  %v568_v45 = vcombine.low %v7690_v36, %v7693_v37  ;;  %v519_v46 = vcombine.low %v7687_v35, %v7697_v38  ;;  %v7766_v20 = vsub.s32 3, %v7655_v11 }
  0x2b   : > { %9274 = vst [vmem:[#allocation10_spill] sm:$0xff] %v7693_v37  ;;  %9275 = vst [vmem:[#allocation11_spill] sm:$0xff] %v7697_v38  ;;  %v540_v47 = vrot.slane %v518_v39, %v7658_v17  ;;  %v566_v48 = vcombine.low %v7681_v33, %v7702_v40  ;;  %v6713_v49 = vcombine.high %v7681_v33, %v7702_v40  ;;  %v7769_v22 = vsub.s32 4, %v7655_v11 }
  0x2c   : > { %9276 = vst [vmem:[#allocation12_spill] sm:$0xff] %v7702_v40  ;;  %9277 = vst [vmem:[#allocation13_spill] sm:$0xff] %v7710_v44  ;;  %v526_v50 = vrot.slane %v516_v42, %v7658_v17  ;;  %v533_v51 = vrot.slane %v6712_v43, %v7658_v17  ;;  %v565_v52 = vcombine.low %v7710_v44, %v7678_v31  ;;  %v7772_v23 = vsub.s32 5, %v7655_v11 }
  0x2d   : > { %v596_v53 = vrot.slane %v568_v45, %v7658_v17  ;;  %v547_v54 = vrot.slane %v519_v46, %v7658_v17  ;;  %v582_v55 = vrot.slane %v566_v48, %v7658_v17  ;;  %v589_v56 = vrot.slane %v6713_v49, %v7658_v17 }
  0x2e   : > { %v7730_v57 = vrot.slane %v469_v25, %v7658_v17  ;;  %v548_v58 = vcombine.low %v526_v50, %v533_v51  ;;  %v575_v59 = vrot.slane %v565_v52, %v7658_v17  ;;  %v7734_v60 = vrot.slane %v470_v41, %v7658_v17 }
  0x2f   : > { %v7738_v61 = vcombine.high %v7693_v37, %v7693_v37  ;;  %v549_v62 = vcombine.low %v540_v47, %v547_v54  ;;  %v598_v63 = vcombine.low %v589_v56, %v596_v53  ;;  %v7775_v24 = vsub.s32 6, %v7655_v11 }
  0x30   : > { %9278 = vst [vmem:[#allocation14_spill] sm:$0xff] %v7730_v57  ;;  %9279 = vst [vmem:[#allocation15_spill] sm:$0xff] %v7734_v60  ;;  %v556_v0 = vrot.slane %v548_v58, %v7658_v17  ;;  %v597_v1 = vcombine.low %v575_v59, %v582_v55  ;;  %v7743_v2 = vcombine.high %v7734_v60, %v7734_v60  ;;  %v7778_v25 = vsub.s32 7, %v7655_v11 }
  0x31   : > { %9280 = vst [vmem:[#allocation16_spill] sm:$0xff] %v7738_v61  ;;  %v614_v3 = vcombine.low %v7734_v60, %v7738_v61  ;;  %v563_v4 = vrot.slane %v549_v62, %v7658_v17  ;;  %v612_v5 = vrot.slane %v598_v63, %v7658_v17  ;;  %v7782_v29 = vcombine.high %v7669_v27, %v7669_v27 }
  0x32   : > { %9281 = vst [vmem:[#allocation17_spill] sm:$0xff] %v7743_v2  ;;  %v605_v6 = vrot.slane %v597_v1, %v7658_v17  ;;  %v615_v7 = vcombine.low %v7743_v2, %v7730_v57  ;;  %v7786_v32 = vcombine.high %v7684_v34, %v7684_v34  ;;  %v7790_v39 = vcombine.high %v7681_v33, %v7681_v33 }
  0x33   : > { %v622_v8 = vrot.slane %v614_v3, %v7658_v17  ;;  %v564_v9 = vcombine.low %v556_v0, %v563_v4  ;;  %9282 = vst [vmem:[#allocation18_spill] sm:$0xff] %v7782_v29  ;;  %v7794_v41 = vcombine.high %v7702_v40, %v7702_v40 }
  0x34   : > { %v629_v10 = vrot.slane %v615_v7, %v7658_v17  ;;  %v613_v12 = vcombine.low %v605_v6, %v612_v5  ;;  %9283 = vst [vmem:[#allocation19_spill] sm:$0xff] %v7786_v32  ;;  %9284 = vst [vmem:[#allocation20_spill] sm:$0xff] %v7790_v39 }
  0x35   : > { %641 = vadd.xlane.f32.xlu0 %v564_v9  ;;  %9285 = vst [vmem:[#allocation21_spill] sm:$0xff] %v7794_v41 }
  0x36   : > { %v630_v13 = vcombine.low %v622_v8, %v629_v10 }
  0x38   : > { %v637_v14 = vrot.slane %v630_v13, %v7658_v17 }
  0x39   : > { %643 = vadd.xlane.f32.xlu0 %v613_v12 }
  0x3a   : > { %v646_v15 = vsel %vm645_vm0, %v637_v14, 0.0 }
  0x3b   : > { %647 = vadd.xlane.f32.xlu1 %v646_v15 }
  0xc2   : > { %v642_v21 = vpop.xlane.xlu0 %641 }
  0xc3   : > { %v650_v26 = vmul.f32 0.0078125, %v642_v21 }
  0xc5   : > { %v659_v11 = vrot.slane %v650_v26, %v7757_v16  ;;  %v663_v42 = vrot.slane %v650_v26, %v7760_v18  ;;  %v667_v43 = vrot.slane %v650_v26, %v7763_v19  ;;  %v671_v45 = vrot.slane %v650_v26, %v7766_v20 }
  0xc6   : > { %v644_v46 = vpop.xlane.xlu0 %643  ;;  %v675_v47 = vrot.slane %v650_v26, %v7769_v22  ;;  %v679_v48 = vrot.slane %v650_v26, %v7772_v23  ;;  %v683_v49 = vrot.slane %v650_v26, %v7775_v24  ;;  %v687_v50 = vrot.slane %v650_v26, %v7778_v25 }
  0xc7   : > { %v7804_v51 = vmul.f32 0.0078125, %v644_v46  ;;  %v7807_v52 = vsub.f32 %v7669_v27, %v659_v11  ;;  %v7810_v53 = vsub.f32 %v7684_v34, %v663_v42  ;;  %v7813_v54 = vsub.f32 %v7782_v29, %v667_v43 }
  0xc8   : > { %v648_v55 = vpop.xlane.xlu1 %647  ;;  %v7816_v56 = vsub.f32 %v7786_v32, %v671_v45  ;;  %v7819_v58 = vsub.f32 %v7672_v28, %v675_v47  ;;  %v7822_v59 = vsub.f32 %v7675_v30, %v679_v48  ;;  %v7825_v62 = vsub.f32 %v7687_v35, %v683_v49 }
  0xc9   : > { %v652_v63 = vmul.f32 0.0078125, %v648_v55  ;;  %v7828_v0 = vsub.f32 %v7697_v38, %v687_v50  ;;  %v776_v1 = vmul.f32 %v7807_v52, %v7807_v52  ;;  %v777_v3 = vmul.f32 %v7810_v53, %v7810_v53 }
  0xca   : > { %v778_v4 = vmul.f32 %v7813_v54, %v7813_v54  ;;  %v779_v5 = vmul.f32 %v7816_v56, %v7816_v56  ;;  %v780_v6 = vmul.f32 %v7819_v58, %v7819_v58  ;;  %v781_v7 = vmul.f32 %v7822_v59, %v7822_v59 }
  0xcb   : > { %v723_v8 = vrot.slane %v652_v63, %v7757_v16  ;;  %v727_v9 = vrot.slane %v652_v63, %v7760_v18  ;;  %v731_v10 = vrot.slane %v652_v63, %v7763_v19  ;;  %v735_v12 = vrot.slane %v652_v63, %v7766_v20 }
  0xcc   : > { %v782_v13 = vmul.f32 %v7825_v62, %v7825_v62  ;;  %v783_v14 = vmul.f32 %v7828_v0, %v7828_v0  ;;  %v816_v15 = vcombine.low %v776_v1, %v777_v3  ;;  %v817_v21 = vcombine.low %v778_v4, %v779_v5 }
  0xcd   : > { %v7851_v26 = vsub.f32 %v7734_v60, %v723_v8  ;;  %v7854_v11 = vsub.f32 %v7738_v61, %v727_v9  ;;  %v7857_v42 = vsub.f32 %v7743_v2, %v731_v10  ;;  %v7860_v43 = vsub.f32 %v7730_v57, %v735_v12 }
  0xce   : > { %v818_v45 = vcombine.low %v780_v6, %v781_v7  ;;  %v819_v46 = vcombine.low %v782_v13, %v783_v14  ;;  %v826_v47 = vrot.slane %v816_v15, %v7658_v17  ;;  %v833_v48 = vrot.slane %v817_v21, %v7658_v17 }
  0xcf   : > { %v792_v49 = vmul.f32 %v7851_v26, %v7851_v26  ;;  %v793_v50 = vmul.f32 %v7854_v11, %v7854_v11  ;;  %v794_v55 = vmul.f32 %v7857_v42, %v7857_v42  ;;  %v795_v63 = vmul.f32 %v7860_v43, %v7860_v43 }
  0xd0   : > { %v840_v1 = vrot.slane %v818_v45, %v7658_v17  ;;  %v847_v3 = vrot.slane %v819_v46, %v7658_v17  ;;  %v848_v4 = vcombine.low %v826_v47, %v833_v48  ;;  %v691_v5 = vrot.slane %v7804_v51, %v7757_v16 }
  0xd1   : > { %v914_v6 = vcombine.low %v792_v49, %v793_v50  ;;  %v915_v7 = vcombine.low %v794_v55, %v795_v63  ;;  %v695_v8 = vrot.slane %v7804_v51, %v7760_v18  ;;  %v699_v9 = vrot.slane %v7804_v51, %v7763_v19 }
  0xd2   : > { %v849_v10 = vcombine.low %v840_v1, %v847_v3  ;;  %v856_v12 = vrot.slane %v848_v4, %v7658_v17  ;;  %v703_v13 = vrot.slane %v7804_v51, %v7766_v20  ;;  %v707_v14 = vrot.slane %v7804_v51, %v7769_v22 }
  0xd3   : > { %v922_v15 = vrot.slane %v914_v6, %v7658_v17  ;;  %v929_v21 = vrot.slane %v915_v7, %v7658_v17  ;;  %v711_v45 = vrot.slane %v7804_v51, %v7772_v23  ;;  %v715_v46 = vrot.slane %v7804_v51, %v7775_v24 }
  0xd4   : > { %v863_v47 = vrot.slane %v849_v10, %v7658_v17  ;;  %v719_v48 = vrot.slane %v7804_v51, %v7778_v25  ;;  %v7895_v49 = vsub.f32 %v7710_v44, %v691_v5  ;;  %v7898_v50 = vsub.f32 %v7678_v31, %v695_v8 }
  0xd5   : > { %v930_v55 = vcombine.low %v922_v15, %v929_v21  ;;  %v7901_v63 = vsub.f32 %v7681_v33, %v699_v9  ;;  %v7904_v1 = vsub.f32 %v7702_v40, %v703_v13  ;;  %v7907_v3 = vsub.f32 %v7790_v39, %v707_v14 }
  0xd6   : > { %v864_v4 = vcombine.low %v856_v12, %v863_v47  ;;  %v7910_v6 = vsub.f32 %v7794_v41, %v711_v45  ;;  %v7913_v51 = vsub.f32 %v7690_v36, %v715_v46  ;;  %v7916_v5 = vsub.f32 %v7693_v37, %v719_v48 }
  0xd7   : > { %v937_v7 = vrot.slane %v930_v55, %v7658_v17  ;;  %v784_v8 = vmul.f32 %v7895_v49, %v7895_v49  ;;  %v785_v9 = vmul.f32 %v7898_v50, %v7898_v50  ;;  %v786_v10 = vmul.f32 %v7901_v63, %v7901_v63 }
  0xd8   : > { %941 = vadd.xlane.f32.xlu1 %v864_v4  ;;  %v787_v12 = vmul.f32 %v7904_v1, %v7904_v1  ;;  %v788_v13 = vmul.f32 %v7907_v3, %v7907_v3  ;;  %v789_v14 = vmul.f32 %v7910_v6, %v7910_v6  ;;  %v790_v15 = vmul.f32 %v7913_v51, %v7913_v51 }
  0xd9   : > { %v945_v21 = vsel %vm645_vm0, %v937_v7, 0.0  ;;  %v791_v45 = vmul.f32 %v7916_v5, %v7916_v5  ;;  %v865_v46 = vcombine.low %v784_v8, %v785_v9 }
  0xda   : > { %v866_v47 = vcombine.low %v786_v10, %v787_v12  ;;  %v867_v48 = vcombine.low %v788_v13, %v789_v14  ;;  %v1391_v12 = vld [vmem:[%s7621_s7] sm:$0xff] }
  0xdb   : > { %v868_v55 = vcombine.low %v790_v15, %v791_v45  ;;  %v875_v4 = vrot.slane %v865_v46, %v7658_v17  ;;  %v1393_v13 = vld [vmem:[%s7621_s7 + $0x20] sm:$0xff]  ;;  %v1392_v15 = vld [vmem:[%s7621_s7 + $0x8] sm:$0xf] }
  0xdc   : > { %946 = vadd.xlane.f32.xlu1 %v945_v21  ;;  %v882_v37 = vrot.slane %v866_v47, %v7658_v17  ;;  %v889_v40 = vrot.slane %v867_v48, %v7658_v17  ;;  %v6715_v14 = vcombine.high %v1391_v12, %v1393_v13  ;;  %v1394_v21 = vld [vmem:[%s7621_s7 + $0x28] sm:$0xf]  ;;  %v6714_v45 = vcombine.low %v1391_v12, %v1393_v13  ;;  %v1403_v13 = vld [vmem:[%s7621_s7 + $0xc0] sm:$0xff] }
  0xdd   : > { %v896_v7 = vrot.slane %v868_v55, %v7658_v17  ;;  %v1398_v48 = vld [vmem:[%s7621_s7 + $0x68] sm:$0xf]  ;;  %v1399_v55 = vld [vmem:[%s7621_s7 + $0x80] sm:$0xff] }
  0xde   : > { %v897_v36 = vcombine.low %v875_v4, %v882_v37  ;;  %v6716_v37 = vcombine.low %v1392_v15, %v1394_v21  ;;  %1579 = vmatprep.subr.bf16.mxu0 %v6715_v14  ;;  %v1401_v4 = vld [vmem:[%s7621_s7 + $0xa0] sm:$0xff]  ;;  %v1402_v12 = vld [vmem:[%s7621_s7 + $0xa8] sm:$0xf] }
  0xdf   : > { %v898_v41 = vcombine.low %v889_v40, %v896_v7  ;;  %1580 = vmatpush1.bf16.msra.mxu0 %v6714_v45  ;;  %v1397_v40 = vld [vmem:[%s7621_s7 + $0x60] sm:$0xff]  ;;  %v9228_v7 = vmov 0   ;;  %v1404_v21 = vld [vmem:[%s7621_s7 + $0xc8] sm:$0xf] }
  0xe0   : > { %v905_v8 = vrot.slane %v897_v36, %v7658_v17  ;;  %7003 = vmatprep.subr.bf16.mxu1 %v6716_v37  ;;  %v1395_v36 = vld [vmem:[%s7621_s7 + $0x40] sm:$0xff]  ;;  %1611 = vmatprep.mubr.bf16.mxu0 %v9228_v7  ;;  %v1406_v45 = vld [vmem:[%s7621_s7 + $0xe8] sm:$0xf] }
  0xe1   : > { %v912_v9 = vrot.slane %v898_v41, %v7658_v17  ;;  %v1396_v41 = vld [vmem:[%s7621_s7 + $0x48] sm:$0xf]  ;;  %7004 = vmatpush3.bf16.msra.mxu1 %v6716_v37  ;;  %v6718_v46 = vcombine.high %v1395_v36, %v1397_v40  ;;  %v6717_v47 = vcombine.low %v1395_v36, %v1397_v40  ;;  %v1405_v15 = vld [vmem:[%s7621_s7 + $0xe0] sm:$0xff]  ;;  %v6720_v37 = vcombine.low %v1399_v55, %v1401_v4 }
  0xe2   : > { %v6724_v36 = vcombine.high %v1403_v13, %v1405_v15  ;;  %v6725_v40 = vcombine.low %v1404_v21, %v1406_v45  ;;  %v1410_v7 = vld [vmem:[%s7621_s7 + $0x128] sm:$0xf]  ;;  %v1417_v45 = vld [vmem:[%s7621_s7 + $0x1a0] sm:$0xff] }
  0xe3   : > { %v913_v10 = vcombine.low %v905_v8, %v912_v9  ;;  %v6719_v8 = vcombine.low %v1396_v41, %v1398_v48  ;;  %v6721_v9 = vcombine.high %v1399_v55, %v1401_v4  ;;  %1581 = vmatprep.subr.bf16.mxu0 %v6718_v46  ;;  %v1407_v41 = vld [vmem:[%s7621_s7 + $0x100] sm:$0xff]  ;;  %v1408_v46 = vld [vmem:[%s7621_s7 + $0x108] sm:$0xf] }
  0xe4   : > { %1582 = vmatpush1.bf16.msra.mxu0 %v6717_v47  ;;  %v1409_v48 = vld [vmem:[%s7621_s7 + $0x120] sm:$0xff]  ;;  %v6728_v55 = vcombine.low %v1408_v46, %v1410_v7 }
  0xe5   : > { %943 = vadd.xlane.f32.xlu0 %v913_v10  ;;  %v1400_v10 = vld [vmem:[%s7621_s7 + $0x88] sm:$0xf]  ;;  %7005 = vmatprep.subr.bf16.mxu1 %v6719_v8  ;;  %v6727_v47 = vcombine.high %v1407_v41, %v1409_v48  ;;  %v1411_v4 = vld [vmem:[%s7621_s7 + $0x140] sm:$0xff]  ;;  %v6726_v21 = vcombine.low %v1407_v41, %v1409_v48 }
  0xe6   : > { %v6722_v14 = vcombine.low %v1400_v10, %v1402_v12  ;;  %7006 = vmatpush3.bf16.msra.mxu1 %v6719_v8  ;;  %1583 = vmatprep.subr.bf16.mxu0 %v6721_v9  ;;  %v6723_v10 = vcombine.low %v1403_v13, %v1405_v15  ;;  %v1413_v8 = vld [vmem:[%s7621_s7 + $0x160] sm:$0xff]  ;;  %v1412_v9 = vld [vmem:[%s7621_s7 + $0x148] sm:$0xf] }
  0xe7   : > { %v1414_v12 = vld [vmem:[%s7621_s7 + $0x168] sm:$0xf]  ;;  %v6730_v13 = vcombine.high %v1411_v4, %v1413_v8  ;;  %v1415_v15 = vld [vmem:[%s7621_s7 + $0x180] sm:$0xff]  ;;  %v6729_v7 = vcombine.low %v1411_v4, %v1413_v8 }
  0xe8   : > { %7007 = vmatprep.subr.bf16.mxu1 %v6722_v14  ;;  %1584 = vmatpush1.bf16.msra.mxu0 %v6720_v37  ;;  %v1416_v37 = vld [vmem:[%s7621_s7 + $0x188] sm:$0xf]  ;;  %v6733_v46 = vcombine.high %v1415_v15, %v1417_v45  ;;  %v1421_v48 = vld [vmem:[%s7621_s7 + $0x1e0] sm:$0xff]  ;;  %v6732_v33 = vcombine.low %v1415_v15, %v1417_v45 }
  0xe9   : > { %1585 = vmatprep.subr.bf16.mxu0 %v6724_v36  ;;  %v1418_v36 = vld [vmem:[%s7621_s7 + $0x1a8] sm:$0xf] }
  0xea   : > { %7008 = vmatpush3.bf16.msra.mxu1 %v6722_v14  ;;  %v6731_v14 = vcombine.low %v1412_v9, %v1414_v12  ;;  %v6734_v41 = vcombine.low %v1416_v37, %v1418_v36 }
  0xeb   : > { %7009 = vmatprep.subr.bf16.mxu1 %v6725_v40 }
  0xec   : > { %1586 = vmatpush1.bf16.msra.mxu0 %v6723_v10  ;;  %v1420_v10 = vld [vmem:[%s7621_s7 + $0x1c8] sm:$0xf] }
  0xed   : > { %1587 = vmatprep.subr.bf16.mxu0 %v6727_v47  ;;  %v1422_v47 = vld [vmem:[%s7621_s7 + $0x1e8] sm:$0xf] }
  0xee   : > { %7010 = vmatpush3.bf16.msra.mxu1 %v6725_v40  ;;  %v1419_v40 = vld [vmem:[%s7621_s7 + $0x1c0] sm:$0xff]  ;;  %v6737_v12 = vcombine.low %v1420_v10, %v1422_v47 }
  0xef   : > { %7011 = vmatprep.subr.bf16.mxu1 %v6728_v55  ;;  %v6736_v9 = vcombine.high %v1419_v40, %v1421_v48 }
  0xf0   : > { %1588 = vmatpush1.bf16.msra.mxu0 %v6726_v21  ;;  %v6735_v21 = vcombine.low %v1419_v40, %v1421_v48 }
  0xf1   : > { %1589 = vmatprep.subr.bf16.mxu0 %v6730_v13 }
  0xf2   : > { %7012 = vmatpush3.bf16.msra.mxu1 %v6728_v55  ;;  %v514_v55 = vld [vmem:[%s7639_s27] sm:$0x3f] }
  0xf3   : > { %7013 = vmatprep.subr.bf16.mxu1 %v6731_v14  ;;  %v1083_v4 = vrot.slane %v514_v55, %v7757_v16  ;;  %v1165_v8 = vrot.slane %v514_v55, %v7760_v18 }
  0xf4   : > { %1590 = vmatpush1.bf16.msra.mxu0 %v6729_v7 }
  0xf5   : > { %1591 = vmatprep.subr.bf16.mxu0 %v6733_v46  ;;  %v1085_v13 = vcombine.high %v1083_v4, %v1083_v4  ;;  %v1167_v37 = vcombine.high %v1165_v8, %v1165_v8  ;;  %v1092_v45 = vrot.slane %v1083_v4, %v7658_v17  ;;  %v1174_v7 = vrot.slane %v1165_v8, %v7658_v17 }
  0xf6   : > { %7014 = vmatpush3.bf16.msra.mxu1 %v6731_v14 }
  0xf7   : > { %7015 = vmatprep.subr.bf16.mxu1 %v6734_v41  ;;  %v1099_v36 = vrot.slane %v1085_v13, %v7658_v17  ;;  %v1181_v46 = vrot.slane %v1167_v37, %v7658_v17  ;;  %v1100_v48 = vcombine.high %v1092_v45, %v1092_v45  ;;  %v7995_v13 = vrot.slane %v1174_v7, %v7658_v17 }
  0xf8   : > { %1592 = vmatpush1.bf16.msra.mxu0 %v6732_v33 }
  0xf9   : > { %1593 = vmatprep.subr.bf16.mxu0 %v6736_v9  ;;  %v1101_v10 = vcombine.high %v1099_v36, %v1099_v36  ;;  %v1182_v9 = vcombine.high %v1174_v7, %v1174_v7  ;;  %v7986_v55 = vrot.slane %v1099_v36, %v7658_v17  ;;  %v7989_v4 = vrot.slane %v1100_v48, %v7658_v17 }
  0xfa   : > { %7016 = vmatpush3.bf16.msra.mxu1 %v6734_v41  ;;  %v7998_v37 = vrot.slane %v1181_v46, %v7658_v17  ;;  %v8024_v48 = vcombine.high %v7995_v13, %v7995_v13 }
  0xfb   : > { %7017 = vmatprep.subr.bf16.mxu1 %v6737_v12  ;;  %v7992_v8 = vrot.slane %v1101_v10, %v7658_v17  ;;  %v8012_v7 = vcombine.high %v7986_v55, %v7986_v55 }
  0xfc   : > { %1594 = vmatpush1.bf16.msra.mxu0 %v6735_v21  ;;  %v7983_v21 = vrot.slane %v1092_v45, %v7658_v17  ;;  %v8028_v10 = vcombine.high %v7998_v37, %v7998_v37 }
  0xfe   : > { %7018 = vmatpush3.bf16.msra.mxu1 %v6737_v12  ;;  %v1183_v12 = vcombine.high %v1181_v46, %v1181_v46  ;;  %v8008_v36 = vcombine.high %v7983_v21, %v7983_v21  ;;  %v8016_v46 = vcombine.high %v7989_v4, %v7989_v4 }
 0x165   : > { %v942_v15 = vpop.xlane.xlu1 %941 }
 0x166   : > { %v948_v14 = vmul.f32 0.0078125, %v942_v15  ;;  %v8001_v15 = vrot.slane %v1182_v9, %v7658_v17 }
 0x168   : > { %v951_v33 = vadd.f32 1e-05, %v948_v14  ;;  %v8004_v14 = vrot.slane %v1183_v12, %v7658_v17 }
 0x169   : > { %v947_v41 = vpop.xlane.xlu1 %946 }
 0x16a   : > { %7379 = vrsqrt.f32 %v951_v33  ;;  %v950_v40 = vmul.f32 0.0078125, %v947_v41  ;;  %v8020_v41 = vcombine.high %v7992_v8, %v7992_v8  ;;  %v8036_v9 = vcombine.high %v8004_v14, %v8004_v14 }
 0x16c   : > { %v953_v47 = vadd.f32 1e-05, %v950_v40 }
 0x16e   : > { %7381 = vrsqrt.f32 %v953_v47  ;;  %v8032_v47 = vcombine.high %v8001_v15, %v8001_v15 }
 0x172   : > { %v944_v45 = vpop.xlane.xlu0 %943 }
 0x173   : > { %v949_v33 = vmul.f32 0.0078125, %v944_v45 }
 0x174   : > { %v7380_v40 = vpop.eup %7379 }
 0x175   : > { %v952_v12 = vadd.f32 1e-05, %v949_v33  ;;  %v963_v45 = vrot.slane %v7380_v40, %v7757_v16  ;;  %v967_v31 = vrot.slane %v7380_v40, %v7760_v18  ;;  %v971_v39 = vrot.slane %v7380_v40, %v7763_v19 }
 0x176   : > { %v975_v44 = vrot.slane %v7380_v40, %v7766_v20  ;;  %v979_v38 = vrot.slane %v7380_v40, %v7769_v22  ;;  %v983_v35 = vrot.slane %v7380_v40, %v7772_v23  ;;  %v987_v30 = vrot.slane %v7380_v40, %v7775_v24 }
 0x177   : > { %7383 = vrsqrt.f32 %v952_v12  ;;  %v991_v32 = vrot.slane %v7380_v40, %v7778_v25  ;;  %v1060_v28 = vmul.f32 %v963_v45, %v7807_v52  ;;  %v1061_v33 = vmul.f32 %v967_v31, %v7810_v53 }
 0x178   : > { %v1062_v29 = vmul.f32 %v971_v39, %v7813_v54  ;;  %v1063_v57 = vmul.f32 %v975_v44, %v7816_v56  ;;  %v1064_v34 = vmul.f32 %v979_v38, %v7819_v58  ;;  %v1065_v27 = vmul.f32 %v983_v35, %v7822_v59  ;;  %v7382_v60 = vpop.eup %7381 }
 0x179   : > { %v1066_v2 = vmul.f32 %v987_v30, %v7825_v62  ;;  %v1067_v61 = vmul.f32 %v991_v32, %v7828_v0  ;;  %v1142_v12 = vmul.f32 %v7983_v21, %v1060_v28  ;;  %v1143_v40 = vmul.f32 %v7989_v4, %v1061_v33 }
 0x17a   : > { %v1144_v52 = vmul.f32 %v8008_v36, %v1062_v29  ;;  %v1145_v31 = vmul.f32 %v8016_v46, %v1063_v57  ;;  %v1146_v39 = vmul.f32 %v7986_v55, %v1064_v34  ;;  %v1147_v44 = vmul.f32 %v7992_v8, %v1065_v27 }
 0x17b   : > { %v1148_v38 = vmul.f32 %v8012_v7, %v1066_v2  ;;  %v1149_v35 = vmul.f32 %v8020_v41, %v1067_v61  ;;  %v1224_v30 = vadd.f32 %v7995_v13, %v1142_v12  ;;  %v1225_v32 = vadd.f32 %v8001_v15, %v1143_v40 }
 0x17c   : > { %v1226_v28 = vadd.f32 %v8024_v48, %v1144_v52  ;;  %v1227_v53 = vadd.f32 %v8032_v47, %v1145_v31  ;;  %v1228_v29 = vadd.f32 %v7998_v37, %v1146_v39  ;;  %v1229_v57 = vadd.f32 %v8004_v14, %v1147_v44 }
 0x17d   : > { %v1230_v34 = vadd.f32 %v8028_v10, %v1148_v38  ;;  %v1231_v27 = vadd.f32 %v8036_v9, %v1149_v35  ;;  %v1264_v54 = vcombine.low %v1224_v30, %v1225_v32  ;;  %v1027_v2 = vrot.slane %v7382_v60, %v7757_v16 }
 0x17e   : > { %v1265_v61 = vcombine.low %v1226_v28, %v1227_v53  ;;  %v1266_v56 = vcombine.low %v1228_v29, %v1229_v57  ;;  %v1031_v58 = vrot.slane %v7382_v60, %v7760_v18  ;;  %v1035_v59 = vrot.slane %v7382_v60, %v7763_v19 }
 0x17f   : > { %v1267_v62 = vcombine.low %v1230_v34, %v1231_v27  ;;  %v1039_v0 = vrot.slane %v7382_v60, %v7766_v20  ;;  %v1076_v45 = vmul.f32 %v1027_v2, %v7851_v26  ;;  %v1274_v33 = vrot.slane %v1264_v54, %v7658_v17 }
 0x180   : > { %v1281_v12 = vrot.slane %v1265_v61, %v7658_v17  ;;  %v1288_v40 = vrot.slane %v1266_v56, %v7658_v17  ;;  %v1077_v52 = vmul.f32 %v1031_v58, %v7854_v11  ;;  %v1078_v44 = vmul.f32 %v1035_v59, %v7857_v42 }
 0x181   : > { %v7384_v31 = vpop.eup %7383  ;;  %v1295_v39 = vrot.slane %v1267_v62, %v7658_v17  ;;  %v1079_v38 = vmul.f32 %v1039_v0, %v7860_v43  ;;  %v1158_v35 = vmul.f32 %v7983_v21, %v1076_v45 }
 0x182   : > { %v995_v60 = vrot.slane %v7384_v31, %v7757_v16  ;;  %v999_v26 = vrot.slane %v7384_v31, %v7760_v18  ;;  %v1003_v30 = vrot.slane %v7384_v31, %v7763_v19  ;;  %v1007_v32 = vrot.slane %v7384_v31, %v7766_v20 }
 0x183   : > { %v1011_v28 = vrot.slane %v7384_v31, %v7769_v22  ;;  %v1015_v11 = vrot.slane %v7384_v31, %v7772_v23  ;;  %v1019_v53 = vrot.slane %v7384_v31, %v7775_v24  ;;  %v1023_v42 = vrot.slane %v7384_v31, %v7778_v25 }
 0x184   : > { %v1068_v43 = vmul.f32 %v995_v60, %v7895_v49  ;;  %v1069_v29 = vmul.f32 %v999_v26, %v7898_v50  ;;  %v1070_v57 = vmul.f32 %v1003_v30, %v7901_v63  ;;  %v1071_v34 = vmul.f32 %v1007_v32, %v7904_v1 }
 0x185   : > { %v1072_v27 = vmul.f32 %v1011_v28, %v7907_v3  ;;  %v1073_v54 = vmul.f32 %v1015_v11, %v7910_v6  ;;  %v1074_v2 = vmul.f32 %v1019_v53, %v7913_v51  ;;  %v1075_v61 = vmul.f32 %v1023_v42, %v7916_v5 }
 0x186   : > { %v1150_v56 = vmul.f32 %v7983_v21, %v1068_v43  ;;  %v1151_v58 = vmul.f32 %v7989_v4, %v1069_v29  ;;  %v1152_v49 = vmul.f32 %v8008_v36, %v1070_v57  ;;  %v1153_v50 = vmul.f32 %v8016_v46, %v1071_v34 }
 0x187   : > { %v1154_v63 = vmul.f32 %v7986_v55, %v1072_v27  ;;  %v1155_v1 = vmul.f32 %v7992_v8, %v1073_v54  ;;  %v1156_v3 = vmul.f32 %v8012_v7, %v1074_v2  ;;  %v1157_v6 = vmul.f32 %v8020_v41, %v1075_v61  ;;  %v515_v27 = vld [vmem:[%s7644_s8] sm:$0xff] }
 0x188   : > { %v1232_v51 = vadd.f32 %v7995_v13, %v1150_v56  ;;  %v1233_v5 = vadd.f32 %v8001_v15, %v1151_v58  ;;  %v1234_v21 = vadd.f32 %v8024_v48, %v1152_v49  ;;  %v1235_v59 = vadd.f32 %v8032_v47, %v1153_v50 }
 0x189   : > { %v1236_v62 = vadd.f32 %v7998_v37, %v1154_v63  ;;  %v1237_v0 = vadd.f32 %v8004_v14, %v1155_v1  ;;  %v1238_v55 = vadd.f32 %v8028_v10, %v1156_v3  ;;  %v1239_v8 = vadd.f32 %v8036_v9, %v1157_v6 }
 0x18a   : > { %v1296_v45 = vcombine.low %v1274_v33, %v1281_v12  ;;  %v1297_v7 = vcombine.low %v1288_v40, %v1295_v39  ;;  %v1313_v31 = vcombine.low %v1232_v51, %v1233_v5  ;;  %v1314_v41 = vcombine.low %v1234_v21, %v1235_v59 }
 0x18b   : > { %v1315_v60 = vcombine.low %v1236_v62, %v1237_v0  ;;  %v1316_v26 = vcombine.low %v1238_v55, %v1239_v8  ;;  %v1159_v30 = vmul.f32 %v7989_v4, %v1077_v52  ;;  %v1160_v32 = vmul.f32 %v8008_v36, %v1078_v44 }
 0x18c   : > { %v1323_v28 = vrot.slane %v1313_v31, %v7658_v17  ;;  %v1330_v37 = vrot.slane %v1314_v41, %v7658_v17  ;;  %v1161_v9 = vmul.f32 %v8016_v46, %v1079_v38  ;;  %v1240_v33 = vadd.f32 %v7995_v13, %v1158_v35 }
 0x18d   : > { %v1337_v14 = vrot.slane %v1315_v60, %v7658_v17  ;;  %v1344_v10 = vrot.slane %v1316_v26, %v7658_v17  ;;  %v1241_v40 = vadd.f32 %v8001_v15, %v1159_v30  ;;  %v1242_v39 = vadd.f32 %v8024_v48, %v1160_v32 }
 0x18e   : > { %v1345_v12 = vcombine.low %v1323_v28, %v1330_v37  ;;  %v1304_v4 = vrot.slane %v1296_v45, %v7658_v17  ;;  %v1311_v36 = vrot.slane %v1297_v7, %v7658_v17  ;;  %v1243_v44 = vadd.f32 %v8032_v47, %v1161_v9 }
 0x18f   : > { %v1346_v52 = vcombine.low %v1337_v14, %v1344_v10  ;;  %v1362_v53 = vcombine.low %v1240_v33, %v1241_v40  ;;  %v9286_v47 = vmov 0   ;;  %v7548_v34 = vmov 0.0  }
 0x190   : > { %v1353_v11 = vrot.slane %v1345_v12, %v7658_v17  ;;  %v1363_v46 = vcombine.low %v1242_v39, %v1243_v44  ;;  %v1312_v38 = vcombine.low %v1304_v4, %v1311_v36  ;;  %7023 = vmatprep.subr.bf16.mxu0 %v7548_v34  ;;  %7035 = vmatprep.subr.bf16.mxu1 %v7548_v34 }
 0x191   : > { %v1360_v42 = vrot.slane %v1346_v52, %v7658_v17  ;;  %v1370_v13 = vrot.slane %v1362_v53, %v7658_v17  ;;  %v1427_v54 = vrot.slane %v515_v27, %v7757_v16  ;;  %v1431_v2 = vrot.slane %v515_v27, %v7763_v19 }
 0x192   : > { %v1377_v15 = vrot.slane %v1363_v46, %v7658_v17  ;;  %v1435_v58 = vrot.slane %v515_v27, %v7769_v22 }
 0x193   : > { %v1361_v35 = vcombine.low %v1353_v11, %v1360_v42  ;;  %v1442_v61 = vrot.slane %v1427_v54, %v7757_v16  ;;  %v1446_v56 = vrot.slane %v1431_v2, %v7757_v16 }
 0x194   : > { %v1378_v43 = vcombine.low %v1370_v13, %v1377_v15  ;;  %v1450_v3 = vrot.slane %v1435_v58, %v7757_v16 }
 0x195   : > { %v1389_v48 = vpack.c.bf16 %v1361_v35, %v1312_v38 }
 0x196   : > { %v1385_v29 = vrot.slane %v1378_v43, %v7658_v17 }
 0x197   : > { %1612 = vmatmul.mubr.bf16.vlgmr.msra.gmra.mrb[0].mxu0 %v1389_v48  ;;  %7019 = vmatprep.mubr.bf16.mxu1 %v1389_v48 }
 0x198   : > { %1621 = vmatprep.mubr.bf16.mxu0 %v9286_v47  ;;  %v1390_v57 = vpack.c.bf16 %v1385_v29, %v1385_v29 }
 0x19a   : > { %7020 = vmatmul.mubr.bf16.vlgmr.msra.gmra.mrb[0].mxu1 %v1390_v57 }
 0x19b   : > { %7037 = vmatprep.mubr.msk.bf16.mxu1 %vm7549_vm1, %v7548_v34 }
 0x19f   : > { %1622 = vmatmul.mubr.bf16.gmra.mrb[4].mxu0 %v1390_v57 }
 0x1a0   : > { %7025 = vmatprep.mubr.msk.bf16.mxu0 %vm7549_vm1, %v7548_v34 }
 0x26a   : > { %v1613_v49 = vpop.f32.mrb[0].mxu0 }
 0x26b   : > { %v1614_v50 = vadd.f32 %v1613_v49, %v1442_v61  ;;  %v1615_v63 = vpop.f32.mrb[1].mxu0 }
 0x26c   : > { %v1616_v1 = vadd.f32 %v1615_v63, %v1446_v56  ;;  %v1617_v6 = vpop.f32.mrb[2].mxu0 }
 0x26d   : > { %v1618_v51 = vadd.f32 %v1617_v6, %v1442_v61  ;;  %v1619_v5 = vpop.f32.mrb[3].mxu0  ;;  %v7021_v62 = vpop.f32.mrb[0].mxu1 }
 0x26e   : > { %v1687_v21 = vcombine.low %v1614_v50, %v1616_v1  ;;  %v1688_v59 = vcombine.high %v1614_v50, %v1616_v1  ;;  %v1620_v0 = vadd.f32 %v1619_v5, %v1446_v56  ;;  %v1664_v55 = vpop.f32.mrb[1].mxu1  ;;  %v1673_v36 = vadd.f32 %v7021_v62, %v1450_v3 }
 0x26f   : > { %v1665_v45 = vadd.f32 %v1664_v55, %v1450_v3  ;;  %v7022_v31 = vpop.f32.mrb[2].mxu1 }
 0x270   : > { %v1696_v8 = vrot.slane %v1687_v21, %v7658_v17  ;;  %v1754_v7 = vcombine.low %v1618_v51, %v1620_v0  ;;  %v1755_v41 = vcombine.high %v1618_v51, %v1620_v0  ;;  %v1667_v60 = vpop.f32.mrb[3].mxu1  ;;  %v1703_v26 = vrot.slane %v1688_v59, %v7658_v17 }
 0x271   : > { %v1689_v30 = vcombine.high %v1665_v45, %v1665_v45  ;;  %v1710_v32 = vrot.slane %v1665_v45, %v7658_v17  ;;  %v1668_v28 = vadd.f32 %v1667_v60, %v1450_v3  ;;  %v1835_v0 = vrot.slane %v1673_v36, %v7658_v17 }
 0x272   : > { %v1623_v37 = vpop.f32.mrb[4].mxu0  ;;  %v1763_v14 = vrot.slane %v1754_v7, %v7658_v17  ;;  %v1770_v52 = vrot.slane %v1755_v41, %v7658_v17 }
 0x273   : > { %v8151_v10 = vadd.f32 %v1623_v37, %v1442_v61  ;;  %v1625_v9 = vpop.f32.mrb[5].mxu0  ;;  %v1717_v33 = vrot.slane %v1689_v30, %v7658_v17  ;;  %v1718_v12 = vcombine.low %v1696_v8, %v1710_v32  ;;  %v1719_v40 = vcombine.high %v1696_v8, %v1710_v32 }
 0x274   : > { %v1756_v39 = vcombine.high %v1668_v28, %v1668_v28  ;;  %v1627_v4 = vpop.f32.mrb[6].mxu0  ;;  %v1777_v44 = vrot.slane %v1668_v28, %v7658_v17  ;;  %v1626_v11 = vadd.f32 %v1625_v9, %v1446_v56 }
 0x275   : > { %v1628_v53 = vpop.f32.mrb[7].mxu0  ;;  %v1720_v42 = vcombine.low %v1703_v26, %v1717_v33  ;;  %v1721_v46 = vcombine.high %v1703_v26, %v1717_v33  ;;  %v1728_v13 = vrot.slane %v1718_v12, %v7658_v17  ;;  %v1742_v38 = vrot.slane %v1719_v40, %v7658_v17 }
 0x276   : > { %v1784_v35 = vrot.slane %v1756_v39, %v7658_v17  ;;  %v1785_v15 = vcombine.low %v1763_v14, %v1777_v44  ;;  %v1786_v48 = vcombine.high %v1763_v14, %v1777_v44  ;;  %v1821_v43 = vcombine.low %v8151_v10, %v1626_v11 }
 0x277   : > { %v1735_v29 = vrot.slane %v1720_v42, %v7658_v17  ;;  %v1749_v57 = vrot.slane %v1721_v46, %v7658_v17  ;;  %v1854_v27 = vcombine.low %v1728_v13, %v1742_v38  ;;  %v6738_v54 = vcombine.high %v1728_v13, %v1742_v38 }
 0x278   : > { %v1787_v2 = vcombine.low %v1770_v52, %v1784_v35  ;;  %v1788_v61 = vcombine.high %v1770_v52, %v1784_v35  ;;  %v1795_v56 = vrot.slane %v1785_v15, %v7658_v17  ;;  %v1809_v58 = vrot.slane %v1786_v48, %v7658_v17 }
 0x279   : > { %v1751_v49 = vcombine.high %v1735_v29, %v1735_v29  ;;  %v1862_v50 = vrot.slane %v1854_v27, %v7658_v17  ;;  %v1869_v63 = vrot.slane %v6738_v54, %v7658_v17  ;;  %v1876_v1 = vrot.slane %v1735_v29, %v7658_v17 }
 0x27a   : > { %v1753_v3 = vcombine.high %v1749_v57, %v1749_v57  ;;  %v1802_v6 = vrot.slane %v1787_v2, %v7658_v17  ;;  %v1816_v51 = vrot.slane %v1788_v61, %v7658_v17  ;;  %v1915_v62 = vrot.slane %v1809_v58, %v7658_v17 }
 0x27b   : > { %v1877_v5 = vcombine.low %v1862_v50, %v1869_v63  ;;  %v1893_v21 = vcombine.low %v1749_v57, %v1751_v49  ;;  %v2018_v59 = vcombine.high %v1862_v50, %v1869_v63  ;;  %v2019_v55 = vcombine.high %v1876_v1, %v1876_v1 }
 0x27c   : > { %v1818_v8 = vcombine.high %v1802_v6, %v1802_v6  ;;  %v1894_v45 = vcombine.low %v1753_v3, %v1795_v56  ;;  %v1891_v31 = vrot.slane %v1876_v1, %v7658_v17  ;;  %v6739_v32 = vcombine.high %v1795_v56, %v1809_v58 }
 0x27d   : > { %v1884_v7 = vrot.slane %v1877_v5, %v7658_v17  ;;  %v1901_v41 = vrot.slane %v1893_v21, %v7658_v17  ;;  %v2026_v60 = vrot.slane %v2018_v59, %v7658_v17  ;;  %v2033_v26 = vrot.slane %v2019_v55, %v7658_v17 }
 0x27e   : > { %v1908_v30 = vrot.slane %v1894_v45, %v7658_v17  ;;  %v1933_v28 = vcombine.low %v1802_v6, %v1816_v51  ;;  %v1954_v10 = vrot.slane %v1818_v8, %v7658_v17  ;;  %v2036_v9 = vcombine.high %v1915_v62, %v1915_v62 }
 0x27f   : > { %v1892_v37 = vcombine.low %v1884_v7, %v1891_v31  ;;  %v8177_v14 = vcombine.high %v1884_v7, %v1891_v31  ;;  %v1940_v12 = vrot.slane %v6739_v32, %v7658_v17  ;;  %v1930_v4 = vrot.slane %v1915_v62, %v7658_v17 }
 0x280   : > { %v1916_v33 = vcombine.low %v1901_v41, %v1908_v30  ;;  %v1947_v40 = vrot.slane %v1933_v28, %v7658_v17  ;;  %v2035_v39 = vcombine.high %v1901_v41, %v1908_v30  ;;  %v2050_v36 = vrot.slane %v2036_v9, %v7658_v17 }
 0x281   : > { %v2053_v52 = vcombine.high %v1954_v10, %v1954_v10  ;;  %v1828_v44 = vrot.slane %v1821_v43, %v7658_v17  ;;  %v2034_v35 = vcombine.low %v2026_v60, %v2033_v26  ;;  %v1820_v54 = vcombine.high %v1816_v51, %v1816_v51 }
 0x282   : > { %v1923_v11 = vrot.slane %v1916_v33, %v7658_v17  ;;  %v1955_v53 = vcombine.low %v1940_v12, %v1947_v40  ;;  %v2043_v42 = vrot.slane %v2035_v39, %v7658_v17  ;;  %v2052_v46 = vcombine.high %v1940_v12, %v1947_v40 }
 0x283   : > { %v1836_v13 = vcombine.low %v1828_v44, %v1835_v0  ;;  %v1837_v38 = vcombine.high %v1828_v44, %v1835_v0  ;;  %v2067_v15 = vrot.slane %v2053_v52, %v7658_v17  ;;  %v2090_v61 = vpack.c.bf16 %v2034_v35, %v2034_v35 }
 0x284   : > { %v2060_v48 = vrot.slane %v2052_v46, %v7658_v17  ;;  %v8189_v29 = vcombine.high %v1923_v11, %v1930_v4  ;;  %v2051_v57 = vcombine.low %v2043_v42, %v2050_v36  ;;  %v1962_v27 = vrot.slane %v1955_v53, %v7658_v17 }
 0x285   : > { %v1844_v43 = vrot.slane %v1836_v13, %v7658_v17  ;;  %v1851_v2 = vrot.slane %v1837_v38, %v7658_v17  ;;  %v1969_v58 = vrot.slane %v1954_v10, %v7658_v17  ;;  %v1931_v49 = vcombine.low %v1923_v11, %v1930_v4 }
 0x286   : > { %v2068_v56 = vcombine.low %v2060_v48, %v2067_v15  ;;  %v2099_v3 = vsel %vm2094_vm2, %v2090_v61, 0  ;;  %v2091_v0 = vpack.c.bf16 %v2051_v57, %v2051_v57  ;;  %v7550_v55 = vmov 65535  }
 0x287   : > { %v1852_v50 = vcombine.high %v1844_v43, %v1844_v43  ;;  %v1853_v63 = vcombine.high %v1851_v2, %v1851_v2  ;;  %v1971_v1 = vcombine.low %v1820_v54, %v1844_v43  ;;  %7024 = vmatpush3.bf16.xpose.msra.mxu0 %v2099_v3  ;;  %v1970_v5 = vcombine.low %v1962_v27, %v1969_v58 }
 0x288   : > { %v2092_v6 = vpack.c.bf16 %v2068_v56, %v2068_v56  ;;  %v8196_v21 = vcombine.high %v1962_v27, %v1969_v58  ;;  %7029 = vmatprep.subr.bf16.mxu0 %v7548_v34  ;;  %v2350_v8 = vsel %vm2348_vm3, 4294967295, %v7550_v55  ;;  %v8204_v41 = vpack.i.bf16 %v2051_v57, %v2034_v35 }
 0x289   : > { %v1972_v51 = vcombine.low %v1851_v2, %v1852_v50  ;;  %v1993_v59 = vrot.slane %v1853_v63, %v7658_v17  ;;  %v1979_v45 = vrot.slane %v1971_v1, %v7658_v17  ;;  %v8206_v60 = vpack.c.bf16 %v1892_v37, %v1892_v37 }
 0x28a   : > { %v2191_v62 = vsel %vm2094_vm2, %v2092_v6, 0  ;;  %v8211_v26 = vpack.i.bf16 %v8189_v29, %v8177_v14  ;;  %v2340_v28 = vpack.c.bf16 %v8177_v14, %v8177_v14  ;;  %v2145_v10 = vsel %vm2094_vm2, %v2091_v0, 0 }
 0x28b   : > { %v1986_v7 = vrot.slane %v1972_v51, %v7658_v17  ;;  %v2070_v31 = vcombine.high %v1993_v59, %v1993_v59  ;;  %7036 = vmatpush3.bf16.xpose.msra.mxu1 %v2191_v62  ;;  %v8216_v9 = vsel %vm2349_vm4, %v2350_v8, 0  ;;  %v2008_v40 = vrot.slane %v1993_v59, %v7658_v17 }
 0x28c   : > { %7047 = vmatprep.subr.bf16.mxu1 %v7548_v34  ;;  %v8224_v39 = vpack.c.bf16 %v1970_v5, %v1970_v5  ;;  %v2353_v14 = vand.u32 %v8216_v9, %v2340_v28  ;;  %v8243_v42 = vpack.c.bf16 %v1931_v49, %v1931_v49  ;;  %v2341_v13 = vpack.c.bf16 %v8189_v29, %v8189_v29 }
 0x28d   : > { %v1994_v30 = vcombine.low %v1979_v45, %v1986_v7  ;;  %v2069_v32 = vcombine.high %v1979_v45, %v1986_v7  ;;  %v2084_v33 = vrot.slane %v2070_v31, %v7658_v17 }
 0x28e   : > { %7026 = vmatmul.mubr.msk.bf16.vlgmr.msra.gmra.mrb[8].mxu0 %vm2094_vm2, %v8206_v60  ;;  %v2399_v35 = vand.u32 %v8216_v9, %v2341_v13 }
 0x28f   : > { %v2077_v37 = vrot.slane %v2069_v32, %v7658_v17  ;;  %v2001_v12 = vrot.slane %v1994_v30, %v7658_v17  ;;  %7030 = vmatpush3.bf16.xpose.msra.mxu0 %v2145_v10  ;;  %7031 = vmatprep.mubr.msk.bf16.mxu0 %vm7549_vm1, %v7548_v34 }
 0x290   : > { %7041 = vmatprep.subr.bf16.mxu0 %v7548_v34 }
 0x291   : > { %v2085_v4 = vcombine.low %v2077_v37, %v2084_v33  ;;  %v2009_v36 = vcombine.low %v2001_v12, %v2008_v40  ;;  %v8230_v52 = vcombine.high %v2001_v12, %v2008_v40 }
 0x292   : > { %7038 = vmatmul.mubr.msk.bf16.vlgmr.msra.gmra.mrb[4].mxu1 %vm2094_vm2, %v8224_v39 }
 0x293   : > { %7048 = vmatpush3.bf16.msra.mxu1 %v2353_v14  ;;  %v2093_v44 = vpack.c.bf16 %v2085_v4, %v2085_v4  ;;  %v8234_v11 = vpack.i.bf16 %v2085_v4, %v2068_v56  ;;  %7049 = vmatprep.mubr.msk.bf16.mxu1 %vm7549_vm1, %v7548_v34  ;;  %v8241_v53 = vpack.i.bf16 %v8230_v52, %v8196_v21 }
 0x294   : > { %7059 = vmatprep.subr.bf16.mxu1 %v7548_v34  ;;  %v8253_v38 = vpack.c.bf16 %v2009_v36, %v2009_v36 }
 0x295   : > { %v2237_v46 = vsel %vm2094_vm2, %v2093_v44, 0 }
 0x296   : > { %7032 = vmatmul.mubr.msk.bf16.vlgmr.msra.gmra.mrb[12].mxu0 %vm2094_vm2, %v8243_v42 }
 0x297   : > { %7042 = vmatpush3.bf16.xpose.msra.mxu0 %v2237_v46  ;;  %7043 = vmatprep.mubr.msk.bf16.mxu0 %vm7549_vm1, %v7548_v34 }
 0x298   : > { %7053 = vmatprep.subr.bf16.mxu0 %v7548_v34 }
 0x29e   : > { %7044 = vmatmul.mubr.msk.bf16.vlgmr.msra.gmra.mrb[16].mxu0 %vm2094_vm2, %v8253_v38 }
 0x29f   : > { %7054 = vmatpush3.bf16.msra.mxu0 %v2399_v35  ;;  %7055 = vmatprep.mubr.msk.bf16.mxu0 %vm7549_vm1, %v7548_v34 }
 0x2a0   : > { %7065 = vmatprep.subr.bf16.mxu0 %v7548_v34 }
 0x361   : > { %v2135_v15 = vpop.f32.mrb[8].mxu0 }
 0x362   : > { %v2279_v48 = vmul.f32 0.17677669, %v2135_v15  ;;  %v7027_v57 = vpop.f32.mrb[9].mxu0 }
 0x363   : > { %v2138_v27 = vpop.f32.mrb[10].mxu0 }
 0x364   : > { %v7028_v54 = vpop.f32.mrb[11].mxu0  ;;  %v2284_v43 = vsel %vm2283_vm5, %v2279_v48, -inf }
 0x365   : > { %v2227_v29 = vpop.f32.mrb[4].mxu1  ;;  %2285 = vmax.xlane.f32.xlu0 %v2284_v43  ;;  %v2342_v43 = vpack.c.bf16 %v8196_v21, %v8196_v21  ;;  %v2343_v21 = vpack.c.bf16 %v8230_v52, %v8230_v52 }
 0x366   : > { %v2281_v2 = vmul.f32 0.17677669, %v2227_v29  ;;  %v7039_v61 = vpop.f32.mrb[5].mxu1 }
 0x367   : > { %v2230_v56 = vpop.f32.mrb[6].mxu1 }
 0x368   : > { %v7040_v58 = vpop.f32.mrb[7].mxu1  ;;  %v2290_v49 = vsel %vm2283_vm5, %v2281_v2, -inf }
 0x369   : > { %2291 = vmax.xlane.f32.xlu0 %v2290_v49  ;;  %v2181_v50 = vpop.f32.mrb[12].mxu0  ;;  %v2445_v49 = vand.u32 %v8216_v9, %v2342_v43 }
 0x36a   : > { %v2280_v63 = vmul.f32 0.17677669, %v2181_v50  ;;  %v7033_v1 = vpop.f32.mrb[13].mxu0 }
 0x36b   : > { %v2184_v3 = vpop.f32.mrb[14].mxu0 }
 0x36c   : > { %v7034_v6 = vpop.f32.mrb[15].mxu0  ;;  %v2287_v5 = vsel %vm2283_vm5, %v2280_v63, -inf }
 0x36d   : > { %2288 = vmax.xlane.f32.xlu1 %v2287_v5 }
 0x371   : > { %v2273_v51 = vpop.f32.mrb[16].mxu0 }
 0x372   : > { %v2282_v59 = vmul.f32 0.17677669, %v2273_v51  ;;  %v7045_v62 = vpop.f32.mrb[17].mxu0 }
 0x373   : > { %v2276_v0 = vpop.f32.mrb[18].mxu0 }
 0x374   : > { %v7046_v55 = vpop.f32.mrb[19].mxu0  ;;  %v2293_v8 = vsel %vm2283_vm5, %v2282_v59, -inf }
 0x375   : > { %2294 = vmax.xlane.f32.xlu1 %v2293_v8 }
 0x3f2   : > { %v2286_v45 = vpop.xlane.xlu0 %2285 }
 0x3f3   : > { %v2296_v7 = vsub.f32 %v2279_v48, %v2286_v45 }
 0x3f5   : > { %v2300_v31 = vmul.f32 1.442695, %v2296_v7 }
 0x3f6   : > { %v2292_v30 = vpop.xlane.xlu0 %2291 }
 0x3f7   : > { %7385 = vpow2.f32 %v2300_v31  ;;  %v2298_v32 = vsub.f32 %v2281_v2, %v2292_v30 }
 0x3f9   : > { %v2304_v28 = vmul.f32 1.442695, %v2298_v32 }
 0x3fa   : > { %v2289_v10 = vpop.xlane.xlu1 %2288 }
 0x3fb   : > { %7387 = vpow2.f32 %v2304_v28  ;;  %v2297_v37 = vsub.f32 %v2280_v63, %v2289_v10 }
 0x3fd   : > { %v2302_v33 = vmul.f32 1.442695, %v2297_v37 }
 0x3ff   : > { %7389 = vpow2.f32 %v2302_v33 }
 0x401   : > { %v7386_v12 = vpop.eup %7385 }
 0x402   : > { %v2308_v40 = vsel %vm2283_vm5, %v7386_v12, 0.0  ;;  %v2295_v46 = vpop.xlane.xlu1 %2294 }
 0x403   : > { %2309 = vadd.xlane.f32.xlu0 %v2308_v40  ;;  %v2299_v13 = vsub.f32 %v2282_v59, %v2295_v46  ;;  %v2491_v59 = vand.u32 %v8216_v9, %v2343_v21 }
 0x405   : > { %v7388_v14 = vpop.eup %7387  ;;  %v2306_v35 = vmul.f32 1.442695, %v2299_v13 }
 0x406   : > { %v2314_v4 = vsel %vm2283_vm5, %v7388_v14, 0.0 }
 0x407   : > { %2315 = vadd.xlane.f32.xlu0 %v2314_v4  ;;  %7391 = vpow2.f32 %v2306_v35 }
 0x409   : > { %v7390_v36 = vpop.eup %7389 }
 0x40a   : > { %v2311_v44 = vsel %vm2283_vm5, %v7390_v36, 0.0 }
 0x40b   : > { %2312 = vadd.xlane.f32.xlu1 %v2311_v44 }
 0x411   : > { %v7392_v15 = vpop.eup %7391 }
 0x412   : > { %v2317_v48 = vsel %vm2283_vm5, %v7392_v15, 0.0 }
 0x41c   : > { %7289 = vrot.lane.b32.xlu1 %v8234_v11, %s7551_s18 }
 0x41d   : > { %7284 = vrot.lane.b32.xlu0 %v8204_v41, %s7551_s18 }
 0x421   : > { %2648 = vrot.lane.b32.xlu0 %v8224_v39, %s7551_s18 }
 0x440   : > { %2318 = vadd.xlane.f32.xlu1 %v2317_v48 }
 0x451   : > { %2550 = vrot.lane.b32.xlu1 %v8206_v60, %s7551_s18 }
 0x455   : > { %2599 = vrot.lane.b32.xlu1 %v8243_v42, %s7551_s18 }
 0x459   : > { %2697 = vrot.lane.b32.xlu1 %v8253_v38, %s7551_s18 }
 0x490   : > { %v2310_v57 = vpop.xlane.xlu0 %2309 }
 0x491   : > { %7393 = vrcp.f32 %v2310_v57 }
 0x494   : > { %v2316_v27 = vpop.xlane.xlu0 %2315 }
 0x495   : > { %7395 = vrcp.f32 %v2316_v27 }
 0x498   : > { %v2313_v54 = vpop.xlane.xlu1 %2312  ;;  %v7285_v61 = vpop.permute.xlu0 %7284 }
 0x499   : > { %7397 = vrcp.f32 %v2313_v54  ;;  %v7286_v50 = vunpack.i.l.bf16 %v7285_v61  ;;  %v7287_v31 = vunpack.i.h.bf16 %v7285_v61 }
 0x49b   : > { %v7394_v29 = vpop.eup %7393  ;;  %v2545_v6 = vpack.c.bf16 %v7286_v50, %v7286_v50  ;;  %v2546_v32 = vpack.c.bf16 %v7287_v31, %v7287_v31 }
 0x49c   : > { %v2324_v2 = vmul.f32 %v7394_v29, %v7386_v12  ;;  %v7290_v52 = vpop.permute.xlu1 %7289  ;;  %v2649_v28 = vpop.permute.xlu0 %2648 }
 0x49d   : > { %v2556_v62 = vsel %vm2094_vm2, %v2545_v6, 0  ;;  %v7291_v0 = vunpack.i.l.bf16 %v7290_v52  ;;  %v7292_v33 = vunpack.i.h.bf16 %v7290_v52  ;;  %v2605_v12 = vsel %vm2094_vm2, %v2546_v32, 0 }
 0x49e   : > { %v2328_v56 = vpack.c.bf16 %v2324_v2, %v2324_v2 }
 0x49f   : > { %v7396_v58 = vpop.eup %7395  ;;  %v2547_v8 = vpack.c.bf16 %v7291_v0, %v7291_v0  ;;  %v2548_v40 = vpack.c.bf16 %v7292_v33, %v7292_v33 }
 0x4a0   : > { %7050 = vmatmul.mubr.msk.bf16.vlgmr.msra.gmra.mrb[8].mxu1 %vm2344_vm6, %v2328_v56  ;;  %v2326_v63 = vmul.f32 %v7396_v58, %v7388_v14 }
 0x4a1   : > { %7060 = vmatpush3.bf16.msra.mxu1 %v2445_v49  ;;  %7061 = vmatprep.mubr.msk.bf16.mxu1 %vm7549_vm1, %v7548_v34  ;;  %v2654_v7 = vsel %vm2094_vm2, %v2547_v8, 0  ;;  %v2703_v4 = vsel %vm2094_vm2, %v2548_v40, 0 }
 0x4a2   : > { %7071 = vmatprep.subr.bf16.mxu1 %v7548_v34  ;;  %v2330_v51 = vpack.c.bf16 %v2326_v63, %v2326_v63 }
 0x4a3   : > { %v7398_v1 = vpop.eup %7397 }
 0x4a4   : > { %v2325_v3 = vmul.f32 %v7398_v1, %v7390_v36 }
 0x4a6   : > { %v2329_v5 = vpack.c.bf16 %v2325_v3, %v2325_v3 }
 0x4a8   : > { %7056 = vmatmul.mubr.msk.bf16.vlgmr.msra.gmra.mrb[20].mxu0 %vm2344_vm6, %v2329_v5  ;;  %7062 = vmatmul.mubr.msk.bf16.vlgmr.msra.gmra.mrb[12].mxu1 %vm2344_vm6, %v2330_v51 }
 0x4a9   : > { %7066 = vmatpush3.bf16.msra.mxu0 %v2491_v59  ;;  %7073 = vmatprep.mubr.msk.bf16.mxu1 %vm7549_vm1, %v7548_v34 }
 0x4aa   : > { %7072 = vmatpush3.bf16.xpose.msra.mxu1 %v2556_v62  ;;  %7067 = vmatprep.mubr.msk.bf16.mxu0 %vm7549_vm1, %v7548_v34 }
 0x4ab   : > { %7083 = vmatprep.subr.bf16.mxu1 %v7548_v34  ;;  %7077 = vmatprep.subr.bf16.mxu0 %v7548_v34 }
 0x4cd   : > { %v2319_v55 = vpop.xlane.xlu1 %2318 }
 0x4ce   : > { %7399 = vrcp.f32 %v2319_v55 }
 0x4d1   : > { %v2551_v45 = vpop.permute.xlu1 %2550 }
 0x4d2   : > { %7074 = vmatmul.mubr.msk.bf16.vlgmr.msra.gmra.mrb[16].mxu1 %vm2094_vm2, %v2551_v45 }
 0x4d3   : > { %7084 = vmatpush3.bf16.xpose.msra.mxu1 %v2654_v7  ;;  %7085 = vmatprep.mubr.msk.bf16.mxu1 %vm7549_vm1, %v7548_v34 }
 0x4d4   : > { %7095 = vmatprep.subr.bf16.mxu1 %v7548_v34 }
 0x4d5   : > { %v2600_v14 = vpop.permute.xlu1 %2599 }
 0x4d8   : > { %v7400_v30 = vpop.eup %7399 }
 0x4d9   : > { %v2327_v10 = vmul.f32 %v7400_v30, %v7392_v15  ;;  %v2698_v36 = vpop.permute.xlu1 %2697 }
 0x4da   : > { %7086 = vmatmul.mubr.msk.bf16.vlgmr.msra.gmra.mrb[20].mxu1 %vm2094_vm2, %v2649_v28 }
 0x4db   : > { %v2331_v37 = vpack.c.bf16 %v2327_v10, %v2327_v10  ;;  %7097 = vmatprep.mubr.msk.bf16.mxu1 %vm7549_vm1, %v7548_v34 }
 0x4dd   : > { %7068 = vmatmul.mubr.msk.bf16.vlgmr.msra.gmra.mrb[24].mxu0 %vm2344_vm6, %v2331_v37 }
 0x4de   : > { %7078 = vmatpush3.bf16.xpose.msra.mxu0 %v2605_v12  ;;  %7079 = vmatprep.mubr.msk.bf16.mxu0 %vm7549_vm1, %v7548_v34 }
 0x4df   : > { %7089 = vmatprep.subr.bf16.mxu0 %v7548_v34 }
 0x4e5   : > { %7080 = vmatmul.mubr.msk.bf16.vlgmr.msra.gmra.mrb[28].mxu0 %vm2094_vm2, %v2600_v14 }
 0x4e6   : > { %7090 = vmatpush3.bf16.xpose.msra.mxu0 %v2703_v4  ;;  %7091 = vmatprep.mubr.msk.bf16.mxu0 %vm7549_vm1, %v7548_v34 }
 0x4e7   : > { %7101 = vmatprep.subr.bf16.mxu0 %v7548_v34 }
 0x4ed   : > { %7092 = vmatmul.mubr.msk.bf16.vlgmr.msra.gmra.mrb[32].mxu0 %vm2094_vm2, %v2698_v36 }
 0x4ee   : > { %7103 = vmatprep.mubr.msk.bf16.mxu0 %vm7549_vm1, %v7548_v34 }
 0x573   : > { %v8321_v44 = vpop.f32.mrb[8].mxu1 }
 0x574   : > { %v7051_v46 = vpop.f32.mrb[9].mxu1 }
 0x575   : > { %v2392_v13 = vpop.f32.mrb[10].mxu1 }
 0x576   : > { %v7052_v35 = vpop.f32.mrb[11].mxu1 }
 0x57b   : > { %v8323_v15 = vpop.f32.mrb[20].mxu0  ;;  %v8325_v48 = vpop.f32.mrb[12].mxu1 }
 0x57c   : > { %v7057_v57 = vpop.f32.mrb[21].mxu0  ;;  %v7063_v27 = vpop.f32.mrb[13].mxu1 }
 0x57d   : > { %v2438_v54 = vpop.f32.mrb[22].mxu0  ;;  %v2484_v29 = vpop.f32.mrb[14].mxu1 }
 0x57e   : > { %v7058_v43 = vpop.f32.mrb[23].mxu0  ;;  %v7064_v2 = vpop.f32.mrb[15].mxu1 }
 0x5a5   : > { %v2592_v61 = vpop.f32.mrb[16].mxu1 }
 0x5a6   : > { %v2745_v56 = vmul.f32 0.17677669, %v2592_v61  ;;  %v7075_v58 = vpop.f32.mrb[17].mxu1 }
 0x5a7   : > { %v2595_v49 = vpop.f32.mrb[18].mxu1 }
 0x5a8   : > { %v7076_v50 = vpop.f32.mrb[19].mxu1  ;;  %v2749_v63 = vsel %vm2283_vm5, %v2745_v56, -inf }
 0x5a9   : > { %2750 = vmax.xlane.f32.xlu0 %v2749_v63 }
 0x5ad   : > { %v2690_v1 = vpop.f32.mrb[20].mxu1 }
 0x5ae   : > { %v2747_v21 = vmul.f32 0.17677669, %v2690_v1  ;;  %v7087_v3 = vpop.f32.mrb[21].mxu1 }
 0x5af   : > { %v2693_v6 = vpop.f32.mrb[22].mxu1 }
 0x5b0   : > { %v8328_v5 = vpop.f32.mrb[24].mxu0  ;;  %v7088_v51 = vpop.f32.mrb[23].mxu1  ;;  %v2755_v59 = vsel %vm2283_vm5, %v2747_v21, -inf }
 0x5b1   : > { %2756 = vmax.xlane.f32.xlu0 %v2755_v59  ;;  %v7069_v62 = vpop.f32.mrb[25].mxu0 }
 0x5b2   : > { %v2530_v52 = vpop.f32.mrb[26].mxu0 }
 0x5b3   : > { %v7070_v0 = vpop.f32.mrb[27].mxu0 }
 0x5b8   : > { %v2641_v55 = vpop.f32.mrb[28].mxu0 }
 0x5b9   : > { %v2746_v8 = vmul.f32 0.17677669, %v2641_v55  ;;  %v7081_v45 = vpop.f32.mrb[29].mxu0 }
 0x5ba   : > { %v2644_v7 = vpop.f32.mrb[30].mxu0 }
 0x5bb   : > { %v7082_v31 = vpop.f32.mrb[31].mxu0  ;;  %v2752_v30 = vsel %vm2283_vm5, %v2746_v8, -inf }
 0x5bc   : > { %2753 = vmax.xlane.f32.xlu1 %v2752_v30 }
 0x5c0   : > { %v2739_v32 = vpop.f32.mrb[32].mxu0 }
 0x5c1   : > { %v2748_v28 = vmul.f32 0.17677669, %v2739_v32  ;;  %v7093_v10 = vpop.f32.mrb[33].mxu0 }
 0x5c2   : > { %v2742_v37 = vpop.f32.mrb[34].mxu0 }
 0x5c3   : > { %v7094_v33 = vpop.f32.mrb[35].mxu0  ;;  %v2758_v12 = vsel %vm2283_vm5, %v2748_v28, -inf }
 0x5c4   : > { %2759 = vmax.xlane.f32.xlu0 %v2758_v12 }
 0x636   : > { %v2751_v40 = vpop.xlane.xlu0 %2750 }
 0x637   : > { %v2761_v14 = vsub.f32 %v2745_v56, %v2751_v40 }
 0x639   : > { %v2765_v4 = vmul.f32 1.442695, %v2761_v14 }
 0x63b   : > { %7401 = vpow2.f32 %v2765_v4 }
 0x63e   : > { %v2757_v36 = vpop.xlane.xlu0 %2756 }
 0x63f   : > { %v2763_v46 = vsub.f32 %v2747_v21, %v2757_v36 }
 0x641   : > { %v2769_v13 = vmul.f32 1.442695, %v2763_v46 }
 0x643   : > { %7403 = vpow2.f32 %v2769_v13 }
 0x645   : > { %v7402_v35 = vpop.eup %7401 }
 0x646   : > { %v2773_v57 = vsel %vm2283_vm5, %v7402_v35, 0.0 }
 0x647   : > { %2774 = vadd.xlane.f32.xlu0 %v2773_v57 }
 0x649   : > { %v2754_v27 = vpop.xlane.xlu1 %2753 }
 0x64a   : > { %v2762_v54 = vsub.f32 %v2746_v8, %v2754_v27 }
 0x64c   : > { %v2767_v29 = vmul.f32 1.442695, %v2762_v54 }
 0x64d   : > { %v7404_v43 = vpop.eup %7403 }
 0x64e   : > { %7405 = vpow2.f32 %v2767_v29  ;;  %v2779_v2 = vsel %vm2283_vm5, %v7404_v43, 0.0 }
 0x64f   : > { %2780 = vadd.xlane.f32.xlu0 %v2779_v2 }
 0x651   : > { %v2760_v58 = vpop.xlane.xlu0 %2759 }
 0x652   : > { %v2764_v49 = vsub.f32 %v2748_v28, %v2760_v58 }
 0x654   : > { %v2771_v50 = vmul.f32 1.442695, %v2764_v49 }
 0x656   : > { %7407 = vpow2.f32 %v2771_v50 }
 0x658   : > { %v7406_v61 = vpop.eup %7405 }
 0x659   : > { %v2776_v56 = vsel %vm2283_vm5, %v7406_v61, 0.0 }
 0x65a   : > { %2777 = vadd.xlane.f32.xlu1 %v2776_v56 }
 0x660   : > { %v8346_v63 = vpop.eup %7407 }
 0x661   : > { %v2782_v1 = vsel %vm2283_vm5, %v8346_v63, 0.0 }
 0x665   : > { %7294 = vrot.lane.b32.xlu0 %v8211_v26, %s7551_s18 }
 0x669   : > { %3013 = vrot.lane.b32.xlu0 %v8206_v60, %s7552_s26 }
 0x66b   : > { %7299 = vrot.lane.b32.xlu1 %v8241_v53, %s7551_s18 }
 0x66d   : > { %3109 = vrot.lane.b32.xlu0 %v8224_v39, %s7552_s26 }
 0x66f   : > { %7304 = vrot.lane.b32.xlu1 %v8204_v41, %s7552_s26 }
 0x693   : > { %2783 = vadd.xlane.f32.xlu1 %v2782_v1 }
 0x6a4   : > { %7309 = vrot.lane.b32.xlu1 %v8234_v11, %s7552_s26 }
 0x6a8   : > { %3061 = vrot.lane.b32.xlu1 %v8243_v42, %s7552_s26 }
 0x6ac   : > { %3157 = vrot.lane.b32.xlu1 %v8253_v38, %s7552_s26 }
 0x6d4   : > { %v2775_v21 = vpop.xlane.xlu0 %2774 }
 0x6d5   : > { %7409 = vrcp.f32 %v2775_v21 }
 0x6dc   : > { %v2781_v3 = vpop.xlane.xlu0 %2780 }
 0x6dd   : > { %7411 = vrcp.f32 %v2781_v3 }
 0x6df   : > { %v7410_v51 = vpop.eup %7409 }
 0x6e0   : > { %v7295_v6 = vpop.permute.xlu0 %7294  ;;  %v2789_v55 = vmul.f32 %v7410_v51, %v7402_v35 }
 0x6e1   : > { %v7297_v59 = vunpack.i.h.bf16 %v7295_v6  ;;  %v7296_v62 = vunpack.i.l.bf16 %v7295_v6 }
 0x6e2   : > { %v2793_v31 = vpack.c.bf16 %v2789_v55, %v2789_v55 }
 0x6e3   : > { %v2810_v52 = vpack.c.bf16 %v7297_v59, %v7297_v59  ;;  %v2809_v0 = vpack.c.bf16 %v7296_v62, %v7296_v62 }
 0x6e4   : > { %v3014_v29 = vpop.permute.xlu0 %3013 }
 0x6e5   : > { %v2863_v8 = vand.u32 %v2810_v52, %v8216_v9  ;;  %v2817_v45 = vand.u32 %v2809_v0, %v8216_v9 }
 0x6e7   : > { %v2778_v7 = vpop.xlane.xlu1 %2777  ;;  %7096 = vmatpush3.bf16.msra.mxu1 %v2817_v45  ;;  %7102 = vmatpush3.bf16.msra.mxu0 %v2863_v8  ;;  %v7412_v32 = vpop.eup %7411 }
 0x6e8   : > { %7413 = vrcp.f32 %v2778_v7  ;;  %7107 = vmatprep.subr.bf16.mxu1 %v7548_v34  ;;  %7113 = vmatprep.subr.bf16.mxu0 %v7548_v34  ;;  %v2791_v33 = vmul.f32 %v7412_v32, %v7404_v43  ;;  %v3110_v6 = vpop.permute.xlu0 %3109 }
 0x6ea   : > { %7098 = vmatmul.mubr.msk.bf16.vlgmr.msra.gmra.mrb[24].mxu1 %vm2344_vm6, %v2793_v31  ;;  %v2795_v13 = vpack.c.bf16 %v2791_v33, %v2791_v33 }
 0x6eb   : > { %v7300_v30 = vpop.permute.xlu1 %7299  ;;  %7109 = vmatprep.mubr.msk.bf16.mxu1 %vm7549_vm1, %v7548_v34 }
 0x6ec   : > { %v7301_v28 = vunpack.i.l.bf16 %v7300_v30  ;;  %v7302_v10 = vunpack.i.h.bf16 %v7300_v30 }
 0x6ee   : > { %v2811_v37 = vpack.c.bf16 %v7301_v28, %v7301_v28  ;;  %v2812_v4 = vpack.c.bf16 %v7302_v10, %v7302_v10 }
 0x6ef   : > { %v7305_v12 = vpop.permute.xlu1 %7304 }
 0x6f0   : > { %v2909_v40 = vand.u32 %v2811_v37, %v8216_v9  ;;  %v7306_v36 = vunpack.i.l.bf16 %v7305_v12  ;;  %v2955_v57 = vand.u32 %v2812_v4, %v8216_v9  ;;  %v7307_v58 = vunpack.i.h.bf16 %v7305_v12 }
 0x6f2   : > { %v7414_v14 = vpop.eup %7413  ;;  %7108 = vmatpush3.bf16.msra.mxu1 %v2909_v40  ;;  %v3009_v27 = vpack.c.bf16 %v7306_v36, %v7306_v36  ;;  %v3010_v1 = vpack.c.bf16 %v7307_v58, %v7307_v58 }
 0x6f3   : > { %v2790_v46 = vmul.f32 %v7414_v14, %v7406_v61  ;;  %7119 = vmatprep.subr.bf16.mxu1 %v7548_v34 }
 0x6f4   : > { %v3019_v54 = vsel %vm2094_vm2, %v3009_v27, 0  ;;  %v3067_v59 = vsel %vm2094_vm2, %v3010_v1, 0 }
 0x6f5   : > { %7110 = vmatmul.mubr.msk.bf16.vlgmr.msra.gmra.mrb[28].mxu1 %vm2344_vm6, %v2795_v13  ;;  %v2794_v35 = vpack.c.bf16 %v2790_v46, %v2790_v46 }
 0x6f6   : > { %7121 = vmatprep.mubr.msk.bf16.mxu1 %vm7549_vm1, %v7548_v34 }
 0x6f7   : > { %7104 = vmatmul.mubr.msk.bf16.vlgmr.msra.gmra.mrb[36].mxu0 %vm2344_vm6, %v2794_v35 }
 0x6f8   : > { %7114 = vmatpush3.bf16.msra.mxu0 %v2955_v57  ;;  %7115 = vmatprep.mubr.msk.bf16.mxu0 %vm7549_vm1, %v7548_v34 }
 0x6f9   : > { %7125 = vmatprep.subr.bf16.mxu0 %v7548_v34 }
 0x6fb   : > { %7120 = vmatpush3.bf16.xpose.msra.mxu1 %v3019_v54 }
 0x6fc   : > { %7131 = vmatprep.subr.bf16.mxu1 %v7548_v34 }
 0x702   : > { %7122 = vmatmul.mubr.msk.bf16.vlgmr.msra.gmra.mrb[32].mxu1 %vm2094_vm2, %v3014_v29 }
 0x703   : > { %7133 = vmatprep.mubr.msk.bf16.mxu1 %vm7549_vm1, %v7548_v34 }
 0x720   : > { %v2784_v43 = vpop.xlane.xlu1 %2783 }
 0x721   : > { %7415 = vrcp.f32 %v2784_v43 }
 0x724   : > { %v7310_v2 = vpop.permute.xlu1 %7309 }
 0x725   : > { %v7311_v61 = vunpack.i.l.bf16 %v7310_v2  ;;  %v7312_v51 = vunpack.i.h.bf16 %v7310_v2 }
 0x727   : > { %v3011_v56 = vpack.c.bf16 %v7311_v61, %v7311_v61  ;;  %v3012_v62 = vpack.c.bf16 %v7312_v51, %v7312_v51 }
 0x729   : > { %v3115_v49 = vsel %vm2094_vm2, %v3011_v56, 0  ;;  %v3163_v52 = vsel %vm2094_vm2, %v3012_v62, 0 }
 0x72a   : > { %7132 = vmatpush3.bf16.xpose.msra.mxu1 %v3115_v49 }
 0x72b   : > { %v7416_v50 = vpop.eup %7415  ;;  %7143 = vmatprep.subr.bf16.mxu1 %v7548_v34 }
 0x72c   : > { %v2792_v21 = vmul.f32 %v7416_v50, %v8346_v63  ;;  %v3062_v63 = vpop.permute.xlu1 %3061 }
 0x72e   : > { %v2796_v3 = vpack.c.bf16 %v2792_v21, %v2792_v21 }
 0x730   : > { %7116 = vmatmul.mubr.msk.bf16.vlgmr.msra.gmra.mrb[40].mxu0 %vm2344_vm6, %v2796_v3  ;;  %v3158_v0 = vpop.permute.xlu1 %3157 }
 0x731   : > { %7126 = vmatpush3.bf16.xpose.msra.mxu0 %v3067_v59  ;;  %7134 = vmatmul.mubr.msk.bf16.vlgmr.msra.gmra.mrb[36].mxu1 %vm2094_vm2, %v3110_v6 }
 0x732   : > { %7127 = vmatprep.mubr.msk.bf16.mxu0 %vm7549_vm1, %v7548_v34  ;;  %7137 = vmatprep.subr.bf16.mxu0 %v7548_v34 }
 0x733   : > { %7145 = vmatprep.mubr.msk.bf16.mxu1 %vm7549_vm1, %v7548_v34 }
 0x738   : > { %7128 = vmatmul.mubr.msk.bf16.vlgmr.msra.gmra.mrb[44].mxu0 %vm2094_vm2, %v3062_v63 }
 0x739   : > { %7138 = vmatpush3.bf16.xpose.msra.mxu0 %v3163_v52  ;;  %7139 = vmatprep.mubr.msk.bf16.mxu0 %vm7549_vm1, %v7548_v34 }
 0x73a   : > { %7149 = vmatprep.subr.bf16.mxu0 %v7548_v34 }
 0x740   : > { %7140 = vmatmul.mubr.msk.bf16.vlgmr.msra.gmra.mrb[48].mxu0 %vm2094_vm2, %v3158_v0 }
 0x741   : > { %7151 = vmatprep.mubr.msk.bf16.mxu0 %vm7549_vm1, %v7548_v34 }
 0x7bd   : > { %v8397_v55 = vpop.f32.mrb[24].mxu1 }
 0x7be   : > { %v7099_v8 = vpop.f32.mrb[25].mxu1 }
 0x7bf   : > { %v2856_v45 = vpop.f32.mrb[26].mxu1 }
 0x7c0   : > { %v7100_v7 = vpop.f32.mrb[27].mxu1 }
 0x7c8   : > { %v8399_v31 = vpop.f32.mrb[28].mxu1 }
 0x7c9   : > { %v7111_v30 = vpop.f32.mrb[29].mxu1 }
 0x7ca   : > { %v8401_v32 = vpop.f32.mrb[36].mxu0  ;;  %v2948_v28 = vpop.f32.mrb[30].mxu1 }
 0x7cb   : > { %v7105_v10 = vpop.f32.mrb[37].mxu0  ;;  %v7112_v37 = vpop.f32.mrb[31].mxu1 }
 0x7cc   : > { %v2902_v33 = vpop.f32.mrb[38].mxu0 }
 0x7cd   : > { %v7106_v12 = vpop.f32.mrb[39].mxu0 }
 0x7d5   : > { %v3055_v40 = vpop.f32.mrb[32].mxu1 }
 0x7d6   : > { %v3205_v14 = vmul.f32 0.17677669, %v3055_v40  ;;  %v7123_v4 = vpop.f32.mrb[33].mxu1 }
 0x7d7   : > { %v3058_v36 = vpop.f32.mrb[34].mxu1 }
 0x7d8   : > { %v7124_v46 = vpop.f32.mrb[35].mxu1  ;;  %v3209_v13 = vsel %vm2283_vm5, %v3205_v14, -inf }
 0x7d9   : > { %3210 = vmax.xlane.f32.xlu0 %v3209_v13 }
 0x803   : > { %v8404_v35 = vpop.f32.mrb[40].mxu0 }
 0x804   : > { %v7117_v57 = vpop.f32.mrb[41].mxu0  ;;  %v3151_v27 = vpop.f32.mrb[36].mxu1 }
 0x805   : > { %v3207_v54 = vmul.f32 0.17677669, %v3151_v27  ;;  %v2994_v29 = vpop.f32.mrb[42].mxu0  ;;  %v7135_v43 = vpop.f32.mrb[37].mxu1 }
 0x806   : > { %v7118_v2 = vpop.f32.mrb[43].mxu0  ;;  %v3154_v61 = vpop.f32.mrb[38].mxu1 }
 0x807   : > { %v7136_v56 = vpop.f32.mrb[39].mxu1  ;;  %v3215_v58 = vsel %vm2283_vm5, %v3207_v54, -inf }
 0x808   : > { %3216 = vmax.xlane.f32.xlu0 %v3215_v58 }
 0x80b   : > { %v3103_v49 = vpop.f32.mrb[44].mxu0 }
 0x80c   : > { %v3206_v50 = vmul.f32 0.17677669, %v3103_v49  ;;  %v7129_v1 = vpop.f32.mrb[45].mxu0 }
 0x80d   : > { %v3106_v21 = vpop.f32.mrb[46].mxu0 }
 0x80e   : > { %v7130_v3 = vpop.f32.mrb[47].mxu0  ;;  %v3212_v6 = vsel %vm2283_vm5, %v3206_v50, -inf }
 0x80f   : > { %3213 = vmax.xlane.f32.xlu1 %v3212_v6 }
 0x813   : > { %v3199_v51 = vpop.f32.mrb[48].mxu0 }
 0x814   : > { %v3208_v59 = vmul.f32 0.17677669, %v3199_v51  ;;  %v7141_v62 = vpop.f32.mrb[49].mxu0 }
 0x815   : > { %v3202_v63 = vpop.f32.mrb[50].mxu0 }
 0x816   : > { %v7142_v52 = vpop.f32.mrb[51].mxu0  ;;  %v3218_v0 = vsel %vm2283_vm5, %v3208_v59, -inf }
 0x817   : > { %3219 = vmax.xlane.f32.xlu0 %v3218_v0 }
 0x866   : > { %v3211_v8 = vpop.xlane.xlu0 %3210 }
 0x867   : > { %v3221_v45 = vsub.f32 %v3205_v14, %v3211_v8 }
 0x869   : > { %v3225_v7 = vmul.f32 1.442695, %v3221_v45 }
 0x86b   : > { %7417 = vpow2.f32 %v3225_v7 }
 0x875   : > { %v7418_v30 = vpop.eup %7417 }
 0x876   : > { %v3233_v28 = vsel %vm2283_vm5, %v7418_v30, 0.0 }
 0x877   : > { %3234 = vadd.xlane.f32.xlu0 %v3233_v28 }
 0x895   : > { %v3217_v10 = vpop.xlane.xlu0 %3216 }
 0x896   : > { %v3223_v37 = vsub.f32 %v3207_v54, %v3217_v10 }
 0x898   : > { %v3229_v33 = vmul.f32 1.442695, %v3223_v37 }
 0x89a   : > { %7419 = vpow2.f32 %v3229_v33 }
 0x89c   : > { %v3214_v12 = vpop.xlane.xlu1 %3213 }
 0x89d   : > { %v3222_v40 = vsub.f32 %v3206_v50, %v3214_v12 }
 0x89f   : > { %v3227_v4 = vmul.f32 1.442695, %v3222_v40 }
 0x8a1   : > { %7421 = vpow2.f32 %v3227_v4 }
 0x8a4   : > { %v7420_v36 = vpop.eup %7419  ;;  %v3220_v57 = vpop.xlane.xlu0 %3219 }
 0x8a5   : > { %v3239_v46 = vsel %vm2283_vm5, %v7420_v36, 0.0  ;;  %v3224_v27 = vsub.f32 %v3208_v59, %v3220_v57 }
 0x8a6   : > { %3240 = vadd.xlane.f32.xlu0 %v3239_v46 }
 0x8a7   : > { %v3231_v54 = vmul.f32 1.442695, %v3224_v27 }
 0x8a9   : > { %7423 = vpow2.f32 %v3231_v54 }
 0x8ab   : > { %v7422_v13 = vpop.eup %7421 }
 0x8ac   : > { %v3236_v14 = vsel %vm2283_vm5, %v7422_v13, 0.0 }
 0x8ad   : > { %3237 = vadd.xlane.f32.xlu1 %v3236_v14 }
 0x8b3   : > { %v8422_v29 = vpop.eup %7423 }
 0x8b4   : > { %v3242_v43 = vsel %vm2283_vm5, %v8422_v29, 0.0 }
 0x8bc   : > { %7314 = vrot.lane.b32.xlu0 %v8211_v26, %s7552_s26 }
 0x8be   : > { %7319 = vrot.lane.b32.xlu1 %v8241_v53, %s7552_s26 }
 0x8c0   : > { %3473 = vrot.lane.b32.xlu0 %v8206_v60, %s7553_s28 }
 0x8c2   : > { %7324 = vrot.lane.b32.xlu1 %v8204_v41, %s7553_s28 }
 0x8c4   : > { %3569 = vrot.lane.b32.xlu0 %v8224_v39, %s7553_s28 }
 0x8e6   : > { %3243 = vadd.xlane.f32.xlu1 %v3242_v43 }
 0x8f7   : > { %7329 = vrot.lane.b32.xlu1 %v8234_v11, %s7553_s28 }
 0x8fb   : > { %3521 = vrot.lane.b32.xlu1 %v8243_v42, %s7553_s28 }
 0x8ff   : > { %3617 = vrot.lane.b32.xlu1 %v8253_v38, %s7553_s28 }
 0x904   : > { %v3235_v41 = vpop.xlane.xlu0 %3234 }
 0x905   : > { %7425 = vrcp.f32 %v3235_v41 }
 0x90f   : > { %v7426_v2 = vpop.eup %7425 }
 0x910   : > { %v3249_v1 = vmul.f32 %v7426_v2, %v7418_v30 }
 0x912   : > { %v3253_v3 = vpack.c.bf16 %v3249_v1, %v3249_v1 }
 0x933   : > { %v3241_v60 = vpop.xlane.xlu0 %3240 }
 0x934   : > { %7427 = vrcp.f32 %v3241_v60 }
 0x937   : > { %v7315_v39 = vpop.permute.xlu0 %7314 }
 0x938   : > { %v7317_v61 = vunpack.i.h.bf16 %v7315_v39  ;;  %v7316_v56 = vunpack.i.l.bf16 %v7315_v39 }
 0x93a   : > { %v3270_v58 = vpack.c.bf16 %v7317_v61, %v7317_v61  ;;  %v3269_v49 = vpack.c.bf16 %v7316_v56, %v7316_v56  ;;  %v3238_v50 = vpop.xlane.xlu1 %3237 }
 0x93b   : > { %7429 = vrcp.f32 %v3238_v50  ;;  %v3474_v12 = vpop.permute.xlu0 %3473 }
 0x93c   : > { %v3323_v11 = vand.u32 %v3270_v58, %v8216_v9  ;;  %v3277_v42 = vand.u32 %v3269_v49, %v8216_v9 }
 0x93e   : > { %v7320_v21 = vpop.permute.xlu1 %7319  ;;  %7144 = vmatpush3.bf16.msra.mxu1 %v3277_v42  ;;  %7150 = vmatpush3.bf16.msra.mxu0 %v3323_v11  ;;  %v7428_v6 = vpop.eup %7427 }
 0x93f   : > { %v7321_v38 = vunpack.i.l.bf16 %v7320_v21  ;;  %7155 = vmatprep.subr.bf16.mxu1 %v7548_v34  ;;  %7161 = vmatprep.subr.bf16.mxu0 %v7548_v34  ;;  %v7322_v51 = vunpack.i.h.bf16 %v7320_v21  ;;  %v3251_v63 = vmul.f32 %v7428_v6, %v7420_v36  ;;  %v3570_v41 = vpop.permute.xlu0 %3569 }
 0x941   : > { %v3271_v59 = vpack.c.bf16 %v7321_v38, %v7321_v38  ;;  %7146 = vmatmul.mubr.msk.bf16.vlgmr.msra.gmra.mrb[40].mxu1 %vm2344_vm6, %v3253_v3  ;;  %v3272_v8 = vpack.c.bf16 %v7322_v51, %v7322_v51  ;;  %v3255_v30 = vpack.c.bf16 %v3251_v63, %v3251_v63 }
 0x942   : > { %v7325_v62 = vpop.permute.xlu1 %7324  ;;  %7157 = vmatprep.mubr.msk.bf16.mxu1 %vm7549_vm1, %v7548_v34 }
 0x943   : > { %v3369_v52 = vand.u32 %v3271_v59, %v8216_v9  ;;  %v7326_v45 = vunpack.i.l.bf16 %v7325_v62  ;;  %v3415_v10 = vand.u32 %v3272_v8, %v8216_v9 }
 0x945   : > { %v7430_v0 = vpop.eup %7429  ;;  %7156 = vmatpush3.bf16.msra.mxu1 %v3369_v52  ;;  %v3469_v37 = vpack.c.bf16 %v7326_v45, %v7326_v45 }
 0x946   : > { %v3250_v7 = vmul.f32 %v7430_v0, %v7422_v13  ;;  %7167 = vmatprep.subr.bf16.mxu1 %v7548_v34  ;;  %v7327_v13 = vunpack.i.h.bf16 %v7325_v62 }
 0x947   : > { %v3479_v33 = vsel %vm2094_vm2, %v3469_v37, 0 }
 0x948   : > { %v3254_v28 = vpack.c.bf16 %v3250_v7, %v3250_v7  ;;  %v3470_v27 = vpack.c.bf16 %v7327_v13, %v7327_v13 }
 0x949   : > { %7158 = vmatmul.mubr.msk.bf16.vlgmr.msra.gmra.mrb[44].mxu1 %vm2344_vm6, %v3255_v30 }
 0x94a   : > { %7152 = vmatmul.mubr.msk.bf16.vlgmr.msra.gmra.mrb[52].mxu0 %vm2344_vm6, %v3254_v28  ;;  %7169 = vmatprep.mubr.msk.bf16.mxu1 %vm7549_vm1, %v7548_v34  ;;  %v3527_v39 = vsel %vm2094_vm2, %v3470_v27, 0 }
 0x94b   : > { %7162 = vmatpush3.bf16.msra.mxu0 %v3415_v10  ;;  %7163 = vmatprep.mubr.msk.bf16.mxu0 %vm7549_vm1, %v7548_v34 }
 0x94c   : > { %7173 = vmatprep.subr.bf16.mxu0 %v7548_v34 }
 0x94e   : > { %7168 = vmatpush3.bf16.xpose.msra.mxu1 %v3479_v33 }
 0x94f   : > { %7179 = vmatprep.subr.bf16.mxu1 %v7548_v34 }
 0x955   : > { %7170 = vmatmul.mubr.msk.bf16.vlgmr.msra.gmra.mrb[48].mxu1 %vm2094_vm2, %v3474_v12 }
 0x956   : > { %7181 = vmatprep.mubr.msk.bf16.mxu1 %vm7549_vm1, %v7548_v34 }
 0x973   : > { %v3244_v40 = vpop.xlane.xlu1 %3243 }
 0x974   : > { %7431 = vrcp.f32 %v3244_v40 }
 0x977   : > { %v7330_v4 = vpop.permute.xlu1 %7329 }
 0x978   : > { %v7331_v36 = vunpack.i.l.bf16 %v7330_v4  ;;  %v7332_v60 = vunpack.i.h.bf16 %v7330_v4 }
 0x97a   : > { %v3471_v46 = vpack.c.bf16 %v7331_v36, %v7331_v36  ;;  %v3472_v2 = vpack.c.bf16 %v7332_v60, %v7332_v60 }
 0x97c   : > { %v3575_v14 = vsel %vm2094_vm2, %v3471_v46, 0  ;;  %v3623_v61 = vsel %vm2094_vm2, %v3472_v2, 0 }
 0x97d   : > { %7180 = vmatpush3.bf16.xpose.msra.mxu1 %v3575_v14 }
 0x97e   : > { %v7432_v57 = vpop.eup %7431  ;;  %7191 = vmatprep.subr.bf16.mxu1 %v7548_v34 }
 0x97f   : > { %v3252_v54 = vmul.f32 %v7432_v57, %v8422_v29  ;;  %v3522_v29 = vpop.permute.xlu1 %3521 }
 0x981   : > { %v3256_v43 = vpack.c.bf16 %v3252_v54, %v3252_v54 }
 0x983   : > { %7164 = vmatmul.mubr.msk.bf16.vlgmr.msra.gmra.mrb[56].mxu0 %vm2344_vm6, %v3256_v43  ;;  %v3618_v56 = vpop.permute.xlu1 %3617 }
 0x984   : > { %7174 = vmatpush3.bf16.xpose.msra.mxu0 %v3527_v39  ;;  %7182 = vmatmul.mubr.msk.bf16.vlgmr.msra.gmra.mrb[52].mxu1 %vm2094_vm2, %v3570_v41 }
 0x985   : > { %7175 = vmatprep.mubr.msk.bf16.mxu0 %vm7549_vm1, %v7548_v34  ;;  %7185 = vmatprep.subr.bf16.mxu0 %v7548_v34 }
 0x986   : > { %7193 = vmatprep.mubr.msk.bf16.mxu1 %vm7549_vm1, %v7548_v34 }
 0x98b   : > { %7176 = vmatmul.mubr.msk.bf16.vlgmr.msra.gmra.mrb[60].mxu0 %vm2094_vm2, %v3522_v29 }
 0x98c   : > { %7186 = vmatpush3.bf16.xpose.msra.mxu0 %v3623_v61  ;;  %7187 = vmatprep.mubr.msk.bf16.mxu0 %vm7549_vm1, %v7548_v34 }
 0x98d   : > { %7197 = vmatprep.subr.bf16.mxu0 %v7548_v34 }
 0x993   : > { %7188 = vmatmul.mubr.msk.bf16.vlgmr.msra.gmra.mrb[64].mxu0 %vm2094_vm2, %v3618_v56 }
 0x994   : > { %7199 = vmatprep.mubr.msk.bf16.mxu0 %vm7549_vm1, %v7548_v34 }
 0xa14   : > { %v8473_v58 = vpop.f32.mrb[40].mxu1 }
 0xa15   : > { %v7147_v49 = vpop.f32.mrb[41].mxu1 }
 0xa16   : > { %v3316_v50 = vpop.f32.mrb[42].mxu1 }
 0xa17   : > { %v7148_v1 = vpop.f32.mrb[43].mxu1 }
 0xa1c   : > { %v8475_v11 = vpop.f32.mrb[44].mxu1 }
 0xa1d   : > { %v8477_v42 = vpop.f32.mrb[52].mxu0  ;;  %v7159_v21 = vpop.f32.mrb[45].mxu1 }
 0xa1e   : > { %v7153_v38 = vpop.f32.mrb[53].mxu0  ;;  %v3408_v3 = vpop.f32.mrb[46].mxu1 }
 0xa1f   : > { %v3362_v6 = vpop.f32.mrb[54].mxu0  ;;  %v7160_v51 = vpop.f32.mrb[47].mxu1 }
 0xa20   : > { %v7154_v59 = vpop.f32.mrb[55].mxu0 }
 0xa28   : > { %v3515_v62 = vpop.f32.mrb[48].mxu1 }
 0xa29   : > { %v3665_v63 = vmul.f32 0.17677669, %v3515_v62  ;;  %v7171_v52 = vpop.f32.mrb[49].mxu1 }
 0xa2a   : > { %v3518_v0 = vpop.f32.mrb[50].mxu1 }
 0xa2b   : > { %v7172_v8 = vpop.f32.mrb[51].mxu1  ;;  %v3669_v45 = vsel %vm2283_vm5, %v3665_v63, -inf }
 0xa2c   : > { %3670 = vmax.xlane.f32.xlu0 %v3669_v45 }
 0xa56   : > { %v3451_v7 = vpop.f32.mrb[56].mxu0 }
 0xa57   : > { %v7165_v30 = vpop.f32.mrb[57].mxu0  ;;  %v3611_v28 = vpop.f32.mrb[52].mxu1 }
 0xa58   : > { %v3667_v10 = vmul.f32 0.17677669, %v3611_v28  ;;  %v3454_v37 = vpop.f32.mrb[58].mxu0  ;;  %v7183_v33 = vpop.f32.mrb[53].mxu1 }
 0xa59   : > { %v7166_v12 = vpop.f32.mrb[59].mxu0  ;;  %v3614_v40 = vpop.f32.mrb[54].mxu1 }
 0xa5a   : > { %v7184_v4 = vpop.f32.mrb[55].mxu1  ;;  %v3675_v36 = vsel %vm2283_vm5, %v3667_v10, -inf }
 0xa5b   : > { %3676 = vmax.xlane.f32.xlu0 %v3675_v36 }
 0xa5e   : > { %v3563_v46 = vpop.f32.mrb[60].mxu0 }
 0xa5f   : > { %v3666_v13 = vmul.f32 0.17677669, %v3563_v46  ;;  %v7177_v14 = vpop.f32.mrb[61].mxu0 }
 0xa60   : > { %v3566_v57 = vpop.f32.mrb[62].mxu0 }
 0xa61   : > { %v7178_v27 = vpop.f32.mrb[63].mxu0  ;;  %v3672_v54 = vsel %vm2283_vm5, %v3666_v13, -inf }
 0xa62   : > { %3673 = vmax.xlane.f32.xlu1 %v3672_v54 }
 0xa66   : > { %v3659_v43 = vpop.f32.mrb[64].mxu0 }
 0xa67   : > { %v3668_v41 = vmul.f32 0.17677669, %v3659_v43  ;;  %v7189_v60 = vpop.f32.mrb[65].mxu0 }
 0xa68   : > { %v3662_v39 = vpop.f32.mrb[66].mxu0 }
 0xa69   : > { %v7190_v2 = vpop.f32.mrb[67].mxu0  ;;  %v3678_v29 = vsel %vm2283_vm5, %v3668_v41, -inf }
 0xa6a   : > { %3679 = vmax.xlane.f32.xlu0 %v3678_v29 }
 0xab9   : > { %v3671_v61 = vpop.xlane.xlu0 %3670 }
 0xaba   : > { %v3681_v56 = vsub.f32 %v3665_v63, %v3671_v61 }
 0xabc   : > { %v3685_v49 = vmul.f32 1.442695, %v3681_v56 }
 0xabe   : > { %7433 = vpow2.f32 %v3685_v49  ;;  %v4266_v49 = vld [vmem:[%s7621_s7 + $0xc] sm:$0xf] }
 0xac8   : > { %v7434_v50 = vpop.eup %7433 }
 0xac9   : > { %v3693_v1 = vsel %vm2283_vm5, %v7434_v50, 0.0 }
 0xaca   : > { %3694 = vadd.xlane.f32.xlu0 %v3693_v1  ;;  %v4268_v1 = vld [vmem:[%s7621_s7 + $0x4c] sm:$0xf] }
 0xae8   : > { %v3677_v21 = vpop.xlane.xlu0 %3676 }
 0xae9   : > { %v3683_v38 = vsub.f32 %v3667_v10, %v3677_v21  ;;  %v4269_v21 = vld [vmem:[%s7621_s7 + $0x6c] sm:$0xf] }
 0xaeb   : > { %v3689_v3 = vmul.f32 1.442695, %v3683_v38 }
 0xaed   : > { %7435 = vpow2.f32 %v3689_v3 }
 0xaef   : > { %v3674_v6 = vpop.xlane.xlu1 %3673 }
 0xaf0   : > { %v3682_v51 = vsub.f32 %v3666_v13, %v3674_v6 }
 0xaf2   : > { %v3687_v59 = vmul.f32 1.442695, %v3682_v51 }
 0xaf4   : > { %7437 = vpow2.f32 %v3687_v59  ;;  %v4270_v59 = vld [vmem:[%s7621_s7 + $0x8c] sm:$0xf] }
 0xaf7   : > { %v7436_v62 = vpop.eup %7435  ;;  %v3680_v52 = vpop.xlane.xlu0 %3679 }
 0xaf8   : > { %v3684_v0 = vsub.f32 %v3668_v41, %v3680_v52  ;;  %v3699_v8 = vsel %vm2283_vm5, %v7436_v62, 0.0 }
 0xaf9   : > { %3700 = vadd.xlane.f32.xlu0 %v3699_v8  ;;  %v4273_v8 = vld [vmem:[%s7621_s7 + $0xec] sm:$0xf] }
 0xafa   : > { %v3691_v63 = vmul.f32 1.442695, %v3684_v0  ;;  %v4272_v0 = vld [vmem:[%s7621_s7 + $0xcc] sm:$0xf] }
 0xafc   : > { %7439 = vpow2.f32 %v3691_v63  ;;  %v6777_v63 = vcombine.low %v4272_v0, %v4273_v8 }
 0xafe   : > { %v7438_v45 = vpop.eup %7437 }
 0xaff   : > { %v3696_v30 = vsel %vm2283_vm5, %v7438_v45, 0.0 }
 0xb00   : > { %3697 = vadd.xlane.f32.xlu1 %v3696_v30 }
 0xb06   : > { %v7440_v28 = vpop.eup %7439 }
 0xb07   : > { %v3702_v10 = vsel %vm2283_vm5, %v7440_v28, 0.0 }
 0xb08   : > { %3703 = vadd.xlane.f32.xlu1 %v3702_v10  ;;  %v4274_v10 = vld [vmem:[%s7621_s7 + $0x10c] sm:$0xf] }
 0xb0f   : > { %7334 = vrot.lane.b32.xlu0 %v8211_v26, %s7553_s28 }
 0xb13   : > { %3921 = vrot.lane.b32.xlu0 %v8397_v55, %s7553_s28 }
 0xb17   : > { %3937 = vrot.lane.b32.xlu0 %v8473_v58, %s7552_s26 }
 0xb19   : > { %7339 = vrot.lane.b32.xlu1 %v8241_v53, %s7553_s28 }
 0xb1b   : > { %3943 = vrot.lane.b32.xlu0 %v3451_v7, %s7552_s26 }
 0xb1d   : > { %3923 = vrot.lane.b32.xlu1 %v8401_v32, %s7553_s28 }
 0xb21   : > { %3939 = vrot.lane.b32.xlu1 %v8477_v42, %s7552_s26 }
 0xb25   : > { %3925 = vrot.lane.b32.xlu1 %v8399_v31, %s7553_s28 }
 0xb29   : > { %3927 = vrot.lane.b32.xlu1 %v8404_v35, %s7553_s28 }
 0xb2d   : > { %3941 = vrot.lane.b32.xlu1 %v8475_v11, %s7552_s26 }
 0xb57   : > { %v3695_v26 = vpop.xlane.xlu0 %3694 }
 0xb58   : > { %7441 = vrcp.f32 %v3695_v26  ;;  %v4275_v26 = vld [vmem:[%s7621_s7 + $0x12c] sm:$0xf] }
 0xb62   : > { %v7442_v58 = vpop.eup %7441 }
 0xb63   : > { %v3709_v42 = vmul.f32 %v7442_v58, %v7434_v50  ;;  %v4267_v50 = vld [vmem:[%s7621_s7 + $0x2c] sm:$0xf] }
 0xb65   : > { %v3713_v35 = vpack.c.bf16 %v3709_v42, %v3709_v42 }
 0xb86   : > { %v3701_v53 = vpop.xlane.xlu0 %3700 }
 0xb8a   : > { %v7335_v55 = vpop.permute.xlu0 %7334 }
 0xb8b   : > { %v7337_v7 = vunpack.i.h.bf16 %v7335_v55  ;;  %v7336_v37 = vunpack.i.l.bf16 %v7335_v55  ;;  %v6778_v55 = vcombine.low %v4274_v10, %v4275_v26 }
 0xb8d   : > { %v3730_v32 = vpack.c.bf16 %v7337_v7, %v7337_v7  ;;  %v3729_v33 = vpack.c.bf16 %v7336_v37, %v7336_v37  ;;  %v3698_v12 = vpop.xlane.xlu1 %3697  ;;  %v4276_v7 = vld [vmem:[%s7621_s7 + $0x14c] sm:$0xf] }
 0xb8e   : > { %7443 = vrcp.f32 %v3698_v12  ;;  %v4277_v37 = vld [vmem:[%s7621_s7 + $0x16c] sm:$0xf] }
 0xb8f   : > { %v3783_v31 = vand.u32 %v3730_v32, %v8216_v9  ;;  %v3737_v40 = vand.u32 %v3729_v33, %v8216_v9  ;;  %7445 = vrcp.f32 %v3701_v53  ;;  %v6779_v33 = vcombine.low %v4276_v7, %v4277_v37 }
 0xb91   : > { %7192 = vmatpush3.bf16.msra.mxu1 %v3737_v40  ;;  %7198 = vmatpush3.bf16.msra.mxu0 %v3783_v31  ;;  %v4278_v31 = vld [vmem:[%s7621_s7 + $0x18c] sm:$0xf] }
 0xb92   : > { %7203 = vmatprep.subr.bf16.mxu1 %v7548_v34  ;;  %7209 = vmatprep.subr.bf16.mxu0 %v7548_v34  ;;  %v4279_v40 = vld [vmem:[%s7621_s7 + $0x1ac] sm:$0xf] }
 0xb94   : > { %7194 = vmatmul.mubr.msk.bf16.vlgmr.msra.gmra.mrb[56].mxu1 %vm2344_vm6, %v3713_v35 }
 0xb95   : > { %v3704_v11 = vpop.xlane.xlu1 %3703  ;;  %7205 = vmatprep.mubr.msk.bf16.mxu1 %vm7549_vm1, %v7548_v34 }
 0xb96   : > { %7447 = vrcp.f32 %v3704_v11 }
 0xb98   : > { %v7444_v4 = vpop.eup %7443 }
 0xb99   : > { %v3710_v36 = vmul.f32 %v7444_v4, %v7438_v45  ;;  %v7340_v46 = vpop.permute.xlu1 %7339  ;;  %v7446_v13 = vpop.eup %7445  ;;  %v6780_v4 = vcombine.low %v4278_v31, %v4279_v40 }
 0xb9a   : > { %v7342_v14 = vunpack.i.h.bf16 %v7340_v46  ;;  %v7341_v57 = vunpack.i.l.bf16 %v7340_v46  ;;  %v3711_v41 = vmul.f32 %v7446_v13, %v7436_v62  ;;  %v4271_v62 = vld [vmem:[%s7621_s7 + $0xac] sm:$0xf] }
 0xb9b   : > { %v3714_v27 = vpack.c.bf16 %v3710_v36, %v3710_v36  ;;  %v6776_v52 = vcombine.low %v4270_v59, %v4271_v62  ;;  %v4280_v36 = vld [vmem:[%s7621_s7 + $0x1cc] sm:$0xf] }
 0xb9c   : > { %v3732_v54 = vpack.c.bf16 %v7342_v14, %v7342_v14  ;;  %v3731_v43 = vpack.c.bf16 %v7341_v57, %v7341_v57  ;;  %v3715_v61 = vpack.c.bf16 %v3711_v41, %v3711_v41  ;;  %v4281_v46 = vld [vmem:[%s7621_s7 + $0x1ec] sm:$0xf] }
 0xb9d   : > { %7200 = vmatmul.mubr.msk.bf16.vlgmr.msra.gmra.mrb[68].mxu0 %vm2344_vm6, %v3714_v27  ;;  %v6781_v57 = vcombine.low %v4280_v36, %v4281_v46  ;;  %v3924_v27 = vpop.permute.xlu1 %3923 }
 0xb9e   : > { %v3875_v60 = vand.u32 %v3732_v54, %v8216_v9  ;;  %v3829_v39 = vand.u32 %v3731_v43, %v8216_v9  ;;  %7211 = vmatprep.mubr.msk.bf16.mxu0 %vm7549_vm1, %v7548_v34  ;;  %v6774_v9 = vcombine.low %v4266_v49, %v4267_v50  ;;  %v6775_v34 = vcombine.low %v4268_v1, %v4269_v21 }
 0xba0   : > { %v7448_v2 = vpop.eup %7447  ;;  %7204 = vmatpush3.bf16.msra.mxu1 %v3829_v39  ;;  %7210 = vmatpush3.bf16.msra.mxu0 %v3875_v60  ;;  %v3922_v60 = vpop.permute.xlu0 %3921 }
 0xba1   : > { %v3712_v29 = vmul.f32 %v7448_v2, %v7440_v28  ;;  %7215 = vmatprep.subr.bf16.mxu1 %v6774_v9  ;;  %v3940_v54 = vpop.permute.xlu1 %3939 }
 0xba3   : > { %7206 = vmatmul.mubr.msk.bf16.vlgmr.msra.gmra.mrb[60].mxu1 %vm2344_vm6, %v3715_v61  ;;  %v3716_v56 = vpack.c.bf16 %v3712_v29, %v3712_v29  ;;  %v3965_v29 = vsel %vm2094_vm2, %v8321_v44, %v3922_v60 }
 0xba4   : > { %7216 = vmatpush3.bf16.msra.mxu1 %v6774_v9  ;;  %v3938_v2 = vpop.permute.xlu0 %3937 }
 0xba5   : > { %7212 = vmatmul.mubr.msk.bf16.vlgmr.msra.gmra.mrb[72].mxu0 %vm2344_vm6, %v3716_v56  ;;  %7217 = vmatprep.subr.bf16.mxu1 %v6775_v34  ;;  %v3926_v43 = vpop.permute.xlu1 %3925  ;;  %v3970_v61 = vsel %vm3969_vm7, %v3965_v29, %v3938_v2 }
 0xba6   : > { %5700 = vmatprep.mubr.bf16.mxu0 %v9286_v47 }
 0xba8   : > { %7218 = vmatpush3.bf16.msra.mxu1 %v6775_v34  ;;  %v3944_v1 = vpop.permute.xlu0 %3943 }
 0xba9   : > { %7219 = vmatprep.subr.bf16.mxu1 %v6776_v52  ;;  %v3928_v41 = vpop.permute.xlu1 %3927 }
 0xbac   : > { %7220 = vmatpush3.bf16.msra.mxu1 %v6776_v52 }
 0xbad   : > { %7221 = vmatprep.subr.bf16.mxu1 %v6777_v63  ;;  %v3942_v39 = vpop.permute.xlu1 %3941 }
 0xbb0   : > { %7222 = vmatpush3.bf16.msra.mxu1 %v6777_v63  ;;  %v3967_v63 = vsel %vm2094_vm2, %v8325_v48, %v3926_v43 }
 0xbb1   : > { %7223 = vmatprep.subr.bf16.mxu1 %v6778_v55 }
 0xbb4   : > { %7224 = vmatpush3.bf16.msra.mxu1 %v6778_v55  ;;  %v3972_v55 = vsel %vm3969_vm7, %v3967_v63, %v3942_v39 }
 0xbb5   : > { %7225 = vmatprep.subr.bf16.mxu1 %v6779_v33 }
 0xbb8   : > { %7226 = vmatpush3.bf16.msra.mxu1 %v6779_v33 }
 0xbb9   : > { %7227 = vmatprep.subr.bf16.mxu1 %v6780_v4 }
 0xbbc   : > { %7228 = vmatpush3.bf16.msra.mxu1 %v6780_v4 }
 0xbbd   : > { %7229 = vmatprep.subr.bf16.mxu1 %v6781_v57 }
 0xbc0   : > { %7230 = vmatpush3.bf16.msra.mxu1 %v6781_v57 }
 0xc67   : > { %v3773_v38 = vpop.f32.mrb[56].mxu1 }
 0xc68   : > { %3953 = vrot.lane.b32.xlu1 %v3773_v38, %s7551_s18  ;;  %v7195_v3 = vpop.f32.mrb[57].mxu1  ;;  %v3966_v38 = vsel %vm2094_vm2, %v8323_v15, %v3924_v27 }
 0xc69   : > { %v3776_v6 = vpop.f32.mrb[58].mxu1 }
 0xc6a   : > { %v7196_v51 = vpop.f32.mrb[59].mxu1  ;;  %v3971_v6 = vsel %vm3969_vm7, %v3966_v38, %v3940_v54 }
 0xc70   : > { %v3819_v45 = vpop.f32.mrb[68].mxu0 }
 0xc71   : > { %3955 = vrot.lane.b32.xlu0 %v3819_v45, %s7551_s18  ;;  %v7201_v30 = vpop.f32.mrb[69].mxu0 }
 0xc72   : > { %v3822_v28 = vpop.f32.mrb[70].mxu0 }
 0xc73   : > { %v7202_v53 = vpop.f32.mrb[71].mxu0  ;;  %v3968_v28 = vsel %vm2094_vm2, %v8328_v5, %v3928_v41 }
 0xc74   : > { %v3973_v5 = vsel %vm3969_vm7, %v3968_v28, %v3944_v1 }
 0xc76   : > { %v3865_v58 = vpop.f32.mrb[60].mxu1 }
 0xc77   : > { %v7207_v32 = vpop.f32.mrb[61].mxu1  ;;  %3957 = vrot.lane.b32.xlu0 %v3865_v58, %s7551_s18 }
 0xc78   : > { %v3868_v12 = vpop.f32.mrb[62].mxu1  ;;  %v3911_v42 = vpop.f32.mrb[72].mxu0 }
 0xc79   : > { %v7208_v35 = vpop.f32.mrb[63].mxu1  ;;  %3959 = vrot.lane.b32.xlu1 %v3911_v42, %s7551_s18  ;;  %v7213_v11 = vpop.f32.mrb[73].mxu0 }
 0xc7a   : > { %v3914_v13 = vpop.f32.mrb[74].mxu0 }
 0xc7b   : > { %v7214_v14 = vpop.f32.mrb[75].mxu0 }
 0xcda   : > { %v3954_v56 = vpop.permute.xlu1 %3953 }
 0xcdb   : > { %v3975_v49 = vsel %vm3974_vm8, %v3970_v61, %v3954_v56 }
 0xcdc   : > { %v3990_v50 = vrot.slane %v3975_v49, %v7658_v17  ;;  %v3983_v21 = vcombine.high %v3975_v49, %v3975_v49 }
 0xcde   : > { %v3998_v9 = vcombine.high %v3990_v50, %v3990_v50  ;;  %v4005_v3 = vrot.slane %v3990_v50, %v7658_v17  ;;  %v3997_v44 = vrot.slane %v3983_v21, %v7658_v17 }
 0xce0   : > { %v4019_v34 = vrot.slane %v3998_v9, %v7658_v17  ;;  %v4012_v45 = vrot.slane %v3997_v44, %v7658_v17 }
 0xce2   : > { %v4139_v59 = vcombine.low %v4005_v3, %v4019_v34  ;;  %v6772_v62 = vcombine.high %v4005_v3, %v4019_v34 }
 0xce3   : > { %v3956_v51 = vpop.permute.xlu0 %3955 }
 0xce4   : > { %v3976_v52 = vsel %vm3974_vm8, %v3971_v6, %v3956_v51  ;;  %v4149_v10 = vrot.slane %v4139_v59, %v7658_v17  ;;  %v4156_v26 = vrot.slane %v6772_v62, %v7658_v17 }
 0xce5   : > { %v4022_v0 = vcombine.high %v3976_v52, %v3976_v52  ;;  %v4029_v8 = vrot.slane %v3976_v52, %v7658_v17 }
 0xce6   : > { %v4171_v4 = vcombine.low %v4149_v10, %v4156_v26 }
 0xce7   : > { %v4037_v15 = vcombine.high %v4029_v8, %v4029_v8  ;;  %v4044_v30 = vrot.slane %v4029_v8, %v7658_v17  ;;  %v4036_v53 = vrot.slane %v4022_v0, %v7658_v17 }
 0xce8   : > { %v4179_v56 = vrot.slane %v4171_v4, %v7658_v17 }
 0xce9   : > { %v4058_v58 = vrot.slane %v4037_v15, %v7658_v17  ;;  %v4059_v7 = vcombine.high %v4044_v30, %v4044_v30  ;;  %v4141_v48 = vcombine.low %v4012_v45, %v4044_v30  ;;  %v3958_v37 = vpop.permute.xlu0 %3957  ;;  %v4051_v40 = vrot.slane %v4036_v53, %v7658_v17 }
 0xcea   : > { %v3977_v32 = vsel %vm3974_vm8, %v3972_v55, %v3958_v37 }
 0xceb   : > { %v4060_v33 = vcombine.high %v4058_v58, %v4058_v58  ;;  %v4142_v12 = vcombine.low %v4058_v58, %v4059_v7  ;;  %v4061_v42 = vcombine.high %v3977_v32, %v3977_v32  ;;  %v3960_v31 = vpop.permute.xlu1 %3959  ;;  %v4068_v35 = vrot.slane %v3977_v32, %v7658_v17  ;;  %v8594_v7 = vld [vmem:[%s7639_s27] sm:$0x3f] }
 0xcec   : > { %v3978_v11 = vsel %vm3974_vm8, %v3973_v5, %v3960_v31  ;;  %v4163_v36 = vrot.slane %v4141_v48, %v7658_v17  ;;  %v4285_v48 = vrot.slane %v8594_v7, %v7769_v22 }
 0xced   : > { %v4170_v46 = vrot.slane %v4142_v12, %v7658_v17  ;;  %v4075_v13 = vrot.slane %v4061_v42, %v7658_v17  ;;  %v4100_v14 = vcombine.high %v3978_v11, %v3978_v11  ;;  %v4076_v57 = vcombine.high %v4068_v35, %v4068_v35 }
 0xcee   : > { %v4107_v27 = vrot.slane %v3978_v11, %v7658_v17  ;;  %v4188_v54 = vcombine.low %v4060_v33, %v4051_v40  ;;  %v4083_v39 = vrot.slane %v4068_v35, %v7658_v17 }
 0xcef   : > { %v4090_v43 = vrot.slane %v4075_v13, %v7658_v17  ;;  %v4114_v41 = vrot.slane %v4100_v14, %v7658_v17  ;;  %v4172_v60 = vcombine.low %v4163_v36, %v4170_v46  ;;  %v4097_v2 = vrot.slane %v4076_v57, %v7658_v17 }
 0xcf0   : > { %v4115_v29 = vcombine.high %v4107_v27, %v4107_v27  ;;  %v4122_v61 = vrot.slane %v4107_v27, %v7658_v17  ;;  %v4198_v34 = vrot.slane %v4188_v54, %v7658_v17 }
 0xcf1   : > { %v4186_v49 = vrot.slane %v4172_v60, %v7658_v17  ;;  %v4189_v50 = vcombine.low %v4083_v39, %v4097_v2  ;;  %v6773_v9 = vcombine.high %v4083_v39, %v4097_v2  ;;  %v4129_v38 = vrot.slane %v4114_v41, %v7658_v17 }
 0xcf2   : > { %v4136_v1 = vrot.slane %v4115_v29, %v7658_v17  ;;  %v4137_v21 = vcombine.high %v4122_v61, %v4122_v61  ;;  %v4191_v3 = vcombine.low %v4090_v43, %v4122_v61  ;;  %v9287_v43 = vld [vmem:[#allocation15_spill] sm:$0xff] }
 0xcf3   : > { %v4187_v6 = vcombine.low %v4179_v56, %v4186_v49  ;;  %v4205_v44 = vrot.slane %v4189_v50, %v7658_v17  ;;  %v4212_v51 = vrot.slane %v6773_v9, %v7658_v17  ;;  %v9289_v49 = vld [vmem:[#allocation16_spill] sm:$0xff]  ;;  %v9291_v9 = vld [vmem:[#allocation17_spill] sm:$0xff] }
 0xcf4   : > { %v4138_v59 = vcombine.high %v4136_v1, %v4136_v1  ;;  %v4237_v62 = vcombine.low %v4136_v1, %v4137_v21  ;;  %v4219_v52 = vrot.slane %v4191_v3, %v7658_v17  ;;  %v9293_v21 = vld [vmem:[#allocation2_spill] sm:$0xff] }
 0xcf5   : > { %v4220_v8 = vcombine.low %v4198_v34, %v4205_v44  ;;  %v9295_v44 = vld [vmem:[#allocation7_spill] sm:$0xff] }
 0xcf6   : > { %v4238_v0 = vcombine.low %v4138_v59, %v4129_v38  ;;  %v4221_v63 = vcombine.low %v4212_v51, %v4219_v52  ;;  %v4245_v45 = vrot.slane %v4237_v62, %v7658_v17  ;;  %v9297_v59 = vld [vmem:[#allocation14_spill] sm:$0xff] }
 0xcf7   : > { %v4228_v30 = vrot.slane %v4220_v8, %v7658_v17  ;;  %v9299_v52 = vld [vmem:[#allocation18_spill] sm:$0xff]  ;;  %v9301_v8 = vld [vmem:[#allocation3_spill] sm:$0xff] }
 0xcf8   : > { %v4252_v15 = vrot.slane %v4238_v0, %v7658_v17  ;;  %v4235_v28 = vrot.slane %v4221_v63, %v7658_v17 }
 0xcfa   : > { %v4253_v10 = vcombine.low %v4245_v45, %v4252_v15  ;;  %v4236_v26 = vcombine.low %v4228_v30, %v4235_v28  ;;  %v9303_v30 = vld [vmem:[#allocation19_spill] sm:$0xff] }
 0xcfc   : > { %v4260_v53 = vrot.slane %v4253_v10, %v7658_v17  ;;  %v4264_v55 = vpack.c.bf16 %v4236_v26, %v4187_v6  ;;  %v9305_v10 = vld [vmem:[#allocation4_spill] sm:$0xff] }
 0xcfe   : > { %v4265_v58 = vpack.c.bf16 %v4260_v53, %v4260_v53  ;;  %7231 = vmatprep.mubr.bf16.mxu1 %v4264_v55  ;;  %v9307_v53 = vld [vmem:[#allocation8_spill] sm:$0xff] }
 0xd00   : > { %7232 = vmatmul.mubr.bf16.vlgmr.msra.gmra.mrb[64].mxu1 %v4265_v58 }
 0xd01   : > { %5751 = vmatprep.mubr.bf16.mxu1 %v9286_v47 }
 0xdd3   : > { %v7233_v37 = vpop.f32.mrb[64].mxu1 }
 0xdd4   : > { %v4377_v32 = vadd.f32 %v7233_v37, %v4285_v48  ;;  %v4368_v33 = vpop.f32.mrb[65].mxu1 }
 0xdd5   : > { %v4369_v12 = vadd.f32 %v4368_v33, %v4285_v48  ;;  %v7234_v42 = vpop.f32.mrb[66].mxu1  ;;  %v9309_v33 = vld [vmem:[#allocation11_spill] sm:$0xff] }
 0xdd6   : > { %v4489_v5 = vrot.slane %v4377_v32, %v7658_v17  ;;  %v4371_v31 = vpop.f32.mrb[67].mxu1 }
 0xdd7   : > { %v4385_v40 = vcombine.high %v4369_v12, %v4369_v12  ;;  %v4392_v35 = vrot.slane %v4369_v12, %v7658_v17  ;;  %v4372_v11 = vadd.f32 %v4371_v31, %v4285_v48 }
 0xdd8   : > { %v4490_v4 = vcombine.high %v4489_v5, %v4489_v5  ;;  %v4497_v36 = vrot.slane %v4489_v5, %v7658_v17 }
 0xdd9   : > { %v4399_v46 = vrot.slane %v4385_v40, %v7658_v17  ;;  %v4400_v13 = vcombine.high %v4392_v35, %v4392_v35  ;;  %v4408_v14 = vrot.slane %v4392_v35, %v7658_v17  ;;  %v4434_v57 = vcombine.high %v4372_v11, %v4372_v11 }
 0xdda   : > { %v4504_v27 = vrot.slane %v4490_v4, %v7658_v17  ;;  %v4505_v54 = vcombine.high %v4497_v36, %v4497_v36  ;;  %v8605_v41 = vadd.f32 %v4497_v36, %v9287_v43  ;;  %v4441_v60 = vrot.slane %v4372_v11, %v7658_v17  ;;  %v9311_v36 = vld [vmem:[#allocation13_spill] sm:$0xff] }
 0xddb   : > { %v4401_v39 = vcombine.high %v4399_v46, %v4399_v46  ;;  %v4415_v2 = vrot.slane %v4399_v46, %v7658_v17  ;;  %v4422_v29 = vrot.slane %v4400_v13, %v7658_v17  ;;  %v4430_v61 = vcombine.high %v4408_v14, %v4408_v14  ;;  %v9313_v13 = vld [vmem:[#allocation20_spill] sm:$0xff] }
 0xddc   : > { %9288 = vst [vmem:[#allocation15_spill] sm:$0xff] %v8605_v41  ;;  %v4506_v56 = vcombine.high %v4504_v27, %v4504_v27  ;;  %v8611_v50 = vadd.f32 %v4504_v27, %v9289_v49  ;;  %v8614_v1 = vadd.f32 %v4505_v54, %v9291_v9  ;;  %v8617_v34 = vadd.f32 %v4408_v14, %v9293_v21  ;;  %v9321_v49 = vld [vmem:[#allocation9_spill] sm:$0xff] }
 0xddd   : > { %v4429_v38 = vrot.slane %v4401_v39, %v7658_v17  ;;  %v4431_v3 = vcombine.high %v4415_v2, %v4415_v2  ;;  %v4432_v6 = vcombine.high %v4422_v29, %v4422_v29  ;;  %v8621_v51 = vadd.f32 %v4422_v29, %v9295_v44  ;;  %v9325_v44 = vld [vmem:[#allocation10_spill] sm:$0xff] }
 0xdde   : > { %9290 = vst [vmem:[#allocation16_spill] sm:$0xff] %v8611_v50  ;;  %9292 = vst [vmem:[#allocation17_spill] sm:$0xff] %v8614_v1  ;;  %v8624_v62 = vadd.f32 %v4506_v56, %v9297_v59  ;;  %v8627_v0 = vadd.f32 %v4430_v61, %v9299_v52  ;;  %v8630_v63 = vadd.f32 %v4415_v2, %v9301_v8  ;;  %v9317_v2 = vld [vmem:[#allocation6_spill] sm:$0xff]  ;;  %v9319_v61 = vld [vmem:[#allocation21_spill] sm:$0xff] }
 0xddf   : > { %9294 = vst [vmem:[#allocation2_spill] sm:$0xff] %v8617_v34  ;;  %9296 = vst [vmem:[#allocation7_spill] sm:$0xff] %v8621_v51  ;;  %v4448_v45 = vrot.slane %v4434_v57, %v7658_v17  ;;  %v4433_v15 = vcombine.high %v4429_v38, %v4429_v38  ;;  %v8634_v28 = vadd.f32 %v4432_v6, %v9303_v30 }
 0xde0   : > { %9298 = vst [vmem:[#allocation14_spill] sm:$0xff] %v8624_v62  ;;  %9300 = vst [vmem:[#allocation18_spill] sm:$0xff] %v8627_v0  ;;  %v8637_v26 = vadd.f32 %v4429_v38, %v9305_v10  ;;  %v8640_v55 = vadd.f32 %v4431_v3, %v9307_v53  ;;  %v4449_v58 = vcombine.high %v4441_v60, %v4441_v60  ;;  %v9323_v3 = vld [vmem:[#allocation12_spill] sm:$0xff] }
 0xde1   : > { %9302 = vst [vmem:[#allocation3_spill] sm:$0xff] %v8630_v63  ;;  %9304 = vst [vmem:[#allocation19_spill] sm:$0xff] %v8634_v28  ;;  %v4450_v48 = vcombine.high %v4448_v45, %v4448_v45  ;;  %v4457_v37 = vrot.slane %v4441_v60, %v7658_v17  ;;  %v4464_v32 = vrot.slane %v4448_v45, %v7658_v17  ;;  %v9315_v60 = vld [vmem:[#allocation5_spill] sm:$0xff] }
 0xde2   : > { %9306 = vst [vmem:[#allocation4_spill] sm:$0xff] %v8637_v26  ;;  %9308 = vst [vmem:[#allocation8_spill] sm:$0xff] %v8640_v55  ;;  %v8645_v12 = vadd.f32 %v4433_v15, %v9309_v33  ;;  %v4567_v42 = vcombine.low %v8617_v34, %v8621_v51  ;;  %v4568_v5 = vcombine.low %v8627_v0, %v8634_v28 }
 0xde3   : > { %v4569_v31 = vcombine.low %v8630_v63, %v8637_v26  ;;  %v4471_v40 = vrot.slane %v4449_v58, %v7658_v17  ;;  %v4478_v35 = vrot.slane %v4450_v48, %v7658_v17  ;;  %v4479_v11 = vcombine.high %v4457_v37, %v4457_v37 }
 0xde4   : > { %9310 = vst [vmem:[#allocation11_spill] sm:$0xff] %v8645_v12  ;;  %v4480_v4 = vcombine.high %v4464_v32, %v4464_v32  ;;  %v8656_v46 = vadd.f32 %v4457_v37, %v9311_v36  ;;  %v8659_v14 = vadd.f32 %v4464_v32, %v9313_v13  ;;  %v4570_v57 = vcombine.low %v8640_v55, %v8645_v12 }
 0xde5   : > { %v4577_v27 = vrot.slane %v4567_v42, %v7658_v17  ;;  %v4481_v54 = vcombine.high %v4471_v40, %v4471_v40  ;;  %v4482_v43 = vcombine.high %v4478_v35, %v4478_v35  ;;  %v8665_v39 = vadd.f32 %v4471_v40, %v9315_v60 }
 0xde6   : > { %9312 = vst [vmem:[#allocation13_spill] sm:$0xff] %v8656_v46  ;;  %9314 = vst [vmem:[#allocation20_spill] sm:$0xff] %v8659_v14  ;;  %v8668_v29 = vadd.f32 %v4479_v11, %v9317_v2  ;;  %v8671_v56 = vadd.f32 %v4478_v35, %v9319_v61  ;;  %v8674_v9 = vadd.f32 %v4480_v4, %v9321_v49 }
 0xde7   : > { %9316 = vst [vmem:[#allocation5_spill] sm:$0xff] %v8665_v39  ;;  %v4584_v21 = vrot.slane %v4568_v5, %v7658_v17  ;;  %v4591_v38 = vrot.slane %v4569_v31, %v7658_v17  ;;  %v8679_v6 = vadd.f32 %v4481_v54, %v9323_v3  ;;  %v8682_v59 = vadd.f32 %v4482_v43, %v9325_v44 }
 0xde8   : > { %9318 = vst [vmem:[#allocation6_spill] sm:$0xff] %v8668_v29  ;;  %9320 = vst [vmem:[#allocation21_spill] sm:$0xff] %v8671_v56  ;;  %v4598_v52 = vrot.slane %v4570_v57, %v7658_v17  ;;  %v4616_v8 = vcombine.low %v8656_v46, %v8665_v39  ;;  %v4618_v15 = vcombine.low %v8659_v14, %v8671_v56 }
 0xde9   : > { %9322 = vst [vmem:[#allocation9_spill] sm:$0xff] %v8674_v9  ;;  %9324 = vst [vmem:[#allocation12_spill] sm:$0xff] %v8679_v6  ;;  %v4599_v45 = vcombine.low %v4577_v27, %v4584_v21  ;;  %v4665_v30 = vcombine.low %v8605_v41, %v8611_v50  ;;  %v4666_v10 = vcombine.low %v8614_v1, %v8624_v62 }
 0xdea   : > { %9326 = vst [vmem:[#allocation10_spill] sm:$0xff] %v8682_v59  ;;  %v4600_v53 = vcombine.low %v4591_v38, %v4598_v52  ;;  %v4617_v58 = vcombine.low %v8668_v29, %v8679_v6  ;;  %v4619_v48 = vcombine.low %v8674_v9, %v8682_v59  ;;  %v4626_v32 = vrot.slane %v4616_v8, %v7658_v17 }
 0xdeb   : > { %v4607_v37 = vrot.slane %v4599_v45, %v7658_v17  ;;  %v4673_v33 = vrot.slane %v4665_v30, %v7658_v17  ;;  %v4680_v42 = vrot.slane %v4666_v10, %v7658_v17  ;;  %v4640_v40 = vrot.slane %v4618_v15, %v7658_v17 }
 0xdec   : > { %v4614_v5 = vrot.slane %v4600_v53, %v7658_v17  ;;  %v4633_v31 = vrot.slane %v4617_v58, %v7658_v17  ;;  %v4647_v35 = vrot.slane %v4619_v48, %v7658_v17 }
 0xded   : > { %v4681_v11 = vcombine.low %v4673_v33, %v4680_v42 }
 0xdee   : > { %v4615_v4 = vcombine.low %v4607_v37, %v4614_v5  ;;  %v4648_v36 = vcombine.low %v4626_v32, %v4633_v31  ;;  %v4649_v13 = vcombine.low %v4640_v40, %v4647_v35 }
 0xdef   : > { %v4688_v57 = vrot.slane %v4681_v11, %v7658_v17 }
 0xdf0   : > { %4692 = vadd.xlane.f32.xlu0 %v4615_v4  ;;  %v4656_v27 = vrot.slane %v4648_v36, %v7658_v17  ;;  %v4663_v54 = vrot.slane %v4649_v13, %v7658_v17 }
 0xdf1   : > { %v4696_v60 = vsel %vm645_vm0, %v4688_v57, 0.0 }
 0xdf2   : > { %v4664_v43 = vcombine.low %v4656_v27, %v4663_v54 }
 0xdf4   : > { %4694 = vadd.xlane.f32.xlu1 %v4664_v43  ;;  %4697 = vadd.xlane.f32.xlu0 %v4696_v60 }
 0xe7d   : > { %v4693_v2 = vpop.xlane.xlu0 %4692 }
 0xe7e   : > { %v4699_v61 = vmul.f32 0.0078125, %v4693_v2 }
 0xe80   : > { %v4708_v49 = vrot.slane %v4699_v61, %v7757_v16  ;;  %v4712_v21 = vrot.slane %v4699_v61, %v7760_v18  ;;  %v4716_v38 = vrot.slane %v4699_v61, %v7763_v19  ;;  %v4720_v3 = vrot.slane %v4699_v61, %v7766_v20 }
 0xe81   : > { %v4695_v44 = vpop.xlane.xlu1 %4694  ;;  %v4698_v52 = vpop.xlane.xlu0 %4697  ;;  %v4724_v8 = vrot.slane %v4699_v61, %v7769_v22  ;;  %v4728_v45 = vrot.slane %v4699_v61, %v7772_v23  ;;  %v4732_v15 = vrot.slane %v4699_v61, %v7775_v24  ;;  %v4736_v30 = vrot.slane %v4699_v61, %v7778_v25 }
 0xe82   : > { %v8717_v10 = vmul.f32 0.0078125, %v4695_v44  ;;  %v4701_v53 = vmul.f32 0.0078125, %v4698_v52  ;;  %v8720_v58 = vsub.f32 %v8617_v34, %v4708_v49  ;;  %v8723_v48 = vsub.f32 %v8621_v51, %v4712_v21 }
 0xe83   : > { %v8726_v37 = vsub.f32 %v8627_v0, %v4716_v38  ;;  %v8729_v32 = vsub.f32 %v8634_v28, %v4720_v3  ;;  %v8732_v33 = vsub.f32 %v8630_v63, %v4724_v8  ;;  %v8735_v42 = vsub.f32 %v8637_v26, %v4728_v45 }
 0xe84   : > { %v4772_v5 = vrot.slane %v4701_v53, %v7757_v16  ;;  %v4776_v31 = vrot.slane %v4701_v53, %v7760_v18  ;;  %v4780_v40 = vrot.slane %v4701_v53, %v7763_v19  ;;  %v4784_v35 = vrot.slane %v4701_v53, %v7766_v20 }
 0xe85   : > { %v8742_v11 = vsub.f32 %v8640_v55, %v4732_v15  ;;  %v8745_v4 = vsub.f32 %v8645_v12, %v4736_v30  ;;  %v4825_v36 = vmul.f32 %v8720_v58, %v8720_v58  ;;  %v4826_v13 = vmul.f32 %v8723_v48, %v8723_v48 }
 0xe86   : > { %v8752_v57 = vsub.f32 %v8605_v41, %v4772_v5  ;;  %v8755_v27 = vsub.f32 %v8611_v50, %v4776_v31  ;;  %v8758_v54 = vsub.f32 %v8614_v1, %v4780_v40  ;;  %v8761_v43 = vsub.f32 %v8624_v62, %v4784_v35 }
 0xe87   : > { %v4827_v60 = vmul.f32 %v8726_v37, %v8726_v37  ;;  %v4828_v2 = vmul.f32 %v8729_v32, %v8729_v32  ;;  %v4829_v61 = vmul.f32 %v8732_v33, %v8732_v33  ;;  %v4830_v49 = vmul.f32 %v8735_v42, %v8735_v42 }
 0xe88   : > { %v4831_v21 = vmul.f32 %v8742_v11, %v8742_v11  ;;  %v4832_v38 = vmul.f32 %v8745_v4, %v8745_v4  ;;  %v4865_v3 = vcombine.low %v4825_v36, %v4826_v13  ;;  %v4841_v44 = vmul.f32 %v8752_v57, %v8752_v57 }
 0xe89   : > { %v4866_v52 = vcombine.low %v4827_v60, %v4828_v2  ;;  %v4867_v8 = vcombine.low %v4829_v61, %v4830_v49  ;;  %v4842_v45 = vmul.f32 %v8755_v27, %v8755_v27  ;;  %v4843_v15 = vmul.f32 %v8758_v54, %v8758_v54 }
 0xe8a   : > { %v4868_v30 = vcombine.low %v4831_v21, %v4832_v38  ;;  %v4875_v53 = vrot.slane %v4865_v3, %v7658_v17  ;;  %v4844_v5 = vmul.f32 %v8761_v43, %v8761_v43  ;;  %v4740_v31 = vrot.slane %v8717_v10, %v7757_v16 }
 0xe8b   : > { %v4882_v40 = vrot.slane %v4866_v52, %v7658_v17  ;;  %v4889_v35 = vrot.slane %v4867_v8, %v7658_v17  ;;  %v4963_v36 = vcombine.low %v4841_v44, %v4842_v45  ;;  %v4744_v13 = vrot.slane %v8717_v10, %v7760_v18 }
 0xe8c   : > { %v4896_v60 = vrot.slane %v4868_v30, %v7658_v17  ;;  %v4964_v2 = vcombine.low %v4843_v15, %v4844_v5  ;;  %v4748_v61 = vrot.slane %v8717_v10, %v7763_v19  ;;  %v4752_v49 = vrot.slane %v8717_v10, %v7766_v20 }
 0xe8d   : > { %v4897_v21 = vcombine.low %v4875_v53, %v4882_v40  ;;  %v4971_v38 = vrot.slane %v4963_v36, %v7658_v17  ;;  %v4756_v3 = vrot.slane %v8717_v10, %v7769_v22  ;;  %v4760_v44 = vrot.slane %v8717_v10, %v7772_v23 }
 0xe8e   : > { %v4898_v52 = vcombine.low %v4889_v35, %v4896_v60  ;;  %v4978_v8 = vrot.slane %v4964_v2, %v7658_v17  ;;  %v4764_v45 = vrot.slane %v8717_v10, %v7775_v24  ;;  %v4768_v15 = vrot.slane %v8717_v10, %v7778_v25 }
 0xe8f   : > { %v4905_v30 = vrot.slane %v4897_v21, %v7658_v17  ;;  %v8807_v53 = vsub.f32 %v8656_v46, %v4740_v31  ;;  %v8810_v5 = vsub.f32 %v8665_v39, %v4744_v13  ;;  %v8813_v40 = vsub.f32 %v8668_v29, %v4748_v61 }
 0xe90   : > { %v4912_v35 = vrot.slane %v4898_v52, %v7658_v17  ;;  %v4979_v36 = vcombine.low %v4971_v38, %v4978_v8  ;;  %v8817_v60 = vsub.f32 %v8679_v6, %v4752_v49  ;;  %v8820_v2 = vsub.f32 %v8659_v14, %v4756_v3  ;;  %v5455_v14 = vld [vmem:[%s7621_s7 + $0xf8] sm:$0xff] }
 0xe91   : > { %v8823_v10 = vsub.f32 %v8671_v56, %v4760_v44  ;;  %v8826_v31 = vsub.f32 %v8674_v9, %v4764_v45  ;;  %v8829_v13 = vsub.f32 %v8682_v59, %v4768_v15  ;;  %v4833_v61 = vmul.f32 %v8807_v53, %v8807_v53  ;;  %v5454_v9 = vld [vmem:[%s7621_s7 + $0xf0] sm:$0xff]  ;;  %v5453_v56 = vld [vmem:[%s7621_s7 + $0xd8] sm:$0xff] }
 0xe92   : > { %v4913_v21 = vcombine.low %v4905_v30, %v4912_v35  ;;  %v4986_v38 = vrot.slane %v4979_v36, %v7658_v17  ;;  %v4834_v49 = vmul.f32 %v8810_v5, %v8810_v5  ;;  %v4835_v3 = vmul.f32 %v8813_v40, %v8813_v40 }
 0xe93   : > { %v4836_v44 = vmul.f32 %v8817_v60, %v8817_v60  ;;  %v4837_v52 = vmul.f32 %v8820_v2, %v8820_v2  ;;  %v4838_v8 = vmul.f32 %v8823_v10, %v8823_v10  ;;  %v4839_v45 = vmul.f32 %v8826_v31, %v8826_v31 }
 0xe94   : > { %4990 = vadd.xlane.f32.xlu0 %v4913_v21  ;;  %v4994_v15 = vsel %vm645_vm0, %v4986_v38, 0.0  ;;  %v4840_v30 = vmul.f32 %v8829_v13, %v8829_v13  ;;  %v4914_v35 = vcombine.low %v4833_v61, %v4834_v49 }
 0xe95   : > { %4995 = vadd.xlane.f32.xlu1 %v4994_v15  ;;  %v4915_v36 = vcombine.low %v4835_v3, %v4836_v44  ;;  %v4916_v62 = vcombine.low %v4837_v52, %v4838_v8  ;;  %v5440_v52 = vld [vmem:[%s7621_s7 + $0x10] sm:$0xff]  ;;  %v5443_v15 = vld [vmem:[%s7621_s7 + $0x38] sm:$0xff] }
 0xe96   : > { %v4917_v1 = vcombine.low %v4839_v45, %v4840_v30  ;;  %v4924_v50 = vrot.slane %v4914_v35, %v7658_v17  ;;  %v5442_v8 = vld [vmem:[%s7621_s7 + $0x30] sm:$0xff]  ;;  %v5441_v45 = vld [vmem:[%s7621_s7 + $0x18] sm:$0xff] }
 0xe97   : > { %v4931_v41 = vrot.slane %v4915_v36, %v7658_v17  ;;  %v4938_v21 = vrot.slane %v4916_v62, %v7658_v17  ;;  %v6783_v62 = vcombine.high %v5440_v52, %v5442_v8  ;;  %v5444_v30 = vld [vmem:[%s7621_s7 + $0x50] sm:$0xff] }
 0xe98   : > { %v4945_v38 = vrot.slane %v4917_v1, %v7658_v17  ;;  %v6782_v1 = vcombine.low %v5440_v52, %v5442_v8  ;;  %v5446_v35 = vld [vmem:[%s7621_s7 + $0x70] sm:$0xff]  ;;  %v5451_v52 = vld [vmem:[%s7621_s7 + $0xb8] sm:$0xff] }
 0xe99   : > { %v4946_v59 = vcombine.low %v4924_v50, %v4931_v41  ;;  %v6784_v41 = vcombine.low %v5441_v45, %v5443_v15  ;;  %v6785_v50 = vcombine.high %v5441_v45, %v5443_v15  ;;  %5668 = vmatprep.subr.bf16.mxu0 %v6783_v62  ;;  %v6787_v36 = vcombine.high %v5444_v30, %v5446_v35  ;;  %v5452_v15 = vld [vmem:[%s7621_s7 + $0xd0] sm:$0xff] }
 0xe9a   : > { %v4947_v61 = vcombine.low %v4938_v21, %v4945_v38  ;;  %v5447_v21 = vld [vmem:[%s7621_s7 + $0x78] sm:$0xff]  ;;  %v5448_v38 = vld [vmem:[%s7621_s7 + $0x90] sm:$0xff]  ;;  %5669 = vmatpush1.bf16.msra.mxu0 %v6782_v1 }
 0xe9b   : > { %v4954_v49 = vrot.slane %v4946_v59, %v7658_v17  ;;  %v5445_v59 = vld [vmem:[%s7621_s7 + $0x58] sm:$0xff]  ;;  %5719 = vmatprep.subr.bf16.mxu1 %v6785_v50  ;;  %5670 = vmatprep.subr.bf16.mxu0 %v6787_v36 }
 0xe9c   : > { %v4961_v3 = vrot.slane %v4947_v61, %v7658_v17  ;;  %v5450_v61 = vld [vmem:[%s7621_s7 + $0xb0] sm:$0xff]  ;;  %5720 = vmatpush1.bf16.msra.mxu1 %v6784_v41  ;;  %v6788_v8 = vcombine.low %v5445_v59, %v5447_v21  ;;  %v6795_v41 = vcombine.high %v5452_v15, %v5454_v9  ;;  %v5457_v36 = vld [vmem:[%s7621_s7 + $0x118] sm:$0xff] }
 0xe9d   : > { %v6791_v45 = vcombine.high %v5448_v38, %v5450_v61  ;;  %v6790_v1 = vcombine.low %v5448_v38, %v5450_v61 }
 0xe9e   : > { %v4962_v44 = vcombine.low %v4954_v49, %v4961_v3  ;;  %v6786_v49 = vcombine.low %v5444_v30, %v5446_v35  ;;  %v6789_v3 = vcombine.high %v5445_v59, %v5447_v21  ;;  %v6797_v30 = vcombine.high %v5453_v56, %v5455_v14  ;;  %v5456_v35 = vld [vmem:[%s7621_s7 + $0x110] sm:$0xff]  ;;  %v5459_v21 = vld [vmem:[%s7621_s7 + $0x138] sm:$0xff] }
 0xe9f   : > { %v5458_v59 = vld [vmem:[%s7621_s7 + $0x130] sm:$0xff]  ;;  %v6801_v61 = vcombine.high %v5457_v36, %v5459_v21 }
 0xea0   : > { %4992 = vadd.xlane.f32.xlu0 %v4962_v44  ;;  %v5449_v44 = vld [vmem:[%s7621_s7 + $0x98] sm:$0xff]  ;;  %5721 = vmatprep.subr.bf16.mxu1 %v6789_v3  ;;  %v6794_v3 = vcombine.low %v5452_v15, %v5454_v9  ;;  %v6799_v38 = vcombine.high %v5456_v35, %v5458_v59  ;;  %v5466_v15 = vld [vmem:[%s7621_s7 + $0x1b0] sm:$0xff] }
 0xea1   : > { %v6793_v62 = vcombine.high %v5449_v44, %v5451_v52  ;;  %5671 = vmatpush1.bf16.msra.mxu0 %v6786_v49  ;;  %5722 = vmatpush1.bf16.msra.mxu1 %v6788_v8  ;;  %v6792_v50 = vcombine.low %v5449_v44, %v5451_v52  ;;  %v6796_v49 = vcombine.low %v5453_v56, %v5455_v14  ;;  %v5460_v44 = vld [vmem:[%s7621_s7 + $0x150] sm:$0xff]  ;;  %v5461_v8 = vld [vmem:[%s7621_s7 + $0x158] sm:$0xff] }
 0xea2   : > { %5672 = vmatprep.subr.bf16.mxu0 %v6791_v45  ;;  %v5462_v52 = vld [vmem:[%s7621_s7 + $0x170] sm:$0xff]  ;;  %v5463_v45 = vld [vmem:[%s7621_s7 + $0x178] sm:$0xff] }
 0xea3   : > { %5723 = vmatprep.subr.bf16.mxu1 %v6793_v62  ;;  %v6798_v62 = vcombine.low %v5456_v35, %v5458_v59  ;;  %v6803_v9 = vcombine.high %v5460_v44, %v5462_v52  ;;  %v6805_v14 = vcombine.high %v5461_v8, %v5463_v45  ;;  %v5464_v56 = vld [vmem:[%s7621_s7 + $0x190] sm:$0xff] }
 0xea4   : > { %v6807_v35 = vcombine.high %v5464_v56, %v5466_v15 }
 0xea5   : > { %5673 = vmatpush1.bf16.msra.mxu0 %v6790_v1  ;;  %5724 = vmatpush1.bf16.msra.mxu1 %v6792_v50  ;;  %v6800_v1 = vcombine.low %v5457_v36, %v5459_v21  ;;  %v5465_v50 = vld [vmem:[%s7621_s7 + $0x198] sm:$0xff]  ;;  %v5468_v36 = vld [vmem:[%s7621_s7 + $0x1d0] sm:$0xff] }
 0xea6   : > { %5674 = vmatprep.subr.bf16.mxu0 %v6795_v41  ;;  %5725 = vmatprep.subr.bf16.mxu1 %v6797_v30  ;;  %v5467_v41 = vld [vmem:[%s7621_s7 + $0x1b8] sm:$0xff]  ;;  %v6802_v30 = vcombine.low %v5460_v44, %v5462_v52  ;;  %v5470_v21 = vld [vmem:[%s7621_s7 + $0x1f0] sm:$0xff] }
 0xea7   : > { %v6809_v59 = vcombine.high %v5465_v50, %v5467_v41  ;;  %v6808_v6 = vcombine.low %v5465_v50, %v5467_v41  ;;  %v6811_v29 = vcombine.high %v5468_v36, %v5470_v21  ;;  %v6810_v44 = vcombine.low %v5468_v36, %v5470_v21 }
 0xea9   : > { %5675 = vmatpush1.bf16.msra.mxu0 %v6794_v3  ;;  %5726 = vmatpush1.bf16.msra.mxu1 %v6796_v49  ;;  %v6804_v3 = vcombine.low %v5461_v8, %v5463_v45  ;;  %v5469_v49 = vld [vmem:[%s7621_s7 + $0x1d8] sm:$0xff]  ;;  %v5132_v8 = vrot.slane %v8594_v7, %v7763_v19  ;;  %v5214_v45 = vrot.slane %v8594_v7, %v7766_v20 }
 0xeaa   : > { %5676 = vmatprep.subr.bf16.mxu0 %v6799_v38  ;;  %5727 = vmatprep.subr.bf16.mxu1 %v6801_v61  ;;  %v5471_v38 = vld [vmem:[%s7621_s7 + $0x1f8] sm:$0xff]  ;;  %v6806_v61 = vcombine.low %v5464_v56, %v5466_v15 }
 0xeab   : > { %v6813_v39 = vcombine.high %v5469_v49, %v5471_v38  ;;  %v6812_v52 = vcombine.low %v5469_v49, %v5471_v38  ;;  %v5141_v15 = vrot.slane %v5132_v8, %v7658_v17 }
 0xead   : > { %5677 = vmatpush1.bf16.msra.mxu0 %v6798_v62  ;;  %5728 = vmatpush1.bf16.msra.mxu1 %v6800_v1  ;;  %v5134_v62 = vcombine.high %v5132_v8, %v5132_v8  ;;  %v5216_v1 = vcombine.high %v5214_v45, %v5214_v45  ;;  %v8896_v36 = vrot.slane %v5141_v15, %v7658_v17 }
 0xeae   : > { %5678 = vmatprep.subr.bf16.mxu0 %v6803_v9  ;;  %5729 = vmatprep.subr.bf16.mxu1 %v6805_v14 }
 0xeaf   : > { %v5230_v41 = vrot.slane %v5216_v1, %v7658_v17  ;;  %v8921_v1 = vcombine.high %v8896_v36, %v8896_v36 }
 0xeb1   : > { %5679 = vmatpush1.bf16.msra.mxu0 %v6802_v30  ;;  %5730 = vmatpush1.bf16.msra.mxu1 %v6804_v3  ;;  %v5149_v30 = vcombine.high %v5141_v15, %v5141_v15 }
 0xeb2   : > { %5680 = vmatprep.subr.bf16.mxu0 %v6807_v35  ;;  %5731 = vmatprep.subr.bf16.mxu1 %v6809_v59  ;;  %v5232_v59 = vcombine.high %v5230_v41, %v5230_v41 }
 0xeb3   : > { %v8902_v49 = vrot.slane %v5149_v30, %v7658_v17 }
 0xeb4   : > { %v8917_v8 = vrot.slane %v5232_v59, %v7658_v17 }
 0xeb5   : > { %5681 = vmatpush1.bf16.msra.mxu0 %v6806_v61  ;;  %5732 = vmatpush1.bf16.msra.mxu1 %v6808_v6  ;;  %v5148_v6 = vrot.slane %v5134_v62, %v7658_v17 }
 0xeb6   : > { %5682 = vmatprep.subr.bf16.mxu0 %v6811_v29  ;;  %5733 = vmatprep.subr.bf16.mxu1 %v6813_v39  ;;  %v5223_v39 = vrot.slane %v5214_v45, %v7658_v17 }
 0xeb7   : > { %v5150_v3 = vcombine.high %v5148_v6, %v5148_v6  ;;  %v8899_v21 = vrot.slane %v5148_v6, %v7658_v17 }
 0xeb8   : > { %v5231_v7 = vcombine.high %v5223_v39, %v5223_v39  ;;  %v8908_v61 = vrot.slane %v5223_v39, %v7658_v17 }
 0xeb9   : > { %5683 = vmatpush1.bf16.msra.mxu0 %v6810_v44  ;;  %5734 = vmatpush1.bf16.msra.mxu1 %v6812_v52  ;;  %v8905_v38 = vrot.slane %v5150_v3, %v7658_v17  ;;  %v8911_v44 = vrot.slane %v5230_v41, %v7658_v17  ;;  %v8949_v41 = vcombine.high %v8917_v8, %v8917_v8 }
 0xeba   : > { %v8914_v52 = vrot.slane %v5231_v7, %v7658_v17  ;;  %v8937_v15 = vcombine.high %v8908_v61, %v8908_v61 }
 0xebc   : > { %v8945_v39 = vcombine.high %v8914_v52, %v8914_v52 }
 0xf21   : > { %v4991_v9 = vpop.xlane.xlu0 %4990 }
 0xf22   : > { %v4997_v14 = vmul.f32 0.0078125, %v4991_v9  ;;  %v4996_v56 = vpop.xlane.xlu1 %4995  ;;  %v8925_v9 = vcombine.high %v8899_v21, %v8899_v21 }
 0xf23   : > { %v4999_v50 = vmul.f32 0.0078125, %v4996_v56  ;;  %v8933_v56 = vcombine.high %v8905_v38, %v8905_v38 }
 0xf24   : > { %v5000_v29 = vadd.f32 1e-05, %v4997_v14  ;;  %v8929_v14 = vcombine.high %v8902_v49, %v8902_v49 }
 0xf25   : > { %v5002_v35 = vadd.f32 1e-05, %v4999_v50  ;;  %v8941_v50 = vcombine.high %v8911_v44, %v8911_v44 }
 0xf26   : > { %7449 = vrsqrt.f32 %v5000_v29 }
 0xf27   : > { %7451 = vrsqrt.f32 %v5002_v35 }
 0xf2d   : > { %v4993_v45 = vpop.xlane.xlu0 %4992 }
 0xf2e   : > { %v4998_v62 = vmul.f32 0.0078125, %v4993_v45 }
 0xf30   : > { %v7450_v6 = vpop.eup %7449  ;;  %v5001_v29 = vadd.f32 1e-05, %v4998_v62 }
 0xf31   : > { %v5012_v30 = vrot.slane %v7450_v6, %v7757_v16  ;;  %v5016_v3 = vrot.slane %v7450_v6, %v7760_v18  ;;  %v5020_v35 = vrot.slane %v7450_v6, %v7763_v19  ;;  %v5024_v7 = vrot.slane %v7450_v6, %v7766_v20 }
 0xf32   : > { %7453 = vrsqrt.f32 %v5001_v29  ;;  %v5028_v59 = vrot.slane %v7450_v6, %v7769_v22  ;;  %v5032_v45 = vrot.slane %v7450_v6, %v7772_v23  ;;  %v5036_v62 = vrot.slane %v7450_v6, %v7775_v24 }
 0xf33   : > { %v5040_v46 = vrot.slane %v7450_v6, %v7778_v25  ;;  %v5109_v12 = vmul.f32 %v5012_v30, %v8720_v58  ;;  %v5110_v55 = vmul.f32 %v5016_v3, %v8723_v48  ;;  %v5111_v26 = vmul.f32 %v5020_v35, %v8726_v37  ;;  %v7452_v30 = vpop.eup %7451 }
 0xf34   : > { %v5112_v28 = vmul.f32 %v5024_v7, %v8729_v32  ;;  %v5113_v63 = vmul.f32 %v5028_v59, %v8732_v33  ;;  %v5114_v29 = vmul.f32 %v5032_v45, %v8735_v42  ;;  %v5115_v0 = vmul.f32 %v5036_v62, %v8742_v11 }
 0xf35   : > { %v5116_v51 = vmul.f32 %v5040_v46, %v8745_v4  ;;  %v5191_v34 = vmul.f32 %v8896_v36, %v5109_v12  ;;  %v5192_v6 = vmul.f32 %v8902_v49, %v5110_v55  ;;  %v5193_v58 = vmul.f32 %v8921_v1, %v5111_v26 }
 0xf36   : > { %v5194_v48 = vmul.f32 %v8929_v14, %v5112_v28  ;;  %v5195_v37 = vmul.f32 %v8899_v21, %v5113_v63  ;;  %v5196_v32 = vmul.f32 %v8905_v38, %v5114_v29  ;;  %v5197_v33 = vmul.f32 %v8925_v9, %v5115_v0 }
 0xf37   : > { %v5198_v42 = vmul.f32 %v8933_v56, %v5116_v51  ;;  %v5273_v11 = vadd.f32 %v8908_v61, %v5191_v34  ;;  %v5274_v46 = vadd.f32 %v8914_v52, %v5192_v6  ;;  %v5275_v12 = vadd.f32 %v8937_v15, %v5193_v58 }
 0xf38   : > { %v5276_v55 = vadd.f32 %v8945_v39, %v5194_v48  ;;  %v5277_v26 = vadd.f32 %v8911_v44, %v5195_v37  ;;  %v5278_v28 = vadd.f32 %v8917_v8, %v5196_v32  ;;  %v5279_v63 = vadd.f32 %v8941_v50, %v5197_v33 }
 0xf39   : > { %v5280_v4 = vadd.f32 %v8949_v41, %v5198_v42  ;;  %v5313_v3 = vcombine.low %v5273_v11, %v5274_v46  ;;  %v5076_v0 = vrot.slane %v7452_v30, %v7757_v16  ;;  %v5080_v51 = vrot.slane %v7452_v30, %v7760_v18 }
 0xf3a   : > { %v5314_v34 = vcombine.low %v5275_v12, %v5276_v55  ;;  %v5315_v35 = vcombine.low %v5277_v26, %v5278_v28  ;;  %v5084_v7 = vrot.slane %v7452_v30, %v7763_v19  ;;  %v5088_v59 = vrot.slane %v7452_v30, %v7766_v20 }
 0xf3b   : > { %v5316_v45 = vcombine.low %v5279_v63, %v5280_v4  ;;  %v5323_v62 = vrot.slane %v5313_v3, %v7658_v17  ;;  %v5125_v29 = vmul.f32 %v5076_v0, %v8752_v57  ;;  %v5126_v6 = vmul.f32 %v5080_v51, %v8755_v27 }
 0xf3c   : > { %v7454_v58 = vpop.eup %7453  ;;  %v5330_v48 = vrot.slane %v5314_v34, %v7658_v17  ;;  %v5337_v37 = vrot.slane %v5315_v35, %v7658_v17  ;;  %v5127_v32 = vmul.f32 %v5084_v7, %v8758_v54  ;;  %v5128_v33 = vmul.f32 %v5088_v59, %v8761_v43 }
 0xf3d   : > { %v5044_v42 = vrot.slane %v7454_v58, %v7757_v16  ;;  %v5048_v30 = vrot.slane %v7454_v58, %v7760_v18  ;;  %v5052_v11 = vrot.slane %v7454_v58, %v7763_v19  ;;  %v5056_v46 = vrot.slane %v7454_v58, %v7766_v20 }
 0xf3e   : > { %v5060_v57 = vrot.slane %v7454_v58, %v7769_v22  ;;  %v5064_v27 = vrot.slane %v7454_v58, %v7772_v23  ;;  %v5068_v12 = vrot.slane %v7454_v58, %v7775_v24  ;;  %v5072_v55 = vrot.slane %v7454_v58, %v7778_v25 }
 0xf3f   : > { %v5117_v54 = vmul.f32 %v5044_v42, %v8807_v53  ;;  %v5118_v43 = vmul.f32 %v5048_v30, %v8810_v5  ;;  %v5119_v16 = vmul.f32 %v5052_v11, %v8813_v40  ;;  %v5120_v26 = vmul.f32 %v5056_v46, %v8817_v60 }
 0xf40   : > { %v5121_v19 = vmul.f32 %v5060_v57, %v8820_v2  ;;  %v5122_v28 = vmul.f32 %v5064_v27, %v8823_v10  ;;  %v5123_v22 = vmul.f32 %v5068_v12, %v8826_v31  ;;  %v5124_v63 = vmul.f32 %v5072_v55, %v8829_v13 }
 0xf41   : > { %v5199_v24 = vmul.f32 %v8896_v36, %v5117_v54  ;;  %v5200_v4 = vmul.f32 %v8902_v49, %v5118_v43  ;;  %v5201_v53 = vmul.f32 %v8921_v1, %v5119_v16  ;;  %v5202_v5 = vmul.f32 %v8929_v14, %v5120_v26  ;;  %v7347_v43 = vld [vmem:[%s7629_s13 + $0x40] sm:$0xff]  }
 0xf42   : > { %v5203_v40 = vmul.f32 %v8899_v21, %v5121_v19  ;;  %v5204_v60 = vmul.f32 %v8905_v38, %v5122_v28  ;;  %v5205_v2 = vmul.f32 %v8925_v9, %v5123_v22  ;;  %v5206_v10 = vmul.f32 %v8933_v56, %v5124_v63  ;;  %v7348_v16 = vld [vmem:[%s7629_s13 + $0xc0] sm:$0xff]   ;;  %6947 = vmatprep.subr.bf16.mxu0 %v7347_v43  ;;  %v7351_v28 = vld [vmem:[%s7629_s13 + $0x48] sm:$0xff]  }
 0xf43   : > { %v5281_v31 = vadd.f32 %v8908_v61, %v5199_v24  ;;  %v5282_v13 = vadd.f32 %v8914_v52, %v5200_v4  ;;  %v5283_v3 = vadd.f32 %v8937_v15, %v5201_v53  ;;  %v5284_v0 = vadd.f32 %v8945_v39, %v5202_v5  ;;  %v7349_v26 = vld [vmem:[%s7629_s13] sm:$0xff]   ;;  %6975 = vmatprep.subr.bf16.mxu1 %v7348_v16  ;;  %v7353_v22 = vld [vmem:[%s7629_s13 + $0x8] sm:$0xff]   ;;  %v7355_v24 = vld [vmem:[%s7629_s13 + $0x50] sm:$0xff]  }
 0xf44   : > { %v5285_v51 = vadd.f32 %v8911_v44, %v5203_v40  ;;  %v5286_v34 = vadd.f32 %v8917_v8, %v5204_v60  ;;  %v5287_v21 = vadd.f32 %v8941_v50, %v5205_v2  ;;  %v5288_v38 = vadd.f32 %v8949_v41, %v5206_v10  ;;  %v7350_v19 = vld [vmem:[%s7629_s13 + $0x80] sm:$0xff]   ;;  %v7354_v63 = vld [vmem:[%s7629_s13 + $0x88] sm:$0xff]   ;;  %v7356_v4 = vld [vmem:[%s7629_s13 + $0xd0] sm:$0xff]  }
 0xf45   : > { %v5344_v9 = vrot.slane %v5316_v45, %v7658_v17  ;;  %v5345_v35 = vcombine.low %v5323_v62, %v5330_v48  ;;  %v5362_v56 = vcombine.low %v5281_v31, %v5282_v13  ;;  %v5363_v7 = vcombine.low %v5283_v3, %v5284_v0  ;;  %v7357_v53 = vld [vmem:[%s7629_s13 + $0x10] sm:$0xff]   ;;  %v7359_v40 = vld [vmem:[%s7629_s13 + $0x58] sm:$0xff]   ;;  %v7363_v31 = vld [vmem:[%s7629_s13 + $0x60] sm:$0xff]  }
 0xf46   : > { %v5364_v59 = vcombine.low %v5285_v51, %v5286_v34  ;;  %v5365_v58 = vcombine.low %v5287_v21, %v5288_v38  ;;  %v5207_v42 = vmul.f32 %v8896_v36, %v5125_v29  ;;  %v5208_v30 = vmul.f32 %v8902_v49, %v5126_v6  ;;  %v7358_v5 = vld [vmem:[%s7629_s13 + $0x90] sm:$0xff]   ;;  %v7360_v60 = vld [vmem:[%s7629_s13 + $0xd8] sm:$0xff]   ;;  %v7364_v13 = vld [vmem:[%s7629_s13 + $0xe0] sm:$0xff]  }
 0xf47   : > { %v5346_v11 = vcombine.low %v5337_v37, %v5344_v9  ;;  %v5372_v44 = vrot.slane %v5362_v56, %v7658_v17  ;;  %v5379_v8 = vrot.slane %v5363_v7, %v7658_v17  ;;  %v5209_v45 = vmul.f32 %v8921_v1, %v5127_v32  ;;  %v7361_v2 = vld [vmem:[%s7629_s13 + $0x18] sm:$0xff]   ;;  %v7365_v3 = vld [vmem:[%s7629_s13 + $0x20] sm:$0xff]   ;;  %v7367_v51 = vld [vmem:[%s7629_s13 + $0x68] sm:$0xff]  }
 0xf48   : > { %v5386_v50 = vrot.slane %v5364_v59, %v7658_v17  ;;  %v5393_v41 = vrot.slane %v5365_v58, %v7658_v17  ;;  %v5210_v62 = vmul.f32 %v8929_v14, %v5128_v33  ;;  %v5353_v48 = vrot.slane %v5345_v35, %v7658_v17  ;;  %v7362_v10 = vld [vmem:[%s7629_s13 + $0x98] sm:$0xff]   ;;  %v7366_v0 = vld [vmem:[%s7629_s13 + $0xa0] sm:$0xff]   ;;  %v7368_v34 = vld [vmem:[%s7629_s13 + $0xe8] sm:$0xff]  }
 0xf49   : > { %v5394_v46 = vcombine.low %v5372_v44, %v5379_v8  ;;  %v5289_v36 = vadd.f32 %v8908_v61, %v5207_v42  ;;  %v5290_v49 = vadd.f32 %v8914_v52, %v5208_v30  ;;  %v5360_v29 = vrot.slane %v5346_v11, %v7658_v17  ;;  %v7369_v21 = vld [vmem:[%s7629_s13 + $0x28] sm:$0xff]   ;;  %v7371_v9 = vld [vmem:[%s7629_s13 + $0x70] sm:$0xff]   ;;  %v7375_v59 = vld [vmem:[%s7629_s13 + $0x78] sm:$0xff]  }
 0xf4a   : > { %v5395_v6 = vcombine.low %v5386_v50, %v5393_v41  ;;  %v5291_v37 = vadd.f32 %v8937_v15, %v5209_v45  ;;  %v5292_v57 = vadd.f32 %v8945_v39, %v5210_v62  ;;  %v7370_v38 = vld [vmem:[%s7629_s13 + $0xa8] sm:$0xff]   ;;  %v7372_v35 = vld [vmem:[%s7629_s13 + $0xf0] sm:$0xff]   ;;  %v7376_v58 = vld [vmem:[%s7629_s13 + $0xf8] sm:$0xff]  }
 0xf4b   : > { %v5402_v27 = vrot.slane %v5394_v46, %v7658_v17  ;;  %v5411_v12 = vcombine.low %v5289_v36, %v5290_v49  ;;  %v5361_v61 = vcombine.low %v5353_v48, %v5360_v29  ;;  %v7373_v56 = vld [vmem:[%s7629_s13 + $0x30] sm:$0xff]   ;;  %v7377_v42 = vld [vmem:[%s7629_s13 + $0x38] sm:$0xff]   ;;  %v7504_v11 = vld [vmem:[%s7644_s8] sm:$0xff] }
 0xf4c   : > { %v5409_v1 = vrot.slane %v5395_v6, %v7658_v17  ;;  %v5412_v14 = vcombine.low %v5291_v37, %v5292_v57  ;;  %v7374_v7 = vld [vmem:[%s7629_s13 + $0xb0] sm:$0xff]   ;;  %v7378_v30 = vld [vmem:[%s7629_s13 + $0xb8] sm:$0xff]   ;;  %v5475_v44 = vrot.slane %v7504_v11, %v7760_v18  ;;  %v5483_v8 = vrot.slane %v7504_v11, %v7772_v23 }
 0xf4d   : > { %v5419_v32 = vrot.slane %v5411_v12, %v7658_v17  ;;  %v5479_v50 = vrot.slane %v7504_v11, %v7766_v20  ;;  %v5487_v41 = vrot.slane %v7504_v11, %v7778_v25 }
 0xf4e   : > { %v5410_v52 = vcombine.low %v5402_v27, %v5409_v1  ;;  %v5426_v33 = vrot.slane %v5412_v14, %v7658_v17  ;;  %v5495_v45 = vrot.slane %v5475_v44, %v7760_v18  ;;  %v5503_v62 = vrot.slane %v5483_v8, %v7760_v18 }
 0xf4f   : > { %v5499_v48 = vrot.slane %v5479_v50, %v7760_v18  ;;  %v5507_v46 = vrot.slane %v5487_v41, %v7760_v18 }
 0xf50   : > { %v5438_v55 = vpack.c.bf16 %v5410_v52, %v5361_v61  ;;  %v5427_v15 = vcombine.low %v5419_v32, %v5426_v33 }
 0xf52   : > { %5701 = vmatmul.mubr.bf16.vlgmr.msra.gmra.mrb[76].mxu0 %v5438_v55  ;;  %5752 = vmatmul.mubr.bf16.vlgmr.msra.gmra.mrb[68].mxu1 %v5438_v55  ;;  %v5434_v39 = vrot.slane %v5427_v15, %v7658_v17 }
 0xf53   : > { %5710 = vmatprep.mubr.bf16.mxu0 %v9286_v47  ;;  %5761 = vmatprep.mubr.bf16.mxu1 %v9286_v47  ;;  %v7352_v47 = vld [vmem:[%s7629_s13 + $0xc8] sm:$0xff]  }
 0xf54   : > { %v5439_v54 = vpack.c.bf16 %v5434_v39, %v5434_v39  ;;  %6948 = vmatpush3.bf16.msra.mxu0 %v7349_v26  ;;  %6976 = vmatpush3.bf16.msra.mxu1 %v7350_v19 }
 0xf55   : > { %6949 = vmatprep.subr.bf16.mxu0 %v7351_v28  ;;  %6977 = vmatprep.subr.bf16.mxu1 %v7352_v47 }
 0xf58   : > { %6950 = vmatpush3.bf16.msra.mxu0 %v7353_v22  ;;  %6978 = vmatpush3.bf16.msra.mxu1 %v7354_v63 }
 0xf59   : > { %6951 = vmatprep.subr.bf16.mxu0 %v7355_v24  ;;  %6979 = vmatprep.subr.bf16.mxu1 %v7356_v4 }
 0xf5a   : > { %5711 = vmatmul.mubr.bf16.gmra.mrb[80].mxu0 %v5439_v54  ;;  %5762 = vmatmul.mubr.bf16.gmra.mrb[72].mxu1 %v5439_v54 }
 0xf5c   : > { %6952 = vmatpush3.bf16.msra.mxu0 %v7357_v53  ;;  %6980 = vmatpush3.bf16.msra.mxu1 %v7358_v5 }
 0xf5d   : > { %6953 = vmatprep.subr.bf16.mxu0 %v7359_v40  ;;  %6981 = vmatprep.subr.bf16.mxu1 %v7360_v60 }
 0xf60   : > { %6954 = vmatpush3.bf16.msra.mxu0 %v7361_v2  ;;  %6982 = vmatpush3.bf16.msra.mxu1 %v7362_v10 }
 0xf61   : > { %6955 = vmatprep.subr.bf16.mxu0 %v7363_v31  ;;  %6983 = vmatprep.subr.bf16.mxu1 %v7364_v13 }
 0xf64   : > { %6956 = vmatpush3.bf16.msra.mxu0 %v7365_v3  ;;  %6984 = vmatpush3.bf16.msra.mxu1 %v7366_v0 }
 0xf65   : > { %6957 = vmatprep.subr.bf16.mxu0 %v7367_v51  ;;  %6985 = vmatprep.subr.bf16.mxu1 %v7368_v34 }
 0xf68   : > { %6958 = vmatpush3.bf16.msra.mxu0 %v7369_v21  ;;  %6986 = vmatpush3.bf16.msra.mxu1 %v7370_v38 }
 0xf69   : > { %6959 = vmatprep.subr.bf16.mxu0 %v7371_v9  ;;  %6987 = vmatprep.subr.bf16.mxu1 %v7372_v35 }
 0xf6c   : > { %6960 = vmatpush3.bf16.msra.mxu0 %v7373_v56  ;;  %6988 = vmatpush3.bf16.msra.mxu1 %v7374_v7 }
 0xf6d   : > { %6961 = vmatprep.subr.bf16.mxu0 %v7375_v59  ;;  %6989 = vmatprep.subr.bf16.mxu1 %v7376_v58 }
 0xf70   : > { %6962 = vmatpush3.bf16.msra.mxu0 %v7377_v42  ;;  %6990 = vmatpush3.bf16.msra.mxu1 %v7378_v30 }
0x1025   : > { %v5702_v36 = vpop.f32.mrb[76].mxu0  ;;  %v5753_v49 = vpop.f32.mrb[68].mxu1 }
0x1026   : > { %v9089_v29 = vadd.f32 %v5702_v36, %v5495_v45  ;;  %v9091_v6 = vadd.f32 %v5753_v49, %v5503_v62  ;;  %v5704_v37 = vpop.f32.mrb[77].mxu0  ;;  %v5755_v57 = vpop.f32.mrb[69].mxu1 }
0x1027   : > { %v9093_v27 = vadd.f32 %v5704_v37, %v5499_v48  ;;  %v9095_v20 = vadd.f32 %v5755_v57, %v5507_v46  ;;  %v5706_v25 = vpop.f32.mrb[78].mxu0  ;;  %v5757_v12 = vpop.f32.mrb[70].mxu1 }
0x1028   : > { %v6814_v1 = vmul.f32 -1.702, %v9089_v29  ;;  %v6816_v14 = vmul.f32 -1.702, %v9091_v6  ;;  %v9099_v32 = vadd.f32 %v5706_v25, %v5495_v45  ;;  %v9101_v18 = vadd.f32 %v5757_v12, %v5503_v62  ;;  %v5708_v61 = vpop.f32.mrb[79].mxu0  ;;  %v5759_v52 = vpop.f32.mrb[71].mxu1 }
0x1029   : > { %v6815_v33 = vmul.f32 -1.702, %v9093_v27  ;;  %v6817_v55 = vmul.f32 -1.702, %v9095_v20  ;;  %v9105_v15 = vadd.f32 %v5708_v61, %v5499_v48  ;;  %v9107_v39 = vadd.f32 %v5759_v52, %v5507_v46 }
0x102a   : > { %v5794_v54 = vmul.f32 1.442695, %v6814_v1  ;;  %v5798_v43 = vmul.f32 1.442695, %v6816_v14  ;;  %v6818_v16 = vmul.f32 -1.702, %v9099_v32 }
0x102b   : > { %v5796_v26 = vmul.f32 1.442695, %v6815_v33  ;;  %v5800_v19 = vmul.f32 1.442695, %v6817_v55  ;;  %v6820_v28 = vmul.f32 -1.702, %v9101_v18 }
0x102c   : > { %7455 = vpow2.f32 %v5794_v54  ;;  %v5802_v47 = vmul.f32 1.442695, %v6818_v16  ;;  %v6819_v22 = vmul.f32 -1.702, %v9105_v15  ;;  %v6821_v63 = vmul.f32 -1.702, %v9107_v39 }
0x102d   : > { %7457 = vpow2.f32 %v5798_v43  ;;  %v5806_v24 = vmul.f32 1.442695, %v6820_v28  ;;  %v5712_v4 = vpop.f32.mrb[80].mxu0  ;;  %v5763_v53 = vpop.f32.mrb[72].mxu1 }
0x102e   : > { %7459 = vpow2.f32 %v5796_v26  ;;  %v5804_v5 = vmul.f32 1.442695, %v6819_v22  ;;  %v5808_v40 = vmul.f32 1.442695, %v6821_v63  ;;  %v9113_v60 = vadd.f32 %v5712_v4, %v5495_v45  ;;  %v5714_v2 = vpop.f32.mrb[81].mxu0  ;;  %v5765_v10 = vpop.f32.mrb[73].mxu1 }
0x102f   : > { %7461 = vpow2.f32 %v5800_v19  ;;  %v9115_v31 = vadd.f32 %v5763_v53, %v5503_v62  ;;  %v9117_v13 = vadd.f32 %v5714_v2, %v5499_v48  ;;  %v9119_v3 = vadd.f32 %v5765_v10, %v5507_v46  ;;  %v5716_v0 = vpop.f32.mrb[82].mxu0  ;;  %v5767_v51 = vpop.f32.mrb[74].mxu1 }
0x1030   : > { %7463 = vpow2.f32 %v5802_v47  ;;  %v6822_v34 = vmul.f32 -1.702, %v9113_v60  ;;  %v5717_v21 = vpop.f32.mrb[83].mxu0  ;;  %v5768_v38 = vpop.f32.mrb[75].mxu1 }
0x1031   : > { %7465 = vpow2.f32 %v5806_v24  ;;  %v6824_v9 = vmul.f32 -1.702, %v9115_v31  ;;  %v6823_v35 = vmul.f32 -1.702, %v9117_v13  ;;  %v6825_v56 = vmul.f32 -1.702, %v9119_v3 }
0x1032   : > { %7467 = vpow2.f32 %v5804_v5  ;;  %v5810_v7 = vmul.f32 1.442695, %v6822_v34 }
0x1033   : > { %7469 = vpow2.f32 %v5808_v40  ;;  %v5814_v59 = vmul.f32 1.442695, %v6824_v9  ;;  %v5812_v58 = vmul.f32 1.442695, %v6823_v35  ;;  %v5816_v42 = vmul.f32 1.442695, %v6825_v56 }
0x1034   : > { %7471 = vpow2.f32 %v5810_v7 }
0x1035   : > { %7473 = vpow2.f32 %v5814_v59 }
0x1036   : > { %v7456_v30 = vpop.eup %7455  ;;  %7475 = vpow2.f32 %v5812_v58  ;;  %v7505_v58 = vld [vmem:[%s7639_s27] sm:$0x3f] }
0x1037   : > { %v7458_v11 = vpop.eup %7457  ;;  %v5818_v44 = vadd.f32 1.0, %v7456_v30  ;;  %7477 = vpow2.f32 %v5816_v42  ;;  %v9139_v42 = vrot.slane %v7505_v58, %v7772_v23 }
0x1038   : > { %v7460_v8 = vpop.eup %7459  ;;  %v5820_v50 = vadd.f32 1.0, %v7458_v11 }
0x1039   : > { %v7462_v41 = vpop.eup %7461  ;;  %7479 = vrcp.f32 %v5818_v44  ;;  %v5819_v45 = vadd.f32 1.0, %v7460_v8 }
0x103a   : > { %v7464_v62 = vpop.eup %7463  ;;  %7481 = vrcp.f32 %v5820_v50  ;;  %v5821_v48 = vadd.f32 1.0, %v7462_v41 }
0x103b   : > { %v7466_v46 = vpop.eup %7465  ;;  %7483 = vrcp.f32 %v5819_v45  ;;  %v5822_v36 = vadd.f32 1.0, %v7464_v62 }
0x103c   : > { %v7468_v49 = vpop.eup %7467  ;;  %7485 = vrcp.f32 %v5821_v48  ;;  %v5824_v37 = vadd.f32 1.0, %v7466_v46 }
0x103d   : > { %v7470_v57 = vpop.eup %7469  ;;  %7487 = vrcp.f32 %v5822_v36  ;;  %v5823_v25 = vadd.f32 1.0, %v7468_v49 }
0x103e   : > { %v7472_v12 = vpop.eup %7471  ;;  %7489 = vrcp.f32 %v5824_v37  ;;  %v5825_v1 = vadd.f32 1.0, %v7470_v57 }
0x103f   : > { %v7474_v14 = vpop.eup %7473  ;;  %7491 = vrcp.f32 %v5823_v25  ;;  %v5826_v61 = vadd.f32 1.0, %v7472_v12 }
0x1040   : > { %v7476_v52 = vpop.eup %7475  ;;  %7493 = vrcp.f32 %v5825_v1  ;;  %v5828_v55 = vadd.f32 1.0, %v7474_v14 }
0x1041   : > { %v7478_v33 = vpop.eup %7477  ;;  %v5827_v54 = vadd.f32 1.0, %v7476_v52  ;;  %7495 = vrcp.f32 %v5826_v61 }
0x1042   : > { %v5829_v43 = vadd.f32 1.0, %v7478_v33 }
0x1043   : > { %v7480_v16 = vpop.eup %7479  ;;  %7497 = vrcp.f32 %v5827_v54 }
0x1044   : > { %v7482_v26 = vpop.eup %7481  ;;  %7499 = vrcp.f32 %v5829_v43  ;;  %v5854_v63 = vmul.f32 %v7480_v16, %v9089_v29 }
0x1045   : > { %v7484_v19 = vpop.eup %7483  ;;  %7501 = vrcp.f32 %v5828_v55  ;;  %v5856_v53 = vmul.f32 %v7482_v26, %v9091_v6 }
0x1046   : > { %v7486_v28 = vpop.eup %7485  ;;  %v5855_v2 = vmul.f32 %v7484_v19, %v9093_v27 }
0x1047   : > { %v7488_v47 = vpop.eup %7487  ;;  %v5857_v51 = vmul.f32 %v7486_v28, %v9095_v20 }
0x1048   : > { %v7490_v22 = vpop.eup %7489  ;;  %v5858_v24 = vmul.f32 %v7488_v47, %v9099_v32 }
0x1049   : > { %v7492_v4 = vpop.eup %7491  ;;  %v5860_v5 = vmul.f32 %v7490_v22, %v9101_v18 }
0x104a   : > { %v7494_v40 = vpop.eup %7493  ;;  %v5866_v10 = vpack.c.bf16 %v5858_v24, %v5854_v63  ;;  %v5859_v0 = vmul.f32 %v7492_v4, %v9105_v15  ;;  %v9327_v4 = vld [vmem:[#allocation2_spill] sm:$0xff] }
0x104b   : > { %v5868_v34 = vpack.c.bf16 %v5860_v5, %v5856_v53  ;;  %v5861_v21 = vmul.f32 %v7494_v40, %v9107_v39  ;;  %v7496_v38 = vpop.eup %7495 }
0x104c   : > { %v5867_v29 = vpack.c.bf16 %v5859_v0, %v5855_v2  ;;  %v5862_v20 = vmul.f32 %v7496_v38, %v9113_v60  ;;  %v9329_v38 = vld [vmem:[#allocation18_spill] sm:$0xff] }
0x104d   : > { %v7498_v9 = vpop.eup %7497  ;;  %v5869_v32 = vpack.c.bf16 %v5861_v21, %v5857_v51 }
0x104e   : > { %v7500_v35 = vpop.eup %7499  ;;  %v5863_v6 = vmul.f32 %v7498_v9, %v9117_v13  ;;  %6166 = vmatprep.mubr.bf16.mxu0 %v5867_v29  ;;  %v5870_v7 = vpack.c.bf16 %v5862_v20, %v5862_v20  ;;  %v9330_v9 = vld [vmem:[#allocation3_spill] sm:$0xff]  ;;  %v9332_v20 = vld [vmem:[#allocation4_spill] sm:$0xff] }
0x104f   : > { %v7502_v18 = vpop.eup %7501  ;;  %v5865_v27 = vmul.f32 %v7500_v35, %v9119_v3  ;;  %6214 = vmatprep.mubr.bf16.mxu1 %v5869_v32  ;;  %6167 = vmatmul.mubr.bf16.vlgmr.msra.gmra.mrb[84].mxu0 %v5866_v10 }
0x1050   : > { %v5871_v15 = vpack.c.bf16 %v5863_v6, %v5863_v6  ;;  %6215 = vmatmul.mubr.bf16.vlgmr.msra.gmra.mrb[76].mxu1 %v5868_v34  ;;  %v5864_v39 = vmul.f32 %v7502_v18, %v9115_v31  ;;  %v9328_v34 = vld [vmem:[#allocation7_spill] sm:$0xff] }
0x1051   : > { %v5873_v56 = vpack.c.bf16 %v5865_v27, %v5865_v27  ;;  %v9331_v27 = vld [vmem:[#allocation19_spill] sm:$0xff] }
0x1052   : > { %6174 = vmatprep.mubr.bf16.mxu0 %v5871_v15  ;;  %v5872_v59 = vpack.c.bf16 %v5864_v39, %v5864_v39  ;;  %v9333_v39 = vld [vmem:[#allocation8_spill] sm:$0xff] }
0x1053   : > { %6222 = vmatprep.mubr.bf16.mxu1 %v5873_v56 }
0x1057   : > { %6175 = vmatmul.mubr.bf16.gmra.mrb[88].mxu0 %v5870_v7 }
0x1058   : > { %6223 = vmatmul.mubr.bf16.gmra.mrb[80].mxu1 %v5872_v59 }
0x1122   : > { %v6963_v13 = vpop.f32.mrb[84].mxu0 }
0x1123   : > { %v6991_v3 = vpop.f32.mrb[76].mxu1  ;;  %v6964_v30 = vpop.f32.mrb[85].mxu0 }
0x1124   : > { %v6965_v11 = vadd.f32 %v6964_v30, %v6963_v13  ;;  %v6992_v44 = vpop.f32.mrb[77].mxu1  ;;  %v6966_v8 = vpop.f32.mrb[86].mxu0 }
0x1125   : > { %v6993_v60 = vadd.f32 %v6992_v44, %v6991_v3  ;;  %v6994_v50 = vpop.f32.mrb[78].mxu1  ;;  %v6967_v41 = vpop.f32.mrb[87].mxu0 }
0x1126   : > { %v6169_v31 = vadd.f32 %v6965_v11, %v9139_v42  ;;  %v6968_v45 = vadd.f32 %v6967_v41, %v6966_v8  ;;  %v6995_v62 = vpop.f32.mrb[79].mxu1 }
0x1127   : > { %v6996_v48 = vadd.f32 %v6995_v62, %v6994_v50  ;;  %v9335_v62 = vld [vmem:[#allocation13_spill] sm:$0xff] }
0x1128   : > { %v6217_v46 = vadd.f32 %v6993_v60, %v6169_v31  ;;  %v6172_v36 = vadd.f32 %v6968_v45, %v9139_v42  ;;  %v9334_v31 = vld [vmem:[#allocation11_spill] sm:$0xff] }
0x112a   : > { %v6233_v49 = vcombine.high %v6217_v46, %v6217_v46  ;;  %v6240_v23 = vrot.slane %v6217_v46, %v7658_v17  ;;  %v6220_v37 = vadd.f32 %v6996_v48, %v6172_v36  ;;  %v6969_v57 = vpop.f32.mrb[88].mxu0  ;;  %v9336_v46 = vld [vmem:[#allocation5_spill] sm:$0xff] }
0x112b   : > { %v6997_v25 = vpop.f32.mrb[80].mxu1  ;;  %v6970_v12 = vpop.f32.mrb[89].mxu0 }
0x112c   : > { %v6247_v1 = vrot.slane %v6233_v49, %v7658_v17  ;;  %v6248_v14 = vcombine.high %v6240_v23, %v6240_v23  ;;  %v6256_v61 = vrot.slane %v6240_v23, %v7658_v17  ;;  %v6282_v52 = vcombine.high %v6220_v37, %v6220_v37  ;;  %v6998_v33 = vpop.f32.mrb[81].mxu1  ;;  %v6972_v55 = vpop.f32.mrb[90].mxu0  ;;  %v9337_v49 = vld [vmem:[#allocation6_spill] sm:$0xff] }
0x112d   : > { %v6289_v54 = vrot.slane %v6220_v37, %v7658_v17  ;;  %v6971_v43 = vadd.f32 %v6970_v12, %v6969_v57  ;;  %v6999_v16 = vadd.f32 %v6998_v33, %v6997_v25  ;;  %v7000_v26 = vpop.f32.mrb[82].mxu1  ;;  %v6973_v19 = vpop.f32.mrb[91].mxu0  ;;  %v9338_v37 = vld [vmem:[#allocation12_spill] sm:$0xff]  ;;  %v9341_v33 = vld [vmem:[#allocation9_spill] sm:$0xff] }
0x112e   : > { %v6249_v28 = vcombine.high %v6247_v1, %v6247_v1  ;;  %v6263_v47 = vrot.slane %v6247_v1, %v7658_v17  ;;  %v6270_v22 = vrot.slane %v6248_v14, %v7658_v17  ;;  %v6278_v63 = vcombine.high %v6256_v61, %v6256_v61  ;;  %v7001_v24 = vpop.f32.mrb[83].mxu1  ;;  %v9339_v25 = vld [vmem:[#allocation20_spill] sm:$0xff]  ;;  %v9340_v1 = vld [vmem:[#allocation21_spill] sm:$0xff] }
0x112f   : > { %v6375_v53 = vadd.f32 %v6256_v61, %v9327_v4  ;;  %v6296_v5 = vrot.slane %v6282_v52, %v7658_v17  ;;  %v6297_v40 = vcombine.high %v6289_v54, %v6289_v54  ;;  %v6305_v2 = vrot.slane %v6289_v54, %v7658_v17 }
0x1130   : > { %v6277_v10 = vrot.slane %v6249_v28, %v7658_v17  ;;  %v6279_v0 = vcombine.high %v6263_v47, %v6263_v47  ;;  %v6280_v51 = vcombine.high %v6270_v22, %v6270_v22  ;;  %v6376_v21 = vadd.f32 %v6270_v22, %v9328_v34 }
0x1131   : > { %v6377_v29 = vadd.f32 %v6278_v63, %v9329_v38  ;;  %v6379_v32 = vadd.f32 %v6263_v47, %v9330_v9  ;;  %v6298_v35 = vcombine.high %v6296_v5, %v6296_v5  ;;  %v6312_v6 = vrot.slane %v6296_v5, %v7658_v17 }
0x1132   : > { %v6281_v18 = vcombine.high %v6277_v10, %v6277_v10  ;;  %v6378_v15 = vadd.f32 %v6280_v51, %v9331_v27  ;;  %v6380_v56 = vadd.f32 %v6277_v10, %v9332_v20  ;;  %v6381_v7 = vadd.f32 %v6279_v0, %v9333_v39  ;;  %v9344_v39 = vld [vmem:[#allocation16_spill] sm:$0xff] }
0x1133   : > { %v6415_v59 = vcombine.low %v6375_v53, %v6376_v21  ;;  %v6319_v13 = vrot.slane %v6297_v40, %v7658_v17  ;;  %v6326_v58 = vrot.slane %v6298_v35, %v7658_v17  ;;  %v6437_v30 = vrot.slane %v6379_v32, %v7658_v17  ;;  %v9342_v21 = vld [vmem:[#allocation10_spill] sm:$0xff] }
0x1134   : > { %v6416_v3 = vcombine.low %v6377_v29, %v6378_v15  ;;  %v6327_v11 = vcombine.high %v6305_v2, %v6305_v2  ;;  %v6328_v44 = vcombine.high %v6312_v6, %v6312_v6  ;;  %v6454_v60 = vcombine.low %v6380_v56, %v6381_v7  ;;  %v9343_v15 = vld [vmem:[#allocation15_spill] sm:$0xff] }
0x1135   : > { %v6423_v8 = vrot.slane %v6415_v59, %v7658_v17  ;;  %v6329_v50 = vcombine.high %v6319_v13, %v6319_v13  ;;  %v6382_v45 = vadd.f32 %v6281_v18, %v9334_v31  ;;  %v6383_v48 = vadd.f32 %v6305_v2, %v9335_v62  ;;  %v9345_v59 = vld [vmem:[#allocation17_spill] sm:$0xff] }
0x1136   : > { %v6430_v41 = vrot.slane %v6416_v3, %v7658_v17  ;;  %v6384_v36 = vadd.f32 %v6319_v13, %v9336_v46  ;;  %v6385_v23 = vadd.f32 %v6327_v11, %v9337_v49  ;;  %v6387_v12 = vadd.f32 %v6312_v6, %v9339_v25  ;;  %v9346_v3 = vld [vmem:[#allocation14_spill] sm:$0xff] }
0x1137   : > { %v6386_v57 = vadd.f32 %v6329_v50, %v9338_v37  ;;  %v6388_v14 = vadd.f32 %v6326_v58, %v9340_v1  ;;  %v6452_v52 = vrot.slane %v6437_v30, %v7658_v17  ;;  %v6389_v55 = vadd.f32 %v6328_v44, %v9341_v33 }
0x1138   : > { %v6438_v61 = vcombine.low %v6423_v8, %v6430_v41  ;;  %v6455_v54 = vcombine.low %v6382_v45, %v6383_v48  ;;  %v6330_v26 = vcombine.high %v6326_v58, %v6326_v58  ;;  %v6177_v47 = vadd.f32 %v6971_v43, %v9139_v42 }
0x1139   : > { %v6493_v19 = vcombine.low %v6385_v23, %v6386_v57  ;;  %v6494_v28 = vcombine.low %v6387_v12, %v6388_v14  ;;  %v6462_v63 = vrot.slane %v6454_v60, %v7658_v17  ;;  %v6476_v4 = vrot.slane %v6384_v36, %v7658_v17 }
0x113a   : > { %v6445_v22 = vrot.slane %v6438_v61, %v7658_v17  ;;  %v6469_v24 = vrot.slane %v6455_v54, %v7658_v17  ;;  %v6515_v40 = vrot.slane %v6389_v55, %v7658_v17  ;;  %v6225_v2 = vadd.f32 %v6999_v16, %v6177_v47 }
0x113b   : > { %v6501_v53 = vrot.slane %v6493_v19, %v7658_v17  ;;  %v6508_v5 = vrot.slane %v6494_v28, %v7658_v17  ;;  %v6491_v34 = vrot.slane %v6476_v4, %v7658_v17  ;;  %v6390_v38 = vadd.f32 %v6330_v26, %v9342_v21 }
0x113c   : > { %v6453_v10 = vcombine.low %v6445_v22, %v6452_v52  ;;  %v6477_v0 = vcombine.low %v6462_v63, %v6469_v24  ;;  %v6337_v42 = vrot.slane %v6225_v2, %v7658_v17  ;;  %v6530_v9 = vrot.slane %v6515_v40, %v7658_v17 }
0x113d   : > { %v6516_v51 = vcombine.low %v6501_v53, %v6508_v5 }
0x113e   : > { %6575 = vst [vmem:[%s7634_s17] sm:$0x1f] %v6453_v10  ;;  %v6484_v43 = vrot.slane %v6477_v0, %v7658_v17  ;;  %v6338_v32 = vcombine.high %v6337_v42, %v6337_v42  ;;  %v6345_v16 = vrot.slane %v6337_v42, %v7658_v17 }
0x113f   : > { %v6523_v29 = vrot.slane %v6516_v51, %v7658_v17 }
0x1140   : > { %v6492_v35 = vcombine.low %v6484_v43, %v6491_v34  ;;  %v6352_v18 = vrot.slane %v6338_v32, %v7658_v17  ;;  %v6353_v27 = vcombine.high %v6345_v16, %v6345_v16  ;;  %v6391_v20 = vadd.f32 %v6345_v16, %v9343_v15 }
0x1141   : > { %v6531_v6 = vcombine.low %v6523_v29, %v6530_v9 }
0x1142   : > { %6576 = vst [vmem:[%s7634_s17 + $0x8] sm:$0x1f] %v6492_v35  ;;  %v6354_v56 = vcombine.high %v6352_v18, %v6352_v18  ;;  %v6392_v7 = vadd.f32 %v6352_v18, %v9344_v39  ;;  %v6393_v13 = vadd.f32 %v6353_v27, %v9345_v59  ;;  %v6532_v58 = vcombine.low %v6390_v38, %v6391_v20 }
0x1143   : > { %6577 = vst [vmem:[%s7634_s17 + $0x10] sm:$0x1f] %v6531_v6 }
0x1144   : > { %v6394_v30 = vadd.f32 %v6354_v56, %v9346_v3  ;;  %v6533_v11 = vcombine.low %v6392_v7, %v6393_v13  ;;  %v6540_v44 = vrot.slane %v6532_v58, %v7658_v17 }
0x1146   : > { %v6547_v8 = vrot.slane %v6533_v11, %v7658_v17  ;;  %v6554_v60 = vrot.slane %v6394_v30, %v7658_v17 }
0x1148   : > { %v6555_v50 = vcombine.low %v6540_v44, %v6547_v8  ;;  %v6569_v31 = vrot.slane %v6554_v60, %v7658_v17 }
0x114a   : > { %v6562_v41 = vrot.slane %v6555_v50, %v7658_v17 }
0x114c   : > { %v6570_v45 = vcombine.low %v6562_v41, %v6569_v31 }
0x114e   : > { %6578 = vst [vmem:[%s7634_s17 + $0x18] sm:$0x1f] %v6570_v45 }
0x114f PF: > { %s15_s22 = sadd.s32 1, %s7544_s22   ;;  %s9347_s18 = smov %s7536_s20 }
0x1150   : > { %p12_p8 = scmp.ge.s32.totalorder %s15_s22, 6   ;;  %s9348_s19 = smov %s7540_s21 }
0x1151   : > { %s9349_s20 = smov %s9352_s23  ;;  %s9350_s21 = smov %s9356_s24 }
0x1152   :  { %14 = sbr.rel (!%p12_p8) target bundleno = 3 (0x3), region = 86 }

</bundles_post_ra>
